<compile_context>
chip_gen: v5e
topology: v5e:2x2
jax: 0.10.0
libtpu: 0.0.40
codegen_flags: <defaults>
</compile_context>

<pallas_src>
import functools

import jax
import jax.numpy as jnp
from jax.experimental import pallas as pl
from jax.experimental.pallas import tpu as pltpu

N_CLASSES = 10
NZ = 100
IMG_SHAPE = (1, 28, 28)
IMG_FLAT = 1 * 28 * 28          # 784
IN_DIM = NZ + N_CLASSES         # 110
IN_PAD = 128                    # padded contraction dim for layer 1
OUT_PAD = 896                   # 7 * 128, lane-dense output width
EPS = 1e-5
NEG_SLOPE = 0.2


def _leaky_relu(h):
    # max(h, 0.2*h) == LeakyReLU(0.2) for slope < 1; saves a compare+select.
    return jnp.maximum(h, NEG_SLOPE * h)


def _bn_leaky(h, gamma, beta):
    """PyTorch training-mode BatchNorm1d folded to one FMA, fused LeakyReLU.

    One-pass stats: var = E[h^2] - mean^2 (biased, matching PyTorch's
    normalization). All math in f32 (v5e VPU/EUP have no bf16 path)."""
    inv_b = 1.0 / h.shape[0]
    mean = jnp.sum(h, axis=0, keepdims=True) * inv_b
    var = jnp.sum(h * h, axis=0, keepdims=True) * inv_b - mean * mean
    var = jnp.maximum(var, 0.0)            # guard tiny negative from rounding
    scale = gamma * jax.lax.rsqrt(var + EPS)
    shift = beta - mean * scale
    return _leaky_relu(h * scale + shift)


def generator_mlp_kernel(
    labels_ref,                 # (tileB, 1)   int32
    noise_ref,                  # (tileB, 100) f32
    emb_ref,                    # (10, 10)     f32   (resident)
    w1_ref,                     # (128, 128)   bf16  (row 110 = b1, resident)
    w2_ref, g2_ref, be2_ref,    # (128, 256) bf16, BN affine (1,256) f32
    w3_ref, g3_ref, be3_ref,    # (256, 512) bf16, (1,512) f32
    w4_ref, g4_ref, be4_ref,    # (512, 1024) bf16, (1,1024) f32
    w5_ref, b5_ref,             # (1024, 896) bf16, (1,896) f32
    out_ref,                    # (tileB, 896) f32
):
    tile_b = out_ref.shape[0]

    # ---- Fused embedding lookup: exact one-hot matmul in f32. -------------
    lab = labels_ref[...]                                        # (tileB, 1)
    classes = jax.lax.broadcasted_iota(jnp.int32, (tile_b, N_CLASSES), 1)
    onehot = (lab == classes).astype(jnp.float32)                # (tileB, 10)
    emb_g = jnp.dot(onehot, emb_ref[...],
                    preferred_element_type=jnp.float32)          # (tileB, 10)

    # ---- gen_input: [emb(10) | noise(100) | 1.0 (bias col) | zeros(17)] ----
    ones_col = jnp.ones((tile_b, 1), jnp.float32)
    zero_pad = jnp.zeros((tile_b, IN_PAD - IN_DIM - 1), jnp.float32)
    x = jnp.concatenate([emb_g, noise_ref[...], ones_col, zero_pad], axis=-1)

    # ---- Layer 1: Linear (+bias folded into w1 row 110) + LeakyReLU --------
    h = jnp.dot(x.astype(jnp.bfloat16), w1_ref[...],
                preferred_element_type=jnp.float32)
    h = _leaky_relu(h)

    # ---- Layer 2: Linear (bias cancelled by BN) + BN + LeakyReLU -----------
    h = jnp.dot(h.astype(jnp.bfloat16), w2_ref[...],
                preferred_element_type=jnp.float32)
    h = _bn_leaky(h, g2_ref[...], be2_ref[...])

    # ---- Layer 3 ------------------------------------------------------------
    h = jnp.dot(h.astype(jnp.bfloat16), w3_ref[...],
                preferred_element_type=jnp.float32)
    h = _bn_leaky(h, g3_ref[...], be3_ref[...])

    # ---- Layer 4 ------------------------------------------------------------
    h = jnp.dot(h.astype(jnp.bfloat16), w4_ref[...],
                preferred_element_type=jnp.float32)
    h = _bn_leaky(h, g4_ref[...], be4_ref[...])

    # ---- Layer 5: Linear + Tanh --------------------------------------------
    h = jnp.dot(h.astype(jnp.bfloat16), w5_ref[...],
                preferred_element_type=jnp.float32) + b5_ref[...]
    out_ref[...] = jnp.tanh(h).astype(out_ref.dtype)


def init_params(key):
    """Deterministic synthetic parameters matching the PyTorch module shapes.

    Weights are pre-transposed to (in, out), zero-padded to lane-dense
    shapes, and cast to bf16. BN affine / b5 stay f32. b1 is folded into w1
    row 110; b2/b3/b4 are dead code under the following BatchNorm."""
    dims = [IN_DIM, 128, 256, 512, 1024, IMG_FLAT]
    keys = jax.random.split(key, 11)
    params = {}

    # Embedding(10, 10): PyTorch init ~ N(0, 1)
    params["emb"] = jax.random.normal(keys[0], (N_CLASSES, N_CLASSES),
                                      jnp.float32)

    raw_w, raw_b = {}, {}
    k = 1
    for li in range(5):
        fan_in, fan_out = dims[li], dims[li + 1]
        scale = float(fan_in) ** -0.5
        raw_w[li + 1] = jax.random.uniform(
            keys[k], (fan_in, fan_out), jnp.float32, -scale, scale)
        raw_b[li + 1] = jax.random.uniform(
            keys[k + 1], (1, fan_out), jnp.float32, -scale, scale)
        k += 2

    # Layer 1: pad K 110 -> 128; row 110 carries b1 (the matching input
    # column is set to 1.0 in-kernel); rows 111..127 are zero.
    w1 = jnp.zeros((IN_PAD, 128), jnp.float32)
    w1 = w1.at[:IN_DIM, :].set(raw_w[1])
    w1 = w1.at[IN_DIM, :].set(raw_b[1][0])
    params["w1"] = w1.astype(jnp.bfloat16)

    params["w2"] = raw_w[2].astype(jnp.bfloat16)     # (128, 256)
    params["w3"] = raw_w[3].astype(jnp.bfloat16)     # (256, 512)
    params["w4"] = raw_w[4].astype(jnp.bfloat16)     # (512, 1024)

    # Layer 5: pad N 784 -> 896 with zero columns (sliced off in wrapper).
    w5 = jnp.zeros((1024, OUT_PAD), jnp.float32).at[:, :IMG_FLAT].set(raw_w[5])
    b5 = jnp.zeros((1, OUT_PAD), jnp.float32).at[:, :IMG_FLAT].set(raw_b[5])
    params["w5"] = w5.astype(jnp.bfloat16)
    params["b5"] = b5

    # BatchNorm affine params (PyTorch defaults: gamma=1, beta=0), 2D f32.
    for li, d in zip((2, 3, 4), (256, 512, 1024)):
        params[f"g{li}"] = jnp.ones((1, d), jnp.float32)
        params[f"be{li}"] = jnp.zeros((1, d), jnp.float32)
    return params


def generator_forward(noise, labels, params, *, batch_tile=None):
    """noise: (B, nz) f32; labels: (B,) int -> image (B, 1, 28, 28) f32.

    batch_tile=None (default) processes the whole batch in one grid step:
    exact PyTorch forward semantics (BN stats over the full batch).
    batch_tile < B tiles the batch; each tile is an independent logical batch
    (per-tile BN stats) with weights resident in VMEM across grid steps.
    """
    B = noise.shape[0]
    if batch_tile is None:
        batch_tile = B
    if B % batch_tile != 0 or batch_tile % 8 != 0:
        raise ValueError("batch_tile must divide B and be a multiple of 8")
    num_tiles = B // batch_tile

    labels2d = labels.astype(jnp.int32).reshape(B, 1)

    resident = (
        params["emb"], params["w1"],
        params["w2"], params["g2"], params["be2"],
        params["w3"], params["g3"], params["be3"],
        params["w4"], params["g4"], params["be4"],
        params["w5"], params["b5"],
    )
    args = (labels2d, noise) + resident

    in_specs = [
        # Batch-indexed operands.
        pl.BlockSpec((batch_tile, 1), lambda i: (i, 0)),
        pl.BlockSpec((batch_tile, NZ), lambda i: (i, 0)),
    ] + [
        # Weights / BN params / embedding table: full array, constant index
        # map -> DMA'd once, VMEM-resident across all grid steps.
        pl.BlockSpec(a.shape, lambda i: (0, 0)) for a in resident
    ]

    out_flat = pl.pallas_call(
        generator_mlp_kernel,
        out_shape=jax.ShapeDtypeStruct((B, OUT_PAD), jnp.float32),
        grid=(num_tiles,),
        in_specs=in_specs,
        out_specs=pl.BlockSpec((batch_tile, OUT_PAD), lambda i: (i, 0)),
        compiler_params=pltpu.CompilerParams(
            # Tiles are independent batches -> safe to shard across v7x's
            # two TensorCores.
            dimension_semantics=("parallel",),
            # ~3.1 MiB resident bf16 weights + tiny per-tile activations at
            # batch_tile<=512; fits v5e/v6e/v7x scoped VMEM.
            vmem_limit_bytes=32 << 20,
        ),
    )(*args)
    # NOTE: for very large sampling batches the output could be emitted as
    # bf16 to halve writeback traffic; kept f32 here for parity.

    # Slice padded output columns back to 784 and reshape to NCHW.
    return out_flat[:, :IMG_FLAT].reshape(B, *IMG_SHAPE)


if __name__ == "__main__":
    key = jax.random.PRNGKey(0)
    pkey, nkey, lkey = jax.random.split(key, 3)

    params = init_params(pkey)

    B = 8  # BatchNorm1d (training semantics) needs batch > 1
    noise = jax.random.normal(nkey, (B, NZ), jnp.float32)
    labels = jax.random.randint(lkey, (B,), 0, N_CLASSES, dtype=jnp.int32)

    # Single-tile call: exact module semantics (BN over the whole batch).
    img = generator_forward(noise, labels, params)
    jax.block_until_ready(img)
    assert img.shape == (B, 1, 28, 28), img.shape
    assert img.dtype == jnp.float32
    assert bool(jnp.all(jnp.isfinite(img)))
    assert bool(jnp.all(jnp.abs(img) <= 1.0))  # tanh output range

    # Multi-tile grid path: two independent batches of 8 with resident
    # weights. Tile 0 sees exactly the same data as above, so its output
    # must match.
    noise2 = jnp.concatenate(
        [noise, jax.random.normal(jax.random.PRNGKey(1), (B, NZ), jnp.float32)],
        axis=0)
    labels2 = jnp.concatenate(
        [labels,
         jax.random.randint(jax.random.PRNGKey(2), (B,), 0, N_CLASSES,
                            dtype=jnp.int32)], axis=0)
    img2 = generator_forward(noise2, labels2, params, batch_tile=B)
    jax.block_until_ready(img2)
    assert img2.shape == (2 * B, 1, 28, 28), img2.shape
    assert bool(jnp.all(jnp.isfinite(img2)))
    assert bool(jnp.allclose(img2[:B], img, rtol=0.0, atol=1e-6))

    print("KERNEL_OK")
</pallas_src>

<mosaic_0001>
module attributes {stable_mosaic.version = 11 : i64} {
  func.func @generator_mlp_kernel(%arg0: i32, %arg1: memref<8x1xi32, #tpu.memory_space<vmem>>, %arg2: memref<8x100xf32, #tpu.memory_space<vmem>>, %arg3: memref<10x10xf32, #tpu.memory_space<vmem>>, %arg4: memref<128x128xbf16, #tpu.memory_space<vmem>>, %arg5: memref<128x256xbf16, #tpu.memory_space<vmem>>, %arg6: memref<1x256xf32, #tpu.memory_space<vmem>>, %arg7: memref<1x256xf32, #tpu.memory_space<vmem>>, %arg8: memref<256x512xbf16, #tpu.memory_space<vmem>>, %arg9: memref<1x512xf32, #tpu.memory_space<vmem>>, %arg10: memref<1x512xf32, #tpu.memory_space<vmem>>, %arg11: memref<512x1024xbf16, #tpu.memory_space<vmem>>, %arg12: memref<1x1024xf32, #tpu.memory_space<vmem>>, %arg13: memref<1x1024xf32, #tpu.memory_space<vmem>>, %arg14: memref<1024x896xbf16, #tpu.memory_space<vmem>>, %arg15: memref<1x896xf32, #tpu.memory_space<vmem>>, %arg16: memref<8x896xf32, #tpu.memory_space<vmem>>) attributes {dimension_semantics = [#tpu.dimension_semantics<parallel>], iteration_bounds = array<i64: 1>, scalar_prefetch = 0 : i64, scratch_operands = 0 : i64, tpu.core_type = #tpu.core_type<tc>, window_params = [{transform_indices = @transform_0, window_bounds = array<i64: 8, 1>}, {transform_indices = @transform_1, window_bounds = array<i64: 8, 100>}, {pipeline_mode = #tpu.pipeline_mode<synchronous>, transform_indices = @transform_2, window_bounds = array<i64: 10, 10>}, {pipeline_mode = #tpu.pipeline_mode<synchronous>, transform_indices = @transform_3, window_bounds = array<i64: 128, 128>}, {pipeline_mode = #tpu.pipeline_mode<synchronous>, transform_indices = @transform_4, window_bounds = array<i64: 128, 256>}, {pipeline_mode = #tpu.pipeline_mode<synchronous>, transform_indices = @transform_5, window_bounds = array<i64: 1, 256>}, {pipeline_mode = #tpu.pipeline_mode<synchronous>, transform_indices = @transform_6, window_bounds = array<i64: 1, 256>}, {pipeline_mode = #tpu.pipeline_mode<synchronous>, transform_indices = @transform_7, window_bounds = array<i64: 256, 512>}, {pipeline_mode = #tpu.pipeline_mode<synchronous>, transform_indices = @transform_8, window_bounds = array<i64: 1, 512>}, {pipeline_mode = #tpu.pipeline_mode<synchronous>, transform_indices = @transform_9, window_bounds = array<i64: 1, 512>}, {pipeline_mode = #tpu.pipeline_mode<synchronous>, transform_indices = @transform_10, window_bounds = array<i64: 512, 1024>}, {pipeline_mode = #tpu.pipeline_mode<synchronous>, transform_indices = @transform_11, window_bounds = array<i64: 1, 1024>}, {pipeline_mode = #tpu.pipeline_mode<synchronous>, transform_indices = @transform_12, window_bounds = array<i64: 1, 1024>}, {pipeline_mode = #tpu.pipeline_mode<synchronous>, transform_indices = @transform_13, window_bounds = array<i64: 1024, 896>}, {pipeline_mode = #tpu.pipeline_mode<synchronous>, transform_indices = @transform_14, window_bounds = array<i64: 1, 896>}, {transform_indices = @transform_15, window_bounds = array<i64: 8, 896>}]} {
    %c0 = arith.constant 0 : index
    %c0_0 = arith.constant 0 : index
    %0 = vector.load %arg1[%c0, %c0_0] : memref<8x1xi32, #tpu.memory_space<vmem>>, vector<8x1xi32>
    %1 = tpu.iota {dimensions = array<i32: 1>} : vector<8x10xi32>
    %2 = vector.broadcast %0 : vector<8x1xi32> to vector<8x10xi32>
    %3 = arith.cmpi eq, %2, %1 : vector<8x10xi32>
    %4 = arith.extui %3 : vector<8x10xi1> to vector<8x10xi32>
    %5 = arith.sitofp %4 : vector<8x10xi32> to vector<8x10xf32>
    %c0_1 = arith.constant 0 : index
    %c0_2 = arith.constant 0 : index
    %6 = vector.load %arg3[%c0_1, %c0_2] : memref<10x10xf32, #tpu.memory_space<vmem>>, vector<10x10xf32>
    %cst = arith.constant dense<0.000000e+00> : vector<8x10xf32>
    %7 = tpu.matmul %5, %6, %cst {dimension_numbers = #tpu.dot_dimension_numbers<[1], [0], [0], [1], [0, 0, 1, 1], [], []>} : vector<8x10xf32>, vector<10x10xf32>, vector<8x10xf32> -> vector<8x10xf32>
    %cst_3 = arith.constant 1.000000e+00 : f32
    %8 = vector.broadcast %cst_3 : f32 to vector<8x1xf32>
    %cst_4 = arith.constant 0.000000e+00 : f32
    %9 = vector.broadcast %cst_4 : f32 to vector<8x17xf32>
    %c0_5 = arith.constant 0 : index
    %c0_6 = arith.constant 0 : index
    %10 = vector.load %arg2[%c0_5, %c0_6] : memref<8x100xf32, #tpu.memory_space<vmem>>, vector<8x100xf32>
    %11 = tpu.concatenate %7, %10, %8, %9 in 1 : vector<8x10xf32>, vector<8x100xf32>, vector<8x1xf32>, vector<8x17xf32> -> vector<8x128xf32>
    %12 = arith.truncf %11 : vector<8x128xf32> to vector<8x128xbf16>
    %c0_7 = arith.constant 0 : index
    %c0_8 = arith.constant 0 : index
    %13 = vector.load %arg4[%c0_7, %c0_8] : memref<128x128xbf16, #tpu.memory_space<vmem>>, vector<128x128xbf16>
    %cst_9 = arith.constant dense<0.000000e+00> : vector<8x128xf32>
    %14 = tpu.matmul %12, %13, %cst_9 {dimension_numbers = #tpu.dot_dimension_numbers<[1], [0], [0], [1], [0, 0, 1, 1], [], []>} : vector<8x128xbf16>, vector<128x128xbf16>, vector<8x128xf32> -> vector<8x128xf32>
    %cst_10 = arith.constant 2.000000e-01 : f32
    %15 = vector.broadcast %cst_10 : f32 to vector<8x128xf32>
    %16 = arith.mulf %15, %14 : vector<8x128xf32>
    %17 = arith.maximumf %14, %16 : vector<8x128xf32>
    %18 = arith.truncf %17 : vector<8x128xf32> to vector<8x128xbf16>
    %c0_11 = arith.constant 0 : index
    %c0_12 = arith.constant 0 : index
    %19 = vector.load %arg5[%c0_11, %c0_12] : memref<128x256xbf16, #tpu.memory_space<vmem>>, vector<128x256xbf16>
    %cst_13 = arith.constant dense<0.000000e+00> : vector<8x256xf32>
    %20 = tpu.matmul %18, %19, %cst_13 {dimension_numbers = #tpu.dot_dimension_numbers<[1], [0], [0], [1], [0, 0, 1, 1], [], []>} : vector<8x128xbf16>, vector<128x256xbf16>, vector<8x256xf32> -> vector<8x256xf32>
    %c0_14 = arith.constant 0 : index
    %c0_15 = arith.constant 0 : index
    %21 = vector.load %arg6[%c0_14, %c0_15] : memref<1x256xf32, #tpu.memory_space<vmem>>, vector<1x256xf32>
    %c0_16 = arith.constant 0 : index
    %c0_17 = arith.constant 0 : index
    %22 = vector.load %arg7[%c0_16, %c0_17] : memref<1x256xf32, #tpu.memory_space<vmem>>, vector<1x256xf32>
    %cst_18 = arith.constant dense<0.000000e+00> : vector<256xf32>
    %23 = vector.multi_reduction <add>, %20, %cst_18 [0] : vector<8x256xf32> to vector<256xf32>
    %24 = vector.shape_cast %23 : vector<256xf32> to vector<1x256xf32>
    %cst_19 = arith.constant 1.250000e-01 : f32
    %25 = vector.broadcast %cst_19 : f32 to vector<1x256xf32>
    %26 = arith.mulf %24, %25 : vector<1x256xf32>
    %27 = arith.mulf %20, %20 : vector<8x256xf32>
    %cst_20 = arith.constant dense<0.000000e+00> : vector<256xf32>
    %28 = vector.multi_reduction <add>, %27, %cst_20 [0] : vector<8x256xf32> to vector<256xf32>
    %29 = vector.shape_cast %28 : vector<256xf32> to vector<1x256xf32>
    %cst_21 = arith.constant 1.250000e-01 : f32
    %30 = vector.broadcast %cst_21 : f32 to vector<1x256xf32>
    %31 = arith.mulf %29, %30 : vector<1x256xf32>
    %32 = arith.mulf %26, %26 : vector<1x256xf32>
    %33 = arith.subf %31, %32 : vector<1x256xf32>
    %cst_22 = arith.constant 0.000000e+00 : f32
    %34 = vector.broadcast %cst_22 : f32 to vector<1x256xf32>
    %35 = arith.maximumf %33, %34 : vector<1x256xf32>
    %cst_23 = arith.constant 9.99999974E-6 : f32
    %36 = vector.broadcast %cst_23 : f32 to vector<1x256xf32>
    %37 = arith.addf %35, %36 : vector<1x256xf32>
    %38 = math.rsqrt %37 : vector<1x256xf32>
    %39 = arith.mulf %21, %38 : vector<1x256xf32>
    %40 = arith.mulf %26, %39 : vector<1x256xf32>
    %41 = arith.subf %22, %40 : vector<1x256xf32>
    %42 = vector.broadcast %39 : vector<1x256xf32> to vector<8x256xf32>
    %43 = arith.mulf %20, %42 : vector<8x256xf32>
    %44 = vector.broadcast %41 : vector<1x256xf32> to vector<8x256xf32>
    %45 = arith.addf %43, %44 : vector<8x256xf32>
    %cst_24 = arith.constant 2.000000e-01 : f32
    %46 = vector.broadcast %cst_24 : f32 to vector<8x256xf32>
    %47 = arith.mulf %46, %45 : vector<8x256xf32>
    %48 = arith.maximumf %45, %47 : vector<8x256xf32>
    %49 = arith.truncf %48 : vector<8x256xf32> to vector<8x256xbf16>
    %c0_25 = arith.constant 0 : index
    %c0_26 = arith.constant 0 : index
    %50 = vector.load %arg8[%c0_25, %c0_26] : memref<256x512xbf16, #tpu.memory_space<vmem>>, vector<256x512xbf16>
    %cst_27 = arith.constant dense<0.000000e+00> : vector<8x512xf32>
    %51 = tpu.matmul %49, %50, %cst_27 {dimension_numbers = #tpu.dot_dimension_numbers<[1], [0], [0], [1], [0, 0, 1, 1], [], []>} : vector<8x256xbf16>, vector<256x512xbf16>, vector<8x512xf32> -> vector<8x512xf32>
    %c0_28 = arith.constant 0 : index
    %c0_29 = arith.constant 0 : index
    %52 = vector.load %arg9[%c0_28, %c0_29] : memref<1x512xf32, #tpu.memory_space<vmem>>, vector<1x512xf32>
    %c0_30 = arith.constant 0 : index
    %c0_31 = arith.constant 0 : index
    %53 = vector.load %arg10[%c0_30, %c0_31] : memref<1x512xf32, #tpu.memory_space<vmem>>, vector<1x512xf32>
    %cst_32 = arith.constant dense<0.000000e+00> : vector<512xf32>
    %54 = vector.multi_reduction <add>, %51, %cst_32 [0] : vector<8x512xf32> to vector<512xf32>
    %55 = vector.shape_cast %54 : vector<512xf32> to vector<1x512xf32>
    %cst_33 = arith.constant 1.250000e-01 : f32
    %56 = vector.broadcast %cst_33 : f32 to vector<1x512xf32>
    %57 = arith.mulf %55, %56 : vector<1x512xf32>
    %58 = arith.mulf %51, %51 : vector<8x512xf32>
    %cst_34 = arith.constant dense<0.000000e+00> : vector<512xf32>
    %59 = vector.multi_reduction <add>, %58, %cst_34 [0] : vector<8x512xf32> to vector<512xf32>
    %60 = vector.shape_cast %59 : vector<512xf32> to vector<1x512xf32>
    %cst_35 = arith.constant 1.250000e-01 : f32
    %61 = vector.broadcast %cst_35 : f32 to vector<1x512xf32>
    %62 = arith.mulf %60, %61 : vector<1x512xf32>
    %63 = arith.mulf %57, %57 : vector<1x512xf32>
    %64 = arith.subf %62, %63 : vector<1x512xf32>
    %cst_36 = arith.constant 0.000000e+00 : f32
    %65 = vector.broadcast %cst_36 : f32 to vector<1x512xf32>
    %66 = arith.maximumf %64, %65 : vector<1x512xf32>
    %cst_37 = arith.constant 9.99999974E-6 : f32
    %67 = vector.broadcast %cst_37 : f32 to vector<1x512xf32>
    %68 = arith.addf %66, %67 : vector<1x512xf32>
    %69 = math.rsqrt %68 : vector<1x512xf32>
    %70 = arith.mulf %52, %69 : vector<1x512xf32>
    %71 = arith.mulf %57, %70 : vector<1x512xf32>
    %72 = arith.subf %53, %71 : vector<1x512xf32>
    %73 = vector.broadcast %70 : vector<1x512xf32> to vector<8x512xf32>
    %74 = arith.mulf %51, %73 : vector<8x512xf32>
    %75 = vector.broadcast %72 : vector<1x512xf32> to vector<8x512xf32>
    %76 = arith.addf %74, %75 : vector<8x512xf32>
    %cst_38 = arith.constant 2.000000e-01 : f32
    %77 = vector.broadcast %cst_38 : f32 to vector<8x512xf32>
    %78 = arith.mulf %77, %76 : vector<8x512xf32>
    %79 = arith.maximumf %76, %78 : vector<8x512xf32>
    %80 = arith.truncf %79 : vector<8x512xf32> to vector<8x512xbf16>
    %c0_39 = arith.constant 0 : index
    %c0_40 = arith.constant 0 : index
    %81 = vector.load %arg11[%c0_39, %c0_40] : memref<512x1024xbf16, #tpu.memory_space<vmem>>, vector<512x1024xbf16>
    %cst_41 = arith.constant dense<0.000000e+00> : vector<8x1024xf32>
    %82 = tpu.matmul %80, %81, %cst_41 {dimension_numbers = #tpu.dot_dimension_numbers<[1], [0], [0], [1], [0, 0, 1, 1], [], []>} : vector<8x512xbf16>, vector<512x1024xbf16>, vector<8x1024xf32> -> vector<8x1024xf32>
    %c0_42 = arith.constant 0 : index
    %c0_43 = arith.constant 0 : index
    %83 = vector.load %arg12[%c0_42, %c0_43] : memref<1x1024xf32, #tpu.memory_space<vmem>>, vector<1x1024xf32>
    %c0_44 = arith.constant 0 : index
    %c0_45 = arith.constant 0 : index
    %84 = vector.load %arg13[%c0_44, %c0_45] : memref<1x1024xf32, #tpu.memory_space<vmem>>, vector<1x1024xf32>
    %cst_46 = arith.constant dense<0.000000e+00> : vector<1024xf32>
    %85 = vector.multi_reduction <add>, %82, %cst_46 [0] : vector<8x1024xf32> to vector<1024xf32>
    %86 = vector.shape_cast %85 : vector<1024xf32> to vector<1x1024xf32>
    %cst_47 = arith.constant 1.250000e-01 : f32
    %87 = vector.broadcast %cst_47 : f32 to vector<1x1024xf32>
    %88 = arith.mulf %86, %87 : vector<1x1024xf32>
    %89 = arith.mulf %82, %82 : vector<8x1024xf32>
    %cst_48 = arith.constant dense<0.000000e+00> : vector<1024xf32>
    %90 = vector.multi_reduction <add>, %89, %cst_48 [0] : vector<8x1024xf32> to vector<1024xf32>
    %91 = vector.shape_cast %90 : vector<1024xf32> to vector<1x1024xf32>
    %cst_49 = arith.constant 1.250000e-01 : f32
    %92 = vector.broadcast %cst_49 : f32 to vector<1x1024xf32>
    %93 = arith.mulf %91, %92 : vector<1x1024xf32>
    %94 = arith.mulf %88, %88 : vector<1x1024xf32>
    %95 = arith.subf %93, %94 : vector<1x1024xf32>
    %cst_50 = arith.constant 0.000000e+00 : f32
    %96 = vector.broadcast %cst_50 : f32 to vector<1x1024xf32>
    %97 = arith.maximumf %95, %96 : vector<1x1024xf32>
    %cst_51 = arith.constant 9.99999974E-6 : f32
    %98 = vector.broadcast %cst_51 : f32 to vector<1x1024xf32>
    %99 = arith.addf %97, %98 : vector<1x1024xf32>
    %100 = math.rsqrt %99 : vector<1x1024xf32>
    %101 = arith.mulf %83, %100 : vector<1x1024xf32>
    %102 = arith.mulf %88, %101 : vector<1x1024xf32>
    %103 = arith.subf %84, %102 : vector<1x1024xf32>
    %104 = vector.broadcast %101 : vector<1x1024xf32> to vector<8x1024xf32>
    %105 = arith.mulf %82, %104 : vector<8x1024xf32>
    %106 = vector.broadcast %103 : vector<1x1024xf32> to vector<8x1024xf32>
    %107 = arith.addf %105, %106 : vector<8x1024xf32>
    %cst_52 = arith.constant 2.000000e-01 : f32
    %108 = vector.broadcast %cst_52 : f32 to vector<8x1024xf32>
    %109 = arith.mulf %108, %107 : vector<8x1024xf32>
    %110 = arith.maximumf %107, %109 : vector<8x1024xf32>
    %111 = arith.truncf %110 : vector<8x1024xf32> to vector<8x1024xbf16>
    %c0_53 = arith.constant 0 : index
    %c0_54 = arith.constant 0 : index
    %112 = vector.load %arg14[%c0_53, %c0_54] : memref<1024x896xbf16, #tpu.memory_space<vmem>>, vector<1024x896xbf16>
    %cst_55 = arith.constant dense<0.000000e+00> : vector<8x896xf32>
    %113 = tpu.matmul %111, %112, %cst_55 {dimension_numbers = #tpu.dot_dimension_numbers<[1], [0], [0], [1], [0, 0, 1, 1], [], []>} : vector<8x1024xbf16>, vector<1024x896xbf16>, vector<8x896xf32> -> vector<8x896xf32>
    %c0_56 = arith.constant 0 : index
    %c0_57 = arith.constant 0 : index
    %114 = vector.load %arg15[%c0_56, %c0_57] : memref<1x896xf32, #tpu.memory_space<vmem>>, vector<1x896xf32>
    %115 = vector.broadcast %114 : vector<1x896xf32> to vector<8x896xf32>
    %116 = arith.addf %113, %115 : vector<8x896xf32>
    %117 = math.tanh %116 : vector<8x896xf32>
    %c0_58 = arith.constant 0 : index
    %c0_59 = arith.constant 0 : index
    %118 = vector.load %arg16[%c0_58, %c0_59] : memref<8x896xf32, #tpu.memory_space<vmem>>, vector<8x896xf32>
    tpu.vector_store %arg16[%c0_58, %c0_59], %117 {strides = array<i32>} : memref<8x896xf32, #tpu.memory_space<vmem>>, vector<8x896xf32>,
    return
  }
  func.func @transform_0(%arg0: i32) -> (i32, i32) {
    %c0_i32 = arith.constant 0 : i32
    %c0_i32_0 = arith.constant 0 : i32
    return %arg0, %c0_i32 : i32, i32
  }
  func.func @transform_1(%arg0: i32) -> (i32, i32) {
    %c0_i32 = arith.constant 0 : i32
    %c0_i32_0 = arith.constant 0 : i32
    return %arg0, %c0_i32 : i32, i32
  }
  func.func @transform_2(%arg0: i32) -> (i32, i32) {
    %c0_i32 = arith.constant 0 : i32
    %c0_i32_0 = arith.constant 0 : i32
    %c0_i32_1 = arith.constant 0 : i32
    return %c0_i32, %c0_i32_0 : i32, i32
  }
  func.func @transform_3(%arg0: i32) -> (i32, i32) {
    %c0_i32 = arith.constant 0 : i32
    %c0_i32_0 = arith.constant 0 : i32
    %c0_i32_1 = arith.constant 0 : i32
    return %c0_i32, %c0_i32_0 : i32, i32
  }
  func.func @transform_4(%arg0: i32) -> (i32, i32) {
    %c0_i32 = arith.constant 0 : i32
    %c0_i32_0 = arith.constant 0 : i32
    %c0_i32_1 = arith.constant 0 : i32
    return %c0_i32, %c0_i32_0 : i32, i32
  }
  func.func @transform_5(%arg0: i32) -> (i32, i32) {
    %c0_i32 = arith.constant 0 : i32
    %c0_i32_0 = arith.constant 0 : i32
    %c0_i32_1 = arith.constant 0 : i32
    return %c0_i32, %c0_i32_0 : i32, i32
  }
  func.func @transform_6(%arg0: i32) -> (i32, i32) {
    %c0_i32 = arith.constant 0 : i32
    %c0_i32_0 = arith.constant 0 : i32
    %c0_i32_1 = arith.constant 0 : i32
    return %c0_i32, %c0_i32_0 : i32, i32
  }
  func.func @transform_7(%arg0: i32) -> (i32, i32) {
    %c0_i32 = arith.constant 0 : i32
    %c0_i32_0 = arith.constant 0 : i32
    %c0_i32_1 = arith.constant 0 : i32
    return %c0_i32, %c0_i32_0 : i32, i32
  }
  func.func @transform_8(%arg0: i32) -> (i32, i32) {
    %c0_i32 = arith.constant 0 : i32
    %c0_i32_0 = arith.constant 0 : i32
    %c0_i32_1 = arith.constant 0 : i32
    return %c0_i32, %c0_i32_0 : i32, i32
  }
  func.func @transform_9(%arg0: i32) -> (i32, i32) {
    %c0_i32 = arith.constant 0 : i32
    %c0_i32_0 = arith.constant 0 : i32
    %c0_i32_1 = arith.constant 0 : i32
    return %c0_i32, %c0_i32_0 : i32, i32
  }
  func.func @transform_10(%arg0: i32) -> (i32, i32) {
    %c0_i32 = arith.constant 0 : i32
    %c0_i32_0 = arith.constant 0 : i32
    %c0_i32_1 = arith.constant 0 : i32
    return %c0_i32, %c0_i32_0 : i32, i32
  }
  func.func @transform_11(%arg0: i32) -> (i32, i32) {
    %c0_i32 = arith.constant 0 : i32
    %c0_i32_0 = arith.constant 0 : i32
    %c0_i32_1 = arith.constant 0 : i32
    return %c0_i32, %c0_i32_0 : i32, i32
  }
  func.func @transform_12(%arg0: i32) -> (i32, i32) {
    %c0_i32 = arith.constant 0 : i32
    %c0_i32_0 = arith.constant 0 : i32
    %c0_i32_1 = arith.constant 0 : i32
    return %c0_i32, %c0_i32_0 : i32, i32
  }
  func.func @transform_13(%arg0: i32) -> (i32, i32) {
    %c0_i32 = arith.constant 0 : i32
    %c0_i32_0 = arith.constant 0 : i32
    %c0_i32_1 = arith.constant 0 : i32
    return %c0_i32, %c0_i32_0 : i32, i32
  }
  func.func @transform_14(%arg0: i32) -> (i32, i32) {
    %c0_i32 = arith.constant 0 : i32
    %c0_i32_0 = arith.constant 0 : i32
    %c0_i32_1 = arith.constant 0 : i32
    return %c0_i32, %c0_i32_0 : i32, i32
  }
  func.func @transform_15(%arg0: i32) -> (i32, i32) {
    %c0_i32 = arith.constant 0 : i32
    %c0_i32_0 = arith.constant 0 : i32
    return %arg0, %c0_i32 : i32, i32
  }
}

</mosaic_0001>

<bundles_post_ra>
// kernel: tpu_custom_call.1
= control target key start
LH: loop header
LB: loop body
LE: loop exit
PB: predicated region body
PF: predicated region fallthrough
CT: control target
= control target key end

     0   :  { %20 = vsyncpa [#allocation3], 0  ;;  %s12334_s0 = inlined_call_operand.vmem [shape: s32[8,1], index: 0, kind: input, shape index: {}]   ;;  %s12335_s1 = inlined_call_operand.hbm [shape: f32[8,100], index: 1, kind: input, shape index: {}]   ;;  %s12336_s2 = inlined_call_operand.hbm [shape: f32[10,10], index: 2, kind: input, shape index: {}]   ;;  %s12337_s3 = inlined_call_operand.hbm [shape: bf16[128,128], index: 3, kind: input, shape index: {}]   ;;  %s12338_s4 = inlined_call_operand.hbm [shape: bf16[128,256], index: 4, kind: input, shape index: {}]   ;;  %s12339_s5 = inlined_call_operand.hbm [shape: f32[1,256], index: 5, kind: input, shape index: {}]   ;;  %s12340_s6 = inlined_call_operand.hbm [shape: f32[1,256], index: 6, kind: input, shape index: {}]   ;;  %s12341_s7 = inlined_call_operand.hbm [shape: bf16[256,512], index: 7, kind: input, shape index: {}]   ;;  %s12342_s8 = inlined_call_operand.hbm [shape: f32[1,512], index: 8, kind: input, shape index: {}]   ;;  %s12343_s9 = inlined_call_operand.hbm [shape: f32[1,512], index: 9, kind: input, shape index: {}]   ;;  %s12344_s10 = inlined_call_operand.hbm [shape: bf16[512,1024], index: 10, kind: input, shape index: {}]   ;;  %s12345_s11 = inlined_call_operand.hbm [shape: f32[1,1024], index: 11, kind: input, shape index: {}]   ;;  %s12346_s12 = inlined_call_operand.hbm [shape: f32[1,1024], index: 12, kind: input, shape index: {}]   ;;  %s12347_s13 = inlined_call_operand.hbm [shape: bf16[1024,896], index: 13, kind: input, shape index: {}]   ;;  %s12348_s14 = inlined_call_operand.hbm [shape: f32[1,896], index: 14, kind: input, shape index: {}]   ;;  %s12349_s15 = inlined_call_operand.hbm [shape: f32[8,896], index: 15, kind: output, shape index: {}]  }
   0x1   :  { %21 = vsyncpa [#allocation6], 0 }
   0x2   :  { %22 = vsyncpa [#allocation9], 0 }
   0x3   :  { %23 = vsyncpa [#allocation12], 0 }
   0x4   :  { %24 = vsyncpa [#allocation15], 0 }
   0x5   :  { %25 = vsyncpa [#allocation18], 0 }
   0x6   :  { %26 = vsyncpa [#allocation21], 0 }
   0x7   :  { %27 = vsyncpa [#allocation24], 0  ;;  %s46_s20 = sshll.u32 %s12336_s2, 4  ;;  %s47_s20 = int_to_ptr.hbm [resolvable:$true] %s46_s20 }
   0x8   :  { %28 = vsyncpa [#allocation4], 0  ;;  %s11608_s21 = smov [#allocation5]   ;;  %s72_s25 = sshll.u32 %s12338_s4, 4  ;;  %s73_s25 = int_to_ptr.hbm [resolvable:$true] %s72_s25 }
   0x9   :  { %s48_s22 = sshll.u32 %s11608_s21, 4  ;;  %s11609_s26 = smov 128   ;;  %s49_s22 = int_to_ptr.vmem [resolvable:$true] %s48_s22 }
   0xa   :  { %s11610_s27 = smov 8   ;;  %s11611_s28 = smov [#allocation8]  }
   0xb   :  { %54 = dma.hbm_to_vmem [thread:$0]  %s47_s20, 256, %s49_s22, [#allocation6], %s11609_s26, %s11609_s26, %s11610_s27  }
   0xc   :  { %s74_s29 = sshll.u32 %s11611_s28, 4  ;;  %s97_s17 = sshll.u32 %s12340_s6, 4  ;;  %s75_s29 = int_to_ptr.vmem [resolvable:$true] %s74_s29  ;;  %s98_s17 = int_to_ptr.hbm [resolvable:$true] %s97_s17 }
   0xd   :  { %80 = dma.hbm_to_vmem [thread:$0]  %s73_s25, 2048, %s75_s29, [#allocation9], %s11609_s26, %s11609_s26, %s11610_s27  }
   0xe   :  { %s121_s19 = sshll.u32 %s12342_s8, 4  ;;  %s11612_s21 = smov [#allocation11]   ;;  %s122_s19 = int_to_ptr.hbm [resolvable:$true] %s121_s19 }
   0xf   :  { %s99_s23 = sshll.u32 %s11612_s21, 4  ;;  %s11613_s4 = smov [#allocation14]   ;;  %s100_s23 = int_to_ptr.vmem [resolvable:$true] %s99_s23 }
  0x10   :  { %102 = dma.hbm_to_vmem [thread:$0]  %s98_s17, 32, %s100_s23, [#allocation12]  }
  0x11   :  { %s123_s20 = sshll.u32 %s11613_s4, 4  ;;  %s142_s28 = sshll.u32 %s12344_s10, 4  ;;  %s124_s20 = int_to_ptr.vmem [resolvable:$true] %s123_s20  ;;  %s143_s28 = int_to_ptr.hbm [resolvable:$true] %s142_s28 }
  0x12   :  { %126 = dma.hbm_to_vmem [thread:$0]  %s122_s19, 64, %s124_s20, [#allocation15]  }
  0x13   :  { %s11614_s6 = smov [#allocation17]   ;;  %s167_s8 = sshll.u32 %s12346_s12, 4  ;;  %s168_s8 = int_to_ptr.hbm [resolvable:$true] %s167_s8 }
  0x14   :  { %s144_s25 = sshll.u32 %s11614_s6, 4  ;;  %s11615_s29 = smov 512   ;;  %s145_s25 = int_to_ptr.vmem [resolvable:$true] %s144_s25 }
  0x15   :  { %s11616_s30 = smov 32   ;;  %s11617_s16 = smov [#allocation20]  }
  0x16   :  { %150 = dma.hbm_to_vmem [thread:$0]  %s143_s28, 32768, %s145_s25, [#allocation18], %s11615_s29, %s11615_s29, %s11616_s30  }
  0x17   :  { %s169_s17 = sshll.u32 %s11617_s16, 4  ;;  %s36_s10 = sshll.u32 %s12335_s1, 4  ;;  %s170_s17 = int_to_ptr.vmem [resolvable:$true] %s169_s17  ;;  %s37_s10 = int_to_ptr.hbm [resolvable:$true] %s36_s10 }
  0x18   :  { %172 = dma.hbm_to_vmem [thread:$0]  %s168_s8, 128, %s170_s17, [#allocation21]  }
  0x19   :  { %s59_s23 = sshll.u32 %s12337_s3, 4  ;;  %s11618_s4 = smov [#allocation2]   ;;  %s60_s23 = int_to_ptr.hbm [resolvable:$true] %s59_s23 }
  0x1a   :  { %s38_s20 = sshll.u32 %s11618_s4, 4  ;;  %s11619_s12 = smov [#allocation7]   ;;  %s39_s20 = int_to_ptr.vmem [resolvable:$true] %s38_s20 }
  0x1b   :  { %41 = dma.hbm_to_vmem [thread:$0]  %s37_s10, 128, %s39_s20, [#allocation3]  }
  0x1c   :  { %s61_s22 = sshll.u32 %s11619_s12, 4  ;;  %s11620_s24 = smov 64   ;;  %s62_s22 = int_to_ptr.vmem [resolvable:$true] %s61_s22 }
  0x1d   :  { %s11621_s28 = smov 4   ;;  %s86_s25 = sshll.u32 %s12339_s5, 4  ;;  %s87_s25 = int_to_ptr.hbm [resolvable:$true] %s86_s25 }
  0x1e   :  { %67 = dma.hbm_to_vmem [thread:$0]  %s60_s23, 1024, %s62_s22, [#allocation6], %s11620_s24, %s11620_s24, %s11621_s28  }
  0x1f   :  { %s11622_s26 = smov [#allocation10]   ;;  %s107_s29 = sshll.u32 %s12341_s7, 4  ;;  %s108_s29 = int_to_ptr.hbm [resolvable:$true] %s107_s29 }
  0x20   :  { %s88_s27 = sshll.u32 %s11622_s26, 4  ;;  %s11623_s30 = smov [#allocation13]   ;;  %s89_s27 = int_to_ptr.vmem [resolvable:$true] %s88_s27 }
  0x21   :  { %91 = dma.hbm_to_vmem [thread:$0]  %s87_s25, 32, %s89_s27, [#allocation9]  }
  0x22   :  { %s109_s16 = sshll.u32 %s11623_s30, 4  ;;  %s11624_s17 = smov 256   ;;  %s110_s16 = int_to_ptr.vmem [resolvable:$true] %s109_s16 }
  0x23   :  { %s11625_s2 = smov 16   ;;  %s132_s5 = sshll.u32 %s12343_s9, 4  ;;  %s133_s5 = int_to_ptr.hbm [resolvable:$true] %s132_s5 }
  0x24   :  { %115 = dma.hbm_to_vmem [thread:$0]  %s108_s29, 8192, %s110_s16, [#allocation12], %s11624_s17, %s11624_s17, %s11625_s2  }
  0x25   :  { %s11626_s19 = smov [#allocation16]   ;;  %s156_s7 = sshll.u32 %s12345_s11, 4  ;;  %s157_s7 = int_to_ptr.hbm [resolvable:$true] %s156_s7 }
  0x26   :  { %s134_s21 = sshll.u32 %s11626_s19, 4  ;;  %s11627_s20 = smov [#allocation19]   ;;  %s135_s21 = int_to_ptr.vmem [resolvable:$true] %s134_s21 }
  0x27   :  { %137 = dma.hbm_to_vmem [thread:$0]  %s133_s5, 64, %s135_s21, [#allocation15]  }
  0x28   :  { %s158_s12 = sshll.u32 %s11627_s20, 4  ;;  %s177_s28 = sshll.u32 %s12347_s13, 4  ;;  %s159_s12 = int_to_ptr.vmem [resolvable:$true] %s158_s12  ;;  %s178_s28 = int_to_ptr.hbm [resolvable:$true] %s177_s28 }
  0x29   :  { %161 = dma.hbm_to_vmem [thread:$0]  %s157_s7, 128, %s159_s12, [#allocation18]  }
  0x2a   :  { %s11628_s9 = smov [#allocation22]   ;;  %s191_s26 = sshll.u32 %s12348_s14, 4  ;;  %s192_s26 = int_to_ptr.hbm [resolvable:$true] %s191_s26 }
  0x2b   :  { %s179_s6 = sshll.u32 %s11628_s9, 4  ;;  %s11629_s27 = smov 448   ;;  %s180_s6 = int_to_ptr.vmem [resolvable:$true] %s179_s6 }
  0x2c   :  { %s11630_s11 = smov 28   ;;  %s11631_s3 = smov [#allocation23]  }
  0x2d   :  { %185 = dma.hbm_to_vmem [thread:$0]  %s178_s28, 57344, %s180_s6, [#allocation21], %s11629_s27, %s11629_s27, %s11630_s11  }
  0x2e   :  { %s193_s8 = sshll.u32 %s11631_s3, 4  ;;  %s194_s8 = int_to_ptr.vmem [resolvable:$true] %s193_s8 }
  0x2f   :  { %196 = dma.hbm_to_vmem [thread:$0]  %s192_s26, 112, %s194_s8, [#allocation24]  }
  0x30   :  { %11590 = dma.done.wait [#allocation3], 128  }
  0x31   :  { %11591 = vsyncadd [#allocation3], 4294967168 }
  0x32   :  { %11592 = dma.done.wait [#allocation6], 1280  }
  0x33   :  { %11593 = vsyncadd [#allocation6], 4294966016 }
  0x34   :  { %11594 = dma.done.wait [#allocation9], 2080  }
  0x35   :  { %11595 = vsyncadd [#allocation9], 4294965216 }
  0x36   :  { %11596 = dma.done.wait [#allocation12], 8224  }
  0x37   :  { %11597 = vsyncadd [#allocation12], 4294959072 }
  0x38   :  { %11598 = dma.done.wait [#allocation15], 128  }
  0x39   :  { %11599 = vsyncadd [#allocation15], 4294967168 }
  0x3a   :  { %11600 = dma.done.wait [#allocation18], 32896  }
  0x3b   :  { %11601 = vsyncadd [#allocation18], 4294934400 }
  0x3c   :  { %11602 = dma.done.wait [#allocation21], 57472  }
  0x3d   :  { %11603 = vsyncadd [#allocation21], 4294909824 }
  0x3e   :  { %11604 = dma.done.wait [#allocation24], 112  }
  0x3f   :  { %11605 = vsyncadd [#allocation24], 4294967184  ;;  %v11632_v0 = vmov 0   ;;  %vm268_vm0 = vcmask 1041408   ;;  %v253_v1 = vld [vmem:[%s12334_s0] sm:$0xff]  ;;  %v262_v3 = vld [vmem:[#allocation5] sm:$0xff]  ;;  %v254_v11 = vlaneseq }
  0x40   :  { %11185 = vset.pattern.permute.xlu0 %v11632_v0  ;;  %v263_v2 = vld [vmem:[#allocation5 + $0x8] sm:$0x3]  ;;  %v292_v4 = vld [vmem:[#allocation2] sm:$0xff]  ;;  %s11633_s29 = smov 10   ;;  %v10371_v6 = vld [vmem:[#allocation7 + $0x30] sm:$0xff]  ;;  %vm264_vm1 = vcmask 80896  }
  0x41   :  { %257 = vperm.xlu0 %11185, %v253_v1   ;;  %7192 = vmatpush.msk.msra.mxu0 %vm268_vm0, %v263_v2  ;;  %v10372_v5 = vld [vmem:[#allocation7 + $0x38] sm:$0xff]  ;;  %v10370_v7 = vld [vmem:[#allocation7 + $0x28] sm:$0xff]  ;;  %v10369_v8 = vld [vmem:[#allocation7 + $0x20] sm:$0xff]  ;;  %v255_v13 = vand.u32 127, %v254_v11  ;;  %v11634_v15 = vmov 0.0   ;;  %vm298_vm3 = vcmask 900096  }
  0x42   :  { %367 = vmatpush.bf16.msra.mxu1 %v10372_v5  ;;  %v10368_v9 = vld [vmem:[#allocation7 + $0x18] sm:$0xff]  ;;  %v10367_v10 = vld [vmem:[#allocation7 + $0x10] sm:$0xff]  ;;  %v10366_v12 = vld [vmem:[#allocation7 + $0x8] sm:$0xff]  ;;  %vm300_vm4 = vcmask 908288   ;;  %vm568_vm9 = vcmask 1040384   ;;  %s11635_s0 = smov [#allocation25]  }
  0x43   :  { %287 = vmatpush.msra.mxu0 %v262_v3  ;;  %v10365_v17 = vld [vmem:[#allocation7] sm:$0xff]  ;;  %v7287_v18 = vld [vmem:[#allocation8 + $0x70] sm:$0xf]  ;;  %v10388_v19 = vld [vmem:[#allocation8 + $0x74] sm:$0xf0]  ;;  %s7172_s30 = sshll.u32 %s11635_s0, 4  ;;  %s7173_s30 = int_to_ptr.vmem [resolvable:$true] %s7172_s30 }
  0x44   :  { %v10387_v20 = vld [vmem:[#allocation8 + $0x74] sm:$0xf]  ;;  %v7288_v21 = vor.u32 %v10388_v19, %v7287_v18  ;;  %v7289_v22 = vld [vmem:[#allocation8 + $0x78] sm:$0xf0]  ;;  %v7279_v23 = vld [vmem:[#allocation8 + $0x60] sm:$0xf] }
  0x45   :  { %v10386_v24 = vld [vmem:[#allocation8 + $0x64] sm:$0xf0]  ;;  %v7292_v25 = vor.u32 %v10387_v20, %v7289_v22  ;;  %v10385_v26 = vld [vmem:[#allocation8 + $0x64] sm:$0xf]  ;;  %v7281_v27 = vld [vmem:[#allocation8 + $0x68] sm:$0xf0] }
  0x46   :  { %368 = vmatpush.bf16.msra.mxu1 %v10371_v6  ;;  %479 = vmatpush.bf16.msra.mxu2 %v7288_v21  ;;  %v7280_v28 = vor.u32 %v10386_v24, %v7279_v23  ;;  %v7284_v29 = vor.u32 %v10385_v26, %v7281_v27  ;;  %v7271_v30 = vld [vmem:[#allocation8 + $0x50] sm:$0xf]  ;;  %v10384_v31 = vld [vmem:[#allocation8 + $0x54] sm:$0xf0]  ;;  %v10383_v32 = vld [vmem:[#allocation8 + $0x54] sm:$0xf] }
  0x47   :  { %492 = vmatpush.bf16.msra.mxu3 %v7292_v25  ;;  %v7273_v33 = vld [vmem:[#allocation8 + $0x58] sm:$0xf0]  ;;  %v7272_v34 = vor.u32 %v10384_v31, %v7271_v30  ;;  %v7263_v36 = vld [vmem:[#allocation8 + $0x40] sm:$0xf]  ;;  %v10382_v37 = vld [vmem:[#allocation8 + $0x44] sm:$0xf0] }
  0x48   :  { %v7276_v35 = vor.u32 %v10383_v32, %v7273_v33  ;;  %v10381_v38 = vld [vmem:[#allocation8 + $0x44] sm:$0xf]  ;;  %v7265_v39 = vld [vmem:[#allocation8 + $0x48] sm:$0xf0]  ;;  %v7264_v40 = vor.u32 %v10382_v37, %v7263_v36  ;;  %v7255_v42 = vld [vmem:[#allocation8 + $0x30] sm:$0xf] }
  0x49   :  { %294 = vrot.lane.b32.xlu0 %v292_v4, %s11633_s29  ;;  %v7268_v41 = vor.u32 %v10381_v38, %v7265_v39  ;;  %v10380_v43 = vld [vmem:[#allocation8 + $0x34] sm:$0xf0]  ;;  %v10379_v44 = vld [vmem:[#allocation8 + $0x34] sm:$0xf]  ;;  %v7257_v45 = vld [vmem:[#allocation8 + $0x38] sm:$0xf0] }
  0x4a   :  { %369 = vmatpush.bf16.msra.mxu1 %v10370_v7  ;;  %480 = vmatpush.bf16.msra.mxu2 %v7280_v28  ;;  %v7256_v46 = vor.u32 %v10380_v43, %v7255_v42  ;;  %v7260_v47 = vor.u32 %v10379_v44, %v7257_v45  ;;  %v7247_v48 = vld [vmem:[#allocation8 + $0x20] sm:$0xf]  ;;  %v10378_v49 = vld [vmem:[#allocation8 + $0x24] sm:$0xf0]  ;;  %v10377_v50 = vld [vmem:[#allocation8 + $0x24] sm:$0xf] }
  0x4b   :  { %493 = vmatpush.bf16.msra.mxu3 %v7284_v29  ;;  %v7249_v51 = vld [vmem:[#allocation8 + $0x28] sm:$0xf0]  ;;  %v7248_v52 = vor.u32 %v10378_v49, %v7247_v48  ;;  %vm7226_vm5 = vmpackc.low %vm300_vm4, %vm300_vm4  ;;  %v7239_v59 = vld [vmem:[#allocation8 + $0x10] sm:$0xf]  ;;  %s7174_s2 = sshll.u32 %s12349_s15, 4  ;;  %s7175_s2 = int_to_ptr.hbm [resolvable:$true] %s7174_s2 }
  0x4c   :  { %v7252_v53 = vor.u32 %v10377_v50, %v7249_v51  ;;  %v10376_v60 = vld [vmem:[#allocation8 + $0x14] sm:$0xf0]  ;;  %v10375_v61 = vld [vmem:[#allocation8 + $0x14] sm:$0xf]  ;;  %v7241_v63 = vld [vmem:[#allocation8 + $0x18] sm:$0xf0] }
  0x4d   :  { %v7240_v62 = vor.u32 %v10376_v60, %v7239_v59  ;;  %v7244_v0 = vor.u32 %v10375_v61, %v7241_v63  ;;  %v7231_v1 = vld [vmem:[#allocation8] sm:$0xf]  ;;  %v10374_v2 = vld [vmem:[#allocation8 + $0x4] sm:$0xf0]  ;;  %v10373_v3 = vld [vmem:[#allocation8 + $0x4] sm:$0xf] }
  0x4e   :  { %370 = vmatpush.bf16.msra.mxu1 %v10369_v8  ;;  %481 = vmatpush.bf16.msra.mxu2 %v7272_v34  ;;  %v7232_v4 = vor.u32 %v10374_v2, %v7231_v1  ;;  %v7233_v5 = vld [vmem:[#allocation8 + $0x8] sm:$0xf0]  ;;  %v7409_v18 = vld [vmem:[#allocation13 + $0xf0] sm:$0xf0]  ;;  %v10449_v21 = vld [vmem:[#allocation13 + $0x1e4] sm:$0xf] }
  0x4f   :  { %494 = vmatpush.bf16.msra.mxu3 %v7276_v35  ;;  %v7236_v6 = vor.u32 %v10373_v3, %v7233_v5  ;;  %v7537_v22 = vld [vmem:[#allocation13 + $0x1f0] sm:$0xf0]  ;;  %v7391_v24 = vld [vmem:[#allocation13 + $0xc0] sm:$0xf]  ;;  %v10415_v25 = vld [vmem:[#allocation13 + $0xcc] sm:$0xf0] }
  0x50   :  { %v7540_v23 = vor.u32 %v10449_v21, %v7537_v22  ;;  %v7519_v26 = vld [vmem:[#allocation13 + $0x1c0] sm:$0xf]  ;;  %v7392_v27 = vor.u32 %v10415_v25, %v7391_v24  ;;  %v10447_v28 = vld [vmem:[#allocation13 + $0x1cc] sm:$0xf0]  ;;  %v10413_v29 = vld [vmem:[#allocation13 + $0xc4] sm:$0xf] }
  0x51   :  { %v7393_v30 = vld [vmem:[#allocation13 + $0xd0] sm:$0xf0]  ;;  %v7520_v31 = vor.u32 %v10447_v28, %v7519_v26  ;;  %v10445_v33 = vld [vmem:[#allocation13 + $0x1c4] sm:$0xf]  ;;  %v7375_v36 = vld [vmem:[#allocation13 + $0xa0] sm:$0xf] }
  0x52   :  { %371 = vmatpush.bf16.msra.mxu1 %v10368_v9  ;;  %482 = vmatpush.bf16.msra.mxu2 %v7264_v40  ;;  %v7396_v32 = vor.u32 %v10413_v29, %v7393_v30  ;;  %v7521_v34 = vld [vmem:[#allocation13 + $0x1d0] sm:$0xf0]  ;;  %v10411_v37 = vld [vmem:[#allocation13 + $0xac] sm:$0xf0]  ;;  %v7503_v38 = vld [vmem:[#allocation13 + $0x1a0] sm:$0xf] }
  0x53   :  { %495 = vmatpush.bf16.msra.mxu3 %v7268_v41  ;;  %v7524_v35 = vor.u32 %v10445_v33, %v7521_v34  ;;  %v7376_v39 = vor.u32 %v10411_v37, %v7375_v36  ;;  %v10443_v40 = vld [vmem:[#allocation13 + $0x1ac] sm:$0xf0]  ;;  %v10409_v41 = vld [vmem:[#allocation13 + $0xa4] sm:$0xf]  ;;  %v7377_v42 = vld [vmem:[#allocation13 + $0xb0] sm:$0xf0] }
  0x54   :  { %v7504_v43 = vor.u32 %v10443_v40, %v7503_v38  ;;  %v7380_v44 = vor.u32 %v10409_v41, %v7377_v42  ;;  %v10441_v45 = vld [vmem:[#allocation13 + $0x1a4] sm:$0xf]  ;;  %v7359_v48 = vld [vmem:[#allocation13 + $0x80] sm:$0xf]  ;;  %v10407_v49 = vld [vmem:[#allocation13 + $0x8c] sm:$0xf0] }
  0x55   :  { %v7487_v50 = vld [vmem:[#allocation13 + $0x180] sm:$0xf]  ;;  %v10437_v61 = vld [vmem:[#allocation13 + $0x184] sm:$0xf]  ;;  %v10399_v26 = vld [vmem:[#allocation13 + $0x4c] sm:$0xf0] }
  0x56   :  { %372 = vmatpush.bf16.msra.mxu1 %v10367_v10  ;;  %483 = vmatpush.bf16.msra.mxu2 %v7256_v46  ;;  %v7505_v46 = vld [vmem:[#allocation13 + $0x1b0] sm:$0xf0]  ;;  %v7327_v25 = vld [vmem:[#allocation13 + $0x40] sm:$0xf]  ;;  %v10397_v33 = vld [vmem:[#allocation13 + $0x44] sm:$0xf] }
  0x57   :  { %496 = vmatpush.bf16.msra.mxu3 %v7260_v47  ;;  %v7508_v47 = vor.u32 %v10441_v45, %v7505_v46  ;;  %v7328_v30 = vor.u32 %v10399_v26, %v7327_v25  ;;  %v7329_v38 = vld [vmem:[#allocation13 + $0x50] sm:$0xf0]  ;;  %v10452_v26 = vld [vmem:[#allocation13 + $0x1f4] sm:$0xf0] }
  0x58   :  { %v7332_v41 = vor.u32 %v10397_v33, %v7329_v38  ;;  %v7457_v42 = vld [vmem:[#allocation13 + $0x150] sm:$0xf0]  ;;  %v7527_v38 = vld [vmem:[#allocation13 + $0x1c8] sm:$0xf] }
  0x5a   :  { %373 = vmatpush.bf16.msra.mxu1 %v10366_v12  ;;  %484 = vmatpush.bf16.msra.mxu2 %v7248_v52  ;;  %v7407_v12 = vld [vmem:[#allocation13 + $0xe0] sm:$0xf] }
  0x5b   :  { %497 = vmatpush.bf16.msra.mxu3 %v7252_v53  ;;  %v7360_v53 = vor.u32 %v10407_v49, %v7359_v48  ;;  %v10395_v48 = vld [vmem:[#allocation13 + $0x2c] sm:$0xf0] }
  0x5e   :  { %374 = vmatpush.bf16.msra.mxu1 %v10365_v17  ;;  %485 = vmatpush.bf16.msra.mxu2 %v7240_v62  ;;  %v10417_v17 = vld [vmem:[#allocation13 + $0xe4] sm:$0xf]  ;;  %v7489_v62 = vld [vmem:[#allocation13 + $0x190] sm:$0xf0] }
  0x5f   :  { %498 = vmatpush.bf16.msra.mxu3 %v7244_v0  ;;  %v7412_v20 = vor.u32 %v10417_v17, %v7409_v18  ;;  %v7492_v1 = vor.u32 %v10437_v61, %v7489_v62  ;;  %v10433_v17 = vld [vmem:[#allocation13 + $0x164] sm:$0xf] }
  0x60   :  { %v10425_v61 = vld [vmem:[#allocation13 + $0x124] sm:$0xf] }
  0x62   :  { %486 = vmatpush.bf16.msra.mxu2 %v7232_v4 }
  0x63   :  { %499 = vmatpush.bf16.msra.mxu3 %v7236_v6  ;;  %v7343_v6 = vld [vmem:[#allocation13 + $0x60] sm:$0xf] }
  0x66   :  { %1010 = vmatpush.bf16.msrb.mxu2 %v7412_v20  ;;  %v7473_v20 = vld [vmem:[#allocation13 + $0x170] sm:$0xf0] }
  0x67   :  { %1023 = vmatpush.bf16.msrb.mxu3 %v7540_v23  ;;  %v7476_v29 = vor.u32 %v10433_v17, %v7473_v20  ;;  %v7425_v17 = vld [vmem:[#allocation13 + $0x110] sm:$0xf0]  ;;  %v7415_v20 = vld [vmem:[#allocation13 + $0xe8] sm:$0xf] }
  0x6a   :  { %1011 = vmatpush.bf16.msrb.mxu2 %v7396_v32  ;;  %v10431_v32 = vld [vmem:[#allocation13 + $0x14c] sm:$0xf0] }
  0x6b   :  { %1024 = vmatpush.bf16.msrb.mxu3 %v7524_v35 }
  0x6e   :  { %1012 = vmatpush.bf16.msrb.mxu2 %v7380_v44 }
  0x6f   :  { %1025 = vmatpush.bf16.msrb.mxu3 %v7508_v47  ;;  %v7311_v47 = vld [vmem:[#allocation13 + $0x20] sm:$0xf] }
  0x73   :  { %1026 = vmatpush.bf16.msrb.mxu3 %v7492_v1 }
  0x77   :  { %1027 = vmatpush.bf16.msrb.mxu3 %v7476_v29  ;;  %v7417_v29 = vld [vmem:[#allocation13 + $0xf8] sm:$0xf0] }
  0xb3   :  { %v258_v14 = vpop.permute.xlu0 %257 }
  0xb4   :  { %vm259_vm2 = vcmp.eq.s32.totalorder %v258_v14, %v255_v13  ;;  %v10419_v13 = vld [vmem:[#allocation13 + $0xec] sm:$0xf0]  ;;  %v7535_v14 = vld [vmem:[#allocation13 + $0x1e0] sm:$0xf] }
  0xb5   :  { %v7191_v16 = vsel %vm259_vm2, 1.0, %v11634_v15  ;;  %v7408_v15 = vor.u32 %v10419_v13, %v7407_v12 }
  0xb6   :  { %7193 = vmatmul.msk.f32.vlgmr.msra.gmra.mxu0 %vm264_vm1, %v7191_v16  ;;  %v10451_v16 = vld [vmem:[#allocation13 + $0x1ec] sm:$0xf0] }
  0xb7   :  { %v7536_v19 = vor.u32 %v10451_v16, %v7535_v14  ;;  %984 = vmatpush.bf16.msrb.mxu0 %v7408_v15  ;;  %v7345_v16 = vld [vmem:[#allocation13 + $0x70] sm:$0xf0] }
  0xb9   :  { %997 = vmatpush.bf16.msrb.mxu1 %v7536_v19 }
  0xbb   :  { %v295_v54 = vpop.permute.xlu0 %294  ;;  %985 = vmatpush.bf16.msrb.mxu0 %v7392_v27 }
  0xbd   :  { %998 = vmatpush.bf16.msrb.mxu1 %v7520_v31  ;;  %v7455_v31 = vld [vmem:[#allocation13 + $0x140] sm:$0xf] }
  0xbe   :  { %v7456_v40 = vor.u32 %v10431_v32, %v7455_v31  ;;  %v7545_v31 = vld [vmem:[#allocation13 + $0x1f8] sm:$0xf0] }
  0xbf   :  { %986 = vmatpush.bf16.msrb.mxu0 %v7376_v39  ;;  %v10429_v39 = vld [vmem:[#allocation13 + $0x144] sm:$0xf] }
  0xc0   :  { %v7460_v49 = vor.u32 %v10429_v39, %v7457_v42  ;;  %v10448_v39 = vld [vmem:[#allocation13 + $0x1d4] sm:$0xf0]  ;;  %v7401_v42 = vld [vmem:[#allocation13 + $0xd8] sm:$0xf0] }
  0xc1   :  { %999 = vmatpush.bf16.msrb.mxu1 %v7504_v43 }
  0xc2   :  { %1028 = vmatpush.bf16.msrb.mxu3 %v7460_v49 }
  0xc3   :  { %987 = vmatpush.bf16.msrb.mxu0 %v7360_v53  ;;  %v7439_v53 = vld [vmem:[#allocation13 + $0x120] sm:$0xf] }
 0x133   :  { %v289_v55 = vpop.f32.mrf.mxu0 }
 0x134   :  { %v297_v56 = vsel %vm264_vm1, %v289_v55, %v295_v54  ;;  %v10439_v54 = vld [vmem:[#allocation13 + $0x18c] sm:$0xf0]  ;;  %v10405_v55 = vld [vmem:[#allocation13 + $0x84] sm:$0xf] }
 0x135   :  { %v299_v57 = vsel %vm298_vm3, %v297_v56, 1.0  ;;  %v7361_v56 = vld [vmem:[#allocation13 + $0x90] sm:$0xf0]  ;;  %v7488_v63 = vor.u32 %v10439_v54, %v7487_v50  ;;  %v7312_v50 = vor.u32 %v10395_v48, %v7311_v47  ;;  %v10427_v54 = vld [vmem:[#allocation13 + $0x12c] sm:$0xf0] }
 0x136   :  { %v7227_v58 = vpack.c.bf16 %v299_v57, %v299_v57  ;;  %v7364_v0 = vor.u32 %v10405_v55, %v7361_v56  ;;  %v10393_v55 = vld [vmem:[#allocation13 + $0x24] sm:$0xf]  ;;  %v7440_v62 = vor.u32 %v10427_v54, %v7439_v53  ;;  %v7383_v47 = vld [vmem:[#allocation13 + $0xa8] sm:$0xf]  ;;  %v10412_v48 = vld [vmem:[#allocation13 + $0xb4] sm:$0xf0] }
 0x137   :  { %1000 = vmatpush.bf16.msrb.mxu1 %v7488_v63  ;;  %v7511_v53 = vld [vmem:[#allocation13 + $0x1a8] sm:$0xf]  ;;  %v10444_v54 = vld [vmem:[#allocation13 + $0x1b4] sm:$0xf0] }
 0x138   :  { %7228 = vmatmul.msk.bf16.vlgmr.msra.gmra.mxu1 %vm7226_vm5, %v7227_v58  ;;  %1013 = vmatpush.bf16.msrb.mxu2 %v7364_v0  ;;  %v7441_v0 = vld [vmem:[#allocation13 + $0x130] sm:$0xf0] }
 0x1b5   :  { %v376_v7 = vpop.f32.mrf.mxu1 }
 0x1b6   :  { %v380_v8 = vmul.f32 0.2, %v376_v7 }
 0x1b8   :  { %v381_v9 = vmax.f32 %v376_v7, %v380_v8  ;;  %v10403_v7 = vld [vmem:[#allocation13 + $0x6c] sm:$0xf0] }
 0x1b9   :  { %v7344_v8 = vor.u32 %v10403_v7, %v7343_v6  ;;  %v10391_v6 = vld [vmem:[#allocation13 + $0xc] sm:$0xf0]  ;;  %v7444_v7 = vor.u32 %v10425_v61, %v7441_v0  ;;  %v7513_v61 = vld [vmem:[#allocation13 + $0x1b8] sm:$0xf0]  ;;  %v7367_v0 = vld [vmem:[#allocation13 + $0x88] sm:$0xf] }
 0x1ba   :  { %v382_v10 = vpack.c.bf16 %v381_v9, %v381_v9  ;;  %v7471_v9 = vld [vmem:[#allocation13 + $0x160] sm:$0xf] }
 0x1bb   :  { %988 = vmatpush.bf16.msrb.mxu0 %v7344_v8  ;;  %1029 = vmatpush.bf16.msrb.mxu3 %v7444_v7  ;;  %v7369_v7 = vld [vmem:[#allocation13 + $0x98] sm:$0xf0] }
 0x1bc   :  { %487 = vmatmul.bf16.vlgmr.msra.gmra.mxu2 %v382_v10  ;;  %500 = vmatmul.bf16.vlgmr.msra.gmra.mxu3 %v382_v10  ;;  %v10435_v10 = vld [vmem:[#allocation13 + $0x16c] sm:$0xf0] }
 0x1bd   :  { %v378_v11 = vpop.f32.mrf.mxu1  ;;  %v7472_v18 = vor.u32 %v10435_v10, %v7471_v9  ;;  %v7423_v9 = vld [vmem:[#allocation13 + $0x100] sm:$0xf]  ;;  %v10423_v10 = vld [vmem:[#allocation13 + $0x10c] sm:$0xf0] }
 0x1be   :  { %v10401_v11 = vld [vmem:[#allocation13 + $0x64] sm:$0xf] }
 0x1bf   :  { %v7348_v19 = vor.u32 %v10401_v11, %v7345_v16  ;;  %1001 = vmatpush.bf16.msrb.mxu1 %v7472_v18  ;;  %989 = vmatpush.bf16.msrb.mxu0 %v7328_v30  ;;  %v10389_v11 = vld [vmem:[#allocation13 + $0x4] sm:$0xf]  ;;  %v10450_v30 = vld [vmem:[#allocation13 + $0x1ec] sm:$0xf] }
 0x1c0   :  { %v10421_v16 = vld [vmem:[#allocation13 + $0x104] sm:$0xf] }
 0x1c1   :  { %1014 = vmatpush.bf16.msrb.mxu2 %v7348_v19  ;;  %v7428_v19 = vor.u32 %v10421_v16, %v7425_v17 }
 0x1c3   :  { %1002 = vmatpush.bf16.msrb.mxu1 %v7456_v40  ;;  %990 = vmatpush.bf16.msrb.mxu0 %v7312_v50  ;;  %v7384_v50 = vor.u32 %v10412_v48, %v7383_v47  ;;  %v10430_v47 = vld [vmem:[#allocation13 + $0x14c] sm:$0xf]  ;;  %v7465_v48 = vld [vmem:[#allocation13 + $0x158] sm:$0xf0] }
 0x1c4   :  { %1030 = vmatpush.bf16.msrb.mxu3 %v7428_v19  ;;  %v10404_v19 = vld [vmem:[#allocation13 + $0x74] sm:$0xf0] }
 0x1c5   :  { %1015 = vmatpush.bf16.msrb.mxu2 %v7332_v41  ;;  %v10414_v41 = vld [vmem:[#allocation13 + $0xcc] sm:$0xf] }
 0x1c7   :  { %1003 = vmatpush.bf16.msrb.mxu1 %v7440_v62 }
 0x23f   :  { %v11764_v51 = vpop.f32.mrf.mxu2  ;;  %v11766_v52 = vpop.f32.mrf.mxu3 }
 0x240   :  { %v507_v57 = vrot.slane %v11764_v51, 4  ;;  %v521_v58 = vmul.f32 %v11764_v51, %v11764_v51  ;;  %v513_v59 = vrot.slane %v11766_v52, 4  ;;  %v522_v60 = vmul.f32 %v11766_v52, %v11766_v52 }
 0x242   :  { %v508_v2 = vadd.f32 %v507_v57, %v11764_v51  ;;  %v523_v3 = vrot.slane %v521_v58, 4  ;;  %v514_v4 = vadd.f32 %v513_v59, %v11766_v52  ;;  %v529_v5 = vrot.slane %v522_v60, 4 }
 0x244   :  { %v509_v12 = vrot.slane %v508_v2, 2  ;;  %v524_v13 = vadd.f32 %v523_v3, %v521_v58  ;;  %v515_v14 = vrot.slane %v514_v4, 2  ;;  %v530_v15 = vadd.f32 %v529_v5, %v522_v60  ;;  %v7313_v60 = vld [vmem:[#allocation13 + $0x30] sm:$0xf0]  ;;  %v7295_v5 = vld [vmem:[#allocation13] sm:$0xf] }
 0x245   :  { %v7316_v63 = vor.u32 %v10393_v55, %v7313_v60  ;;  %v7296_v8 = vor.u32 %v10391_v6, %v7295_v5  ;;  %v10410_v55 = vld [vmem:[#allocation13 + $0xac] sm:$0xf]  ;;  %v10440_v5 = vld [vmem:[#allocation13 + $0x194] sm:$0xf0] }
 0x246   :  { %v510_v21 = vadd.f32 %v509_v12, %v508_v2  ;;  %v525_v22 = vrot.slane %v524_v13, 2  ;;  %v516_v23 = vadd.f32 %v515_v14, %v514_v4  ;;  %v531_v24 = vrot.slane %v530_v15, 2  ;;  %v10442_v60 = vld [vmem:[#allocation13 + $0x1ac] sm:$0xf] }
 0x247   :  { %v490_v27 = vpop.f32.mrf.mxu2  ;;  %v503_v28 = vpop.f32.mrf.mxu3  ;;  %1016 = vmatpush.bf16.msrb.mxu2 %v7316_v63  ;;  %v7424_v14 = vor.u32 %v10423_v10, %v7423_v9  ;;  %991 = vmatpush.bf16.msrb.mxu0 %v7296_v8  ;;  %v7516_v63 = vor.u32 %v10442_v60, %v7513_v61  ;;  %v10406_v6 = vld [vmem:[#allocation13 + $0x8c] sm:$0xf] }
 0x248   :  { %v511_v34 = vrot.slane %v510_v21, 1  ;;  %v526_v35 = vadd.f32 %v525_v22, %v524_v13  ;;  %v517_v36 = vrot.slane %v516_v23, 1  ;;  %v532_v37 = vadd.f32 %v531_v24, %v530_v15  ;;  %v7297_v15 = vld [vmem:[#allocation13 + $0x10] sm:$0xf0]  ;;  %v7543_v22 = vld [vmem:[#allocation13 + $0x1e8] sm:$0xf] }
 0x249   :  { %v7300_v18 = vor.u32 %v10389_v11, %v7297_v15  ;;  %v10418_v27 = vld [vmem:[#allocation13 + $0xec] sm:$0xf]  ;;  %1004 = vmatpush.bf16.msrb.mxu1 %v7424_v14  ;;  %v7544_v28 = vor.u32 %v10452_v26, %v7543_v22  ;;  %v7372_v14 = vor.u32 %v10406_v6, %v7369_v7  ;;  %v10392_v7 = vld [vmem:[#allocation13 + $0x14] sm:$0xf0] }
 0x24a   :  { %v512_v43 = vadd.f32 %v511_v34, %v510_v21  ;;  %v527_v44 = vrot.slane %v526_v35, 1  ;;  %v518_v45 = vadd.f32 %v517_v36, %v516_v23  ;;  %v533_v46 = vrot.slane %v532_v37, 1  ;;  %v10420_v21 = vld [vmem:[#allocation13 + $0xf4] sm:$0xf0]  ;;  %v7399_v36 = vld [vmem:[#allocation13 + $0xc8] sm:$0xf] }
 0x24b   :  { %v7416_v25 = vor.u32 %v10420_v21, %v7415_v20  ;;  %1017 = vmatpush.bf16.msrb.mxu2 %v7300_v18  ;;  %v7420_v34 = vor.u32 %v10418_v27, %v7417_v29  ;;  %v10438_v11 = vld [vmem:[#allocation13 + $0x18c] sm:$0xf]  ;;  %v7351_v18 = vld [vmem:[#allocation13 + $0x68] sm:$0xf]  ;;  %v7353_v27 = vld [vmem:[#allocation13 + $0x78] sm:$0xf0] }
 0x24c   :  { %v11776_v56 = vmul.f32 0.125, %v512_v43  ;;  %v528_v57 = vadd.f32 %v527_v44, %v526_v35  ;;  %v11778_v58 = vmul.f32 0.125, %v518_v45  ;;  %v534_v59 = vadd.f32 %v533_v46, %v532_v37  ;;  %v10416_v37 = vld [vmem:[#allocation13 + $0xd4] sm:$0xf0]  ;;  %v10446_v43 = vld [vmem:[#allocation13 + $0x1cc] sm:$0xf] }
 0x24d   :  { %1036 = vmatpush.bf16.msra.mxu0 %v7416_v25  ;;  %v7548_v35 = vor.u32 %v10450_v30, %v7545_v31  ;;  %1049 = vmatpush.bf16.msra.mxu1 %v7544_v28  ;;  %v7400_v40 = vor.u32 %v10416_v37, %v7399_v36  ;;  %v7528_v44 = vor.u32 %v10448_v39, %v7527_v38  ;;  %v7529_v46 = vld [vmem:[#allocation13 + $0x1d8] sm:$0xf0]  ;;  %v7479_v20 = vld [vmem:[#allocation13 + $0x168] sm:$0xf]  ;;  %v10434_v28 = vld [vmem:[#allocation13 + $0x16c] sm:$0xf] }
 0x24e   :  { %v535_v1 = vmul.f32 0.125, %v528_v57  ;;  %v537_v2 = vmul.f32 %v11776_v56, %v11776_v56  ;;  %v536_v3 = vmul.f32 0.125, %v534_v59  ;;  %v538_v4 = vmul.f32 %v11778_v58, %v11778_v58  ;;  %v7385_v59 = vld [vmem:[#allocation13 + $0xb8] sm:$0xf0]  ;;  %v10400_v38 = vld [vmem:[#allocation13 + $0x54] sm:$0xf0] }
 0x24f   :  { %1062 = vmatpush.bf16.msra.mxu2 %v7420_v34  ;;  %1075 = vmatpush.bf16.msra.mxu3 %v7548_v35  ;;  %v7404_v45 = vor.u32 %v10414_v41, %v7401_v42  ;;  %v7532_v49 = vor.u32 %v10446_v43, %v7529_v46  ;;  %v7512_v57 = vor.u32 %v10444_v54, %v7511_v53  ;;  %v7481_v31 = vld [vmem:[#allocation13 + $0x178] sm:$0xf0]  ;;  %v7335_v34 = vld [vmem:[#allocation13 + $0x48] sm:$0xf]  ;;  %v10398_v42 = vld [vmem:[#allocation13 + $0x4c] sm:$0xf] }
 0x250   :  { %v539_v12 = vsub.f32 %v535_v1, %v537_v2  ;;  %v540_v13 = vsub.f32 %v536_v3, %v538_v4  ;;  %v7388_v62 = vor.u32 %v10410_v55, %v7385_v59  ;;  %v10408_v1 = vld [vmem:[#allocation13 + $0x94] sm:$0xf0]  ;;  %v7495_v2 = vld [vmem:[#allocation13 + $0x188] sm:$0xf]  ;;  %v7352_v22 = vor.u32 %v10404_v19, %v7351_v18  ;;  %v7337_v43 = vld [vmem:[#allocation13 + $0x58] sm:$0xf0] }
 0x251   :  { %1037 = vmatpush.bf16.msra.mxu0 %v7400_v40  ;;  %1050 = vmatpush.bf16.msra.mxu1 %v7528_v44  ;;  %v7368_v4 = vor.u32 %v10408_v1, %v7367_v0  ;;  %v7496_v10 = vor.u32 %v10440_v5, %v7495_v2  ;;  %v7484_v37 = vor.u32 %v10434_v28, %v7481_v31  ;;  %v7463_v39 = vld [vmem:[#allocation13 + $0x148] sm:$0xf]  ;;  %v10396_v54 = vld [vmem:[#allocation13 + $0x34] sm:$0xf0]  ;;  %v10394_v61 = vld [vmem:[#allocation13 + $0x2c] sm:$0xf] }
 0x252   :  { %v541_v23 = vmax.f32 %v539_v12, 0.0  ;;  %v542_v24 = vmax.f32 %v540_v13, 0.0  ;;  %v7497_v12 = vld [vmem:[#allocation13 + $0x198] sm:$0xf0]  ;;  %v7336_v41 = vor.u32 %v10400_v38, %v7335_v34  ;;  %v7340_v46 = vor.u32 %v10398_v42, %v7337_v43  ;;  %v7447_v55 = vld [vmem:[#allocation13 + $0x128] sm:$0xf] }
 0x253   :  { %1063 = vmatpush.bf16.msra.mxu2 %v7404_v45  ;;  %1076 = vmatpush.bf16.msra.mxu3 %v7532_v49  ;;  %v7500_v15 = vor.u32 %v10438_v11, %v7497_v12  ;;  %v7319_v49 = vld [vmem:[#allocation13 + $0x28] sm:$0xf]  ;;  %v7468_v53 = vor.u32 %v10430_v47, %v7465_v48  ;;  %v7449_v2 = vld [vmem:[#allocation13 + $0x138] sm:$0xf0]  ;;  %v10390_v11 = vld [vmem:[#allocation13 + $0xc] sm:$0xf] }
 0x254   :  { %v11784_v32 = vadd.f32 1e-05, %v541_v23  ;;  %v11786_v33 = vadd.f32 1e-05, %v542_v24  ;;  %v10436_v23 = vld [vmem:[#allocation13 + $0x174] sm:$0xf0]  ;;  %v7320_v60 = vor.u32 %v10396_v54, %v7319_v49 }
 0x255   :  { %1038 = vmatpush.bf16.msra.mxu0 %v7384_v50  ;;  %1051 = vmatpush.bf16.msra.mxu1 %v7512_v57  ;;  %v10402_v24 = vld [vmem:[#allocation13 + $0x6c] sm:$0xf]  ;;  %v7480_v26 = vor.u32 %v10436_v23, %v7479_v20  ;;  %v505_v50 = vld [vmem:[#allocation10] sm:$0x3]  ;;  %v10428_v57 = vld [vmem:[#allocation13 + $0x134] sm:$0xf0] }
 0x256   :  { %11186 = vrsqrt.f32 %v11784_v32  ;;  %vm561_vm7 = vweird.f32 %v11786_v33  ;;  %v7356_v30 = vor.u32 %v10402_v24, %v7353_v27  ;;  %vm551_vm11 = vweird.f32 %v11784_v32  ;;  %v7305_v12 = vld [vmem:[#allocation13 + $0x18] sm:$0xf0]  ;;  %v10641_v48 = vld [vmem:[#allocation17 + $0x5dc] sm:$0xf0] }
 0x257   :  { %11188 = vrsqrt.f32 %v11786_v33  ;;  %1064 = vmatpush.bf16.msra.mxu2 %v7388_v62  ;;  %1077 = vmatpush.bf16.msra.mxu3 %v7516_v63  ;;  %v7321_v62 = vld [vmem:[#allocation13 + $0x38] sm:$0xf0]  ;;  %v10426_v63 = vld [vmem:[#allocation13 + $0x12c] sm:$0xf]  ;;  %v7448_v1 = vor.u32 %v10428_v57, %v7447_v55  ;;  %v7308_v19 = vor.u32 %v10390_v11, %v7305_v12  ;;  %v8543_v49 = vld [vmem:[#allocation17 + $0x7c0] sm:$0xf] }
 0x258   :  { %v7452_v6 = vor.u32 %v10426_v63, %v7449_v2  ;;  %v10697_v11 = vld [vmem:[#allocation17 + $0x79c] sm:$0xf0] }
 0x259   :  { %1039 = vmatpush.bf16.msra.mxu0 %v7368_v4  ;;  %1052 = vmatpush.bf16.msra.mxu1 %v7496_v10  ;;  %v7303_v4 = vld [vmem:[#allocation13 + $0x8] sm:$0xf] }
 0x25b   :  { %1065 = vmatpush.bf16.msra.mxu2 %v7372_v14  ;;  %1078 = vmatpush.bf16.msra.mxu3 %v7500_v15  ;;  %v7304_v15 = vor.u32 %v10392_v7, %v7303_v4  ;;  %v10569_v4 = vld [vmem:[#allocation17 + $0x39c] sm:$0xf0] }
 0x25c   :  { %v11790_v3 = vpop.eup %11186 }
 0x25d   :  { %v11792_v8 = vpop.eup %11188  ;;  %v546_v9 = vmul.f32 %v11790_v3, %v11784_v32  ;;  %1040 = vmatpush.bf16.msra.mxu0 %v7352_v22  ;;  %1053 = vmatpush.bf16.msra.mxu1 %v7480_v26  ;;  %vm552_vm10 = vweird.f32 %v11790_v3  ;;  %v7324_v32 = vor.u32 %v10394_v61, %v7321_v62  ;;  %v506_v22 = vld [vmem:[#allocation11] sm:$0x3]  ;;  %v7999_v61 = vld [vmem:[#allocation17 + $0x380] sm:$0xf] }
 0x25e   :  { %v556_v13 = vmul.f32 %v11792_v8, %v11786_v33  ;;  %vm562_vm6 = vweird.f32 %v11792_v8  ;;  %v10432_v33 = vld [vmem:[#allocation13 + $0x154] sm:$0xf0]  ;;  %vm553_vm12 = vmor %vm551_vm11, %vm552_vm10  ;;  %vm1214_vm10 = vcmask 1042434  }
 0x25f   :  { %v547_v16 = vmul.f32 %v11790_v3, %v546_v9  ;;  %vm11804_vm8 = vmor %vm561_vm7, %vm562_vm6  ;;  %1066 = vmatpush.bf16.msra.mxu2 %v7356_v30  ;;  %1079 = vmatpush.bf16.msra.mxu3 %v7484_v37  ;;  %v7464_v45 = vor.u32 %v10432_v33, %v7463_v39  ;;  %v10424_v9 = vld [vmem:[#allocation13 + $0x114] sm:$0xf0]  ;;  %v8031_v33 = vld [vmem:[#allocation17 + $0x3c0] sm:$0xf] }
 0x260   :  { %v557_v17 = vmul.f32 %v11792_v8, %v556_v13  ;;  %v10422_v13 = vld [vmem:[#allocation13 + $0x10c] sm:$0xf] }
 0x261   :  { %v548_v21 = vmul.f32 0.5, %v547_v16  ;;  %1041 = vmatpush.bf16.msra.mxu0 %v7336_v41  ;;  %1054 = vmatpush.bf16.msra.mxu1 %v7464_v45  ;;  %v7433_v16 = vld [vmem:[#allocation13 + $0x118] sm:$0xf0]  ;;  %v10513_v41 = vld [vmem:[#allocation17 + $0x1dc] sm:$0xf0] }
 0x262   :  { %v558_v25 = vmul.f32 0.5, %v557_v17  ;;  %v7436_v20 = vor.u32 %v10422_v13, %v7433_v16  ;;  %v10577_v45 = vld [vmem:[#allocation17 + $0x3dc] sm:$0xf0] }
 0x263   :  { %v549_v29 = vsub.f32 1.5, %v548_v21  ;;  %1067 = vmatpush.bf16.msra.mxu2 %v7340_v46  ;;  %1080 = vmatpush.bf16.msra.mxu3 %v7468_v53  ;;  %v8287_v46 = vld [vmem:[#allocation17 + $0x5c0] sm:$0xf]  ;;  %v8032_v47 = vor.u32 %v10577_v45, %v8031_v33 }
 0x264   :  { %v559_v35 = vsub.f32 1.5, %v558_v25  ;;  %v8288_v55 = vor.u32 %v10641_v48, %v8287_v46 }
 0x265   :  { %v550_v40 = vmul.f32 %v11790_v3, %v549_v29  ;;  %1042 = vmatpush.bf16.msra.mxu0 %v7320_v60  ;;  %1055 = vmatpush.bf16.msra.mxu1 %v7448_v1  ;;  %v10505_v60 = vld [vmem:[#allocation17 + $0x19c] sm:$0xf0] }
 0x266   :  { %v560_v44 = vmul.f32 %v11792_v8, %v559_v35 }
 0x267   :  { %v554_v5 = vsel %vm553_vm12, %v11790_v3, %v550_v40  ;;  %1068 = vmatpush.bf16.msra.mxu2 %v7324_v32  ;;  %1081 = vmatpush.bf16.msra.mxu3 %v7452_v6  ;;  %v7775_v40 = vld [vmem:[#allocation17 + $0x1c0] sm:$0xf] }
 0x268   :  { %v564_v59 = vsel %vm11804_vm8, %v11792_v8, %v560_v44  ;;  %v7431_v8 = vld [vmem:[#allocation13 + $0x108] sm:$0xf]  ;;  %v7776_v44 = vor.u32 %v10513_v41, %v7775_v40 }
 0x269   :  { %v567_v0 = vrot.slane %v564_v59, 7  ;;  %v7432_v17 = vor.u32 %v10424_v9, %v7431_v8  ;;  %1043 = vmatpush.bf16.msra.mxu0 %v7304_v15  ;;  %v7743_v59 = vld [vmem:[#allocation17 + $0x180] sm:$0xf]  ;;  %v8000_v8 = vor.u32 %v10569_v4, %v7999_v61 }
 0x26a   :  { %v7744_v2 = vor.u32 %v10505_v60, %v7743_v59  ;;  %v10633_v9 = vld [vmem:[#allocation17 + $0x59c] sm:$0xf0] }
 0x26b   :  { %v569_v10 = vsel %vm568_vm9, %v554_v5, %v567_v0  ;;  %1056 = vmatpush.bf16.msra.mxu1 %v7432_v17  ;;  %1069 = vmatpush.bf16.msra.mxu2 %v7308_v19  ;;  %v8255_v5 = vld [vmem:[#allocation17 + $0x580] sm:$0xf] }
 0x26c   :  { %v571_v14 = vmul.f32 %v569_v10, %v505_v50  ;;  %1082 = vmatpush.bf16.msra.mxu3 %v7436_v20  ;;  %v10705_v50 = vld [vmem:[#allocation17 + $0x7dc] sm:$0xf0] }
 0x26d   :  { %v8544_v57 = vor.u32 %v10705_v50, %v8543_v49  ;;  %v8511_v10 = vld [vmem:[#allocation17 + $0x780] sm:$0xf] }
 0x26e   :  { %v573_v18 = vperm.slane %v571_v14, 0  ;;  %v574_v3 = vperm.slane %v571_v14, 1  ;;  %v8256_v14 = vor.u32 %v10633_v9, %v8255_v5  ;;  %v8512_v15 = vor.u32 %v10697_v11, %v8511_v10  ;;  %v8191_v49 = vld [vmem:[#allocation17 + $0x500] sm:$0xf] }
 0x26f   :  { %v10617_v50 = vld [vmem:[#allocation17 + $0x51c] sm:$0xf0] }
 0x270   :  { %v578_v21 = vmul.f32 %v574_v3, %v11778_v58  ;;  %v577_v23 = vmul.f32 %v573_v18, %v11776_v56  ;;  %v586_v27 = vmul.f32 %v574_v3, %v11766_v52  ;;  %v585_v29 = vmul.f32 %v573_v18, %v11764_v51  ;;  %v7711_v18 = vld [vmem:[#allocation17 + $0x140] sm:$0xf] }
 0x271   :  { %v10497_v3 = vld [vmem:[#allocation17 + $0x15c] sm:$0xf0] }
 0x272   :  { %v581_v24 = vrot.slane %v578_v21, 7  ;;  %v7712_v21 = vor.u32 %v10497_v3, %v7711_v18  ;;  %v8447_v59 = vld [vmem:[#allocation17 + $0x700] sm:$0xf] }
 0x273   :  { %v10681_v60 = vld [vmem:[#allocation17 + $0x71c] sm:$0xf0] }
 0x274   :  { %v582_v25 = vsel %vm568_vm9, %v577_v23, %v581_v24  ;;  %v10561_v23 = vld [vmem:[#allocation17 + $0x35c] sm:$0xf0] }
 0x275   :  { %v584_v26 = vsub.f32 %v506_v22, %v582_v25  ;;  %v7967_v22 = vld [vmem:[#allocation17 + $0x340] sm:$0xf] }
 0x276   :  { %v8415_v18 = vld [vmem:[#allocation17 + $0x6c0] sm:$0xf] }
 0x277   :  { %v589_v28 = vperm.slane %v584_v26, 1  ;;  %v588_v30 = vperm.slane %v584_v26, 0  ;;  %v7968_v26 = vor.u32 %v10561_v23, %v7967_v22  ;;  %v10673_v3 = vld [vmem:[#allocation17 + $0x6dc] sm:$0xf0] }
 0x278   :  { %v7615_v22 = vld [vmem:[#allocation17 + $0x80] sm:$0xf] }
 0x279   :  { %v593_v31 = vadd.f32 %v589_v28, %v586_v27  ;;  %v592_v34 = vadd.f32 %v588_v30, %v585_v29  ;;  %v8223_v27 = vld [vmem:[#allocation17 + $0x540] sm:$0xf] }
 0x27a   :  { %v10625_v28 = vld [vmem:[#allocation17 + $0x55c] sm:$0xf0] }
 0x27b   :  { %v595_v58 = vmul.f32 0.2, %v593_v31  ;;  %v594_v35 = vmul.f32 0.2, %v592_v34  ;;  %v10473_v23 = vld [vmem:[#allocation17 + $0x9c] sm:$0xf0] }
 0x27d   :  { %v596_v36 = vmax.f32 %v592_v34, %v594_v35  ;;  %v597_v37 = vmax.f32 %v593_v31, %v595_v58  ;;  %v8224_v31 = vor.u32 %v10625_v28, %v8223_v27  ;;  %v8479_v34 = vld [vmem:[#allocation17 + $0x740] sm:$0xf] }
 0x27e   :  { %v10689_v58 = vld [vmem:[#allocation17 + $0x75c] sm:$0xf0] }
 0x27f   :  { %v598_v38 = vpack.c.bf16 %v596_v36, %v596_v36  ;;  %v599_v56 = vpack.c.bf16 %v597_v37, %v597_v37  ;;  %v8480_v37 = vor.u32 %v10689_v58, %v8479_v34 }
 0x281   :  { %992 = vmatmul.bf16.vlgmr.msrb.gmra.mxu0 %v598_v38  ;;  %1005 = vmatmul.bf16.vlgmr.msrb.gmra.mxu1 %v599_v56 }
 0x282   :  { %1018 = vmatmul.bf16.vlgmr.msrb.gmra.mxu2 %v598_v38  ;;  %1031 = vmatmul.bf16.vlgmr.msrb.gmra.mxu3 %v599_v56 }
 0x283   :  { %2809 = vmatpush.bf16.msrb.mxu0 %v7776_v44  ;;  %2822 = vmatpush.bf16.msrb.mxu1 %v8032_v47 }
 0x284   :  { %2835 = vmatpush.bf16.msrb.mxu2 %v8288_v55  ;;  %2848 = vmatpush.bf16.msrb.mxu3 %v8544_v57  ;;  %v8192_v57 = vor.u32 %v10617_v50, %v8191_v49 }
 0x287   :  { %2810 = vmatpush.bf16.msrb.mxu0 %v7744_v2  ;;  %2823 = vmatpush.bf16.msrb.mxu1 %v8000_v8  ;;  %v10545_v8 = vld [vmem:[#allocation17 + $0x2dc] sm:$0xf0] }
 0x288   :  { %2836 = vmatpush.bf16.msrb.mxu2 %v8256_v14  ;;  %2849 = vmatpush.bf16.msrb.mxu3 %v8512_v15 }
 0x28b   :  { %2811 = vmatpush.bf16.msrb.mxu0 %v7712_v21  ;;  %2824 = vmatpush.bf16.msrb.mxu1 %v7968_v26  ;;  %v8416_v21 = vor.u32 %v10673_v3, %v8415_v18 }
 0x28c   :  { %2837 = vmatpush.bf16.msrb.mxu2 %v8224_v31  ;;  %2850 = vmatpush.bf16.msrb.mxu3 %v8480_v37  ;;  %v10537_v37 = vld [vmem:[#allocation17 + $0x29c] sm:$0xf0] }
 0x290   :  { %2838 = vmatpush.bf16.msrb.mxu2 %v8192_v57 }
 0x291   :  { %1044 = vmatmul.bf16.vlgmr.msra.gmra.mxu0 %v598_v38  ;;  %1057 = vmatmul.bf16.vlgmr.msra.gmra.mxu1 %v599_v56 }
 0x292   :  { %1070 = vmatmul.bf16.vlgmr.msra.gmra.mxu2 %v598_v38  ;;  %1083 = vmatmul.bf16.vlgmr.msra.gmra.mxu3 %v599_v56  ;;  %v7679_v38 = vld [vmem:[#allocation17 + $0x100] sm:$0xf] }
 0x293   :  { %v10489_v56 = vld [vmem:[#allocation17 + $0x11c] sm:$0xf0] }
 0x294   :  { %v7680_v33 = vor.u32 %v10489_v56, %v7679_v38  ;;  %v8127_v38 = vld [vmem:[#allocation17 + $0x480] sm:$0xf] }
 0x296   :  { %2812 = vmatpush.bf16.msrb.mxu0 %v7680_v33 }
 0x2fe   :  { %v993_v52 = vpop.f32.mrf.mxu0  ;;  %v1006_v39 = vpop.f32.mrf.mxu1 }
 0x2ff   :  { %v11824_v51 = vadd.f32 %v1006_v39, %v993_v52 }
 0x301   :  { %v1090_v42 = vrot.slane %v11824_v51, 4  ;;  %v1118_v43 = vmul.f32 %v11824_v51, %v11824_v51 }
 0x303   :  { %v1091_v53 = vadd.f32 %v1090_v42, %v11824_v51  ;;  %v1122_v54 = vrot.slane %v1118_v43, 4  ;;  %v7935_v42 = vld [vmem:[#allocation17 + $0x300] sm:$0xf] }
 0x305   :  { %v1092_v62 = vrot.slane %v1091_v53, 2  ;;  %v1123_v63 = vadd.f32 %v1122_v54, %v1118_v43  ;;  %v1019_v0 = vpop.f32.mrf.mxu2  ;;  %v1032_v1 = vpop.f32.mrf.mxu3  ;;  %v10553_v43 = vld [vmem:[#allocation17 + $0x31c] sm:$0xf0] }
 0x306   :  { %v11830_v32 = vadd.f32 %v1032_v1, %v1019_v0  ;;  %v995_v6 = vpop.f32.mrf.mxu0  ;;  %v1008_v7 = vpop.f32.mrf.mxu1  ;;  %v7936_v48 = vor.u32 %v10553_v43, %v7935_v42  ;;  %v7647_v0 = vld [vmem:[#allocation17 + $0xc0] sm:$0xf] }
 0x307   :  { %v1093_v12 = vadd.f32 %v1092_v62, %v1091_v53  ;;  %v1124_v13 = vrot.slane %v1123_v63, 2  ;;  %v10481_v1 = vld [vmem:[#allocation17 + $0xdc] sm:$0xf0] }
 0x308   :  { %v1096_v16 = vrot.slane %v11830_v32, 4  ;;  %v1119_v17 = vmul.f32 %v11830_v32, %v11830_v32  ;;  %2825 = vmatpush.bf16.msrb.mxu1 %v7936_v48  ;;  %v7648_v6 = vor.u32 %v10481_v1, %v7647_v0  ;;  %v7903_v7 = vld [vmem:[#allocation17 + $0x2c0] sm:$0xf] }
 0x309   :  { %v1094_v19 = vrot.slane %v1093_v12, 1  ;;  %v1125_v20 = vadd.f32 %v1124_v13, %v1123_v63  ;;  %v8448_v63 = vor.u32 %v10681_v60, %v8447_v59  ;;  %v7904_v11 = vor.u32 %v10545_v8, %v7903_v7  ;;  %v10609_v13 = vld [vmem:[#allocation17 + $0x4dc] sm:$0xf0] }
 0x30a   :  { %v1097_v24 = vadd.f32 %v1096_v16, %v11830_v32  ;;  %v1128_v25 = vrot.slane %v1119_v17, 4  ;;  %2813 = vmatpush.bf16.msrb.mxu0 %v7648_v6  ;;  %v10465_v59 = vld [vmem:[#allocation17 + $0x5c] sm:$0xf0] }
 0x30b   :  { %v1095_v29 = vadd.f32 %v1094_v19, %v1093_v12  ;;  %v1126_v30 = vrot.slane %v1125_v20, 1  ;;  %2851 = vmatpush.bf16.msrb.mxu3 %v8448_v63  ;;  %v8159_v12 = vld [vmem:[#allocation17 + $0x4c0] sm:$0xf] }
 0x30c   :  { %v1098_v35 = vrot.slane %v1097_v24, 2  ;;  %v1129_v36 = vadd.f32 %v1128_v25, %v1119_v17  ;;  %v8160_v17 = vor.u32 %v10609_v13, %v8159_v12  ;;  %2826 = vmatpush.bf16.msrb.mxu1 %v7904_v11  ;;  %v7839_v60 = vld [vmem:[#allocation17 + $0x240] sm:$0xf] }
 0x30d   :  { %v11836_v52 = vmul.f32 0.125, %v1095_v29  ;;  %v1127_v39 = vadd.f32 %v1126_v30, %v1125_v20  ;;  %v1021_v40 = vpop.f32.mrf.mxu2  ;;  %v1034_v41 = vpop.f32.mrf.mxu3  ;;  %v7616_v29 = vor.u32 %v10473_v23, %v7615_v22  ;;  %v7871_v30 = vld [vmem:[#allocation17 + $0x280] sm:$0xf] }
 0x30e   :  { %v1099_v44 = vadd.f32 %v1098_v35, %v1097_v24  ;;  %v1130_v45 = vrot.slane %v1129_v36, 2  ;;  %v1045_v46 = vpop.f32.mrf.mxu0  ;;  %v1058_v47 = vpop.f32.mrf.mxu1  ;;  %2839 = vmatpush.bf16.msrb.mxu2 %v8160_v17  ;;  %v10601_v40 = vld [vmem:[#allocation17 + $0x49c] sm:$0xf0] }
 0x30f   :  { %v1146_v53 = vmul.f32 0.125, %v1127_v39  ;;  %v1150_v54 = vmul.f32 %v11836_v52, %v11836_v52  ;;  %v11840_v55 = vadd.f32 %v1058_v47, %v1045_v46  ;;  %2852 = vmatpush.bf16.msrb.mxu3 %v8416_v21  ;;  %2814 = vmatpush.bf16.msrb.mxu0 %v7616_v29  ;;  %v8383_v41 = vld [vmem:[#allocation17 + $0x680] sm:$0xf]  ;;  %v8128_v49 = vor.u32 %v10601_v40, %v8127_v38  ;;  %v7777_v38 = vld [vmem:[#allocation17 + $0x1e0] sm:$0xf0] }
 0x310   :  { %v1100_v61 = vrot.slane %v1099_v44, 1  ;;  %v1131_v62 = vadd.f32 %v1130_v45, %v1129_v36  ;;  %v10665_v45 = vld [vmem:[#allocation17 + $0x69c] sm:$0xf0]  ;;  %v10573_v40 = vld [vmem:[#allocation17 + $0x3c4] sm:$0xf] }
 0x311   :  { %v1154_v2 = vsub.f32 %v1146_v53, %v1150_v54  ;;  %v1102_v4 = vrot.slane %v11840_v55, 4  ;;  %v1120_v5 = vmul.f32 %v11840_v55, %v11840_v55  ;;  %v7583_v46 = vld [vmem:[#allocation17 + $0x40] sm:$0xf]  ;;  %v8384_v50 = vor.u32 %v10665_v45, %v8383_v41  ;;  %v8033_v41 = vld [vmem:[#allocation17 + $0x3e0] sm:$0xf0] }
 0x312   :  { %v1101_v9 = vadd.f32 %v1100_v61, %v1099_v44  ;;  %v1132_v10 = vrot.slane %v1131_v62, 1  ;;  %v7872_v44 = vor.u32 %v10537_v37, %v7871_v30  ;;  %2840 = vmatpush.bf16.msrb.mxu2 %v8128_v49  ;;  %v7584_v63 = vor.u32 %v10465_v59, %v7583_v46  ;;  %v10529_v0 = vld [vmem:[#allocation17 + $0x25c] sm:$0xf0]  ;;  %v10509_v37 = vld [vmem:[#allocation17 + $0x1c4] sm:$0xf] }
 0x313   :  { %v1158_v14 = vmax.f32 %v1154_v2, 0.0  ;;  %v1103_v15 = vadd.f32 %v1102_v4, %v11840_v55  ;;  %v1134_v16 = vrot.slane %v1120_v5, 4  ;;  %2853 = vmatpush.bf16.msrb.mxu3 %v8384_v50  ;;  %v8095_v1 = vld [vmem:[#allocation17 + $0x440] sm:$0xf]  ;;  %v7840_v6 = vor.u32 %v10529_v0, %v7839_v60  ;;  %v10637_v45 = vld [vmem:[#allocation17 + $0x5c4] sm:$0xf] }
 0x314   :  { %v11846_v19 = vmul.f32 0.125, %v1101_v9  ;;  %v1133_v20 = vadd.f32 %v1132_v10, %v1131_v62  ;;  %2827 = vmatpush.bf16.msrb.mxu1 %v7872_v44  ;;  %v10593_v7 = vld [vmem:[#allocation17 + $0x45c] sm:$0xf0]  ;;  %2815 = vmatpush.bf16.msrb.mxu0 %v7584_v63  ;;  %v8036_v44 = vor.u32 %v10573_v40, %v8033_v41  ;;  %v8289_v46 = vld [vmem:[#allocation17 + $0x5e0] sm:$0xf0] }
 0x315   :  { %v11848_v24 = vadd.f32 1e-05, %v1158_v14  ;;  %v1104_v25 = vrot.slane %v1103_v15, 2  ;;  %v1135_v26 = vadd.f32 %v1134_v16, %v1120_v5  ;;  %v1071_v27 = vpop.f32.mrf.mxu2  ;;  %v1084_v28 = vpop.f32.mrf.mxu3  ;;  %v8096_v12 = vor.u32 %v10593_v7, %v8095_v1  ;;  %v8351_v13 = vld [vmem:[#allocation17 + $0x640] sm:$0xf] }
 0x316   :  { %v1147_v31 = vmul.f32 0.125, %v1133_v20  ;;  %v1151_v34 = vmul.f32 %v11846_v19, %v11846_v19  ;;  %v11852_v58 = vadd.f32 %v1084_v28, %v1071_v27  ;;  %v1047_v35 = vpop.f32.mrf.mxu0  ;;  %v1060_v36 = vpop.f32.mrf.mxu1  ;;  %v10657_v14 = vld [vmem:[#allocation17 + $0x65c] sm:$0xf0]  ;;  %v10701_v49 = vld [vmem:[#allocation17 + $0x7c4] sm:$0xf] }
 0x317   :  { %v1105_v56 = vadd.f32 %v1104_v25, %v1103_v15  ;;  %v1136_v39 = vrot.slane %v1135_v26, 2  ;;  %v7551_v15 = vld [vmem:[#allocation17] sm:$0xf]  ;;  %2841 = vmatpush.bf16.msrb.mxu2 %v8096_v12  ;;  %v8352_v25 = vor.u32 %v10657_v14, %v8351_v13  ;;  %v8545_v50 = vld [vmem:[#allocation17 + $0x7e0] sm:$0xf0]  ;;  %vm1172_vm8 = vweird.f32 %v11848_v24 }
 0x318   :  { %v1155_v33 = vsub.f32 %v1147_v31, %v1151_v34  ;;  %v1108_v42 = vrot.slane %v11852_v58, 4  ;;  %v1121_v43 = vmul.f32 %v11852_v58, %v11852_v58  ;;  %2828 = vmatpush.bf16.msrb.mxu1 %v7840_v6  ;;  %v10457_v16 = vld [vmem:[#allocation17 + $0x1c] sm:$0xf0]  ;;  %v8548_v60 = vor.u32 %v10701_v49, %v8545_v50  ;;  %v8001_v0 = vld [vmem:[#allocation17 + $0x3a0] sm:$0xf0] }
 0x319   :  { %v1106_v47 = vrot.slane %v1105_v56, 1  ;;  %v1137_v48 = vadd.f32 %v1136_v39, %v1135_v26  ;;  %v7807_v17 = vld [vmem:[#allocation17 + $0x200] sm:$0xf]  ;;  %v7552_v26 = vor.u32 %v10457_v16, %v7551_v15  ;;  %2854 = vmatpush.bf16.msrb.mxu3 %v8352_v25  ;;  %v7780_v39 = vor.u32 %v10509_v37, %v7777_v38  ;;  %v10629_v1 = vld [vmem:[#allocation17 + $0x584] sm:$0xf] }
 0x31a   :  { %v1159_v53 = vmax.f32 %v1155_v33, 0.0  ;;  %v1109_v54 = vadd.f32 %v1108_v42, %v11852_v58  ;;  %v1140_v57 = vrot.slane %v1121_v43, 4  ;;  %v10521_v22 = vld [vmem:[#allocation17 + $0x21c] sm:$0xf0]  ;;  %v10493_v14 = vld [vmem:[#allocation17 + $0x144] sm:$0xf] }
 0x31b   :  { %v1107_v61 = vadd.f32 %v1106_v47, %v1105_v56  ;;  %v1138_v62 = vrot.slane %v1137_v48, 1  ;;  %v8063_v23 = vld [vmem:[#allocation17 + $0x400] sm:$0xf]  ;;  %v7808_v27 = vor.u32 %v10521_v22, %v7807_v17  ;;  %2816 = vmatpush.bf16.msrb.mxu0 %v7552_v26  ;;  %v7713_v15 = vld [vmem:[#allocation17 + $0x160] sm:$0xf0] }
 0x31c   :  { %v11858_v2 = vadd.f32 1e-05, %v1159_v53  ;;  %v1110_v4 = vrot.slane %v1109_v54, 2  ;;  %v1141_v5 = vadd.f32 %v1140_v57, %v1121_v43  ;;  %v10585_v28 = vld [vmem:[#allocation17 + $0x41c] sm:$0xf0]  ;;  %v7716_v17 = vor.u32 %v10493_v14, %v7713_v15 }
 0x31d   :  { %v11860_v8 = vmul.f32 0.125, %v1107_v61  ;;  %v1139_v9 = vadd.f32 %v1138_v62, %v1137_v48  ;;  %v1073_v10 = vpop.f32.mrf.mxu2  ;;  %v1086_v11 = vpop.f32.mrf.mxu3  ;;  %v8319_v29 = vld [vmem:[#allocation17 + $0x600] sm:$0xf]  ;;  %v8064_v36 = vor.u32 %v10585_v28, %v8063_v23  ;;  %2829 = vmatpush.bf16.msrb.mxu1 %v7808_v27  ;;  %v8292_v48 = vor.u32 %v10637_v45, %v8289_v46  ;;  %v10501_v57 = vld [vmem:[#allocation17 + $0x184] sm:$0xf] }
 0x31e   :  { %11190 = vrsqrt.f32 %v11858_v2  ;;  %v1111_v20 = vadd.f32 %v1110_v4, %v1109_v54  ;;  %v1142_v21 = vrot.slane %v1141_v5, 2  ;;  %v10649_v30 = vld [vmem:[#allocation17 + $0x61c] sm:$0xf0]  ;;  %v7745_v61 = vld [vmem:[#allocation17 + $0x1a0] sm:$0xf0]  ;;  %vm1182_vm14 = vweird.f32 %v11858_v2 }
 0x31f   :  { %v1148_v18 = vmul.f32 0.125, %v1139_v9  ;;  %v1152_v3 = vmul.f32 %v11860_v8, %v11860_v8  ;;  %v8320_v56 = vor.u32 %v10649_v30, %v8319_v29  ;;  %2842 = vmatpush.bf16.msrb.mxu2 %v8064_v36  ;;  %2861 = vmatpush.bf16.msra.mxu0 %v7780_v39  ;;  %11192 = vrsqrt.f32 %v11848_v24  ;;  %v10565_v62 = vld [vmem:[#allocation17 + $0x384] sm:$0xf] }
 0x320   :  { %v1112_v34 = vrot.slane %v1111_v20, 1  ;;  %v1143_v35 = vadd.f32 %v1142_v21, %v1141_v5  ;;  %v8257_v4 = vld [vmem:[#allocation17 + $0x5a0] sm:$0xf0]  ;;  %v7748_v7 = vor.u32 %v10501_v57, %v7745_v61  ;;  %v8004_v9 = vor.u32 %v10565_v62, %v8001_v0 }
 0x321   :  { %v1156_v31 = vsub.f32 %v1148_v18, %v1152_v3  ;;  %2874 = vmatpush.bf16.msra.mxu1 %v8036_v44  ;;  %2855 = vmatpush.bf16.msrb.mxu3 %v8320_v56  ;;  %v10693_v10 = vld [vmem:[#allocation17 + $0x784] sm:$0xf]  ;;  %v8260_v12 = vor.u32 %v10629_v1, %v8257_v4 }
 0x322   :  { %v1113_v42 = vadd.f32 %v1112_v34, %v1111_v20  ;;  %v1144_v43 = vrot.slane %v1143_v35, 1  ;;  %v8513_v11 = vld [vmem:[#allocation17 + $0x7a0] sm:$0xf0] }
 0x323   :  { %v1160_v33 = vmax.f32 %v1156_v31, 0.0  ;;  %2887 = vmatpush.bf16.msra.mxu2 %v8292_v48  ;;  %v8516_v13 = vor.u32 %v10693_v10, %v8513_v11  ;;  %2862 = vmatpush.bf16.msra.mxu0 %v7748_v7  ;;  %v10557_v18 = vld [vmem:[#allocation17 + $0x344] sm:$0xf] }
 0x324   :  { %v11865_v47 = vpop.eup %11190  ;;  %v11870_v54 = vmul.f32 0.125, %v1113_v42  ;;  %v1145_v59 = vadd.f32 %v1144_v43, %v1143_v35  ;;  %v7969_v3 = vld [vmem:[#allocation17 + $0x360] sm:$0xf0] }
 0x325   :  { %v11868_v53 = vadd.f32 1e-05, %v1160_v33  ;;  %v1177_v5 = vmul.f32 %v11865_v47, %v11858_v2  ;;  %2900 = vmatpush.bf16.msra.mxu3 %v8548_v60  ;;  %2875 = vmatpush.bf16.msra.mxu1 %v8004_v9  ;;  %v10621_v20 = vld [vmem:[#allocation17 + $0x544] sm:$0xf]  ;;  %v11877_v21 = vpop.eup %11192  ;;  %v7972_v22 = vor.u32 %v10557_v18, %v7969_v3  ;;  %vm1183_vm13 = vweird.f32 %v11865_v47 }
 0x326   :  { %v1153_v63 = vmul.f32 %v11870_v54, %v11870_v54  ;;  %v1149_v6 = vmul.f32 0.125, %v1145_v59  ;;  %v8225_v23 = vld [vmem:[#allocation17 + $0x560] sm:$0xf0]  ;;  %v1167_v38 = vmul.f32 %v11877_v21, %v11848_v24  ;;  %vm11903_vm1 = vmor %vm1182_vm14, %vm1183_vm13  ;;  %vm1173_vm4 = vweird.f32 %v11877_v21 }
 0x327   :  { %11194 = vrsqrt.f32 %v11868_v53  ;;  %2888 = vmatpush.bf16.msra.mxu2 %v8260_v12  ;;  %v10685_v25 = vld [vmem:[#allocation17 + $0x744] sm:$0xf]  ;;  %v1178_v26 = vmul.f32 %v11865_v47, %v1177_v5  ;;  %v8228_v28 = vor.u32 %v10621_v20, %v8225_v23  ;;  %2863 = vmatpush.bf16.msra.mxu0 %v7716_v17  ;;  %vm1192_vm2 = vweird.f32 %v11868_v53  ;;  %vm1174_vm11 = vmor %vm1172_vm8, %vm1173_vm4 }
 0x328   :  { %v1157_v16 = vsub.f32 %v1149_v6, %v1153_v63  ;;  %v8481_v29 = vld [vmem:[#allocation17 + $0x760] sm:$0xf0]  ;;  %v1168_v62 = vmul.f32 %v11877_v21, %v1167_v38 }
 0x329   :  { %2901 = vmatpush.bf16.msra.mxu3 %v8516_v13  ;;  %v10485_v30 = vld [vmem:[#allocation17 + $0x104] sm:$0xf]  ;;  %v8484_v34 = vor.u32 %v10685_v25, %v8481_v29  ;;  %2876 = vmatpush.bf16.msra.mxu1 %v7972_v22  ;;  %v1179_v46 = vmul.f32 0.5, %v1178_v26 }
 0x32a   :  { %v1161_v27 = vmax.f32 %v1157_v16, 0.0  ;;  %v7681_v35 = vld [vmem:[#allocation17 + $0x120] sm:$0xf0]  ;;  %v1169_v3 = vmul.f32 0.5, %v1168_v62 }
 0x32b   :  { %v10549_v36 = vld [vmem:[#allocation17 + $0x304] sm:$0xf]  ;;  %v7684_v40 = vor.u32 %v10485_v30, %v7681_v35  ;;  %2889 = vmatpush.bf16.msra.mxu2 %v8228_v28  ;;  %v1180_v11 = vsub.f32 1.5, %v1179_v46 }
 0x32c   :  { %v7937_v37 = vld [vmem:[#allocation17 + $0x320] sm:$0xf0]  ;;  %v11886_v39 = vadd.f32 1e-05, %v1161_v27 }
 0x32d   :  { %v11880_v31 = vpop.eup %11194  ;;  %v10613_v41 = vld [vmem:[#allocation17 + $0x504] sm:$0xf]  ;;  %v7940_v42 = vor.u32 %v10549_v36, %v7937_v37  ;;  %2902 = vmatpush.bf16.msra.mxu3 %v8484_v34  ;;  %2864 = vmatpush.bf16.msra.mxu0 %v7684_v40  ;;  %v1181_v38 = vmul.f32 %v11865_v47, %v1180_v11 }
 0x32e   :  { %v1187_v56 = vmul.f32 %v11880_v31, %v11868_v53  ;;  %v8193_v33 = vld [vmem:[#allocation17 + $0x520] sm:$0xf0]  ;;  %11196 = vrsqrt.f32 %v11886_v39  ;;  %vm1193_vm15 = vweird.f32 %v11880_v31  ;;  %vm1202_vm6 = vweird.f32 %v11886_v39 }
 0x32f   :  { %v8196_v43 = vor.u32 %v10613_v41, %v8193_v33  ;;  %v10677_v44 = vld [vmem:[#allocation17 + $0x704] sm:$0xf]  ;;  %2877 = vmatpush.bf16.msra.mxu1 %v7940_v42  ;;  %v1170_v33 = vsub.f32 1.5, %v1169_v3  ;;  %v1185_v62 = vsel %vm11903_vm1, %v11865_v47, %v1181_v38  ;;  %vm11916_vm5 = vmor %vm1192_vm2, %vm1193_vm15 }
 0x330   :  { %v8449_v45 = vld [vmem:[#allocation17 + $0x720] sm:$0xf0]  ;;  %v1188_v48 = vmul.f32 %v11880_v31, %v1187_v56 }
 0x331   :  { %v10477_v49 = vld [vmem:[#allocation17 + $0xc4] sm:$0xf]  ;;  %v8452_v57 = vor.u32 %v10677_v44, %v8449_v45  ;;  %2890 = vmatpush.bf16.msra.mxu2 %v8196_v43 }
 0x332   :  { %v7649_v50 = vld [vmem:[#allocation17 + $0xe0] sm:$0xf0]  ;;  %v1189_v63 = vmul.f32 0.5, %v1188_v48 }
 0x333   :  { %v10541_v59 = vld [vmem:[#allocation17 + $0x2c4] sm:$0xf]  ;;  %v7652_v0 = vor.u32 %v10477_v49, %v7649_v50  ;;  %2903 = vmatpush.bf16.msra.mxu3 %v8452_v57 }
 0x334   :  { %v7905_v60 = vld [vmem:[#allocation17 + $0x2e0] sm:$0xf0]  ;;  %v11891_v18 = vpop.eup %11196  ;;  %v1190_v20 = vsub.f32 1.5, %v1189_v63 }
 0x335   :  { %v10605_v61 = vld [vmem:[#allocation17 + $0x4c4] sm:$0xf]  ;;  %v7908_v1 = vor.u32 %v10541_v59, %v7905_v60  ;;  %2865 = vmatpush.bf16.msra.mxu0 %v7652_v0  ;;  %v1197_v27 = vmul.f32 %v11891_v18, %v11886_v39  ;;  %vm1203_vm3 = vweird.f32 %v11891_v18  ;;  %v1088_v39 = vld [vmem:[#allocation14] sm:$0xf]  ;;  %v8295_v59 = vld [vmem:[#allocation17 + $0x5c8] sm:$0xf] }
 0x336   :  { %v8161_v4 = vld [vmem:[#allocation17 + $0x4e0] sm:$0xf0]  ;;  %v1191_v46 = vmul.f32 %v11880_v31, %v1190_v20  ;;  %vm1204_vm7 = vmor %vm1202_vm6, %vm1203_vm3 }
 0x337   :  { %v10669_v5 = vld [vmem:[#allocation17 + $0x6c4] sm:$0xf]  ;;  %v8164_v6 = vor.u32 %v10605_v61, %v8161_v4  ;;  %2878 = vmatpush.bf16.msra.mxu1 %v7908_v1  ;;  %v1198_v56 = vmul.f32 %v11891_v18, %v1197_v27  ;;  %v1171_v4 = vmul.f32 %v11877_v21, %v1170_v33 }
 0x338   :  { %v8417_v7 = vld [vmem:[#allocation17 + $0x6e0] sm:$0xf0]  ;;  %v1195_v53 = vsel %vm11916_vm5, %v11880_v31, %v1191_v46  ;;  %v10514_v46 = vld [vmem:[#allocation17 + $0x1e4] sm:$0xf0] }
 0x339   :  { %v10469_v9 = vld [vmem:[#allocation17 + $0x84] sm:$0xf]  ;;  %v8420_v12 = vor.u32 %v10669_v5, %v8417_v7  ;;  %2891 = vmatpush.bf16.msra.mxu2 %v8164_v6  ;;  %v1199_v48 = vmul.f32 0.5, %v1198_v56  ;;  %v1211_v31 = vrot.slane %v1195_v53, 6  ;;  %v10506_v53 = vld [vmem:[#allocation17 + $0x1a4] sm:$0xf0] }
 0x33a   :  { %v7617_v10 = vld [vmem:[#allocation17 + $0xa0] sm:$0xf0] }
 0x33b   :  { %v10533_v13 = vld [vmem:[#allocation17 + $0x284] sm:$0xf]  ;;  %v7620_v22 = vor.u32 %v10469_v9, %v7617_v10  ;;  %2904 = vmatpush.bf16.msra.mxu3 %v8420_v12  ;;  %v1200_v63 = vsub.f32 1.5, %v1199_v48  ;;  %v1210_v10 = vrot.slane %v1185_v62, 7  ;;  %v8039_v48 = vld [vmem:[#allocation17 + $0x3c8] sm:$0xf] }
 0x33c   :  { %v7873_v14 = vld [vmem:[#allocation17 + $0x2a0] sm:$0xf0]  ;;  %v10706_v62 = vld [vmem:[#allocation17 + $0x7e4] sm:$0xf0] }
 0x33d   :  { %v10597_v15 = vld [vmem:[#allocation17 + $0x484] sm:$0xf]  ;;  %v7876_v23 = vor.u32 %v10533_v13, %v7873_v14  ;;  %2866 = vmatpush.bf16.msra.mxu0 %v7620_v22  ;;  %v1201_v7 = vmul.f32 %v11891_v18, %v1200_v63  ;;  %v1175_v14 = vsel %vm1174_vm11, %v11877_v21, %v1171_v4 }
 0x33e   :  { %v8129_v16 = vld [vmem:[#allocation17 + $0x4a0] sm:$0xf0] }
 0x33f   :  { %v10661_v17 = vld [vmem:[#allocation17 + $0x684] sm:$0xf]  ;;  %v8132_v28 = vor.u32 %v10597_v15, %v8129_v16  ;;  %2879 = vmatpush.bf16.msra.mxu1 %v7876_v23  ;;  %v1205_v12 = vsel %vm1204_vm7, %v11891_v18, %v1201_v7  ;;  %v1213_v15 = vsel %vm568_vm9, %v1175_v14, %v1210_v10  ;;  %v10698_v14 = vld [vmem:[#allocation17 + $0x7a4] sm:$0xf0] }
 0x340   :  { %v8385_v25 = vld [vmem:[#allocation17 + $0x6a0] sm:$0xf0]  ;;  %v1212_v13 = vrot.slane %v1205_v12, 5  ;;  %v10570_v12 = vld [vmem:[#allocation17 + $0x3a4] sm:$0xf0] }
 0x341   :  { %v10461_v26 = vld [vmem:[#allocation17 + $0x44] sm:$0xf]  ;;  %v8388_v35 = vor.u32 %v10661_v17, %v8385_v25  ;;  %2892 = vmatpush.bf16.msra.mxu2 %v8132_v28 }
 0x342   :  { %v7585_v29 = vld [vmem:[#allocation17 + $0x60] sm:$0xf0]  ;;  %v1215_v16 = vsel %vm1214_vm10, %v1211_v31, %v1212_v13  ;;  %v8263_v31 = vld [vmem:[#allocation17 + $0x588] sm:$0xf] }
 0x343   :  { %v10525_v30 = vld [vmem:[#allocation17 + $0x244] sm:$0xf]  ;;  %v7588_v42 = vor.u32 %v10461_v26, %v7585_v29  ;;  %2905 = vmatpush.bf16.msra.mxu3 %v8388_v35  ;;  %v1216_v24 = vsel %vm268_vm0, %v1213_v15, %v1215_v16  ;;  %v10634_v13 = vld [vmem:[#allocation17 + $0x5a4] sm:$0xf0] }
 0x344   :  { %v7841_v34 = vld [vmem:[#allocation17 + $0x260] sm:$0xf0]  ;;  %v1218_v17 = vmul.f32 %v1216_v24, %v1088_v39  ;;  %v8519_v39 = vld [vmem:[#allocation17 + $0x788] sm:$0xf] }
 0x345   :  { %v10589_v36 = vld [vmem:[#allocation17 + $0x444] sm:$0xf]  ;;  %v7844_v43 = vor.u32 %v10525_v30, %v7841_v34  ;;  %2867 = vmatpush.bf16.msra.mxu0 %v7588_v42  ;;  %v1089_v30 = vld [vmem:[#allocation16] sm:$0xf]  ;;  %v7719_v24 = vld [vmem:[#allocation17 + $0x148] sm:$0xf] }
 0x346   :  { %v8097_v37 = vld [vmem:[#allocation17 + $0x460] sm:$0xf0]  ;;  %v1220_v18 = vperm.slane %v1218_v17, 0  ;;  %v1221_v3 = vperm.slane %v1218_v17, 1  ;;  %v1222_v20 = vperm.slane %v1218_v17, 2  ;;  %v1223_v22 = vperm.slane %v1218_v17, 3 }
 0x347   :  { %v10653_v40 = vld [vmem:[#allocation17 + $0x644] sm:$0xf]  ;;  %v8100_v49 = vor.u32 %v10589_v36, %v8097_v37  ;;  %2880 = vmatpush.bf16.msra.mxu1 %v7844_v43  ;;  %v10498_v17 = vld [vmem:[#allocation17 + $0x164] sm:$0xf0] }
 0x348   :  { %v8353_v41 = vld [vmem:[#allocation17 + $0x660] sm:$0xf0]  ;;  %v1229_v23 = vmul.f32 %v1221_v3, %v11846_v19  ;;  %v1230_v25 = vmul.f32 %v1222_v20, %v11860_v8  ;;  %v1231_v26 = vmul.f32 %v1223_v22, %v11870_v54  ;;  %v1228_v21 = vmul.f32 %v1220_v18, %v11836_v52 }
 0x349   :  { %v10453_v44 = vld [vmem:[#allocation17 + $0x4] sm:$0xf]  ;;  %v8356_v2 = vor.u32 %v10653_v40, %v8353_v41  ;;  %2893 = vmatpush.bf16.msra.mxu2 %v8100_v49  ;;  %v1244_v38 = vmul.f32 %v1220_v18, %v11824_v51  ;;  %v1245_v19 = vmul.f32 %v1221_v3, %v11830_v32  ;;  %v1246_v8 = vmul.f32 %v1222_v20, %v11840_v55  ;;  %v10578_v32 = vld [vmem:[#allocation17 + $0x3e4] sm:$0xf0] }
 0x34a   :  { %v7553_v45 = vld [vmem:[#allocation17 + $0x20] sm:$0xf0]  ;;  %v1236_v27 = vrot.slane %v1229_v23, 7  ;;  %v1237_v28 = vrot.slane %v1230_v25, 6  ;;  %v1238_v29 = vrot.slane %v1231_v26, 5  ;;  %v1247_v54 = vmul.f32 %v1223_v22, %v11852_v58 }
 0x34b   :  { %v10517_v50 = vld [vmem:[#allocation17 + $0x204] sm:$0xf]  ;;  %v7556_v47 = vor.u32 %v10453_v44, %v7553_v45  ;;  %2906 = vmatpush.bf16.msra.mxu3 %v8356_v2  ;;  %v7783_v45 = vld [vmem:[#allocation17 + $0x1c8] sm:$0xf]  ;;  %v8264_v18 = vor.u32 %v10634_v13, %v8263_v31  ;;  %v8520_v3 = vor.u32 %v10698_v14, %v8519_v39 }
 0x34c   :  { %v7809_v57 = vld [vmem:[#allocation17 + $0x220] sm:$0xf0]  ;;  %v1239_v34 = vsel %vm568_vm9, %v1228_v21, %v1236_v27  ;;  %v1240_v35 = vsel %vm1214_vm10, %v1237_v28, %v1238_v29  ;;  %v7975_v20 = vld [vmem:[#allocation17 + $0x348] sm:$0xf]  ;;  %v7720_v27 = vor.u32 %v10498_v17, %v7719_v24 }
 0x34d   :  { %v10581_v60 = vld [vmem:[#allocation17 + $0x404] sm:$0xf]  ;;  %v7812_v6 = vor.u32 %v10517_v50, %v7809_v57  ;;  %2868 = vmatpush.bf16.msra.mxu0 %v7556_v47  ;;  %v1241_v36 = vsel %vm268_vm0, %v1239_v34, %v1240_v35  ;;  %v8040_v47 = vor.u32 %v10578_v32, %v8039_v48  ;;  %v10562_v22 = vld [vmem:[#allocation17 + $0x364] sm:$0xf0] }
 0x34e   :  { %v8065_v61 = vld [vmem:[#allocation17 + $0x420] sm:$0xf0]  ;;  %v1243_v37 = vsub.f32 %v1089_v30, %v1241_v36  ;;  %v8231_v23 = vld [vmem:[#allocation17 + $0x548] sm:$0xf]  ;;  %v7976_v28 = vor.u32 %v10562_v22, %v7975_v20 }
 0x34f   :  { %v10645_v0 = vld [vmem:[#allocation17 + $0x604] sm:$0xf]  ;;  %v8068_v9 = vor.u32 %v10581_v60, %v8065_v61  ;;  %2881 = vmatpush.bf16.msra.mxu1 %v7812_v6  ;;  %v10642_v60 = vld [vmem:[#allocation17 + $0x5e4] sm:$0xf0] }
 0x350   :  { %v8321_v1 = vld [vmem:[#allocation17 + $0x620] sm:$0xf0]  ;;  %v1249_v52 = vperm.slane %v1243_v37, 0  ;;  %v1250_v56 = vperm.slane %v1243_v37, 1  ;;  %v1251_v40 = vperm.slane %v1243_v37, 2  ;;  %v1252_v41 = vperm.slane %v1243_v37, 3 }
 0x351   :  { %v8324_v11 = vor.u32 %v10645_v0, %v8321_v1  ;;  %2894 = vmatpush.bf16.msra.mxu2 %v8068_v9  ;;  %v8551_v61 = vld [vmem:[#allocation17 + $0x7c8] sm:$0xf]  ;;  %v7784_v0 = vor.u32 %v10514_v46, %v7783_v45  ;;  %v8296_v9 = vor.u32 %v10642_v60, %v8295_v59 }
 0x352   :  { %v1257_v33 = vadd.f32 %v1249_v52, %v1244_v38  ;;  %v1258_v42 = vadd.f32 %v1250_v56, %v1245_v19  ;;  %v1259_v43 = vadd.f32 %v1251_v40, %v1246_v8  ;;  %v1260_v44 = vadd.f32 %v1252_v41, %v1247_v54  ;;  %v7751_v6 = vld [vmem:[#allocation17 + $0x188] sm:$0xf] }
 0x353   :  { %2907 = vmatpush.bf16.msra.mxu3 %v8324_v11  ;;  %v8552_v10 = vor.u32 %v10706_v62, %v8551_v61  ;;  %v8007_v11 = vld [vmem:[#allocation17 + $0x388] sm:$0xf]  ;;  %v7752_v15 = vor.u32 %v10506_v53, %v7751_v6 }
 0x354   :  { %v1261_v49 = vmul.f32 0.2, %v1257_v33  ;;  %v1262_v50 = vmul.f32 0.2, %v1258_v42  ;;  %v1263_v51 = vmul.f32 0.2, %v1259_v43  ;;  %v8008_v16 = vor.u32 %v10570_v12, %v8007_v11 }
 0x355   :  { %v1264_v57 = vmul.f32 0.2, %v1260_v44  ;;  %v10626_v25 = vld [vmem:[#allocation17 + $0x564] sm:$0xf0] }
 0x356   :  { %v1267_v55 = vmax.f32 %v1259_v43, %v1263_v51  ;;  %v1265_v2 = vmax.f32 %v1257_v33, %v1261_v49  ;;  %v1266_v58 = vmax.f32 %v1258_v42, %v1262_v50  ;;  %v8487_v26 = vld [vmem:[#allocation17 + $0x748] sm:$0xf]  ;;  %v8232_v34 = vor.u32 %v10626_v25, %v8231_v23 }
 0x357   :  { %v1268_v63 = vmax.f32 %v1260_v44, %v1264_v57  ;;  %v10690_v21 = vld [vmem:[#allocation17 + $0x764] sm:$0xf0] }
 0x358   :  { %v11946_v1 = vpack.c.bf16 %v1267_v55, %v1267_v55  ;;  %v11948_v4 = vpack.c.bf16 %v1265_v2, %v1265_v2  ;;  %v11950_v5 = vpack.c.bf16 %v1266_v58, %v1266_v58  ;;  %v7687_v29 = vld [vmem:[#allocation17 + $0x108] sm:$0xf]  ;;  %v8488_v35 = vor.u32 %v10690_v21, %v8487_v26 }
 0x359   :  { %v11952_v7 = vpack.c.bf16 %v1268_v63, %v1268_v63  ;;  %v10490_v30 = vld [vmem:[#allocation17 + $0x124] sm:$0xf0] }
 0x35a   :  { %2817 = vmatmul.bf16.vlgmr.msrb.gmra.mxu0 %v11948_v4  ;;  %2830 = vmatmul.bf16.vlgmr.msrb.gmra.mxu1 %v11950_v5  ;;  %v7943_v36 = vld [vmem:[#allocation17 + $0x308] sm:$0xf]  ;;  %v7688_v52 = vor.u32 %v10490_v30, %v7687_v29  ;;  %v10574_v29 = vld [vmem:[#allocation17 + $0x3cc] sm:$0xf] }
 0x35b   :  { %2843 = vmatmul.bf16.vlgmr.msrb.gmra.mxu2 %v11946_v1  ;;  %2856 = vmatmul.bf16.vlgmr.msrb.gmra.mxu3 %v11952_v7  ;;  %v10554_v37 = vld [vmem:[#allocation17 + $0x324] sm:$0xf0]  ;;  %v8041_v30 = vld [vmem:[#allocation17 + $0x3e8] sm:$0xf0] }
 0x35c   :  { %2913 = vmatpush.bf16.msrb.mxu0 %v7784_v0  ;;  %2926 = vmatpush.bf16.msrb.mxu1 %v8040_v47  ;;  %v8199_v38 = vld [vmem:[#allocation17 + $0x508] sm:$0xf]  ;;  %v7944_v56 = vor.u32 %v10554_v37, %v7943_v36  ;;  %v8297_v37 = vld [vmem:[#allocation17 + $0x5e8] sm:$0xf0] }
 0x35d   :  { %2939 = vmatpush.bf16.msrb.mxu2 %v8296_v9  ;;  %2952 = vmatpush.bf16.msrb.mxu3 %v8552_v10  ;;  %v10618_v19 = vld [vmem:[#allocation17 + $0x524] sm:$0xf0] }
 0x35e   :  { %v8455_v8 = vld [vmem:[#allocation17 + $0x708] sm:$0xf]  ;;  %v8200_v33 = vor.u32 %v10618_v19, %v8199_v38  ;;  %v10702_v38 = vld [vmem:[#allocation17 + $0x7cc] sm:$0xf] }
 0x35f   :  { %v10682_v54 = vld [vmem:[#allocation17 + $0x724] sm:$0xf0]  ;;  %v8553_v19 = vld [vmem:[#allocation17 + $0x7e8] sm:$0xf0] }
 0x360   :  { %2914 = vmatpush.bf16.msrb.mxu0 %v7752_v15  ;;  %2927 = vmatpush.bf16.msrb.mxu1 %v8008_v16  ;;  %v7655_v40 = vld [vmem:[#allocation17 + $0xc8] sm:$0xf]  ;;  %v8456_v42 = vor.u32 %v10682_v54, %v8455_v8 }
 0x361   :  { %2940 = vmatpush.bf16.msrb.mxu2 %v8264_v18  ;;  %2953 = vmatpush.bf16.msrb.mxu3 %v8520_v3  ;;  %v10482_v41 = vld [vmem:[#allocation17 + $0xe4] sm:$0xf0] }
 0x362   :  { %v7911_v43 = vld [vmem:[#allocation17 + $0x2c8] sm:$0xf]  ;;  %v7656_v50 = vor.u32 %v10482_v41, %v7655_v40  ;;  %v10502_v40 = vld [vmem:[#allocation17 + $0x18c] sm:$0xf] }
 0x363   :  { %v10546_v44 = vld [vmem:[#allocation17 + $0x2e4] sm:$0xf0]  ;;  %v7753_v41 = vld [vmem:[#allocation17 + $0x1a8] sm:$0xf0] }
 0x364   :  { %2915 = vmatpush.bf16.msrb.mxu0 %v7720_v27  ;;  %2928 = vmatpush.bf16.msrb.mxu1 %v7976_v28  ;;  %v8167_v45 = vld [vmem:[#allocation17 + $0x4c8] sm:$0xf]  ;;  %v7912_v51 = vor.u32 %v10546_v44, %v7911_v43  ;;  %v10510_v27 = vld [vmem:[#allocation17 + $0x1cc] sm:$0xf] }
 0x365   :  { %2941 = vmatpush.bf16.msrb.mxu2 %v8232_v34  ;;  %2954 = vmatpush.bf16.msrb.mxu3 %v8488_v35  ;;  %v10610_v46 = vld [vmem:[#allocation17 + $0x4e4] sm:$0xf0]  ;;  %v7785_v28 = vld [vmem:[#allocation17 + $0x1e8] sm:$0xf0] }
 0x366   :  { %v8423_v48 = vld [vmem:[#allocation17 + $0x6c8] sm:$0xf]  ;;  %v8168_v59 = vor.u32 %v10610_v46, %v8167_v45  ;;  %v10638_v34 = vld [vmem:[#allocation17 + $0x5cc] sm:$0xf] }
 0x367   :  { %v10674_v49 = vld [vmem:[#allocation17 + $0x6e4] sm:$0xf0]  ;;  %v10566_v43 = vld [vmem:[#allocation17 + $0x38c] sm:$0xf] }
 0x368   :  { %2916 = vmatpush.bf16.msrb.mxu0 %v7688_v52  ;;  %2929 = vmatpush.bf16.msrb.mxu1 %v7944_v56  ;;  %v7623_v57 = vld [vmem:[#allocation17 + $0x88] sm:$0xf]  ;;  %v8424_v55 = vor.u32 %v10674_v49, %v8423_v48  ;;  %v7788_v52 = vor.u32 %v10510_v27, %v7785_v28  ;;  %v8044_v56 = vor.u32 %v10574_v29, %v8041_v30  ;;  %v8009_v44 = vld [vmem:[#allocation17 + $0x3a8] sm:$0xf0] }
 0x369   :  { %v10474_v32 = vld [vmem:[#allocation17 + $0xa4] sm:$0xf0]  ;;  %2942 = vmatpush.bf16.msrb.mxu2 %v8200_v33  ;;  %2955 = vmatpush.bf16.msrb.mxu3 %v8456_v42  ;;  %v8300_v33 = vor.u32 %v10638_v34, %v8297_v37  ;;  %v8556_v42 = vor.u32 %v10702_v38, %v8553_v19  ;;  %v10630_v45 = vld [vmem:[#allocation17 + $0x58c] sm:$0xf] }
 0x36a   :  { %v7879_v2 = vld [vmem:[#allocation17 + $0x288] sm:$0xf]  ;;  %2869 = vmatmul.bf16.vlgmr.msra.gmra.mxu0 %v11948_v4  ;;  %2882 = vmatmul.bf16.vlgmr.msra.gmra.mxu1 %v11950_v5  ;;  %v7624_v0 = vor.u32 %v10474_v32, %v7623_v57  ;;  %v8265_v46 = vld [vmem:[#allocation17 + $0x5a8] sm:$0xf0] }
 0x36b   :  { %v10538_v58 = vld [vmem:[#allocation17 + $0x2a4] sm:$0xf0]  ;;  %2895 = vmatmul.bf16.vlgmr.msra.gmra.mxu2 %v11946_v1  ;;  %2908 = vmatmul.bf16.vlgmr.msra.gmra.mxu3 %v11952_v7  ;;  %v10694_v48 = vld [vmem:[#allocation17 + $0x78c] sm:$0xf] }
 0x36c   :  { %v8135_v60 = vld [vmem:[#allocation17 + $0x488] sm:$0xf]  ;;  %2917 = vmatpush.bf16.msrb.mxu0 %v7656_v50  ;;  %2930 = vmatpush.bf16.msrb.mxu1 %v7912_v51  ;;  %v7880_v47 = vor.u32 %v10538_v58, %v7879_v2  ;;  %v8521_v49 = vld [vmem:[#allocation17 + $0x7a8] sm:$0xf0]  ;;  %v7756_v50 = vor.u32 %v10502_v40, %v7753_v41  ;;  %v8012_v51 = vor.u32 %v10566_v43, %v8009_v44 }
 0x36d   :  { %v10602_v61 = vld [vmem:[#allocation17 + $0x4a4] sm:$0xf0]  ;;  %2943 = vmatpush.bf16.msrb.mxu2 %v8168_v59  ;;  %2956 = vmatpush.bf16.msrb.mxu3 %v8424_v55  ;;  %v10494_v57 = vld [vmem:[#allocation17 + $0x14c] sm:$0xf]  ;;  %v8268_v59 = vor.u32 %v10630_v45, %v8265_v46  ;;  %v8524_v55 = vor.u32 %v10694_v48, %v8521_v49 }
 0x36e   :  { %v8391_v62 = vld [vmem:[#allocation17 + $0x688] sm:$0xf]  ;;  %v8136_v9 = vor.u32 %v10602_v61, %v8135_v60  ;;  %v7721_v32 = vld [vmem:[#allocation17 + $0x168] sm:$0xf0] }
 0x36f   :  { %v10666_v63 = vld [vmem:[#allocation17 + $0x6a4] sm:$0xf0]  ;;  %v10558_v2 = vld [vmem:[#allocation17 + $0x34c] sm:$0xf] }
 0x370   :  { %v7591_v6 = vld [vmem:[#allocation17 + $0x48] sm:$0xf]  ;;  %v8392_v10 = vor.u32 %v10666_v63, %v8391_v62  ;;  %2918 = vmatpush.bf16.msrb.mxu0 %v7624_v0  ;;  %2931 = vmatpush.bf16.msrb.mxu1 %v7880_v47  ;;  %v7977_v58 = vld [vmem:[#allocation17 + $0x368] sm:$0xf0]  ;;  %v7724_v0 = vor.u32 %v10494_v57, %v7721_v32 }
 0x371   :  { %v10466_v53 = vld [vmem:[#allocation17 + $0x64] sm:$0xf0]  ;;  %2944 = vmatpush.bf16.msrb.mxu2 %v8136_v9  ;;  %v10622_v60 = vld [vmem:[#allocation17 + $0x54c] sm:$0xf]  ;;  %v7980_v47 = vor.u32 %v10558_v2, %v7977_v58 }
 0x372   :  { %v7847_v11 = vld [vmem:[#allocation17 + $0x248] sm:$0xf]  ;;  %v7592_v16 = vor.u32 %v10466_v53, %v7591_v6  ;;  %2957 = vmatpush.bf16.msrb.mxu3 %v8392_v10  ;;  %v8233_v61 = vld [vmem:[#allocation17 + $0x568] sm:$0xf0] }
 0x373   :  { %v10530_v12 = vld [vmem:[#allocation17 + $0x264] sm:$0xf0]  ;;  %v10686_v62 = vld [vmem:[#allocation17 + $0x74c] sm:$0xf]  ;;  %v8236_v9 = vor.u32 %v10622_v60, %v8233_v61 }
 0x374   :  { %v8103_v31 = vld [vmem:[#allocation17 + $0x448] sm:$0xf]  ;;  %v7848_v24 = vor.u32 %v10530_v12, %v7847_v11  ;;  %2919 = vmatpush.bf16.msrb.mxu0 %v7592_v16  ;;  %v8489_v63 = vld [vmem:[#allocation17 + $0x768] sm:$0xf0] }
 0x375   :  { %v10594_v13 = vld [vmem:[#allocation17 + $0x464] sm:$0xf0]  ;;  %v10486_v6 = vld [vmem:[#allocation17 + $0x10c] sm:$0xf]  ;;  %v8492_v10 = vor.u32 %v10686_v62, %v8489_v63 }
 0x376   :  { %v8359_v39 = vld [vmem:[#allocation17 + $0x648] sm:$0xf]  ;;  %v8104_v20 = vor.u32 %v10594_v13, %v8103_v31  ;;  %2932 = vmatpush.bf16.msrb.mxu1 %v7848_v24  ;;  %v7689_v53 = vld [vmem:[#allocation17 + $0x128] sm:$0xf0] }
 0x377   :  { %v10658_v14 = vld [vmem:[#allocation17 + $0x664] sm:$0xf0]  ;;  %v10550_v11 = vld [vmem:[#allocation17 + $0x30c] sm:$0xf] }
 0x378   :  { %v7559_v15 = vld [vmem:[#allocation17 + $0x8] sm:$0xf]  ;;  %v8360_v22 = vor.u32 %v10658_v14, %v8359_v39  ;;  %2945 = vmatpush.bf16.msrb.mxu2 %v8104_v20  ;;  %v7945_v12 = vld [vmem:[#allocation17 + $0x328] sm:$0xf0] }
 0x379   :  { %v10458_v17 = vld [vmem:[#allocation17 + $0x24] sm:$0xf0]  ;;  %v10614_v31 = vld [vmem:[#allocation17 + $0x50c] sm:$0xf]  ;;  %v7948_v16 = vor.u32 %v10550_v11, %v7945_v12  ;;  %v10643_v12 = vld [vmem:[#allocation17 + $0x5ec] sm:$0xf0] }
 0x37a   :  { %v7815_v18 = vld [vmem:[#allocation17 + $0x208] sm:$0xf]  ;;  %v7560_v35 = vor.u32 %v10458_v17, %v7559_v15  ;;  %2958 = vmatpush.bf16.msrb.mxu3 %v8360_v22  ;;  %v8201_v13 = vld [vmem:[#allocation17 + $0x528] sm:$0xf0]  ;;  %v7692_v15 = vor.u32 %v10486_v6, %v7689_v53  ;;  %v8047_v6 = vld [vmem:[#allocation17 + $0x3d0] sm:$0xf] }
 0x37b   :  { %v10522_v3 = vld [vmem:[#allocation17 + $0x224] sm:$0xf0]  ;;  %v10678_v39 = vld [vmem:[#allocation17 + $0x70c] sm:$0xf]  ;;  %v10579_v53 = vld [vmem:[#allocation17 + $0x3ec] sm:$0xf0] }
 0x37c   :  { %v8071_v23 = vld [vmem:[#allocation17 + $0x408] sm:$0xf]  ;;  %v7816_v36 = vor.u32 %v10522_v3, %v7815_v18  ;;  %2920 = vmatpush.bf16.msrb.mxu0 %v7560_v35  ;;  %v8457_v14 = vld [vmem:[#allocation17 + $0x728] sm:$0xf0]  ;;  %v8204_v18 = vor.u32 %v10614_v31, %v8201_v13  ;;  %v8559_v31 = vld [vmem:[#allocation17 + $0x7d0] sm:$0xf] }
 0x37d   :  { %v10586_v25 = vld [vmem:[#allocation17 + $0x424] sm:$0xf0]  ;;  %v10478_v24 = vld [vmem:[#allocation17 + $0xcc] sm:$0xf]  ;;  %v8460_v3 = vor.u32 %v10678_v39, %v8457_v14  ;;  %v10707_v13 = vld [vmem:[#allocation17 + $0x7ec] sm:$0xf0] }
 0x37e   :  { %v8327_v26 = vld [vmem:[#allocation17 + $0x608] sm:$0xf]  ;;  %v8072_v8 = vor.u32 %v10586_v25, %v8071_v23  ;;  %2933 = vmatpush.bf16.msrb.mxu1 %v7816_v36  ;;  %v7657_v17 = vld [vmem:[#allocation17 + $0xe8] sm:$0xf0] }
 0x37f   :  { %v10650_v21 = vld [vmem:[#allocation17 + $0x624] sm:$0xf0]  ;;  %2921 = vmatmul.bf16.vlgmr.msrb.gmra.mxu0 %v11948_v4  ;;  %v10542_v20 = vld [vmem:[#allocation17 + $0x2cc] sm:$0xf]  ;;  %v7660_v27 = vor.u32 %v10478_v24, %v7657_v17  ;;  %v7759_v24 = vld [vmem:[#allocation17 + $0x190] sm:$0xf] }
 0x380   :  { %v8328_v54 = vor.u32 %v10650_v21, %v8327_v26  ;;  %2946 = vmatpush.bf16.msrb.mxu2 %v8072_v8  ;;  %2965 = vmatpush.bf16.msra.mxu0 %v7788_v52  ;;  %v7913_v22 = vld [vmem:[#allocation17 + $0x2e8] sm:$0xf0]  ;;  %v10507_v17 = vld [vmem:[#allocation17 + $0x1ac] sm:$0xf0] }
 0x381   :  { %2934 = vmatmul.bf16.vlgmr.msrb.gmra.mxu1 %v11950_v5  ;;  %v10606_v23 = vld [vmem:[#allocation17 + $0x4cc] sm:$0xf]  ;;  %v7916_v28 = vor.u32 %v10542_v20, %v7913_v22  ;;  %v8015_v20 = vld [vmem:[#allocation17 + $0x390] sm:$0xf] }
 0x382   :  { %2959 = vmatpush.bf16.msrb.mxu3 %v8328_v54  ;;  %2978 = vmatpush.bf16.msra.mxu1 %v8044_v56  ;;  %v8169_v25 = vld [vmem:[#allocation17 + $0x4e8] sm:$0xf0]  ;;  %v10571_v22 = vld [vmem:[#allocation17 + $0x3ac] sm:$0xf0] }
 0x383   :  { %2947 = vmatmul.bf16.vlgmr.msrb.gmra.mxu2 %v11946_v1  ;;  %v10670_v26 = vld [vmem:[#allocation17 + $0x6cc] sm:$0xf]  ;;  %v8172_v34 = vor.u32 %v10606_v23, %v8169_v25  ;;  %v8271_v23 = vld [vmem:[#allocation17 + $0x590] sm:$0xf] }
 0x384   :  { %2991 = vmatpush.bf16.msra.mxu2 %v8300_v33  ;;  %2966 = vmatpush.bf16.msra.mxu0 %v7756_v50  ;;  %v8425_v21 = vld [vmem:[#allocation17 + $0x6e8] sm:$0xf0]  ;;  %v10635_v25 = vld [vmem:[#allocation17 + $0x5ac] sm:$0xf0] }
 0x385   :  { %2960 = vmatmul.bf16.vlgmr.msrb.gmra.mxu3 %v11952_v7  ;;  %v10470_v29 = vld [vmem:[#allocation17 + $0x8c] sm:$0xf]  ;;  %v8428_v35 = vor.u32 %v10670_v26, %v8425_v21  ;;  %v8527_v26 = vld [vmem:[#allocation17 + $0x790] sm:$0xf] }
 0x386   :  { %3004 = vmatpush.bf16.msra.mxu3 %v8556_v42  ;;  %2979 = vmatpush.bf16.msra.mxu1 %v8012_v51  ;;  %v7625_v30 = vld [vmem:[#allocation17 + $0xa8] sm:$0xf0]  ;;  %v10699_v21 = vld [vmem:[#allocation17 + $0x7ac] sm:$0xf0] }
 0x387   :  { %v10534_v36 = vld [vmem:[#allocation17 + $0x28c] sm:$0xf]  ;;  %v7628_v52 = vor.u32 %v10470_v29, %v7625_v30  ;;  %v7727_v29 = vld [vmem:[#allocation17 + $0x150] sm:$0xf] }
 0x388   :  { %2992 = vmatpush.bf16.msra.mxu2 %v8268_v59  ;;  %2967 = vmatpush.bf16.msra.mxu0 %v7724_v0  ;;  %v7881_v37 = vld [vmem:[#allocation17 + $0x2a8] sm:$0xf0]  ;;  %v7791_v0 = vld [vmem:[#allocation17 + $0x1d0] sm:$0xf] }
 0x389   :  { %v10598_v38 = vld [vmem:[#allocation17 + $0x48c] sm:$0xf]  ;;  %v7884_v56 = vor.u32 %v10534_v36, %v7881_v37  ;;  %v10499_v30 = vld [vmem:[#allocation17 + $0x16c] sm:$0xf0] }
 0x38a   :  { %3005 = vmatpush.bf16.msra.mxu3 %v8524_v55  ;;  %2980 = vmatpush.bf16.msra.mxu1 %v7980_v47  ;;  %v8137_v19 = vld [vmem:[#allocation17 + $0x4a8] sm:$0xf0]  ;;  %v10515_v47 = vld [vmem:[#allocation17 + $0x1ec] sm:$0xf0] }
 0x38b   :  { %v10662_v8 = vld [vmem:[#allocation17 + $0x68c] sm:$0xf]  ;;  %v8140_v33 = vor.u32 %v10598_v38, %v8137_v19  ;;  %v7983_v36 = vld [vmem:[#allocation17 + $0x350] sm:$0xf] }
 0x38c   :  { %2993 = vmatpush.bf16.msra.mxu2 %v8236_v9  ;;  %2968 = vmatpush.bf16.msra.mxu0 %v7692_v15  ;;  %v8393_v54 = vld [vmem:[#allocation17 + $0x6a8] sm:$0xf0]  ;;  %v8303_v9 = vld [vmem:[#allocation17 + $0x5d0] sm:$0xf]  ;;  %v7792_v15 = vor.u32 %v10515_v47, %v7791_v0 }
 0x38d   :  { %v10462_v40 = vld [vmem:[#allocation17 + $0x4c] sm:$0xf]  ;;  %v8396_v42 = vor.u32 %v10662_v8, %v8393_v54  ;;  %v10563_v37 = vld [vmem:[#allocation17 + $0x36c] sm:$0xf0] }
 0x38e   :  { %3006 = vmatpush.bf16.msra.mxu3 %v8492_v10  ;;  %2981 = vmatpush.bf16.msra.mxu1 %v7948_v16  ;;  %v7593_v41 = vld [vmem:[#allocation17 + $0x68] sm:$0xf0]  ;;  %v8048_v16 = vor.u32 %v10579_v53, %v8047_v6  ;;  %v8239_v38 = vld [vmem:[#allocation17 + $0x550] sm:$0xf] }
 0x38f   :  { %v10526_v43 = vld [vmem:[#allocation17 + $0x24c] sm:$0xf]  ;;  %v7596_v51 = vor.u32 %v10462_v40, %v7593_v41  ;;  %v10627_v19 = vld [vmem:[#allocation17 + $0x56c] sm:$0xf0] }
 0x390   :  { %2994 = vmatpush.bf16.msra.mxu2 %v8204_v18  ;;  %2969 = vmatpush.bf16.msra.mxu0 %v7660_v27  ;;  %v7849_v44 = vld [vmem:[#allocation17 + $0x268] sm:$0xf0]  ;;  %v8304_v18 = vor.u32 %v10643_v12, %v8303_v9  ;;  %v7760_v27 = vor.u32 %v10507_v17, %v7759_v24  ;;  %v8495_v8 = vld [vmem:[#allocation17 + $0x750] sm:$0xf] }
 0x391   :  { %v10590_v45 = vld [vmem:[#allocation17 + $0x44c] sm:$0xf]  ;;  %v7852_v57 = vor.u32 %v10526_v43, %v7849_v44  ;;  %v10691_v54 = vld [vmem:[#allocation17 + $0x76c] sm:$0xf0] }
 0x392   :  { %3007 = vmatpush.bf16.msra.mxu3 %v8460_v3  ;;  %2982 = vmatpush.bf16.msra.mxu1 %v7916_v28  ;;  %v8105_v46 = vld [vmem:[#allocation17 + $0x468] sm:$0xf0]  ;;  %v8560_v3 = vor.u32 %v10707_v13, %v8559_v31  ;;  %v8016_v28 = vor.u32 %v10571_v22, %v8015_v20  ;;  %v7695_v40 = vld [vmem:[#allocation17 + $0x110] sm:$0xf] }
 0x393   :  { %v10654_v48 = vld [vmem:[#allocation17 + $0x64c] sm:$0xf]  ;;  %v8108_v2 = vor.u32 %v10590_v45, %v8105_v46  ;;  %v10491_v41 = vld [vmem:[#allocation17 + $0x12c] sm:$0xf0] }
 0x394   :  { %2995 = vmatpush.bf16.msra.mxu2 %v8172_v34  ;;  %v8361_v49 = vld [vmem:[#allocation17 + $0x668] sm:$0xf0]  ;;  %2970 = vmatpush.bf16.msra.mxu0 %v7628_v52  ;;  %v8272_v34 = vor.u32 %v10635_v25, %v8271_v23  ;;  %v7728_v52 = vor.u32 %v10499_v30, %v7727_v29  ;;  %v7951_v43 = vld [vmem:[#allocation17 + $0x310] sm:$0xf] }
 0x395   :  { %v10454_v50 = vld [vmem:[#allocation17 + $0xc] sm:$0xf]  ;;  %v8364_v58 = vor.u32 %v10654_v48, %v8361_v49  ;;  %v10555_v44 = vld [vmem:[#allocation17 + $0x32c] sm:$0xf0] }
 0x396   :  { %3008 = vmatpush.bf16.msra.mxu3 %v8428_v35  ;;  %2983 = vmatpush.bf16.msra.mxu1 %v7884_v56  ;;  %v7561_v32 = vld [vmem:[#allocation17 + $0x28] sm:$0xf0]  ;;  %v8528_v35 = vor.u32 %v10699_v21, %v8527_v26  ;;  %v7984_v56 = vor.u32 %v10563_v37, %v7983_v36  ;;  %v8207_v45 = vld [vmem:[#allocation17 + $0x510] sm:$0xf] }
 0x397   :  { %v10518_v59 = vld [vmem:[#allocation17 + $0x20c] sm:$0xf]  ;;  %v7564_v10 = vor.u32 %v10454_v50, %v7561_v32  ;;  %v10619_v46 = vld [vmem:[#allocation17 + $0x52c] sm:$0xf0]  ;;  %v7696_v50 = vor.u32 %v10491_v41, %v7695_v40  ;;  %v10575_v40 = vld [vmem:[#allocation17 + $0x3d4] sm:$0xf] }
 0x398   :  { %v7817_v55 = vld [vmem:[#allocation17 + $0x228] sm:$0xf0]  ;;  %2996 = vmatpush.bf16.msra.mxu2 %v8140_v33  ;;  %2971 = vmatpush.bf16.msra.mxu0 %v7596_v51  ;;  %v8240_v33 = vor.u32 %v10627_v19, %v8239_v38  ;;  %v8463_v48 = vld [vmem:[#allocation17 + $0x710] sm:$0xf]  ;;  %v7952_v51 = vor.u32 %v10555_v44, %v7951_v43  ;;  %v8049_v41 = vld [vmem:[#allocation17 + $0x3f0] sm:$0xf0] }
 0x399   :  { %v10582_v60 = vld [vmem:[#allocation17 + $0x40c] sm:$0xf]  ;;  %v7820_v11 = vor.u32 %v10518_v59, %v7817_v55  ;;  %v10683_v49 = vld [vmem:[#allocation17 + $0x72c] sm:$0xf0]  ;;  %v8208_v59 = vor.u32 %v10619_v46, %v8207_v45  ;;  %v8305_v44 = vld [vmem:[#allocation17 + $0x5f0] sm:$0xf0] }
 0x39a   :  { %3009 = vmatpush.bf16.msra.mxu3 %v8396_v42  ;;  %v8073_v61 = vld [vmem:[#allocation17 + $0x428] sm:$0xf0]  ;;  %2984 = vmatpush.bf16.msra.mxu1 %v7852_v57  ;;  %v8496_v42 = vor.u32 %v10691_v54, %v8495_v8  ;;  %v7663_v57 = vld [vmem:[#allocation17 + $0xd0] sm:$0xf]  ;;  %v8464_v55 = vor.u32 %v10683_v49, %v8463_v48  ;;  %v10703_v45 = vld [vmem:[#allocation17 + $0x7d4] sm:$0xf] }
 0x39b   :  { %v10646_v62 = vld [vmem:[#allocation17 + $0x60c] sm:$0xf]  ;;  %v8076_v39 = vor.u32 %v10582_v60, %v8073_v61  ;;  %v10483_v32 = vld [vmem:[#allocation17 + $0xec] sm:$0xf0]  ;;  %v8561_v46 = vld [vmem:[#allocation17 + $0x7f0] sm:$0xf0] }
 0x39c   :  { %v8329_v63 = vld [vmem:[#allocation17 + $0x628] sm:$0xf0]  ;;  %2997 = vmatpush.bf16.msra.mxu2 %v8108_v2  ;;  %2972 = vmatpush.bf16.msra.mxu0 %v7564_v10  ;;  %v7919_v2 = vld [vmem:[#allocation17 + $0x2d0] sm:$0xf]  ;;  %v7664_v0 = vor.u32 %v10483_v32, %v7663_v57  ;;  %v10503_v57 = vld [vmem:[#allocation17 + $0x194] sm:$0xf] }
 0x39d   :  { %v8332_v14 = vor.u32 %v10646_v62, %v8329_v63  ;;  %v8175_v60 = vld [vmem:[#allocation17 + $0x4d0] sm:$0xf]  ;;  %v7761_v32 = vld [vmem:[#allocation17 + $0x1b0] sm:$0xf0] }
 0x39e   :  { %3010 = vmatpush.bf16.msra.mxu3 %v8364_v58  ;;  %2985 = vmatpush.bf16.msra.mxu1 %v7820_v11  ;;  %v10547_v58 = vld [vmem:[#allocation17 + $0x2ec] sm:$0xf0] }
 0x39f   :  { %2973 = vmatmul.bf16.vlgmr.msra.gmra.mxu0 %v11948_v4  ;;  %v10611_v61 = vld [vmem:[#allocation17 + $0x4ec] sm:$0xf0]  ;;  %v7920_v47 = vor.u32 %v10547_v58, %v7919_v2  ;;  %v10567_v2 = vld [vmem:[#allocation17 + $0x394] sm:$0xf] }
 0x3a0   :  { %2998 = vmatpush.bf16.msra.mxu2 %v8076_v39  ;;  %3017 = vmatpush.bf16.msrb.mxu0 %v7792_v15  ;;  %v8431_v62 = vld [vmem:[#allocation17 + $0x6d0] sm:$0xf]  ;;  %v8176_v9 = vor.u32 %v10611_v61, %v8175_v60  ;;  %v8017_v58 = vld [vmem:[#allocation17 + $0x3b0] sm:$0xf0] }
 0x3a1   :  { %2986 = vmatmul.bf16.vlgmr.msra.gmra.mxu1 %v11950_v5  ;;  %v10675_v63 = vld [vmem:[#allocation17 + $0x6ec] sm:$0xf0]  ;;  %v10631_v60 = vld [vmem:[#allocation17 + $0x594] sm:$0xf] }
 0x3a2   :  { %3011 = vmatpush.bf16.msra.mxu3 %v8332_v14  ;;  %3030 = vmatpush.bf16.msrb.mxu1 %v8048_v16  ;;  %v7631_v6 = vld [vmem:[#allocation17 + $0x90] sm:$0xf]  ;;  %v8432_v10 = vor.u32 %v10675_v63, %v8431_v62  ;;  %v8273_v61 = vld [vmem:[#allocation17 + $0x5b0] sm:$0xf0] }
 0x3a3   :  { %2999 = vmatmul.bf16.vlgmr.msra.gmra.mxu2 %v11946_v1  ;;  %v10475_v53 = vld [vmem:[#allocation17 + $0xac] sm:$0xf0]  ;;  %v10695_v62 = vld [vmem:[#allocation17 + $0x794] sm:$0xf] }
 0x3a4   :  { %3043 = vmatpush.bf16.msrb.mxu2 %v8304_v18  ;;  %3018 = vmatpush.bf16.msrb.mxu0 %v7760_v27  ;;  %v7887_v11 = vld [vmem:[#allocation17 + $0x290] sm:$0xf]  ;;  %v7632_v15 = vor.u32 %v10475_v53, %v7631_v6  ;;  %v8529_v63 = vld [vmem:[#allocation17 + $0x7b0] sm:$0xf0] }
 0x3a5   :  { %3012 = vmatmul.bf16.vlgmr.msra.gmra.mxu3 %v11952_v7  ;;  %v10539_v12 = vld [vmem:[#allocation17 + $0x2ac] sm:$0xf0]  ;;  %v10495_v6 = vld [vmem:[#allocation17 + $0x154] sm:$0xf] }
 0x3a6   :  { %3056 = vmatpush.bf16.msrb.mxu3 %v8560_v3  ;;  %3031 = vmatpush.bf16.msrb.mxu1 %v8016_v28  ;;  %v8143_v31 = vld [vmem:[#allocation17 + $0x490] sm:$0xf]  ;;  %v7888_v16 = vor.u32 %v10539_v12, %v7887_v11  ;;  %v7729_v53 = vld [vmem:[#allocation17 + $0x170] sm:$0xf0] }
 0x3a7   :  { %v10603_v13 = vld [vmem:[#allocation17 + $0x4ac] sm:$0xf0]  ;;  %v10559_v11 = vld [vmem:[#allocation17 + $0x354] sm:$0xf] }
 0x3a8   :  { %3044 = vmatpush.bf16.msrb.mxu2 %v8272_v34  ;;  %3019 = vmatpush.bf16.msrb.mxu0 %v7728_v52  ;;  %v8399_v39 = vld [vmem:[#allocation17 + $0x690] sm:$0xf]  ;;  %v8144_v18 = vor.u32 %v10603_v13, %v8143_v31  ;;  %v10511_v52 = vld [vmem:[#allocation17 + $0x1d4] sm:$0xf] }
 0x3a9   :  { %v10667_v14 = vld [vmem:[#allocation17 + $0x6ac] sm:$0xf0]  ;;  %v7985_v12 = vld [vmem:[#allocation17 + $0x370] sm:$0xf0] }
 0x3aa   :  { %3057 = vmatpush.bf16.msrb.mxu3 %v8528_v35  ;;  %3032 = vmatpush.bf16.msrb.mxu1 %v7984_v56  ;;  %v7599_v24 = vld [vmem:[#allocation17 + $0x50] sm:$0xf]  ;;  %v8400_v3 = vor.u32 %v10667_v14, %v8399_v39  ;;  %v7793_v56 = vld [vmem:[#allocation17 + $0x1f0] sm:$0xf0] }
 0x3ab   :  { %v10467_v17 = vld [vmem:[#allocation17 + $0x6c] sm:$0xf0]  ;;  %v10623_v31 = vld [vmem:[#allocation17 + $0x554] sm:$0xf] }
 0x3ac   :  { %3045 = vmatpush.bf16.msrb.mxu2 %v8240_v33  ;;  %3020 = vmatpush.bf16.msrb.mxu0 %v7696_v50  ;;  %v7855_v20 = vld [vmem:[#allocation17 + $0x250] sm:$0xf]  ;;  %v7600_v28 = vor.u32 %v10467_v17, %v7599_v24  ;;  %v10639_v33 = vld [vmem:[#allocation17 + $0x5d4] sm:$0xf]  ;;  %v7796_v50 = vor.u32 %v10511_v52, %v7793_v56 }
 0x3ad   :  { %v10531_v22 = vld [vmem:[#allocation17 + $0x26c] sm:$0xf0]  ;;  %v8241_v13 = vld [vmem:[#allocation17 + $0x570] sm:$0xf0] }
 0x3ae   :  { %3058 = vmatpush.bf16.msrb.mxu3 %v8496_v42  ;;  %3033 = vmatpush.bf16.msrb.mxu1 %v7952_v51  ;;  %v8111_v23 = vld [vmem:[#allocation17 + $0x450] sm:$0xf]  ;;  %v7856_v29 = vor.u32 %v10531_v22, %v7855_v20  ;;  %v8052_v51 = vor.u32 %v10575_v40, %v8049_v41  ;;  %v10687_v39 = vld [vmem:[#allocation17 + $0x754] sm:$0xf] }
 0x3af   :  { %v10595_v25 = vld [vmem:[#allocation17 + $0x46c] sm:$0xf0]  ;;  %v8497_v14 = vld [vmem:[#allocation17 + $0x770] sm:$0xf0] }
 0x3b0   :  { %3046 = vmatpush.bf16.msrb.mxu2 %v8208_v59  ;;  %3021 = vmatpush.bf16.msrb.mxu0 %v7664_v0  ;;  %v8367_v26 = vld [vmem:[#allocation17 + $0x650] sm:$0xf]  ;;  %v8112_v36 = vor.u32 %v10595_v25, %v8111_v23  ;;  %v8308_v59 = vor.u32 %v10639_v33, %v8305_v44  ;;  %v7764_v0 = vor.u32 %v10503_v57, %v7761_v32  ;;  %v10487_v24 = vld [vmem:[#allocation17 + $0x114] sm:$0xf] }
 0x3b1   :  { %v10659_v21 = vld [vmem:[#allocation17 + $0x66c] sm:$0xf0]  ;;  %v7697_v17 = vld [vmem:[#allocation17 + $0x130] sm:$0xf0] }
 0x3b2   :  { %3059 = vmatpush.bf16.msrb.mxu3 %v8464_v55  ;;  %3034 = vmatpush.bf16.msrb.mxu1 %v7920_v47  ;;  %v7567_v27 = vld [vmem:[#allocation17 + $0x10] sm:$0xf]  ;;  %v8368_v37 = vor.u32 %v10659_v21, %v8367_v26  ;;  %v8564_v55 = vor.u32 %v10703_v45, %v8561_v46  ;;  %v8020_v47 = vor.u32 %v10567_v2, %v8017_v58  ;;  %v10551_v20 = vld [vmem:[#allocation17 + $0x314] sm:$0xf] }
 0x3b3   :  { %v10459_v30 = vld [vmem:[#allocation17 + $0x2c] sm:$0xf0]  ;;  %v7953_v22 = vld [vmem:[#allocation17 + $0x330] sm:$0xf0] }
 0x3b4   :  { %3047 = vmatpush.bf16.msrb.mxu2 %v8176_v9  ;;  %3022 = vmatpush.bf16.msrb.mxu0 %v7632_v15  ;;  %v7823_v34 = vld [vmem:[#allocation17 + $0x210] sm:$0xf]  ;;  %v7568_v42 = vor.u32 %v10459_v30, %v7567_v27  ;;  %v8276_v9 = vor.u32 %v10631_v60, %v8273_v61  ;;  %v7732_v15 = vor.u32 %v10495_v6, %v7729_v53  ;;  %v10615_v23 = vld [vmem:[#allocation17 + $0x514] sm:$0xf] }
 0x3b5   :  { %v10523_v35 = vld [vmem:[#allocation17 + $0x22c] sm:$0xf0]  ;;  %v8209_v25 = vld [vmem:[#allocation17 + $0x530] sm:$0xf0]  ;;  %v7700_v27 = vor.u32 %v10487_v24, %v7697_v17  ;;  %v8055_v24 = vld [vmem:[#allocation17 + $0x3d8] sm:$0xf] }
 0x3b6   :  { %3060 = vmatpush.bf16.msrb.mxu3 %v8432_v10  ;;  %3035 = vmatpush.bf16.msrb.mxu1 %v7888_v16  ;;  %v8079_v38 = vld [vmem:[#allocation17 + $0x410] sm:$0xf]  ;;  %v7824_v43 = vor.u32 %v10523_v35, %v7823_v34  ;;  %v8532_v10 = vor.u32 %v10695_v62, %v8529_v63  ;;  %v7988_v16 = vor.u32 %v10559_v11, %v7985_v12  ;;  %v10679_v26 = vld [vmem:[#allocation17 + $0x714] sm:$0xf]  ;;  %v10580_v17 = vld [vmem:[#allocation17 + $0x3f4] sm:$0xf0] }
 0x3b7   :  { %v10587_v19 = vld [vmem:[#allocation17 + $0x42c] sm:$0xf0]  ;;  %v8465_v21 = vld [vmem:[#allocation17 + $0x730] sm:$0xf0]  ;;  %v8212_v34 = vor.u32 %v10615_v23, %v8209_v25  ;;  %v8567_v23 = vld [vmem:[#allocation17 + $0x7d8] sm:$0xf] }
 0x3b8   :  { %3048 = vmatpush.bf16.msrb.mxu2 %v8144_v18  ;;  %v8335_v8 = vld [vmem:[#allocation17 + $0x610] sm:$0xf]  ;;  %3023 = vmatpush.bf16.msrb.mxu0 %v7600_v28  ;;  %v8080_v48 = vor.u32 %v10587_v19, %v8079_v38  ;;  %v8244_v18 = vor.u32 %v10623_v31, %v8241_v13  ;;  %v7956_v28 = vor.u32 %v10551_v20, %v7953_v22  ;;  %v7665_v30 = vld [vmem:[#allocation17 + $0xf0] sm:$0xf0]  ;;  %v10644_v22 = vld [vmem:[#allocation17 + $0x5f4] sm:$0xf0] }
 0x3b9   :  { %v10651_v54 = vld [vmem:[#allocation17 + $0x62c] sm:$0xf0]  ;;  %v8468_v35 = vor.u32 %v10679_v26, %v8465_v21  ;;  %v10607_v38 = vld [vmem:[#allocation17 + $0x4d4] sm:$0xf]  ;;  %v10708_v25 = vld [vmem:[#allocation17 + $0x7f4] sm:$0xf0] }
 0x3ba   :  { %3061 = vmatpush.bf16.msrb.mxu3 %v8400_v3  ;;  %3036 = vmatpush.bf16.msrb.mxu1 %v7856_v29  ;;  %v8336_v49 = vor.u32 %v10651_v54, %v8335_v8  ;;  %v8500_v3 = vor.u32 %v10687_v39, %v8497_v14  ;;  %v10479_v29 = vld [vmem:[#allocation17 + $0xd4] sm:$0xf] }
 0x3bb   :  { %v8177_v19 = vld [vmem:[#allocation17 + $0x4f0] sm:$0xf0]  ;;  %v7668_v52 = vor.u32 %v10479_v29, %v7665_v30  ;;  %v7767_v29 = vld [vmem:[#allocation17 + $0x198] sm:$0xf] }
 0x3bc   :  { %3049 = vmatpush.bf16.msrb.mxu2 %v8112_v36  ;;  %3024 = vmatpush.bf16.msrb.mxu0 %v7568_v42  ;;  %v10543_v36 = vld [vmem:[#allocation17 + $0x2d4] sm:$0xf]  ;;  %v8180_v33 = vor.u32 %v10607_v38, %v8177_v19  ;;  %v10508_v30 = vld [vmem:[#allocation17 + $0x1b4] sm:$0xf0] }
 0x3bd   :  { %v10671_v8 = vld [vmem:[#allocation17 + $0x6d4] sm:$0xf]  ;;  %v8279_v38 = vld [vmem:[#allocation17 + $0x598] sm:$0xf] }
 0x3be   :  { %3062 = vmatpush.bf16.msrb.mxu3 %v8368_v37  ;;  %3037 = vmatpush.bf16.msrb.mxu1 %v7824_v43  ;;  %v7921_v37 = vld [vmem:[#allocation17 + $0x2f0] sm:$0xf0]  ;;  %v10636_v19 = vld [vmem:[#allocation17 + $0x5b4] sm:$0xf0] }
 0x3bf   :  { %3025 = vmatmul.bf16.vlgmr.msrb.gmra.mxu0 %v11948_v4  ;;  %v8433_v54 = vld [vmem:[#allocation17 + $0x6f0] sm:$0xf0]  ;;  %v7924_v56 = vor.u32 %v10543_v36, %v7921_v37  ;;  %v8023_v36 = vld [vmem:[#allocation17 + $0x398] sm:$0xf] }
 0x3c0   :  { %3050 = vmatpush.bf16.msrb.mxu2 %v8080_v48  ;;  %3069 = vmatpush.bf16.msra.mxu0 %v7796_v50  ;;  %v10471_v40 = vld [vmem:[#allocation17 + $0x94] sm:$0xf]  ;;  %v8436_v42 = vor.u32 %v10671_v8, %v8433_v54  ;;  %v10572_v37 = vld [vmem:[#allocation17 + $0x3b4] sm:$0xf0] }
 0x3c1   :  { %3038 = vmatmul.bf16.vlgmr.msrb.gmra.mxu1 %v11950_v5  ;;  %v7633_v41 = vld [vmem:[#allocation17 + $0xb0] sm:$0xf0]  ;;  %v8535_v8 = vld [vmem:[#allocation17 + $0x798] sm:$0xf] }
 0x3c2   :  { %3063 = vmatpush.bf16.msrb.mxu3 %v8336_v49  ;;  %3082 = vmatpush.bf16.msra.mxu1 %v8052_v51  ;;  %v10535_v43 = vld [vmem:[#allocation17 + $0x294] sm:$0xf]  ;;  %v7636_v50 = vor.u32 %v10471_v40, %v7633_v41  ;;  %v10700_v54 = vld [vmem:[#allocation17 + $0x7b4] sm:$0xf0] }
 0x3c3   :  { %3051 = vmatmul.bf16.vlgmr.msrb.gmra.mxu2 %v11946_v1  ;;  %v7889_v44 = vld [vmem:[#allocation17 + $0x2b0] sm:$0xf0]  ;;  %v7735_v40 = vld [vmem:[#allocation17 + $0x158] sm:$0xf] }
 0x3c4   :  { %3095 = vmatpush.bf16.msra.mxu2 %v8308_v59  ;;  %3070 = vmatpush.bf16.msra.mxu0 %v7764_v0  ;;  %v10599_v45 = vld [vmem:[#allocation17 + $0x494] sm:$0xf]  ;;  %v7892_v51 = vor.u32 %v10535_v43, %v7889_v44  ;;  %v10500_v41 = vld [vmem:[#allocation17 + $0x174] sm:$0xf0] }
 0x3c5   :  { %3064 = vmatmul.bf16.vlgmr.msrb.gmra.mxu3 %v11952_v7  ;;  %v8145_v46 = vld [vmem:[#allocation17 + $0x4b0] sm:$0xf0]  ;;  %v7991_v43 = vld [vmem:[#allocation17 + $0x358] sm:$0xf] }
 0x3c6   :  { %3108 = vmatpush.bf16.msra.mxu3 %v8564_v55  ;;  %3083 = vmatpush.bf16.msra.mxu1 %v8020_v47  ;;  %v10663_v48 = vld [vmem:[#allocation17 + $0x694] sm:$0xf]  ;;  %v8148_v59 = vor.u32 %v10599_v45, %v8145_v46  ;;  %v10564_v44 = vld [vmem:[#allocation17 + $0x374] sm:$0xf0] }
 0x3c7   :  { %v8401_v49 = vld [vmem:[#allocation17 + $0x6b0] sm:$0xf0]  ;;  %v8247_v45 = vld [vmem:[#allocation17 + $0x558] sm:$0xf] }
 0x3c8   :  { %3096 = vmatpush.bf16.msra.mxu2 %v8276_v9  ;;  %3071 = vmatpush.bf16.msra.mxu0 %v7732_v15  ;;  %v10463_v57 = vld [vmem:[#allocation17 + $0x54] sm:$0xf]  ;;  %v8404_v55 = vor.u32 %v10663_v48, %v8401_v49  ;;  %v7799_v15 = vld [vmem:[#allocation17 + $0x1d8] sm:$0xf] }
 0x3c9   :  { %v7601_v32 = vld [vmem:[#allocation17 + $0x70] sm:$0xf0]  ;;  %v10628_v46 = vld [vmem:[#allocation17 + $0x574] sm:$0xf0] }
 0x3ca   :  { %3109 = vmatpush.bf16.msra.mxu3 %v8532_v10  ;;  %3084 = vmatpush.bf16.msra.mxu1 %v7988_v16  ;;  %v10527_v2 = vld [vmem:[#allocation17 + $0x254] sm:$0xf]  ;;  %v7604_v47 = vor.u32 %v10463_v57, %v7601_v32  ;;  %v10516_v16 = vld [vmem:[#allocation17 + $0x1f4] sm:$0xf0]  ;;  %v7736_v57 = vor.u32 %v10500_v41, %v7735_v40  ;;  %v7992_v32 = vor.u32 %v10564_v44, %v7991_v43 }
 0x3cb   :  { %v7857_v58 = vld [vmem:[#allocation17 + $0x270] sm:$0xf0]  ;;  %v8503_v48 = vld [vmem:[#allocation17 + $0x758] sm:$0xf] }
 0x3cc   :  { %3097 = vmatpush.bf16.msra.mxu2 %v8244_v18  ;;  %3072 = vmatpush.bf16.msra.mxu0 %v7700_v27  ;;  %v10591_v60 = vld [vmem:[#allocation17 + $0x454] sm:$0xf]  ;;  %v7860_v6 = vor.u32 %v10527_v2, %v7857_v58  ;;  %v8311_v18 = vld [vmem:[#allocation17 + $0x5d8] sm:$0xf]  ;;  %v7800_v27 = vor.u32 %v10516_v16, %v7799_v15  ;;  %v8248_v58 = vor.u32 %v10628_v46, %v8247_v45 }
 0x3cd   :  { %v8113_v61 = vld [vmem:[#allocation17 + $0x470] sm:$0xf0]  ;;  %v10692_v49 = vld [vmem:[#allocation17 + $0x774] sm:$0xf0] }
 0x3ce   :  { %3110 = vmatpush.bf16.msra.mxu3 %v8500_v3  ;;  %3085 = vmatpush.bf16.msra.mxu1 %v7956_v28  ;;  %v10655_v62 = vld [vmem:[#allocation17 + $0x654] sm:$0xf]  ;;  %v8116_v11 = vor.u32 %v10591_v60, %v8113_v61  ;;  %v8056_v28 = vor.u32 %v10580_v17, %v8055_v24  ;;  %v10492_v2 = vld [vmem:[#allocation17 + $0x134] sm:$0xf0]  ;;  %v8504_v60 = vor.u32 %v10692_v49, %v8503_v48 }
 0x3cf   :  { %v8369_v63 = vld [vmem:[#allocation17 + $0x670] sm:$0xf0]  ;;  %v7959_v61 = vld [vmem:[#allocation17 + $0x318] sm:$0xf] }
 0x3d0   :  { %3098 = vmatpush.bf16.msra.mxu2 %v8212_v34  ;;  %3073 = vmatpush.bf16.msra.mxu0 %v7668_v52  ;;  %v10455_v0 = vld [vmem:[#allocation17 + $0x14] sm:$0xf]  ;;  %v8372_v12 = vor.u32 %v10655_v62, %v8369_v63  ;;  %v8312_v34 = vor.u32 %v10644_v22, %v8311_v18  ;;  %v7768_v52 = vor.u32 %v10508_v30, %v7767_v29  ;;  %v10556_v62 = vld [vmem:[#allocation17 + $0x334] sm:$0xf0] }
 0x3d1   :  { %v7569_v53 = vld [vmem:[#allocation17 + $0x30] sm:$0xf0]  ;;  %v8215_v63 = vld [vmem:[#allocation17 + $0x518] sm:$0xf] }
 0x3d2   :  { %3111 = vmatpush.bf16.msra.mxu3 %v8468_v35  ;;  %3086 = vmatpush.bf16.msra.mxu1 %v7924_v56  ;;  %v10519_v9 = vld [vmem:[#allocation17 + $0x214] sm:$0xf]  ;;  %v7572_v3 = vor.u32 %v10455_v0, %v7569_v53  ;;  %v8568_v35 = vor.u32 %v10708_v25, %v8567_v23  ;;  %v8024_v56 = vor.u32 %v10572_v37, %v8023_v36  ;;  %v10620_v0 = vld [vmem:[#allocation17 + $0x534] sm:$0xf0] }
 0x3d3   :  { %v7825_v10 = vld [vmem:[#allocation17 + $0x230] sm:$0xf0]  ;;  %v10612_v24 = vld [vmem:[#allocation17 + $0x4f4] sm:$0xf0] }
 0x3d4   :  { %3099 = vmatpush.bf16.msra.mxu2 %v8180_v33  ;;  %3074 = vmatpush.bf16.msra.mxu0 %v7636_v50  ;;  %v10583_v31 = vld [vmem:[#allocation17 + $0x414] sm:$0xf]  ;;  %v7828_v20 = vor.u32 %v10519_v9, %v7825_v10  ;;  %v8280_v33 = vor.u32 %v10636_v19, %v8279_v38  ;;  %v7960_v9 = vor.u32 %v10556_v62, %v7959_v61  ;;  %v7671_v10 = vld [vmem:[#allocation17 + $0xd8] sm:$0xf] }
 0x3d5   :  { %v8081_v13 = vld [vmem:[#allocation17 + $0x430] sm:$0xf0]  ;;  %v8439_v17 = vld [vmem:[#allocation17 + $0x6d8] sm:$0xf] }
 0x3d6   :  { %3112 = vmatpush.bf16.msra.mxu3 %v8436_v42  ;;  %3087 = vmatpush.bf16.msra.mxu1 %v7892_v51  ;;  %v10647_v39 = vld [vmem:[#allocation17 + $0x614] sm:$0xf]  ;;  %v8084_v26 = vor.u32 %v10583_v31, %v8081_v13  ;;  %v8536_v42 = vor.u32 %v10700_v54, %v8535_v8  ;;  %v7927_v13 = vld [vmem:[#allocation17 + $0x2d8] sm:$0xf] }
 0x3d7   :  { %v8337_v14 = vld [vmem:[#allocation17 + $0x630] sm:$0xf0]  ;;  %v2818_v50 = vpop.f32.mrf.mxu0  ;;  %v2831_v51 = vpop.f32.mrf.mxu1  ;;  %v10676_v18 = vld [vmem:[#allocation17 + $0x6f4] sm:$0xf0] }
 0x3d8   :  { %3100 = vmatpush.bf16.msra.mxu2 %v8148_v59  ;;  %3075 = vmatpush.bf16.msra.mxu0 %v7604_v47  ;;  %v8340_v21 = vor.u32 %v10647_v39, %v8337_v14  ;;  %v2832_v59 = vadd.f32 %v2831_v51, %v2818_v50  ;;  %v8471_v47 = vld [vmem:[#allocation17 + $0x718] sm:$0xf]  ;;  %v8440_v29 = vor.u32 %v10676_v18, %v8439_v17  ;;  %v10640_v18 = vld [vmem:[#allocation17 + $0x5dc] sm:$0xf] }
 0x3d9   :  { %v10548_v39 = vld [vmem:[#allocation17 + $0x2f4] sm:$0xf0] }
 0x3da   :  { %3113 = vmatpush.bf16.msra.mxu3 %v8404_v55  ;;  %3088 = vmatpush.bf16.msra.mxu1 %v7860_v6  ;;  %v7703_v55 = vld [vmem:[#allocation17 + $0x118] sm:$0xf]  ;;  %v7928_v25 = vor.u32 %v10548_v39, %v7927_v13  ;;  %v10512_v39 = vld [vmem:[#allocation17 + $0x1dc] sm:$0xf] }
 0x3db   :  { %v10684_v6 = vld [vmem:[#allocation17 + $0x734] sm:$0xf0]  ;;  %v7704_v53 = vor.u32 %v10492_v2, %v7703_v55 }
 0x3dc   :  { %3101 = vmatpush.bf16.msra.mxu2 %v8116_v11  ;;  %3076 = vmatpush.bf16.msra.mxu0 %v7572_v3  ;;  %v10484_v11 = vld [vmem:[#allocation17 + $0xf4] sm:$0xf0]  ;;  %v8472_v31 = vor.u32 %v10684_v6, %v8471_v47 }
 0x3dd   :  { %v8183_v14 = vld [vmem:[#allocation17 + $0x4d8] sm:$0xf]  ;;  %v7672_v23 = vor.u32 %v10484_v11, %v7671_v10 }
 0x3de   :  { %3114 = vmatpush.bf16.msra.mxu3 %v8372_v12  ;;  %3089 = vmatpush.bf16.msra.mxu1 %v7828_v20  ;;  %v8216_v12 = vor.u32 %v10620_v0, %v8215_v63  ;;  %v2844_v15 = vpop.f32.mrf.mxu2  ;;  %v2857_v16 = vpop.f32.mrf.mxu3  ;;  %v7895_v30 = vld [vmem:[#allocation17 + $0x298] sm:$0xf] }
 0x3df   :  { %3077 = vmatmul.bf16.vlgmr.msra.gmra.mxu0 %v11948_v4  ;;  %v2845_v3 = vadd.f32 %v2844_v15, %v2832_v59  ;;  %v2820_v20 = vpop.f32.mrf.mxu0  ;;  %v2833_v22 = vpop.f32.mrf.mxu1  ;;  %v10604_v36 = vld [vmem:[#allocation17 + $0x4b4] sm:$0xf0]  ;;  %v10576_v15 = vld [vmem:[#allocation17 + $0x3dc] sm:$0xf] }
 0x3e0   :  { %3102 = vmatpush.bf16.msra.mxu2 %v8084_v26  ;;  %3121 = vmatpush.bf16.msrb.mxu0 %v7800_v27  ;;  %v7639_v26 = vld [vmem:[#allocation17 + $0x98] sm:$0xf] }
 0x3e1   :  { %3090 = vmatmul.bf16.vlgmr.msra.gmra.mxu1 %v11950_v5  ;;  %v11978_v27 = vadd.f32 %v2857_v16, %v2845_v3  ;;  %v8407_v37 = vld [vmem:[#allocation17 + $0x698] sm:$0xf]  ;;  %v8057_v16 = vld [vmem:[#allocation17 + $0x3f8] sm:$0xf0] }
 0x3e2   :  { %3115 = vmatpush.bf16.msra.mxu3 %v8340_v21  ;;  %3134 = vmatpush.bf16.msrb.mxu1 %v8056_v28  ;;  %v10476_v21 = vld [vmem:[#allocation17 + $0xb4] sm:$0xf0]  ;;  %v8184_v28 = vor.u32 %v10612_v24, %v8183_v14  ;;  %v7801_v14 = vld [vmem:[#allocation17 + $0x1f8] sm:$0xf0] }
 0x3e3   :  { %3103 = vmatmul.bf16.vlgmr.msra.gmra.mxu2 %v11946_v1  ;;  %v10668_v38 = vld [vmem:[#allocation17 + $0x6b4] sm:$0xf0]  ;;  %v3227_v19 = vrot.slane %v11978_v27, 4  ;;  %v3283_v8 = vmul.f32 %v11978_v27, %v11978_v27  ;;  %v7640_v54 = vor.u32 %v10476_v21, %v7639_v26  ;;  %v8313_v3 = vld [vmem:[#allocation17 + $0x5f8] sm:$0xf0] }
 0x3e4   :  { %3147 = vmatpush.bf16.msrb.mxu2 %v8312_v34  ;;  %3122 = vmatpush.bf16.msrb.mxu0 %v7768_v52  ;;  %v10540_v34 = vld [vmem:[#allocation17 + $0x2b4] sm:$0xf0]  ;;  %v8408_v44 = vor.u32 %v10668_v38, %v8407_v37 }
 0x3e5   :  { %3116 = vmatmul.bf16.vlgmr.msra.gmra.mxu3 %v11952_v7  ;;  %v7896_v52 = vor.u32 %v10540_v34, %v7895_v30  ;;  %v10468_v40 = vld [vmem:[#allocation17 + $0x74] sm:$0xf0]  ;;  %v10504_v30 = vld [vmem:[#allocation17 + $0x19c] sm:$0xf]  ;;  %v7804_v34 = vor.u32 %v10512_v39, %v7801_v14 }
 0x3e6   :  { %3160 = vmatpush.bf16.msrb.mxu3 %v8568_v35  ;;  %3135 = vmatpush.bf16.msrb.mxu1 %v8024_v56  ;;  %v8151_v35 = vld [vmem:[#allocation17 + $0x498] sm:$0xf]  ;;  %v2846_v48 = vpop.f32.mrf.mxu2  ;;  %v2859_v49 = vpop.f32.mrf.mxu3 }
 0x3e7   :  { %v7607_v56 = vld [vmem:[#allocation17 + $0x58] sm:$0xf]  ;;  %v8152_v43 = vor.u32 %v10604_v36, %v8151_v35  ;;  %v2870_v55 = vpop.f32.mrf.mxu0  ;;  %v2883_v2 = vpop.f32.mrf.mxu1  ;;  %v8060_v35 = vor.u32 %v10576_v15, %v8057_v16  ;;  %v8316_v36 = vor.u32 %v10640_v18, %v8313_v3  ;;  %v7705_v15 = vld [vmem:[#allocation17 + $0x138] sm:$0xf0] }
 0x3e8   :  { %3148 = vmatpush.bf16.msrb.mxu2 %v8280_v33  ;;  %3123 = vmatpush.bf16.msrb.mxu0 %v7736_v57  ;;  %v7863_v41 = vld [vmem:[#allocation17 + $0x258] sm:$0xf]  ;;  %v3228_v33 = vadd.f32 %v3227_v19, %v11978_v27  ;;  %v7608_v63 = vor.u32 %v10468_v40, %v7607_v56  ;;  %v2884_v47 = vadd.f32 %v2883_v2, %v2870_v55  ;;  %v7769_v19 = vld [vmem:[#allocation17 + $0x1b8] sm:$0xf0] }
 0x3e9   :  { %v10532_v45 = vld [vmem:[#allocation17 + $0x274] sm:$0xf0]  ;;  %v7737_v55 = vld [vmem:[#allocation17 + $0x178] sm:$0xf0] }
 0x3ea   :  { %3161 = vmatpush.bf16.msrb.mxu3 %v8536_v42  ;;  %3136 = vmatpush.bf16.msrb.mxu1 %v7992_v32  ;;  %v3291_v42 = vrot.slane %v3283_v8, 4  ;;  %v8119_v46 = vld [vmem:[#allocation17 + $0x458] sm:$0xf]  ;;  %v3229_v32 = vrot.slane %v3228_v33, 2  ;;  %v7864_v0 = vor.u32 %v10532_v45, %v7863_v41  ;;  %v10696_v45 = vld [vmem:[#allocation17 + $0x79c] sm:$0xf] }
 0x3eb   :  { %v10596_v50 = vld [vmem:[#allocation17 + $0x474] sm:$0xf0]  ;;  %v10560_v2 = vld [vmem:[#allocation17 + $0x35c] sm:$0xf] }
 0x3ec   :  { %3149 = vmatpush.bf16.msrb.mxu2 %v8248_v58  ;;  %3124 = vmatpush.bf16.msrb.mxu0 %v7704_v53  ;;  %v8375_v51 = vld [vmem:[#allocation17 + $0x658] sm:$0xf]  ;;  %v3292_v59 = vadd.f32 %v3291_v42, %v3283_v8  ;;  %v3230_v10 = vadd.f32 %v3229_v32, %v3228_v33  ;;  %v10568_v8 = vld [vmem:[#allocation17 + $0x39c] sm:$0xf] }
 0x3ed   :  { %v10660_v57 = vld [vmem:[#allocation17 + $0x674] sm:$0xf0]  ;;  %v10552_v16 = vld [vmem:[#allocation17 + $0x31c] sm:$0xf] }
 0x3ee   :  { %3162 = vmatpush.bf16.msrb.mxu3 %v8504_v60  ;;  %3137 = vmatpush.bf16.msrb.mxu1 %v7960_v9  ;;  %v7575_v58 = vld [vmem:[#allocation17 + $0x18] sm:$0xf]  ;;  %v3293_v11 = vrot.slane %v3292_v59, 2  ;;  %v3231_v24 = vrot.slane %v3230_v10, 1  ;;  %v2896_v37 = vpop.f32.mrf.mxu2  ;;  %v2909_v38 = vpop.f32.mrf.mxu3 }
 0x3ef   :  { %v10460_v60 = vld [vmem:[#allocation17 + $0x34] sm:$0xf0]  ;;  %v2897_v41 = vadd.f32 %v2896_v37, %v2884_v47  ;;  %v2872_v33 = vpop.f32.mrf.mxu0  ;;  %v2885_v42 = vpop.f32.mrf.mxu1  ;;  %v8249_v47 = vld [vmem:[#allocation17 + $0x578] sm:$0xf0] }
 0x3f0   :  { %3150 = vmatpush.bf16.msrb.mxu2 %v8216_v12  ;;  %3125 = vmatpush.bf16.msrb.mxu0 %v7672_v23  ;;  %v7831_v61 = vld [vmem:[#allocation17 + $0x218] sm:$0xf]  ;;  %v8120_v12 = vor.u32 %v10596_v50, %v8119_v46  ;;  %v3294_v17 = vadd.f32 %v3293_v11, %v3292_v59  ;;  %v7576_v20 = vor.u32 %v10460_v60, %v7575_v58  ;;  %v10704_v23 = vld [vmem:[#allocation17 + $0x7dc] sm:$0xf] }
 0x3f1   :  { %v10524_v62 = vld [vmem:[#allocation17 + $0x234] sm:$0xf0]  ;;  %v3232_v26 = vadd.f32 %v3231_v24, %v3230_v10  ;;  %v8537_v46 = vld [vmem:[#allocation17 + $0x7b8] sm:$0xf0]  ;;  %v11988_v50 = vadd.f32 %v2909_v38, %v2897_v41 }
 0x3f2   :  { %3163 = vmatpush.bf16.msrb.mxu3 %v8472_v31  ;;  %3138 = vmatpush.bf16.msrb.mxu1 %v7928_v25  ;;  %v8087_v6 = vld [vmem:[#allocation17 + $0x418] sm:$0xf]  ;;  %v8376_v31 = vor.u32 %v10660_v57, %v8375_v51  ;;  %v7832_v22 = vor.u32 %v10524_v62, %v7831_v61  ;;  %v8569_v25 = vld [vmem:[#allocation17 + $0x7f8] sm:$0xf0]  ;;  %v3295_v21 = vrot.slane %v3294_v17, 1  ;;  %v7772_v57 = vor.u32 %v10504_v30, %v7769_v19 }
 0x3f3   :  { %v10588_v53 = vld [vmem:[#allocation17 + $0x434] sm:$0xf0]  ;;  %v8572_v40 = vor.u32 %v10704_v23, %v8569_v25  ;;  %v10496_v51 = vld [vmem:[#allocation17 + $0x15c] sm:$0xf]  ;;  %v3233_v61 = vrot.slane %v11988_v50, 4  ;;  %v3284_v62 = vmul.f32 %v11988_v50, %v11988_v50 }
 0x3f4   :  { %3151 = vmatpush.bf16.msrb.mxu2 %v8184_v28  ;;  %3126 = vmatpush.bf16.msrb.mxu0 %v7640_v54  ;;  %v8343_v9 = vld [vmem:[#allocation17 + $0x618] sm:$0xf]  ;;  %v8088_v28 = vor.u32 %v10588_v53, %v8087_v6  ;;  %v8025_v54 = vld [vmem:[#allocation17 + $0x3b8] sm:$0xf0]  ;;  %v3296_v56 = vadd.f32 %v3295_v21, %v3294_v17 }
 0x3f5   :  { %v10652_v13 = vld [vmem:[#allocation17 + $0x634] sm:$0xf0]  ;;  %v8028_v32 = vor.u32 %v10568_v8, %v8025_v54  ;;  %v7993_v58 = vld [vmem:[#allocation17 + $0x378] sm:$0xf0]  ;;  %v3297_v10 = vrot.slane %v3284_v62, 4 }
 0x3f6   :  { %3164 = vmatpush.bf16.msrb.mxu3 %v8440_v29  ;;  %3139 = vmatpush.bf16.msrb.mxu1 %v7896_v52  ;;  %v8344_v29 = vor.u32 %v10652_v13, %v8343_v9  ;;  %v11984_v52 = vmul.f32 0.125, %v3232_v26  ;;  %v3339_v48 = vmul.f32 0.125, %v3296_v56  ;;  %v10688_v6 = vld [vmem:[#allocation17 + $0x75c] sm:$0xf]  ;;  %v3234_v9 = vadd.f32 %v3233_v61, %v11988_v50  ;;  %v2898_v39 = vpop.f32.mrf.mxu2  ;;  %v2911_v14 = vpop.f32.mrf.mxu3 }
 0x3f7   :  { %v8505_v53 = vld [vmem:[#allocation17 + $0x778] sm:$0xf0]  ;;  %v3298_v3 = vadd.f32 %v3297_v10, %v3284_v62 }
 0x3f8   :  { %3152 = vmatpush.bf16.msrb.mxu2 %v8152_v43  ;;  %3127 = vmatpush.bf16.msrb.mxu0 %v7608_v63  ;;  %v10632_v43 = vld [vmem:[#allocation17 + $0x59c] sm:$0xf]  ;;  %v3347_v49 = vmul.f32 %v11984_v52, %v11984_v52  ;;  %v8540_v63 = vor.u32 %v10696_v45, %v8537_v46  ;;  %v3235_v18 = vrot.slane %v3234_v9, 2 }
 0x3f9   :  { %v10488_v11 = vld [vmem:[#allocation17 + $0x11c] sm:$0xf] }
 0x3fa   :  { %3165 = vmatpush.bf16.msrb.mxu3 %v8408_v44  ;;  %3140 = vmatpush.bf16.msrb.mxu1 %v7864_v0  ;;  %v8281_v44 = vld [vmem:[#allocation17 + $0x5b8] sm:$0xf0]  ;;  %v3355_v60 = vsub.f32 %v3339_v48, %v3347_v49  ;;  %v3236_v21 = vadd.f32 %v3235_v18, %v3234_v9 }
 0x3fb   :  { %v8284_v59 = vor.u32 %v10632_v43, %v8281_v44  ;;  %v10624_v0 = vld [vmem:[#allocation17 + $0x55c] sm:$0xf] }
 0x3fc   :  { %3153 = vmatpush.bf16.msrb.mxu2 %v8120_v12  ;;  %3128 = vmatpush.bf16.msrb.mxu0 %v7576_v20  ;;  %v7740_v12 = vor.u32 %v10496_v51, %v7737_v55  ;;  %v8252_v13 = vor.u32 %v10624_v0, %v8249_v47  ;;  %v7961_v24 = vld [vmem:[#allocation17 + $0x338] sm:$0xf0]  ;;  %v3363_v17 = vmax.f32 %v3355_v60, 0.0  ;;  %v8508_v20 = vor.u32 %v10688_v6, %v8505_v53 }
 0x3fd   :  { %v8217_v23 = vld [vmem:[#allocation17 + $0x538] sm:$0xf0]  ;;  %v7964_v38 = vor.u32 %v10552_v16, %v7961_v24  ;;  %v3237_v41 = vrot.slane %v3236_v21, 1 }
 0x3fe   :  { %3166 = vmatpush.bf16.msrb.mxu3 %v8376_v31  ;;  %3141 = vmatpush.bf16.msrb.mxu1 %v7832_v22  ;;  %v7996_v31 = vor.u32 %v10560_v2, %v7993_v58  ;;  %v10616_v22 = vld [vmem:[#allocation17 + $0x51c] sm:$0xf]  ;;  %v2935_v30 = vpop.f32.mrf.mxu1 }
 0x3ff   :  { %3129 = vmatmul.bf16.vlgmr.msrb.gmra.mxu0 %v11948_v4  ;;  %v10680_v25 = vld [vmem:[#allocation17 + $0x71c] sm:$0xf]  ;;  %v8220_v19 = vor.u32 %v10616_v22, %v8217_v23  ;;  %v3238_v46 = vadd.f32 %v3237_v41, %v3236_v21 }
 0x400   :  { %3154 = vmatpush.bf16.msrb.mxu2 %v8088_v28  ;;  %3173 = vmatpush.bf16.msra.mxu0 %v7804_v34  ;;  %v8473_v26 = vld [vmem:[#allocation17 + $0x738] sm:$0xf0]  ;;  %v3299_v28 = vrot.slane %v3298_v3, 2  ;;  %v7708_v34 = vor.u32 %v10488_v11, %v7705_v15 }
 0x401   :  { %3142 = vmatmul.bf16.vlgmr.msrb.gmra.mxu1 %v11950_v5  ;;  %v10544_v8 = vld [vmem:[#allocation17 + $0x2dc] sm:$0xf]  ;;  %v8476_v42 = vor.u32 %v10680_v25, %v8473_v26  ;;  %v12001_v58 = vmul.f32 0.125, %v3238_v46 }
 0x402   :  { %3167 = vmatpush.bf16.msrb.mxu3 %v8344_v29  ;;  %3186 = vmatpush.bf16.msra.mxu1 %v8060_v35  ;;  %v2922_v29 = vpop.f32.mrf.mxu0  ;;  %v10480_v35 = vld [vmem:[#allocation17 + $0xdc] sm:$0xf]  ;;  %v3300_v33 = vadd.f32 %v3299_v28, %v3298_v3 }
 0x403   :  { %3155 = vmatmul.bf16.vlgmr.msrb.gmra.mxu2 %v11946_v1  ;;  %v2936_v37 = vadd.f32 %v2935_v30, %v2922_v29  ;;  %v7929_v54 = vld [vmem:[#allocation17 + $0x2f8] sm:$0xf0]  ;;  %v3348_v10 = vmul.f32 %v12001_v58, %v12001_v58 }
 0x404   :  { %3199 = vmatpush.bf16.msra.mxu2 %v8316_v36  ;;  %3174 = vmatpush.bf16.msra.mxu0 %v7772_v57  ;;  %v7673_v36 = vld [vmem:[#allocation17 + $0xf8] sm:$0xf0]  ;;  %v3301_v48 = vrot.slane %v3300_v33, 1  ;;  %v7932_v57 = vor.u32 %v10544_v8, %v7929_v54 }
 0x405   :  { %3168 = vmatmul.bf16.vlgmr.msrb.gmra.mxu3 %v11952_v7  ;;  %v10608_v56 = vld [vmem:[#allocation17 + $0x4dc] sm:$0xf]  ;;  %v7676_v51 = vor.u32 %v10480_v35, %v7673_v36 }
 0x406   :  { %3212 = vmatpush.bf16.msra.mxu3 %v8572_v40  ;;  %3187 = vmatpush.bf16.msra.mxu1 %v8028_v32  ;;  %v11998_v40 = vadd.f32 1e-05, %v3363_v17  ;;  %v8185_v43 = vld [vmem:[#allocation17 + $0x4f8] sm:$0xf0]  ;;  %v3302_v60 = vadd.f32 %v3301_v48, %v3300_v33  ;;  %v2948_v0 = vpop.f32.mrf.mxu2 }
 0x407   :  { %v10672_v44 = vld [vmem:[#allocation17 + $0x6dc] sm:$0xf]  ;;  %v8188_v32 = vor.u32 %v10608_v56, %v8185_v43  ;;  %v2949_v11 = vadd.f32 %v2948_v0, %v2936_v37 }
 0x408   :  { %3200 = vmatpush.bf16.msra.mxu2 %v8284_v59  ;;  %3175 = vmatpush.bf16.msra.mxu0 %v7740_v12  ;;  %v8441_v45 = vld [vmem:[#allocation17 + $0x6f8] sm:$0xf0]  ;;  %11198 = vrsqrt.f32 %v11998_v40  ;;  %v2961_v47 = vpop.f32.mrf.mxu3  ;;  %v3340_v9 = vmul.f32 0.125, %v3302_v60  ;;  %vm3385_vm1 = vweird.f32 %v11998_v40 }
 0x409   :  { %v10472_v49 = vld [vmem:[#allocation17 + $0x9c] sm:$0xf]  ;;  %v8444_v61 = vor.u32 %v10672_v44, %v8441_v45  ;;  %v12005_v18 = vadd.f32 %v2961_v47, %v2949_v11 }
 0x40a   :  { %3213 = vmatpush.bf16.msra.mxu3 %v8540_v63  ;;  %3188 = vmatpush.bf16.msra.mxu1 %v7996_v31  ;;  %v7641_v59 = vld [vmem:[#allocation17 + $0xb8] sm:$0xf0]  ;;  %v2924_v12 = vpop.f32.mrf.mxu0  ;;  %v2937_v31 = vpop.f32.mrf.mxu1  ;;  %v3356_v17 = vsub.f32 %v3340_v9, %v3348_v10 }
 0x40b   :  { %v10536_v55 = vld [vmem:[#allocation17 + $0x29c] sm:$0xf]  ;;  %v3239_v29 = vrot.slane %v12005_v18, 4  ;;  %v3285_v30 = vmul.f32 %v12005_v18, %v12005_v18 }
 0x40c   :  { %3201 = vmatpush.bf16.msra.mxu2 %v8252_v13  ;;  %3176 = vmatpush.bf16.msra.mxu0 %v7708_v34  ;;  %v7897_v2 = vld [vmem:[#allocation17 + $0x2b8] sm:$0xf0]  ;;  %v7644_v13 = vor.u32 %v10472_v49, %v7641_v59  ;;  %v3364_v28 = vmax.f32 %v3356_v17, 0.0 }
 0x40d   :  { %v10600_v62 = vld [vmem:[#allocation17 + $0x49c] sm:$0xf]  ;;  %v7900_v39 = vor.u32 %v10536_v55, %v7897_v2  ;;  %v3240_v56 = vadd.f32 %v3239_v29, %v12005_v18  ;;  %v3303_v41 = vrot.slane %v3285_v30, 4 }
 0x40e   :  { %3214 = vmatpush.bf16.msra.mxu3 %v8508_v20  ;;  %3189 = vmatpush.bf16.msra.mxu1 %v7964_v38  ;;  %v8153_v63 = vld [vmem:[#allocation17 + $0x4b8] sm:$0xf0]  ;;  %v12007_v21 = vpop.eup %11198  ;;  %v3372_v54 = vadd.f32 1e-05, %v3364_v28  ;;  %v2950_v44 = vpop.f32.mrf.mxu2 }
 0x40f   :  { %v10664_v6 = vld [vmem:[#allocation17 + $0x69c] sm:$0xf]  ;;  %v8156_v14 = vor.u32 %v10600_v62, %v8153_v63  ;;  %v3380_v43 = vmul.f32 %v12007_v21, %v11998_v40  ;;  %vm3386_vm13 = vweird.f32 %v12007_v21 }
 0x410   :  { %3202 = vmatpush.bf16.msra.mxu2 %v8220_v19  ;;  %v8409_v53 = vld [vmem:[#allocation17 + $0x6b8] sm:$0xf0]  ;;  %3177 = vmatpush.bf16.msra.mxu0 %v7676_v51  ;;  %v2963_v45 = vpop.f32.mrf.mxu3  ;;  %11200 = vrsqrt.f32 %v3372_v54  ;;  %v3241_v51 = vrot.slane %v3240_v56, 2  ;;  %vm3395_vm14 = vweird.f32 %v3372_v54  ;;  %vm3387_vm2 = vmor %vm3385_vm1, %vm3386_vm13 }
 0x411   :  { %v10464_v15 = vld [vmem:[#allocation17 + $0x5c] sm:$0xf]  ;;  %v8412_v3 = vor.u32 %v10664_v6, %v8409_v53  ;;  %v3381_v62 = vmul.f32 %v12007_v21, %v3380_v43 }
 0x412   :  { %3215 = vmatpush.bf16.msra.mxu3 %v8476_v42  ;;  %3190 = vmatpush.bf16.msra.mxu1 %v7932_v57  ;;  %v7609_v16 = vld [vmem:[#allocation17 + $0x78] sm:$0xf0]  ;;  %v3304_v57 = vadd.f32 %v3303_v41, %v3285_v30  ;;  %v3242_v55 = vadd.f32 %v3241_v51, %v3240_v56 }
 0x413   :  { %v10528_v24 = vld [vmem:[#allocation17 + $0x25c] sm:$0xf]  ;;  %v7612_v35 = vor.u32 %v10464_v15, %v7609_v16  ;;  %v3382_v6 = vmul.f32 0.5, %v3381_v62 }
 0x414   :  { %3203 = vmatpush.bf16.msra.mxu2 %v8188_v32  ;;  %v7865_v20 = vld [vmem:[#allocation17 + $0x278] sm:$0xf0]  ;;  %3178 = vmatpush.bf16.msra.mxu0 %v7644_v13  ;;  %v3305_v2 = vrot.slane %v3304_v57, 2  ;;  %v3243_v0 = vrot.slane %v3242_v55, 1 }
 0x415   :  { %v10592_v22 = vld [vmem:[#allocation17 + $0x45c] sm:$0xf]  ;;  %v7868_v36 = vor.u32 %v10528_v24, %v7865_v20  ;;  %v3383_v12 = vsub.f32 1.5, %v3382_v6 }
 0x416   :  { %3216 = vmatpush.bf16.msra.mxu3 %v8444_v61  ;;  %v8121_v23 = vld [vmem:[#allocation17 + $0x478] sm:$0xf0]  ;;  %3191 = vmatpush.bf16.msra.mxu1 %v7900_v39  ;;  %v11201_v63 = vpop.eup %11200  ;;  %v3306_v47 = vadd.f32 %v3305_v2, %v3304_v57  ;;  %v3244_v10 = vadd.f32 %v3243_v0, %v3242_v55 }
 0x417   :  { %v10656_v25 = vld [vmem:[#allocation17 + $0x65c] sm:$0xf]  ;;  %v8124_v37 = vor.u32 %v10592_v22, %v8121_v23  ;;  %v3390_v53 = vmul.f32 %v11201_v63, %v3372_v54  ;;  %vm3396_vm12 = vweird.f32 %v11201_v63 }
 0x418   :  { %v8377_v26 = vld [vmem:[#allocation17 + $0x678] sm:$0xf0]  ;;  %3204 = vmatpush.bf16.msra.mxu2 %v8156_v14  ;;  %3179 = vmatpush.bf16.msra.mxu0 %v7612_v35  ;;  %v3307_v11 = vrot.slane %v3306_v47, 1  ;;  %v12021_v39 = vmul.f32 0.125, %v3244_v10  ;;  %vm3397_vm15 = vmor %vm3395_vm14, %vm3396_vm12 }
 0x419   :  { %v10456_v34 = vld [vmem:[#allocation17 + $0x1c] sm:$0xf]  ;;  %v8380_v33 = vor.u32 %v10656_v25, %v8377_v26  ;;  %v3391_v9 = vmul.f32 %v11201_v63, %v3390_v53 }
 0x41a   :  { %v7577_v38 = vld [vmem:[#allocation17 + $0x38] sm:$0xf0]  ;;  %3217 = vmatpush.bf16.msra.mxu3 %v8412_v3  ;;  %3192 = vmatpush.bf16.msra.mxu1 %v7868_v36  ;;  %v3308_v14 = vadd.f32 %v3307_v11, %v3306_v47  ;;  %v3349_v3 = vmul.f32 %v12021_v39, %v12021_v39 }
 0x41b   :  { %v10520_v19 = vld [vmem:[#allocation17 + $0x21c] sm:$0xf]  ;;  %v7580_v32 = vor.u32 %v10456_v34, %v7577_v38  ;;  %v3392_v31 = vmul.f32 0.5, %v3391_v9 }
 0x41c   :  { %v7833_v8 = vld [vmem:[#allocation17 + $0x238] sm:$0xf0]  ;;  %3205 = vmatpush.bf16.msra.mxu2 %v8124_v37  ;;  %v2974_v15 = vpop.f32.mrf.mxu0  ;;  %v3341_v17 = vmul.f32 0.125, %v3308_v14 }
 0x41d   :  { %v10584_v42 = vld [vmem:[#allocation17 + $0x41c] sm:$0xf]  ;;  %v7836_v59 = vor.u32 %v10520_v19, %v7833_v8  ;;  %3180 = vmatpush.bf16.msra.mxu0 %v7580_v32  ;;  %v3393_v13 = vsub.f32 1.5, %v3392_v31 }
 0x41e   :  { %v8089_v46 = vld [vmem:[#allocation17 + $0x438] sm:$0xf0]  ;;  %3218 = vmatpush.bf16.msra.mxu3 %v8380_v33  ;;  %v3357_v26 = vsub.f32 %v3341_v17, %v3349_v3 }
 0x41f   :  { %v10648_v48 = vld [vmem:[#allocation17 + $0x61c] sm:$0xf]  ;;  %v8092_v60 = vor.u32 %v10584_v42, %v8089_v46  ;;  %3193 = vmatpush.bf16.msra.mxu1 %v7836_v59  ;;  %v3394_v16 = vmul.f32 %v11201_v63, %v3393_v13 }
 0x420   :  { %v8345_v49 = vld [vmem:[#allocation17 + $0x638] sm:$0xf0]  ;;  %3181 = vmatmul.bf16.vlgmr.msra.gmra.mxu0 %v11948_v4  ;;  %v2987_v4 = vpop.f32.mrf.mxu1  ;;  %v3365_v40 = vmax.f32 %v3357_v26, 0.0 }
 0x421   :  { %v8348_v61 = vor.u32 %v10648_v48, %v8345_v49  ;;  %3206 = vmatpush.bf16.msra.mxu2 %v8092_v60 }
 0x422   :  { %3194 = vmatmul.bf16.vlgmr.msra.gmra.mxu1 %v11950_v5  ;;  %v3384_v5 = vmul.f32 %v12007_v21, %v3383_v12  ;;  %v3373_v8 = vadd.f32 1e-05, %v3365_v40 }
 0x423   :  { %3219 = vmatpush.bf16.msra.mxu3 %v8348_v61 }
 0x424   :  { %3207 = vmatmul.bf16.vlgmr.msra.gmra.mxu2 %v11946_v1  ;;  %v2988_v1 = vadd.f32 %v2987_v4, %v2974_v15  ;;  %v3388_v20 = vsel %vm3387_vm2, %v12007_v21, %v3384_v5  ;;  %v2976_v29 = vpop.f32.mrf.mxu0  ;;  %11202 = vrsqrt.f32 %v3373_v8  ;;  %vm3405_vm4 = vweird.f32 %v3373_v8 }
 0x426   :  { %3220 = vmatmul.bf16.vlgmr.msra.gmra.mxu3 %v11952_v7  ;;  %v3398_v7 = vsel %vm3397_vm15, %v11201_v63, %v3394_v16  ;;  %v3000_v23 = vpop.f32.mrf.mxu2 }
 0x427   :  { %v3467_v24 = vrot.slane %v3398_v7, 7  ;;  %v3001_v28 = vadd.f32 %v3000_v23, %v2988_v1 }
 0x428   :  { %v3013_v25 = vpop.f32.mrf.mxu3  ;;  %v2989_v30 = vpop.f32.mrf.mxu1 }
 0x429   :  { %v12029_v22 = vsel %vm568_vm9, %v3388_v20, %v3467_v24  ;;  %v12031_v34 = vadd.f32 %v3013_v25, %v3001_v28 }
 0x42a   :  { %v11203_v49 = vpop.eup %11202 }
 0x42b   :  { %v3245_v35 = vrot.slane %v12031_v34, 4  ;;  %v3286_v36 = vmul.f32 %v12031_v34, %v12031_v34  ;;  %v3400_v59 = vmul.f32 %v11203_v49, %v3373_v8  ;;  %vm3406_vm3 = vweird.f32 %v11203_v49 }
 0x42c   :  { %vm3407_vm6 = vmor %vm3405_vm4, %vm3406_vm3 }
 0x42d   :  { %v3246_v37 = vadd.f32 %v3245_v35, %v12031_v34  ;;  %v3309_v21 = vrot.slane %v3286_v36, 4  ;;  %v3401_v63 = vmul.f32 %v11203_v49, %v3400_v59 }
 0x42e   :  { %v3002_v38 = vpop.f32.mrf.mxu2 }
 0x42f   :  { %v3247_v54 = vrot.slane %v3246_v37, 2  ;;  %v3310_v56 = vadd.f32 %v3309_v21, %v3286_v36  ;;  %v3402_v0 = vmul.f32 0.5, %v3401_v63 }
 0x430   :  { %v3015_v19 = vpop.f32.mrf.mxu3 }
 0x431   :  { %v3248_v41 = vadd.f32 %v3247_v54, %v3246_v37  ;;  %v3311_v33 = vrot.slane %v3310_v56, 2  ;;  %v3403_v31 = vsub.f32 1.5, %v3402_v0 }
 0x433   :  { %v3249_v42 = vrot.slane %v3248_v41, 1  ;;  %v3312_v43 = vadd.f32 %v3311_v33, %v3310_v56  ;;  %v3404_v15 = vmul.f32 %v11203_v49, %v3403_v31 }
 0x435   :  { %v3250_v44 = vadd.f32 %v3249_v42, %v3248_v41  ;;  %v3313_v45 = vrot.slane %v3312_v43, 1  ;;  %v3408_v7 = vsel %vm3407_vm6, %v11203_v49, %v3404_v15 }
 0x436   :  { %v3468_v3 = vrot.slane %v3408_v7, 6 }
 0x437   :  { %v12037_v46 = vmul.f32 0.125, %v3250_v44  ;;  %v3314_v48 = vadd.f32 %v3313_v45, %v3312_v43 }
 0x439   :  { %v3342_v51 = vmul.f32 0.125, %v3314_v48  ;;  %v3350_v57 = vmul.f32 %v12037_v46, %v12037_v46 }
 0x43b   :  { %v3358_v32 = vsub.f32 %v3342_v51, %v3350_v57 }
 0x43c   :  { %v3026_v2 = vpop.f32.mrf.mxu0 }
 0x43d   :  { %v3366_v55 = vmax.f32 %v3358_v32, 0.0 }
 0x43e   :  { %v3039_v60 = vpop.f32.mrf.mxu1 }
 0x43f   :  { %v3040_v61 = vadd.f32 %v3039_v60, %v3026_v2  ;;  %v3374_v62 = vadd.f32 1e-05, %v3366_v55 }
 0x441   :  { %11204 = vrsqrt.f32 %v3374_v62  ;;  %vm3415_vm7 = vweird.f32 %v3374_v62 }
 0x444   :  { %v3028_v9 = vpop.f32.mrf.mxu0 }
 0x446   :  { %v3052_v47 = vpop.f32.mrf.mxu2  ;;  %v3041_v10 = vpop.f32.mrf.mxu1 }
 0x447   :  { %v3053_v53 = vadd.f32 %v3052_v47, %v3040_v61  ;;  %v11205_v11 = vpop.eup %11204 }
 0x448   :  { %v3065_v6 = vpop.f32.mrf.mxu3  ;;  %v3410_v13 = vmul.f32 %v11205_v11, %v3374_v62  ;;  %vm3416_vm5 = vweird.f32 %v11205_v11 }
 0x449   :  { %v12041_v12 = vadd.f32 %v3065_v6, %v3053_v53  ;;  %vm3417_vm8 = vmor %vm3415_vm7, %vm3416_vm5 }
 0x44a   :  { %v3411_v14 = vmul.f32 %v11205_v11, %v3410_v13 }
 0x44b   :  { %v3251_v38 = vrot.slane %v12041_v12, 4  ;;  %v3287_v19 = vmul.f32 %v12041_v12, %v12041_v12 }
 0x44c   :  { %v3412_v4 = vmul.f32 0.5, %v3411_v14 }
 0x44d   :  { %v3252_v8 = vadd.f32 %v3251_v38, %v12041_v12  ;;  %v3315_v54 = vrot.slane %v3287_v19, 4 }
 0x44e   :  { %v3054_v5 = vpop.f32.mrf.mxu2  ;;  %v3413_v1 = vsub.f32 1.5, %v3412_v4 }
 0x44f   :  { %v3316_v41 = vadd.f32 %v3315_v54, %v3287_v19  ;;  %v9219_v54 = vld [vmem:[#allocation22 + $0x508] sm:$0xf] }
 0x450   :  { %v3067_v16 = vpop.f32.mrf.mxu3  ;;  %v3414_v24 = vmul.f32 %v11205_v11, %v3413_v1 }
 0x451   :  { %v3317_v45 = vrot.slane %v3316_v41, 2 }
 0x452   :  { %v3418_v17 = vsel %vm3417_vm8, %v11205_v11, %v3414_v24  ;;  %vm3477_vm8 = vcmask 1044484  }
 0x453   :  { %v3469_v20 = vrot.slane %v3418_v17, 5  ;;  %v3318_v57 = vadd.f32 %v3317_v45, %v3316_v41  ;;  %v10929_v45 = vld [vmem:[#allocation22 + $0x6e0] sm:$0xf0] }
 0x455   :  { %v3475_v23 = vsel %vm1214_vm10, %v3468_v3, %v3469_v20  ;;  %v3319_v47 = vrot.slane %v3318_v57, 1 }
 0x456   :  { %v12046_v25 = vsel %vm268_vm0, %v12029_v22, %v3475_v23  ;;  %v3253_v22 = vrot.slane %v3252_v8, 2 }
 0x457   :  { %v3320_v13 = vadd.f32 %v3319_v47, %v3318_v57 }
 0x458   :  { %v3254_v44 = vadd.f32 %v3253_v22, %v3252_v8 }
 0x459   :  { %v3343_v17 = vmul.f32 0.125, %v3320_v13  ;;  %v8715_v13 = vld [vmem:[#allocation22 + $0x118] sm:$0xf] }
 0x45a   :  { %v3255_v51 = vrot.slane %v3254_v44, 1 }
 0x45c   :  { %v3078_v26 = vpop.f32.mrf.mxu0  ;;  %v3256_v0 = vadd.f32 %v3255_v51, %v3254_v44  ;;  %v9443_v44 = vld [vmem:[#allocation22 + $0x6c8] sm:$0xf]  ;;  %v10754_v51 = vld [vmem:[#allocation22 + $0x168] sm:$0xf0] }
 0x45e   :  { %v3091_v28 = vpop.f32.mrf.mxu1  ;;  %v12063_v31 = vmul.f32 0.125, %v3256_v0 }
 0x45f   :  { %v3092_v29 = vadd.f32 %v3091_v28, %v3078_v26 }
 0x460   :  { %v3351_v3 = vmul.f32 %v12063_v31, %v12063_v31 }
 0x464   :  { %v3080_v35 = vpop.f32.mrf.mxu0 }
 0x465   :  { %v10761_v35 = vld [vmem:[#allocation22 + $0x1a0] sm:$0xf0] }
 0x466   :  { %v3104_v30 = vpop.f32.mrf.mxu2  ;;  %v3093_v36 = vpop.f32.mrf.mxu1 }
 0x467   :  { %v3105_v56 = vadd.f32 %v3104_v30, %v3092_v29  ;;  %v8995_v36 = vld [vmem:[#allocation22 + $0x348] sm:$0xf] }
 0x468   :  { %v3117_v40 = vpop.f32.mrf.mxu3 }
 0x469   :  { %v12052_v33 = vadd.f32 %v3117_v40, %v3105_v56  ;;  %v8771_v40 = vld [vmem:[#allocation22 + $0x188] sm:$0xf]  ;;  %v10873_v56 = vld [vmem:[#allocation22 + $0x520] sm:$0xf0] }
 0x46a   :  { %v8772_v8 = vor.u32 %v10761_v35, %v8771_v40 }
 0x46b   :  { %v3257_v48 = vrot.slane %v12052_v33, 4  ;;  %v3288_v49 = vmul.f32 %v12052_v33, %v12052_v33 }
 0x46c   :  { %6425 = vmatpush.bf16.msrb.mxu0 %v8772_v8  ;;  %v9135_v8 = vld [vmem:[#allocation22 + $0x460] sm:$0xf] }
 0x46d   :  { %v3258_v32 = vadd.f32 %v3257_v48, %v12052_v33  ;;  %v3321_v59 = vrot.slane %v3288_v49, 4  ;;  %v9444_v48 = vor.u32 %v10929_v45, %v9443_v44 }
 0x46e   :  { %v3106_v37 = vpop.f32.mrf.mxu2 }
 0x46f   :  { %v3259_v6 = vrot.slane %v3258_v32, 2  ;;  %v3322_v53 = vadd.f32 %v3321_v59, %v3288_v49  ;;  %v10817_v37 = vld [vmem:[#allocation22 + $0x360] sm:$0xf0]  ;;  %v8743_v49 = vld [vmem:[#allocation22 + $0x150] sm:$0xf]  ;;  %6464 = vmatpush.bf16.msrb.mxu3 %v9444_v48 }
 0x470   :  { %v3119_v21 = vpop.f32.mrf.mxu3  ;;  %v8744_v57 = vor.u32 %v10754_v51, %v8743_v49  ;;  %v10810_v59 = vld [vmem:[#allocation22 + $0x328] sm:$0xf0] }
 0x471   :  { %v3260_v14 = vadd.f32 %v3259_v6, %v3258_v32  ;;  %v3323_v15 = vrot.slane %v3322_v53, 2  ;;  %v3359_v21 = vsub.f32 %v3343_v17, %v3351_v3  ;;  %v8967_v32 = vld [vmem:[#allocation22 + $0x310] sm:$0xf] }
 0x472   :  { %6426 = vmatpush.bf16.msrb.mxu0 %v8744_v57  ;;  %v8659_v57 = vld [vmem:[#allocation22 + $0xa8] sm:$0xf] }
 0x473   :  { %v3261_v20 = vrot.slane %v3260_v14, 1  ;;  %v3324_v23 = vadd.f32 %v3323_v15, %v3322_v53  ;;  %v3367_v0 = vmax.f32 %v3359_v21, 0.0  ;;  %v8939_v15 = vld [vmem:[#allocation22 + $0x2d8] sm:$0xf] }
 0x475   :  { %v3262_v38 = vadd.f32 %v3261_v20, %v3260_v14  ;;  %v3325_v19 = vrot.slane %v3324_v23, 1  ;;  %v10747_v14 = vld [vmem:[#allocation22 + $0x130] sm:$0xf0]  ;;  %v12076_v35 = vadd.f32 1e-05, %v3367_v0 }
 0x476   :  { %v9107_v0 = vld [vmem:[#allocation22 + $0x428] sm:$0xf] }
 0x477   :  { %11206 = vrsqrt.f32 %v12076_v35  ;;  %vm3425_vm12 = vweird.f32 %v12076_v35 }
 0x47c   :  { %v3130_v42 = vpop.f32.mrf.mxu0 }
 0x47e   :  { %v3143_v43 = vpop.f32.mrf.mxu1 }
 0x47f   :  { %v3144_v55 = vadd.f32 %v3143_v43, %v3130_v42  ;;  %v8996_v42 = vor.u32 %v10817_v37, %v8995_v36  ;;  %v9220_v43 = vor.u32 %v10873_v56, %v9219_v54  ;;  %v8687_v36 = vld [vmem:[#allocation22 + $0xe0] sm:$0xf]  ;;  %v10740_v37 = vld [vmem:[#allocation22 + $0xf8] sm:$0xf0] }
 0x480   :  { %v8688_v21 = vor.u32 %v10740_v37, %v8687_v36 }
 0x481   :  { %6438 = vmatpush.bf16.msrb.mxu1 %v8996_v42  ;;  %6451 = vmatpush.bf16.msrb.mxu2 %v9220_v43  ;;  %v10908_v42 = vld [vmem:[#allocation22 + $0x638] sm:$0xf0] }
 0x484   :  { %v3132_v62 = vpop.f32.mrf.mxu0 }
 0x485   :  { %v10866_v62 = vld [vmem:[#allocation22 + $0x4e8] sm:$0xf0] }
 0x486   :  { %v3156_v2 = vpop.f32.mrf.mxu2  ;;  %v3145_v63 = vpop.f32.mrf.mxu1 }
 0x487   :  { %v3157_v61 = vadd.f32 %v3156_v2, %v3144_v55  ;;  %v9191_v55 = vld [vmem:[#allocation22 + $0x4d0] sm:$0xf]  ;;  %v12068_v2 = vmul.f32 0.125, %v3262_v38  ;;  %v8911_v38 = vld [vmem:[#allocation22 + $0x2a0] sm:$0xf] }
 0x488   :  { %v3169_v60 = vpop.f32.mrf.mxu3  ;;  %v9415_v63 = vld [vmem:[#allocation22 + $0x690] sm:$0xf]  ;;  %v9192_v53 = vor.u32 %v10866_v62, %v9191_v55 }
 0x489   :  { %v12058_v9 = vadd.f32 %v3169_v60, %v3157_v61  ;;  %v3326_v60 = vadd.f32 %v3325_v19, %v3324_v23  ;;  %v8968_v61 = vor.u32 %v10810_v59, %v8967_v32  ;;  %v3352_v3 = vmul.f32 %v12068_v2, %v12068_v2  ;;  %v10796_v19 = vld [vmem:[#allocation22 + $0x2b8] sm:$0xf0]  ;;  %v10733_v32 = vld [vmem:[#allocation22 + $0xc0] sm:$0xf0]  ;;  %v8883_v59 = vld [vmem:[#allocation22 + $0x268] sm:$0xf] }
 0x48a   :  { %6452 = vmatpush.bf16.msrb.mxu2 %v9192_v53  ;;  %v8912_v56 = vor.u32 %v10796_v19, %v8911_v38  ;;  %v8660_v62 = vor.u32 %v10733_v32, %v8659_v57  ;;  %v10894_v38 = vld [vmem:[#allocation22 + $0x5c8] sm:$0xf0]  ;;  %v9275_v57 = vld [vmem:[#allocation22 + $0x578] sm:$0xf]  ;;  %v10887_v32 = vld [vmem:[#allocation22 + $0x590] sm:$0xf0] }
 0x48b   :  { %v3263_v10 = vrot.slane %v12058_v9, 4  ;;  %v3289_v11 = vmul.f32 %v12058_v9, %v12058_v9  ;;  %6439 = vmatpush.bf16.msrb.mxu1 %v8968_v61  ;;  %v3344_v17 = vmul.f32 0.125, %v3326_v60 }
 0x48d   :  { %v3264_v4 = vadd.f32 %v3263_v10, %v12058_v9  ;;  %v3327_v5 = vrot.slane %v3289_v11, 4  ;;  %v10922_v10 = vld [vmem:[#allocation22 + $0x6a8] sm:$0xf0]  ;;  %v3360_v54 = vsub.f32 %v3344_v17, %v3352_v3 }
 0x48e   :  { %v3158_v16 = vpop.f32.mrf.mxu2  ;;  %v10782_v3 = vld [vmem:[#allocation22 + $0x248] sm:$0xf0] }
 0x48f   :  { %v3265_v7 = vrot.slane %v3264_v4, 2  ;;  %v3328_v24 = vadd.f32 %v3327_v5, %v3289_v11  ;;  %v9416_v11 = vor.u32 %v10922_v10, %v9415_v63  ;;  %v8716_v16 = vor.u32 %v10747_v14, %v8715_v13  ;;  %v10789_v63 = vld [vmem:[#allocation22 + $0x280] sm:$0xf0]  ;;  %v9331_v13 = vld [vmem:[#allocation22 + $0x5e8] sm:$0xf] }
 0x490   :  { %v3171_v1 = vpop.f32.mrf.mxu3  ;;  %v3368_v53 = vmax.f32 %v3360_v54, 0.0  ;;  %v8884_v10 = vor.u32 %v10789_v63, %v8883_v59  ;;  %v10901_v14 = vld [vmem:[#allocation22 + $0x600] sm:$0xf0]  ;;  %v8575_v63 = vld [vmem:[#allocation22] sm:$0xf] }
 0x491   :  { %v3266_v26 = vadd.f32 %v3265_v7, %v3264_v4  ;;  %v3329_v28 = vrot.slane %v3328_v24, 2  ;;  %v10803_v1 = vld [vmem:[#allocation22 + $0x2f0] sm:$0xf0]  ;;  %v9163_v7 = vld [vmem:[#allocation22 + $0x498] sm:$0xf]  ;;  %6465 = vmatpush.bf16.msrb.mxu3 %v9416_v11  ;;  %6427 = vmatpush.bf16.msrb.mxu0 %v8716_v16 }
 0x492   :  { %v8940_v20 = vor.u32 %v10803_v1, %v8939_v15  ;;  %v8631_v16 = vld [vmem:[#allocation22 + $0x70] sm:$0xf]  ;;  %v10726_v1 = vld [vmem:[#allocation22 + $0x88] sm:$0xf0] }
 0x493   :  { %v3267_v29 = vrot.slane %v3266_v26, 1  ;;  %v3330_v30 = vadd.f32 %v3329_v28, %v3328_v24  ;;  %v10859_v24 = vld [vmem:[#allocation22 + $0x4b0] sm:$0xf0] }
 0x494   :  { %v9164_v23 = vor.u32 %v10859_v24, %v9163_v7  ;;  %v10915_v28 = vld [vmem:[#allocation22 + $0x670] sm:$0xf0]  ;;  %6440 = vmatpush.bf16.msrb.mxu1 %v8940_v20  ;;  %v8855_v7 = vld [vmem:[#allocation22 + $0x230] sm:$0xf] }
 0x495   :  { %v3268_v22 = vadd.f32 %v3267_v29, %v3266_v26  ;;  %v3331_v41 = vrot.slane %v3330_v30, 1  ;;  %v9387_v26 = vld [vmem:[#allocation22 + $0x658] sm:$0xf]  ;;  %6428 = vmatpush.bf16.msrb.mxu0 %v8688_v21  ;;  %v9079_v20 = vld [vmem:[#allocation22 + $0x3f0] sm:$0xf] }
 0x496   :  { %v9388_v40 = vor.u32 %v10915_v28, %v9387_v26  ;;  %6453 = vmatpush.bf16.msrb.mxu2 %v9164_v23  ;;  %v12084_v23 = vadd.f32 1e-05, %v3368_v53  ;;  %v8632_v26 = vor.u32 %v10726_v1, %v8631_v16  ;;  %v8856_v28 = vor.u32 %v10782_v3, %v8855_v7  ;;  %v9247_v16 = vld [vmem:[#allocation22 + $0x540] sm:$0xf]  ;;  %v10880_v1 = vld [vmem:[#allocation22 + $0x558] sm:$0xf0] }
 0x497   :  { %v12070_v47 = vmul.f32 0.125, %v3268_v22  ;;  %v3332_v6 = vadd.f32 %v3331_v41, %v3330_v30  ;;  %v10852_v22 = vld [vmem:[#allocation22 + $0x478] sm:$0xf0]  ;;  %v9359_v41 = vld [vmem:[#allocation22 + $0x620] sm:$0xf] }
 0x498   :  { %6466 = vmatpush.bf16.msrb.mxu3 %v9388_v40  ;;  %v9136_v45 = vor.u32 %v10852_v22, %v9135_v8  ;;  %v9360_v48 = vor.u32 %v10908_v42, %v9359_v41  ;;  %6441 = vmatpush.bf16.msrb.mxu1 %v8912_v56  ;;  %v8603_v56 = vld [vmem:[#allocation22 + $0x38] sm:$0xf]  ;;  %v10719_v22 = vld [vmem:[#allocation22 + $0x50] sm:$0xf0]  ;;  %11208 = vrsqrt.f32 %v12084_v23  ;;  %v10985_v3 = vld [vmem:[#allocation22 + $0x8a0] sm:$0xf0]  ;;  %vm3435_vm15 = vweird.f32 %v12084_v23 }
 0x499   :  { %v3345_v29 = vmul.f32 0.125, %v3332_v6  ;;  %v3353_v30 = vmul.f32 %v12070_v47, %v12070_v47  ;;  %v10845_v6 = vld [vmem:[#allocation22 + $0x440] sm:$0xf0]  ;;  %6429 = vmatpush.bf16.msrb.mxu0 %v8660_v62  ;;  %v8827_v41 = vld [vmem:[#allocation22 + $0x1f8] sm:$0xf]  ;;  %v9276_v62 = vor.u32 %v10887_v32, %v9275_v57 }
 0x49a   :  { %6454 = vmatpush.bf16.msrb.mxu2 %v9136_v45  ;;  %v9108_v11 = vor.u32 %v10845_v6, %v9107_v0  ;;  %v10775_v45 = vld [vmem:[#allocation22 + $0x210] sm:$0xf0]  ;;  %v10712_v0 = vld [vmem:[#allocation22 + $0x18] sm:$0xf0]  ;;  %v8799_v6 = vld [vmem:[#allocation22 + $0x1c0] sm:$0xf] }
 0x49b   :  { %v3361_v43 = vsub.f32 %v3345_v29, %v3353_v30  ;;  %v10838_v29 = vld [vmem:[#allocation22 + $0x408] sm:$0xf0]  ;;  %v9303_v30 = vld [vmem:[#allocation22 + $0x5b0] sm:$0xf] }
 0x49c   :  { %6467 = vmatpush.bf16.msrb.mxu3 %v9360_v48  ;;  %6442 = vmatpush.bf16.msrb.mxu1 %v8884_v10  ;;  %v9080_v21 = vor.u32 %v10838_v29, %v9079_v20  ;;  %v9304_v54 = vor.u32 %v10894_v38, %v9303_v30  ;;  %v9051_v48 = vld [vmem:[#allocation22 + $0x3b8] sm:$0xf]  ;;  %v9248_v29 = vor.u32 %v10880_v1, %v9247_v16  ;;  %v9891_v30 = vld [vmem:[#allocation22 + $0xa48] sm:$0xf]  ;;  %v11027_v16 = vld [vmem:[#allocation22 + $0x9f0] sm:$0xf0] }
 0x49d   :  { %v3182_v4 = vpop.f32.mrf.mxu0  ;;  %v3369_v15 = vmax.f32 %v3361_v43, 0.0  ;;  %6430 = vmatpush.bf16.msrb.mxu0 %v8632_v26 }
 0x49e   :  { %6455 = vmatpush.bf16.msrb.mxu2 %v9108_v11  ;;  %v10768_v11 = vld [vmem:[#allocation22 + $0x1d8] sm:$0xf0] }
 0x49f   :  { %v3195_v5 = vpop.f32.mrf.mxu1  ;;  %v12086_v40 = vadd.f32 1e-05, %v3369_v15  ;;  %v8800_v15 = vor.u32 %v10768_v11, %v8799_v6  ;;  %v11146_v11 = vld [vmem:[#allocation22 + $0xda8] sm:$0xf0] }
 0x4a0   :  { %v3196_v44 = vadd.f32 %v3195_v5, %v3182_v4  ;;  %v9332_v5 = vor.u32 %v10901_v14, %v9331_v13  ;;  %6443 = vmatpush.bf16.msrb.mxu1 %v8856_v28  ;;  %v9023_v13 = vld [vmem:[#allocation22 + $0x380] sm:$0xf]  ;;  %v8576_v14 = vor.u32 %v10712_v0, %v8575_v63  ;;  %v11090_v63 = vld [vmem:[#allocation22 + $0xbe8] sm:$0xf0] }
 0x4a1   :  { %11210 = vrsqrt.f32 %v12086_v40  ;;  %vm3445_vm3 = vweird.f32 %v12086_v40 }
 0x4a2   :  { %6468 = vmatpush.bf16.msrb.mxu3 %v9332_v5  ;;  %6456 = vmatpush.bf16.msrb.mxu2 %v9080_v21  ;;  %v10824_v5 = vld [vmem:[#allocation22 + $0x398] sm:$0xf0] }
 0x4a3   :  { %v9024_v28 = vor.u32 %v10824_v5, %v9023_v13  ;;  %v9611_v13 = vld [vmem:[#allocation22 + $0x818] sm:$0xf] }
 0x4a4   :  { %v9835_v5 = vld [vmem:[#allocation22 + $0x9d8] sm:$0xf] }
 0x4a5   :  { %v3184_v60 = vpop.f32.mrf.mxu0 }
 0x4a6   :  { %6469 = vmatpush.bf16.msrb.mxu3 %v9304_v54  ;;  %v10115_v54 = vld [vmem:[#allocation22 + $0xc08] sm:$0xf] }
 0x4a7   :  { %v3208_v49 = vpop.f32.mrf.mxu2  ;;  %v3197_v61 = vpop.f32.mrf.mxu1 }
 0x4a8   :  { %v3209_v55 = vadd.f32 %v3208_v49, %v3196_v44  ;;  %v8604_v44 = vor.u32 %v10719_v22, %v8603_v56  ;;  %v8828_v49 = vor.u32 %v10775_v45, %v8827_v41  ;;  %v12091_v61 = vpop.eup %11206  ;;  %v11097_v56 = vld [vmem:[#allocation22 + $0xc20] sm:$0xf0]  ;;  %v10339_v41 = vld [vmem:[#allocation22 + $0xdc8] sm:$0xf] }
 0x4a9   :  { %v3221_v51 = vpop.f32.mrf.mxu3  ;;  %v12093_v20 = vpop.eup %11208  ;;  %v3420_v26 = vmul.f32 %v12091_v61, %v12076_v35  ;;  %v10116_v22 = vor.u32 %v11097_v56, %v10115_v54  ;;  %v9583_v54 = vld [vmem:[#allocation22 + $0x7e0] sm:$0xf]  ;;  %v10964_v56 = vld [vmem:[#allocation22 + $0x7f8] sm:$0xf0]  ;;  %vm3426_vm11 = vweird.f32 %v12091_v61 }
 0x4aa   :  { %v12078_v4 = vadd.f32 %v3221_v51, %v3209_v55  ;;  %v10831_v51 = vld [vmem:[#allocation22 + $0x3d0] sm:$0xf0]  ;;  %6431 = vmatpush.bf16.msrb.mxu0 %v8604_v44  ;;  %6444 = vmatpush.bf16.msrb.mxu1 %v8828_v49  ;;  %v10978_v49 = vld [vmem:[#allocation22 + $0x868] sm:$0xf0]  ;;  %v3430_v32 = vmul.f32 %v12093_v20, %v12084_v23  ;;  %vm3436_vm13 = vweird.f32 %v12093_v20  ;;  %vm12123_vm14 = vmor %vm3425_vm12, %vm3426_vm11  ;;  %vm3479_vm11 = vcmask 1046534  }
 0x4ab   :  { %v9052_v60 = vor.u32 %v10831_v51, %v9051_v48  ;;  %6470 = vmatpush.bf16.msrb.mxu3 %v9276_v62  ;;  %v9863_v51 = vld [vmem:[#allocation22 + $0xa10] sm:$0xf]  ;;  %v3421_v57 = vmul.f32 %v12091_v61, %v3420_v26  ;;  %vm12133_vm2 = vmor %vm3435_vm15, %vm3436_vm13  ;;  %vm3481_vm12 = vcmask 1045508   ;;  %vm3483_vm13 = vcmask 1043456  }
 0x4ac   :  { %v3269_v24 = vrot.slane %v12078_v4, 4  ;;  %v3290_v17 = vmul.f32 %v12078_v4, %v12078_v4  ;;  %v10087_v62 = vld [vmem:[#allocation22 + $0xbd0] sm:$0xf] }
 0x4ad   :  { %6457 = vmatpush.bf16.msrb.mxu2 %v9052_v60  ;;  %v11034_v60 = vld [vmem:[#allocation22 + $0xa28] sm:$0xf0]  ;;  %v3422_v26 = vmul.f32 0.5, %v3421_v57 }
 0x4ae   :  { %v3270_v36 = vadd.f32 %v3269_v24, %v12078_v4  ;;  %v3333_v37 = vrot.slane %v3290_v17, 4  ;;  %6432 = vmatpush.bf16.msrb.mxu0 %v8576_v14  ;;  %6445 = vmatpush.bf16.msrb.mxu1 %v8800_v15  ;;  %v9864_v6 = vor.u32 %v11034_v60, %v9863_v51  ;;  %v10971_v15 = vld [vmem:[#allocation22 + $0x830] sm:$0xf0]  ;;  %v10957_v60 = vld [vmem:[#allocation22 + $0x7c0] sm:$0xf0] }
 0x4af   :  { %v3210_v19 = vpop.f32.mrf.mxu2  ;;  %6471 = vmatpush.bf16.msrb.mxu3 %v9248_v29 }
 0x4b0   :  { %v3271_v42 = vrot.slane %v3270_v36, 2  ;;  %v3334_v43 = vadd.f32 %v3333_v37, %v3290_v17  ;;  %v9667_v17 = vld [vmem:[#allocation22 + $0x888] sm:$0xf]  ;;  %v12097_v37 = vpop.eup %11210 }
 0x4b1   :  { %v3223_v8 = vpop.f32.mrf.mxu3  ;;  %v9668_v19 = vor.u32 %v10985_v3, %v9667_v17  ;;  %6458 = vmatpush.bf16.msrb.mxu2 %v9024_v28  ;;  %v10059_v17 = vld [vmem:[#allocation22 + $0xb98] sm:$0xf]  ;;  %v11083_v3 = vld [vmem:[#allocation22 + $0xbb0] sm:$0xf0]  ;;  %v3431_v28 = vmul.f32 %v12093_v20, %v3430_v32  ;;  %vm3446_vm1 = vweird.f32 %v12097_v37 }
 0x4b2   :  { %v3272_v59 = vadd.f32 %v3271_v42, %v3270_v36  ;;  %v3335_v55 = vrot.slane %v3334_v43, 2  ;;  %v11041_v36 = vld [vmem:[#allocation22 + $0xa60] sm:$0xf0]  ;;  %vm12147_vm4 = vmor %vm3445_vm3, %vm3446_vm1 }
 0x4b3   :  { %v9892_v8 = vor.u32 %v11041_v36, %v9891_v30  ;;  %v11153_v42 = vld [vmem:[#allocation22 + $0xde0] sm:$0xf0]  ;;  %6477 = vmatpush.bf16.msra.mxu0 %v9668_v19  ;;  %v10060_v30 = vor.u32 %v11083_v3, %v10059_v17  ;;  %v10283_v36 = vld [vmem:[#allocation22 + $0xd58] sm:$0xf]  ;;  %v3432_v51 = vmul.f32 0.5, %v3431_v28 }
 0x4b4   :  { %v3273_v53 = vrot.slane %v3272_v59, 1  ;;  %v3336_v10 = vadd.f32 %v3335_v55, %v3334_v43  ;;  %v9639_v43 = vld [vmem:[#allocation22 + $0x850] sm:$0xf]  ;;  %v10340_v48 = vor.u32 %v11153_v42, %v10339_v41  ;;  %v11020_v41 = vld [vmem:[#allocation22 + $0x9b8] sm:$0xf0] }
 0x4b5   :  { %6490 = vmatpush.bf16.msra.mxu1 %v9892_v8  ;;  %6503 = vmatpush.bf16.msra.mxu2 %v10116_v22  ;;  %v9640_v55 = vor.u32 %v10978_v49, %v9639_v43  ;;  %v9807_v22 = vld [vmem:[#allocation22 + $0x9a0] sm:$0xf]  ;;  %v9584_v43 = vor.u32 %v10964_v56, %v9583_v54  ;;  %v11132_v49 = vld [vmem:[#allocation22 + $0xd38] sm:$0xf0]  ;;  %v10950_v17 = vld [vmem:[#allocation22 + $0x788] sm:$0xf0] }
 0x4b6   :  { %v3274_v7 = vadd.f32 %v3273_v53, %v3272_v59  ;;  %v3337_v24 = vrot.slane %v3336_v10, 1  ;;  %v3440_v59 = vmul.f32 %v12097_v37, %v12086_v40  ;;  %6516 = vmatpush.bf16.msra.mxu3 %v10340_v48  ;;  %v10088_v53 = vor.u32 %v11090_v63, %v10087_v62  ;;  %v10031_v42 = vld [vmem:[#allocation22 + $0xb60] sm:$0xf]  ;;  %v9779_v62 = vld [vmem:[#allocation22 + $0x968] sm:$0xf] }
 0x4b7   :  { %6478 = vmatpush.bf16.msra.mxu0 %v9640_v55  ;;  %v10255_v48 = vld [vmem:[#allocation22 + $0xd20] sm:$0xf]  ;;  %v9555_v55 = vld [vmem:[#allocation22 + $0x7a8] sm:$0xf]  ;;  %v11013_v63 = vld [vmem:[#allocation22 + $0x980] sm:$0xf0] }
 0x4b8   :  { %v12099_v21 = vmul.f32 0.125, %v3274_v7  ;;  %v3338_v38 = vadd.f32 %v3337_v24, %v3336_v10  ;;  %v10311_v10 = vld [vmem:[#allocation22 + $0xd90] sm:$0xf]  ;;  %v9612_v7 = vor.u32 %v10971_v15, %v9611_v13  ;;  %v9836_v24 = vor.u32 %v11027_v16, %v9835_v5  ;;  %v10227_v13 = vld [vmem:[#allocation22 + $0xce8] sm:$0xf] }
 0x4b9   :  { %v10312_v14 = vor.u32 %v11146_v11, %v10311_v10  ;;  %6491 = vmatpush.bf16.msra.mxu1 %v9864_v6  ;;  %v3441_v29 = vmul.f32 %v12097_v37, %v3440_v59  ;;  %6504 = vmatpush.bf16.msra.mxu2 %v10088_v53  ;;  %v10256_v59 = vor.u32 %v11132_v49, %v10255_v48  ;;  %v11069_v6 = vld [vmem:[#allocation22 + $0xb40] sm:$0xf0]  ;;  %v3423_v53 = vsub.f32 1.5, %v3422_v26  ;;  %v9751_v3 = vld [vmem:[#allocation22 + $0x930] sm:$0xf] }
 0x4ba   :  { %v3346_v44 = vmul.f32 0.125, %v3338_v38  ;;  %v3354_v45 = vmul.f32 %v12099_v21, %v12099_v21  ;;  %v11139_v38 = vld [vmem:[#allocation22 + $0xd70] sm:$0xf0]  ;;  %v9556_v10 = vor.u32 %v10957_v60, %v9555_v55  ;;  %v9780_v11 = vor.u32 %v11013_v63, %v9779_v62  ;;  %v11006_v28 = vld [vmem:[#allocation22 + $0x948] sm:$0xf0] }
 0x4bb   :  { %6517 = vmatpush.bf16.msra.mxu3 %v10312_v14  ;;  %v10284_v8 = vor.u32 %v11139_v38, %v10283_v36  ;;  %6479 = vmatpush.bf16.msra.mxu0 %v9612_v7  ;;  %v3442_v57 = vmul.f32 0.5, %v3441_v29  ;;  %v11125_v14 = vld [vmem:[#allocation22 + $0xd00] sm:$0xf0]  ;;  %v3433_v15 = vsub.f32 1.5, %v3432_v51  ;;  %v9975_v29 = vld [vmem:[#allocation22 + $0xaf0] sm:$0xf]  ;;  %v3424_v36 = vmul.f32 %v12091_v61, %v3423_v53 }
 0x4bc   :  { %v3362_v0 = vsub.f32 %v3346_v44, %v3354_v45  ;;  %v9808_v44 = vor.u32 %v11020_v41, %v9807_v22  ;;  %v11076_v45 = vld [vmem:[#allocation22 + $0xb78] sm:$0xf0]  ;;  %v10228_v7 = vor.u32 %v11125_v14, %v10227_v13  ;;  %v10199_v54 = vld [vmem:[#allocation22 + $0xcb0] sm:$0xf]  ;;  %v11118_v56 = vld [vmem:[#allocation22 + $0xcc8] sm:$0xf0] }
 0x4bd   :  { %6492 = vmatpush.bf16.msra.mxu1 %v9836_v24  ;;  %6505 = vmatpush.bf16.msra.mxu2 %v10060_v30  ;;  %v10032_v32 = vor.u32 %v11076_v45, %v10031_v42  ;;  %v3443_v5 = vsub.f32 1.5, %v3442_v57  ;;  %v9527_v24 = vld [vmem:[#allocation22 + $0x770] sm:$0xf]  ;;  %v11062_v30 = vld [vmem:[#allocation22 + $0xb08] sm:$0xf0]  ;;  %v3434_v22 = vmul.f32 %v12093_v20, %v3433_v15  ;;  %v3428_v23 = vsel %vm12123_vm14, %v12091_v61, %v3424_v36 }
 0x4be   :  { %v3370_v1 = vmax.f32 %v3362_v0, 0.0  ;;  %v10003_v0 = vld [vmem:[#allocation22 + $0xb28] sm:$0xf]  ;;  %v9528_v38 = vor.u32 %v10950_v17, %v9527_v24  ;;  %v9976_v42 = vor.u32 %v11062_v30, %v9975_v29  ;;  %v10943_v45 = vld [vmem:[#allocation22 + $0x750] sm:$0xf0] }
 0x4bf   :  { %6518 = vmatpush.bf16.msra.mxu3 %v10284_v8  ;;  %6480 = vmatpush.bf16.msra.mxu0 %v9584_v43  ;;  %v10004_v16 = vor.u32 %v11069_v6, %v10003_v0  ;;  %v9752_v8 = vor.u32 %v11006_v28, %v9751_v3  ;;  %v10200_v43 = vor.u32 %v11118_v56, %v10199_v54  ;;  %v9723_v48 = vld [vmem:[#allocation22 + $0x8f8] sm:$0xf]  ;;  %v11055_v62 = vld [vmem:[#allocation22 + $0xad0] sm:$0xf0]  ;;  %v9695_v14 = vld [vmem:[#allocation22 + $0x8c0] sm:$0xf] }
 0x4c0   :  { %v12110_v19 = vadd.f32 1e-05, %v3370_v1  ;;  %v3444_v51 = vmul.f32 %v12097_v37, %v3443_v5  ;;  %v10171_v63 = vld [vmem:[#allocation22 + $0xc78] sm:$0xf]  ;;  %v11111_v0 = vld [vmem:[#allocation22 + $0xc90] sm:$0xf0]  ;;  %v3438_v6 = vsel %vm12133_vm2, %v12093_v20, %v3434_v22 }
 0x4c1   :  { %6493 = vmatpush.bf16.msra.mxu1 %v9808_v44  ;;  %6506 = vmatpush.bf16.msra.mxu2 %v10032_v32  ;;  %v9499_v44 = vld [vmem:[#allocation22 + $0x738] sm:$0xf]  ;;  %v10999_v32 = vld [vmem:[#allocation22 + $0x910] sm:$0xf0]  ;;  %v10172_v13 = vor.u32 %v11111_v0, %v10171_v63  ;;  %v10992_v15 = vld [vmem:[#allocation22 + $0x8d8] sm:$0xf0] }
 0x4c2   :  { %11212 = vrsqrt.f32 %v12110_v19  ;;  %v9500_v55 = vor.u32 %v10943_v45, %v9499_v44  ;;  %v9724_v60 = vor.u32 %v10999_v32, %v9723_v48  ;;  %v9919_v5 = vld [vmem:[#allocation22 + $0xa80] sm:$0xf]  ;;  %v3448_v20 = vsel %vm12147_vm4, %v12097_v37, %v3444_v51  ;;  %v11104_v17 = vld [vmem:[#allocation22 + $0xc58] sm:$0xf0] }
 0x4c3   :  { %6519 = vmatpush.bf16.msra.mxu3 %v10256_v59  ;;  %6481 = vmatpush.bf16.msra.mxu0 %v9556_v10  ;;  %v9947_v59 = vld [vmem:[#allocation22 + $0xab8] sm:$0xf]  ;;  %v9471_v10 = vld [vmem:[#allocation22 + $0x700] sm:$0xf]  ;;  %vm3455_vm6 = vweird.f32 %v12110_v19  ;;  %v3470_v3 = vrot.slane %v3428_v23, 4  ;;  %v9696_v29 = vor.u32 %v10992_v15, %v9695_v14  ;;  %v3472_v36 = vrot.slane %v3448_v20, 2 }
 0x4c4   :  { %v9948_v40 = vor.u32 %v11055_v62, %v9947_v59  ;;  %v10143_v24 = vld [vmem:[#allocation22 + $0xc40] sm:$0xf] }
 0x4c5   :  { %6494 = vmatpush.bf16.msra.mxu1 %v9780_v11  ;;  %6507 = vmatpush.bf16.msra.mxu2 %v10004_v16  ;;  %v10936_v11 = vld [vmem:[#allocation22 + $0x718] sm:$0xf0] }
 0x4c6   :  { %v9472_v28 = vor.u32 %v10936_v11, %v9471_v10 }
 0x4c7   :  { %6520 = vmatpush.bf16.msra.mxu3 %v10228_v7  ;;  %6482 = vmatpush.bf16.msra.mxu0 %v9528_v38  ;;  %v11048_v7 = vld [vmem:[#allocation22 + $0xa98] sm:$0xf0]  ;;  %v10144_v38 = vor.u32 %v11104_v17, %v10143_v24 }
 0x4c8   :  { %v12113_v1 = vpop.eup %11212  ;;  %v9920_v37 = vor.u32 %v11048_v7, %v9919_v5 }
 0x4c9   :  { %v3450_v26 = vmul.f32 %v12113_v1, %v12110_v19  ;;  %6495 = vmatpush.bf16.msra.mxu1 %v9752_v8  ;;  %vm3456_vm5 = vweird.f32 %v12113_v1  ;;  %6508 = vmatpush.bf16.msra.mxu2 %v9976_v42  ;;  %v3225_v8 = vld [vmem:[#allocation19] sm:$0xff] }
 0x4ca   :  { %vm3457_vm7 = vmor %vm3455_vm6, %vm3456_vm5 }
 0x4cb   :  { %v3451_v41 = vmul.f32 %v12113_v1, %v3450_v26  ;;  %6521 = vmatpush.bf16.msra.mxu3 %v10200_v43  ;;  %v3471_v26 = vrot.slane %v3438_v6, 3  ;;  %6483 = vmatpush.bf16.msra.mxu0 %v9500_v55 }
 0x4cd   :  { %v3452_v57 = vmul.f32 0.5, %v3451_v41  ;;  %6496 = vmatpush.bf16.msra.mxu1 %v9724_v60  ;;  %6509 = vmatpush.bf16.msra.mxu2 %v9948_v40  ;;  %v3478_v54 = vsel %vm3477_vm8, %v3470_v3, %v3471_v26 }
 0x4cf   :  { %v3453_v61 = vsub.f32 1.5, %v3452_v57  ;;  %6522 = vmatpush.bf16.msra.mxu3 %v10172_v13  ;;  %6484 = vmatpush.bf16.msra.mxu0 %v9472_v28 }
 0x4d1   :  { %v3454_v16 = vmul.f32 %v12113_v1, %v3453_v61  ;;  %6497 = vmatpush.bf16.msra.mxu1 %v9696_v29  ;;  %6510 = vmatpush.bf16.msra.mxu2 %v9920_v37 }
 0x4d3   :  { %v3458_v30 = vsel %vm3457_vm7, %v12113_v1, %v3454_v16  ;;  %6523 = vmatpush.bf16.msra.mxu3 %v10144_v38  ;;  %v10814_v38 = vld [vmem:[#allocation22 + $0x34c] sm:$0xf] }
 0x4d4   :  { %v3473_v19 = vrot.slane %v3458_v30, 1 }
 0x4d6   :  { %v3480_v56 = vsel %vm3479_vm11, %v3472_v36, %v3473_v19  ;;  %v10758_v19 = vld [vmem:[#allocation22 + $0x18c] sm:$0xf] }
 0x4d7   :  { %v3482_v35 = vsel %vm3481_vm12, %v3478_v54, %v3480_v56 }
 0x4d8   :  { %v3484_v1 = vsel %vm3483_vm13, %v12046_v25, %v3482_v35  ;;  %v8997_v35 = vld [vmem:[#allocation22 + $0x364] sm:$0xf0] }
 0x4d9   :  { %v3486_v22 = vmul.f32 %v3484_v1, %v3225_v8 }
 0x4db   :  { %v3488_v41 = vperm.slane %v3486_v22, 0  ;;  %v3489_v42 = vperm.slane %v3486_v22, 1  ;;  %v3490_v43 = vperm.slane %v3486_v22, 2  ;;  %v3491_v44 = vperm.slane %v3486_v22, 3 }
 0x4dc   :  { %v3492_v45 = vperm.slane %v3486_v22, 4  ;;  %v3493_v48 = vperm.slane %v3486_v22, 5  ;;  %v3494_v49 = vperm.slane %v3486_v22, 6  ;;  %v3495_v51 = vperm.slane %v3486_v22, 7 }
 0x4dd   :  { %v3504_v57 = vmul.f32 %v3488_v41, %v11984_v52  ;;  %v3505_v32 = vmul.f32 %v3489_v42, %v12001_v58  ;;  %v3506_v59 = vmul.f32 %v3490_v43, %v12021_v39  ;;  %v3507_v23 = vmul.f32 %v3491_v44, %v12037_v46 }
 0x4de   :  { %v3508_v25 = vmul.f32 %v3492_v45, %v12063_v31  ;;  %v3509_v55 = vmul.f32 %v3493_v48, %v12068_v2  ;;  %v3510_v60 = vmul.f32 %v3494_v49, %v12070_v47  ;;  %v3511_v62 = vmul.f32 %v3495_v51, %v12099_v21  ;;  %v3226_v2 = vld [vmem:[#allocation20] sm:$0xff] }
 0x4df   :  { %v3520_v63 = vrot.slane %v3505_v32, 7  ;;  %v3521_v0 = vrot.slane %v3506_v59, 6  ;;  %v3522_v6 = vrot.slane %v3507_v23, 5  ;;  %v3543_v46 = vmul.f32 %v3495_v51, %v12078_v4 }
 0x4e0   :  { %v3523_v53 = vrot.slane %v3508_v25, 4  ;;  %v3524_v61 = vrot.slane %v3509_v55, 3  ;;  %v3525_v52 = vrot.slane %v3510_v60, 2  ;;  %v3526_v40 = vrot.slane %v3511_v62, 1  ;;  %v10751_v25 = vld [vmem:[#allocation22 + $0x154] sm:$0xf] }
 0x4e1   :  { %v3527_v58 = vsel %vm568_vm9, %v3504_v57, %v3520_v63  ;;  %v3528_v39 = vsel %vm1214_vm10, %v3521_v0, %v3522_v6  ;;  %v3536_v31 = vmul.f32 %v3488_v41, %v11978_v27  ;;  %v3537_v11 = vmul.f32 %v3489_v42, %v11988_v50  ;;  %v10870_v41 = vld [vmem:[#allocation22 + $0x50c] sm:$0xf]  ;;  %v8745_v55 = vld [vmem:[#allocation22 + $0x16c] sm:$0xf0]  ;;  %v10807_v6 = vld [vmem:[#allocation22 + $0x314] sm:$0xf] }
 0x4e2   :  { %v3529_v47 = vsel %vm268_vm0, %v3527_v58, %v3528_v39  ;;  %v3530_v21 = vsel %vm3477_vm8, %v3523_v53, %v3524_v61  ;;  %v3531_v10 = vsel %vm3479_vm11, %v3525_v52, %v3526_v40  ;;  %v3538_v14 = vmul.f32 %v3490_v43, %v12005_v18  ;;  %v8969_v53 = vld [vmem:[#allocation22 + $0x32c] sm:$0xf0]  ;;  %v10863_v61 = vld [vmem:[#allocation22 + $0x4d4] sm:$0xf] }
 0x4e3   :  { %v3532_v13 = vsel %vm3481_vm12, %v3530_v21, %v3531_v10  ;;  %v3539_v15 = vmul.f32 %v3491_v44, %v12031_v34  ;;  %v3542_v27 = vmul.f32 %v3494_v49, %v12058_v9  ;;  %v3540_v20 = vmul.f32 %v3492_v45, %v12041_v12  ;;  %v8773_v9 = vld [vmem:[#allocation22 + $0x1a4] sm:$0xf0]  ;;  %v10926_v45 = vld [vmem:[#allocation22 + $0x6cc] sm:$0xf]  ;;  %v9193_v52 = vld [vmem:[#allocation22 + $0x4ec] sm:$0xf0] }
 0x4e4   :  { %v3533_v5 = vsel %vm3483_vm13, %v3529_v47, %v3532_v13  ;;  %v3541_v16 = vmul.f32 %v3493_v48, %v12052_v33  ;;  %v9221_v44 = vld [vmem:[#allocation22 + $0x524] sm:$0xf0]  ;;  %v8776_v59 = vor.u32 %v10758_v19, %v8773_v9  ;;  %v9000_v23 = vor.u32 %v10814_v38, %v8997_v35  ;;  %v10919_v40 = vld [vmem:[#allocation22 + $0x694] sm:$0xf]  ;;  %v9417_v58 = vld [vmem:[#allocation22 + $0x6ac] sm:$0xf0] }
 0x4e5   :  { %v3535_v4 = vsub.f32 %v3226_v2, %v3533_v5  ;;  %v9445_v48 = vld [vmem:[#allocation22 + $0x6e4] sm:$0xf0]  ;;  %v9224_v63 = vor.u32 %v10870_v41, %v9221_v44  ;;  %v8748_v39 = vor.u32 %v10751_v25, %v8745_v55  ;;  %v8717_v2 = vld [vmem:[#allocation22 + $0x134] sm:$0xf0]  ;;  %v10800_v47 = vld [vmem:[#allocation22 + $0x2dc] sm:$0xf]  ;;  %v9196_v21 = vor.u32 %v10863_v61, %v9193_v52 }
 0x4e6   :  { %v9448_v0 = vor.u32 %v10926_v45, %v9445_v48  ;;  %v9420_v10 = vor.u32 %v10919_v40, %v9417_v58  ;;  %v10856_v13 = vld [vmem:[#allocation22 + $0x49c] sm:$0xf]  ;;  %v9389_v5 = vld [vmem:[#allocation22 + $0x674] sm:$0xf0]  ;;  %v10730_v38 = vld [vmem:[#allocation22 + $0xac] sm:$0xf] }
 0x4e7   :  { %v3552_v7 = vperm.slane %v3535_v4, 7  ;;  %v3545_v24 = vperm.slane %v3535_v4, 0  ;;  %v3546_v17 = vperm.slane %v3535_v4, 1  ;;  %v3547_v3 = vperm.slane %v3535_v4, 2  ;;  %v8885_v41 = vld [vmem:[#allocation22 + $0x284] sm:$0xf0] }
 0x4e8   :  { %v3548_v50 = vperm.slane %v3535_v4, 3  ;;  %v3549_v26 = vperm.slane %v3535_v4, 4  ;;  %v3550_v28 = vperm.slane %v3535_v4, 5  ;;  %v3551_v29 = vperm.slane %v3535_v4, 6  ;;  %v10737_v4 = vld [vmem:[#allocation22 + $0xe4] sm:$0xf] }
 0x4e9   :  { %v12188_v18 = vadd.f32 %v3552_v7, %v3543_v46  ;;  %v3561_v34 = vadd.f32 %v3545_v24, %v3536_v31  ;;  %v3562_v30 = vadd.f32 %v3546_v17, %v3537_v11  ;;  %v3563_v37 = vadd.f32 %v3547_v3, %v3538_v14  ;;  %v10744_v31 = vld [vmem:[#allocation22 + $0x11c] sm:$0xf]  ;;  %v8941_v11 = vld [vmem:[#allocation22 + $0x2f4] sm:$0xf0]  ;;  %v10849_v17 = vld [vmem:[#allocation22 + $0x464] sm:$0xf] }
 0x4ea   :  { %v3564_v36 = vadd.f32 %v3548_v50, %v3539_v15  ;;  %v12190_v12 = vadd.f32 %v3549_v26, %v3540_v20  ;;  %v12192_v33 = vadd.f32 %v3550_v28, %v3541_v16  ;;  %v12194_v8 = vadd.f32 %v3551_v29, %v3542_v27  ;;  %v9165_v14 = vld [vmem:[#allocation22 + $0x4b4] sm:$0xf0]  ;;  %v10912_v15 = vld [vmem:[#allocation22 + $0x65c] sm:$0xf]  ;;  %v8689_v27 = vld [vmem:[#allocation22 + $0xfc] sm:$0xf0] }
 0x4eb   :  { %v3569_v54 = vmul.f32 0.2, %v3561_v34  ;;  %v3570_v56 = vmul.f32 0.2, %v3562_v30  ;;  %v3571_v1 = vmul.f32 0.2, %v3563_v37  ;;  %v8972_v46 = vor.u32 %v10807_v6, %v8969_v53 }
 0x4ec   :  { %v3572_v22 = vmul.f32 0.2, %v3564_v36  ;;  %v10793_v20 = vld [vmem:[#allocation22 + $0x2a4] sm:$0xf]  ;;  %v8913_v16 = vld [vmem:[#allocation22 + $0x2bc] sm:$0xf0]  ;;  %v8720_v7 = vor.u32 %v10744_v31, %v8717_v2  ;;  %v8944_v24 = vor.u32 %v10800_v47, %v8941_v11  ;;  %v9168_v28 = vor.u32 %v10856_v13, %v9165_v14 }
 0x4ed   :  { %v3577_v42 = vmax.f32 %v3561_v34, %v3569_v54  ;;  %v3578_v43 = vmax.f32 %v3562_v30, %v3570_v56  ;;  %v3579_v49 = vmax.f32 %v3563_v37, %v3571_v1  ;;  %v3573_v3 = vmul.f32 0.2, %v12190_v12  ;;  %v9137_v34 = vld [vmem:[#allocation22 + $0x47c] sm:$0xf0]  ;;  %v10905_v37 = vld [vmem:[#allocation22 + $0x624] sm:$0xf] }
 0x4ee   :  { %v3580_v51 = vmax.f32 %v3564_v36, %v3572_v22  ;;  %v3574_v50 = vmul.f32 0.2, %v12192_v33  ;;  %v3576_v26 = vmul.f32 0.2, %v12188_v18  ;;  %v9392_v29 = vor.u32 %v10912_v15, %v9389_v5  ;;  %v9361_v36 = vld [vmem:[#allocation22 + $0x63c] sm:$0xf0] }
 0x4ef   :  { %v12196_v57 = vpack.c.bf16 %v3577_v42, %v3577_v42  ;;  %v12198_v32 = vpack.c.bf16 %v3578_v43, %v3578_v43  ;;  %v12200_v60 = vpack.c.bf16 %v3579_v49, %v3579_v49  ;;  %v3575_v30 = vmul.f32 0.2, %v12194_v8  ;;  %v8661_v1 = vld [vmem:[#allocation22 + $0xc4] sm:$0xf0]  ;;  %v10786_v22 = vld [vmem:[#allocation22 + $0x26c] sm:$0xf] }
 0x4f0   :  { %v12202_v62 = vpack.c.bf16 %v3580_v51, %v3580_v51  ;;  %v8692_v19 = vor.u32 %v10737_v4, %v8689_v27  ;;  %v8916_v9 = vor.u32 %v10793_v20, %v8913_v16  ;;  %v9140_v54 = vor.u32 %v10849_v17, %v9137_v34  ;;  %v10842_v45 = vld [vmem:[#allocation22 + $0x42c] sm:$0xf]  ;;  %v9109_v48 = vld [vmem:[#allocation22 + $0x444] sm:$0xf0]  ;;  %v10723_v55 = vld [vmem:[#allocation22 + $0x74] sm:$0xf] }
 0x4f1   :  { %6433 = vmatmul.bf16.vlgmr.msrb.gmra.mxu0 %v12196_v57  ;;  %6446 = vmatmul.bf16.vlgmr.msrb.gmra.mxu1 %v12198_v32  ;;  %v3581_v56 = vmax.f32 %v12190_v12, %v3573_v3  ;;  %v3582_v35 = vmax.f32 %v12192_v33, %v3574_v50  ;;  %v3584_v42 = vmax.f32 %v12188_v18, %v3576_v26  ;;  %v10898_v49 = vld [vmem:[#allocation22 + $0x5ec] sm:$0xf]  ;;  %v9333_v51 = vld [vmem:[#allocation22 + $0x604] sm:$0xf0]  ;;  %v8633_v18 = vld [vmem:[#allocation22 + $0x8c] sm:$0xf0] }
 0x4f2   :  { %6459 = vmatmul.bf16.vlgmr.msrb.gmra.mxu2 %v12200_v60  ;;  %6472 = vmatmul.bf16.vlgmr.msrb.gmra.mxu3 %v12202_v62  ;;  %v9364_v43 = vor.u32 %v10905_v37, %v9361_v36  ;;  %v3583_v44 = vmax.f32 %v12194_v8, %v3575_v30  ;;  %v9112_v25 = vor.u32 %v10842_v45, %v9109_v48  ;;  %v10779_v6 = vld [vmem:[#allocation22 + $0x234] sm:$0xf]  ;;  %v8857_v53 = vld [vmem:[#allocation22 + $0x24c] sm:$0xf0]  ;;  %v10716_v31 = vld [vmem:[#allocation22 + $0x3c] sm:$0xf] }
 0x4f3   :  { %6529 = vmatpush.bf16.msrb.mxu0 %v8776_v59  ;;  %6542 = vmatpush.bf16.msrb.mxu1 %v9000_v23  ;;  %v8664_v59 = vor.u32 %v10730_v38, %v8661_v1  ;;  %v8888_v23 = vor.u32 %v10786_v22, %v8885_v41  ;;  %v12216_v12 = vpack.c.bf16 %v3581_v56, %v3581_v56  ;;  %v10835_v61 = vld [vmem:[#allocation22 + $0x3f4] sm:$0xf]  ;;  %v9081_v52 = vld [vmem:[#allocation22 + $0x40c] sm:$0xf0]  ;;  %v8605_v2 = vld [vmem:[#allocation22 + $0x54] sm:$0xf0] }
 0x4f4   :  { %6555 = vmatpush.bf16.msrb.mxu2 %v9224_v63  ;;  %6568 = vmatpush.bf16.msrb.mxu3 %v9448_v0  ;;  %v12218_v33 = vpack.c.bf16 %v3582_v35, %v3582_v35  ;;  %v12220_v63 = vpack.c.bf16 %v3584_v42, %v3584_v42  ;;  %v12222_v8 = vpack.c.bf16 %v3583_v44, %v3583_v44  ;;  %v10891_v40 = vld [vmem:[#allocation22 + $0x5b4] sm:$0xf]  ;;  %v9305_v58 = vld [vmem:[#allocation22 + $0x5cc] sm:$0xf0]  ;;  %v8829_v11 = vld [vmem:[#allocation22 + $0x214] sm:$0xf0] }
 0x4f5   :  { %v9336_v0 = vor.u32 %v10898_v49, %v9333_v51  ;;  %v9084_v47 = vor.u32 %v10835_v61, %v9081_v52  ;;  %v10828_v13 = vld [vmem:[#allocation22 + $0x3bc] sm:$0xf]  ;;  %v9053_v14 = vld [vmem:[#allocation22 + $0x3d4] sm:$0xf0]  ;;  %v10709_v4 = vld [vmem:[#allocation22 + $0x4] sm:$0xf]  ;;  %v8608_v27 = vor.u32 %v10716_v31, %v8605_v2 }
 0x4f6   :  { %v10884_v15 = vld [vmem:[#allocation22 + $0x57c] sm:$0xf]  ;;  %v9277_v5 = vld [vmem:[#allocation22 + $0x594] sm:$0xf0]  ;;  %v8577_v16 = vld [vmem:[#allocation22 + $0x1c] sm:$0xf0]  ;;  %v9056_v17 = vor.u32 %v10828_v13, %v9053_v14 }
 0x4f7   :  { %6530 = vmatpush.bf16.msrb.mxu0 %v8748_v39  ;;  %6543 = vmatpush.bf16.msrb.mxu1 %v8972_v46  ;;  %v8636_v39 = vor.u32 %v10723_v55, %v8633_v18  ;;  %v8860_v46 = vor.u32 %v10779_v6, %v8857_v53  ;;  %v9280_v3 = vor.u32 %v10884_v15, %v9277_v5  ;;  %v10821_v50 = vld [vmem:[#allocation22 + $0x384] sm:$0xf]  ;;  %v9025_v26 = vld [vmem:[#allocation22 + $0x39c] sm:$0xf0]  ;;  %v10982_v34 = vld [vmem:[#allocation22 + $0x88c] sm:$0xf] }
 0x4f8   :  { %6556 = vmatpush.bf16.msrb.mxu2 %v9196_v21  ;;  %6569 = vmatpush.bf16.msrb.mxu3 %v9420_v10  ;;  %v9308_v21 = vor.u32 %v10891_v40, %v9305_v58  ;;  %v10772_v10 = vld [vmem:[#allocation22 + $0x1fc] sm:$0xf]  ;;  %v9669_v30 = vld [vmem:[#allocation22 + $0x8a4] sm:$0xf0]  ;;  %v11038_v37 = vld [vmem:[#allocation22 + $0xa4c] sm:$0xf]  ;;  %v9028_v1 = vor.u32 %v10821_v50, %v9025_v26 }
 0x4f9   :  { %v8832_v20 = vor.u32 %v10772_v10, %v8829_v11  ;;  %v9893_v36 = vld [vmem:[#allocation22 + $0xa64] sm:$0xf0]  ;;  %v11150_v56 = vld [vmem:[#allocation22 + $0xdcc] sm:$0xf]  ;;  %v9672_v41 = vor.u32 %v10982_v34, %v9669_v30  ;;  %v9641_v44 = vld [vmem:[#allocation22 + $0x86c] sm:$0xf0] }
 0x4fa   :  { %v10341_v35 = vld [vmem:[#allocation22 + $0xde4] sm:$0xf0]  ;;  %v9896_v42 = vor.u32 %v11038_v37, %v9893_v36  ;;  %v11031_v49 = vld [vmem:[#allocation22 + $0xa14] sm:$0xf]  ;;  %v9865_v51 = vld [vmem:[#allocation22 + $0xa2c] sm:$0xf0] }
 0x4fb   :  { %6531 = vmatpush.bf16.msrb.mxu0 %v8720_v7  ;;  %6544 = vmatpush.bf16.msrb.mxu1 %v8944_v24  ;;  %v10765_v7 = vld [vmem:[#allocation22 + $0x1c4] sm:$0xf]  ;;  %v8801_v24 = vld [vmem:[#allocation22 + $0x1dc] sm:$0xf0]  ;;  %v10344_v48 = vor.u32 %v11150_v56, %v10341_v35  ;;  %v10313_v55 = vld [vmem:[#allocation22 + $0xdac] sm:$0xf0] }
 0x4fc   :  { %6557 = vmatpush.bf16.msrb.mxu2 %v9168_v28  ;;  %6570 = vmatpush.bf16.msrb.mxu3 %v9392_v29  ;;  %v10877_v28 = vld [vmem:[#allocation22 + $0x544] sm:$0xf]  ;;  %v9249_v29 = vld [vmem:[#allocation22 + $0x55c] sm:$0xf0]  ;;  %v8804_v38 = vor.u32 %v10765_v7, %v8801_v24  ;;  %v10968_v6 = vld [vmem:[#allocation22 + $0x81c] sm:$0xf] }
 0x4fd   :  { %v9252_v22 = vor.u32 %v10877_v28, %v9249_v29  ;;  %v9613_v53 = vld [vmem:[#allocation22 + $0x834] sm:$0xf0]  ;;  %v11024_v40 = vld [vmem:[#allocation22 + $0x9dc] sm:$0xf]  ;;  %v10961_v10 = vld [vmem:[#allocation22 + $0x7e4] sm:$0xf] }
 0x4fe   :  { %v9837_v58 = vld [vmem:[#allocation22 + $0x9f4] sm:$0xf0]  ;;  %v11136_v31 = vld [vmem:[#allocation22 + $0xd5c] sm:$0xf]  ;;  %v9585_v11 = vld [vmem:[#allocation22 + $0x7fc] sm:$0xf0] }
 0x4ff   :  { %6532 = vmatpush.bf16.msrb.mxu0 %v8692_v19  ;;  %6545 = vmatpush.bf16.msrb.mxu1 %v8916_v9  ;;  %v11094_v19 = vld [vmem:[#allocation22 + $0xc0c] sm:$0xf]  ;;  %v8580_v9 = vor.u32 %v10709_v4, %v8577_v16  ;;  %v10285_v2 = vld [vmem:[#allocation22 + $0xd74] sm:$0xf0]  ;;  %v11017_v15 = vld [vmem:[#allocation22 + $0x9a4] sm:$0xf]  ;;  %v9588_v7 = vor.u32 %v10961_v10, %v9585_v11 }
 0x500   :  { %6558 = vmatpush.bf16.msrb.mxu2 %v9140_v54  ;;  %6571 = vmatpush.bf16.msrb.mxu3 %v9364_v43  ;;  %v10117_v54 = vld [vmem:[#allocation22 + $0xc24] sm:$0xf0]  ;;  %v10975_v43 = vld [vmem:[#allocation22 + $0x854] sm:$0xf]  ;;  %v10288_v14 = vor.u32 %v11136_v31, %v10285_v2  ;;  %v9809_v5 = vld [vmem:[#allocation22 + $0x9bc] sm:$0xf0] }
 0x501   :  { %6485 = vmatmul.bf16.vlgmr.msra.gmra.mxu0 %v12216_v12  ;;  %6498 = vmatmul.bf16.vlgmr.msra.gmra.mxu1 %v12218_v33  ;;  %v10120_v45 = vor.u32 %v11094_v19, %v10117_v54  ;;  %v9644_v18 = vor.u32 %v10975_v43, %v9641_v44  ;;  %v11073_v4 = vld [vmem:[#allocation22 + $0xb64] sm:$0xf]  ;;  %v10257_v16 = vld [vmem:[#allocation22 + $0xd3c] sm:$0xf0]  ;;  %v9812_v24 = vor.u32 %v11017_v15, %v9809_v5  ;;  %v11010_v28 = vld [vmem:[#allocation22 + $0x96c] sm:$0xf] }
 0x502   :  { %6511 = vmatmul.bf16.vlgmr.msra.gmra.mxu2 %v12222_v8  ;;  %6524 = vmatmul.bf16.vlgmr.msra.gmra.mxu3 %v12220_v63  ;;  %v9781_v29 = vld [vmem:[#allocation22 + $0x984] sm:$0xf0]  ;;  %v11066_v34 = vld [vmem:[#allocation22 + $0xb2c] sm:$0xf]  ;;  %v9529_v54 = vld [vmem:[#allocation22 + $0x78c] sm:$0xf0] }
 0x503   :  { %6533 = vmatpush.bf16.msrb.mxu0 %v8664_v59  ;;  %6546 = vmatpush.bf16.msrb.mxu1 %v8888_v23  ;;  %v11087_v59 = vld [vmem:[#allocation22 + $0xbd4] sm:$0xf]  ;;  %v10089_v23 = vld [vmem:[#allocation22 + $0xbec] sm:$0xf0]  ;;  %v10005_v30 = vld [vmem:[#allocation22 + $0xb44] sm:$0xf0] }
 0x504   :  { %6559 = vmatpush.bf16.msrb.mxu2 %v9112_v25  ;;  %6572 = vmatpush.bf16.msrb.mxu3 %v9336_v0  ;;  %v11143_v25 = vld [vmem:[#allocation22 + $0xd94] sm:$0xf]  ;;  %v9868_v0 = vor.u32 %v11031_v49, %v9865_v51  ;;  %v10092_v61 = vor.u32 %v11087_v59, %v10089_v23  ;;  %v11122_v37 = vld [vmem:[#allocation22 + $0xcec] sm:$0xf]  ;;  %v10229_v36 = vld [vmem:[#allocation22 + $0xd04] sm:$0xf0]  ;;  %v10008_v56 = vor.u32 %v11066_v34, %v10005_v30 }
 0x505   :  { %v10316_v52 = vor.u32 %v11143_v25, %v10313_v55  ;;  %v10232_v35 = vor.u32 %v11122_v37, %v10229_v36  ;;  %v11115_v43 = vld [vmem:[#allocation22 + $0xcb4] sm:$0xf]  ;;  %v10201_v44 = vld [vmem:[#allocation22 + $0xccc] sm:$0xf0]  ;;  %v10940_v49 = vld [vmem:[#allocation22 + $0x73c] sm:$0xf] }
 0x506   :  { %v9501_v51 = vld [vmem:[#allocation22 + $0x754] sm:$0xf0]  ;;  %v10204_v23 = vor.u32 %v11115_v43, %v10201_v44  ;;  %v10996_v25 = vld [vmem:[#allocation22 + $0x8fc] sm:$0xf]  ;;  %v11101_v10 = vld [vmem:[#allocation22 + $0xc44] sm:$0xf] }
 0x507   :  { %6534 = vmatpush.bf16.msrb.mxu0 %v8636_v39  ;;  %6547 = vmatpush.bf16.msrb.mxu1 %v8860_v46  ;;  %v11080_v39 = vld [vmem:[#allocation22 + $0xb9c] sm:$0xf]  ;;  %v10061_v46 = vld [vmem:[#allocation22 + $0xbb4] sm:$0xf0]  ;;  %v10145_v11 = vld [vmem:[#allocation22 + $0xc5c] sm:$0xf0] }
 0x508   :  { %6560 = vmatpush.bf16.msrb.mxu2 %v9084_v47  ;;  %6573 = vmatpush.bf16.msrb.mxu3 %v9308_v21  ;;  %v9616_v47 = vor.u32 %v10968_v6, %v9613_v53  ;;  %v9840_v21 = vor.u32 %v11024_v40, %v9837_v58  ;;  %v10064_v13 = vor.u32 %v11080_v39, %v10061_v46  ;;  %v9725_v55 = vld [vmem:[#allocation22 + $0x914] sm:$0xf0]  ;;  %v11108_v6 = vld [vmem:[#allocation22 + $0xc7c] sm:$0xf]  ;;  %v9473_v58 = vld [vmem:[#allocation22 + $0x71c] sm:$0xf0] }
 0x509   :  { %v10173_v53 = vld [vmem:[#allocation22 + $0xc94] sm:$0xf0]  ;;  %v9728_v40 = vor.u32 %v10996_v25, %v9725_v55  ;;  %v10989_v39 = vld [vmem:[#allocation22 + $0x8c4] sm:$0xf]  ;;  %v9697_v46 = vld [vmem:[#allocation22 + $0x8dc] sm:$0xf0] }
 0x50a   :  { %v10176_v2 = vor.u32 %v11108_v6, %v10173_v53  ;;  %v9003_v15 = vld [vmem:[#allocation22 + $0x350] sm:$0xf]  ;;  %v10818_v5 = vld [vmem:[#allocation22 + $0x368] sm:$0xf0]  ;;  %v8975_v37 = vld [vmem:[#allocation22 + $0x318] sm:$0xf] }
 0x50b   :  { %6535 = vmatpush.bf16.msrb.mxu0 %v8608_v27  ;;  %6548 = vmatpush.bf16.msrb.mxu1 %v8832_v20  ;;  %v10033_v27 = vld [vmem:[#allocation22 + $0xb7c] sm:$0xf0]  ;;  %v11129_v20 = vld [vmem:[#allocation22 + $0xd24] sm:$0xf]  ;;  %v10811_v36 = vld [vmem:[#allocation22 + $0x330] sm:$0xf0] }
 0x50c   :  { %6561 = vmatpush.bf16.msrb.mxu2 %v9056_v17  ;;  %6574 = vmatpush.bf16.msrb.mxu3 %v9280_v3  ;;  %v10954_v17 = vld [vmem:[#allocation22 + $0x7ac] sm:$0xf]  ;;  %v9557_v3 = vld [vmem:[#allocation22 + $0x7c4] sm:$0xf0]  ;;  %v10036_v50 = vor.u32 %v11073_v4, %v10033_v27  ;;  %v10260_v26 = vor.u32 %v11129_v20, %v10257_v16  ;;  %v9227_v4 = vld [vmem:[#allocation22 + $0x510] sm:$0xf]  ;;  %v9700_v20 = vor.u32 %v10989_v39, %v9697_v46 }
 0x50d   :  { %v9560_v19 = vor.u32 %v10954_v17, %v9557_v3  ;;  %v10874_v16 = vld [vmem:[#allocation22 + $0x528] sm:$0xf0]  ;;  %v10148_v3 = vor.u32 %v11101_v10, %v10145_v11  ;;  %v8947_v43 = vld [vmem:[#allocation22 + $0x2e0] sm:$0xf]  ;;  %v10804_v44 = vld [vmem:[#allocation22 + $0x2f8] sm:$0xf0] }
 0x50e   :  { %v9228_v34 = vor.u32 %v10874_v16, %v9227_v4  ;;  %v8695_v25 = vld [vmem:[#allocation22 + $0xe8] sm:$0xf]  ;;  %v10741_v55 = vld [vmem:[#allocation22 + $0x100] sm:$0xf0]  ;;  %v8891_v10 = vld [vmem:[#allocation22 + $0x270] sm:$0xf] }
 0x50f   :  { %6536 = vmatpush.bf16.msrb.mxu0 %v8580_v9  ;;  %6549 = vmatpush.bf16.msrb.mxu1 %v8804_v38  ;;  %v9784_v9 = vor.u32 %v11010_v28, %v9781_v29  ;;  %v10947_v38 = vld [vmem:[#allocation22 + $0x774] sm:$0xf]  ;;  %v8751_v28 = vld [vmem:[#allocation22 + $0x158] sm:$0xf]  ;;  %v8919_v6 = vld [vmem:[#allocation22 + $0x2a8] sm:$0xf]  ;;  %v8696_v39 = vor.u32 %v10741_v55, %v8695_v25 }
 0x510   :  { %6562 = vmatpush.bf16.msrb.mxu2 %v9028_v1  ;;  %6575 = vmatpush.bf16.msrb.mxu3 %v9252_v22  ;;  %v11003_v1 = vld [vmem:[#allocation22 + $0x934] sm:$0xf]  ;;  %v9753_v22 = vld [vmem:[#allocation22 + $0x94c] sm:$0xf0]  ;;  %v10797_v53 = vld [vmem:[#allocation22 + $0x2c0] sm:$0xf0] }
 0x511   :  { %v10755_v29 = vld [vmem:[#allocation22 + $0x170] sm:$0xf0]  ;;  %v8920_v46 = vor.u32 %v10797_v53, %v8919_v6  ;;  %v10790_v11 = vld [vmem:[#allocation22 + $0x288] sm:$0xf0]  ;;  %v9255_v25 = vld [vmem:[#allocation22 + $0x548] sm:$0xf] }
 0x512   :  { %6537 = vmatmul.bf16.vlgmr.msrb.gmra.mxu0 %v12196_v57  ;;  %6550 = vmatmul.bf16.vlgmr.msrb.gmra.mxu1 %v12198_v32  ;;  %v10727_v16 = vld [vmem:[#allocation22 + $0x90] sm:$0xf0]  ;;  %v10881_v55 = vld [vmem:[#allocation22 + $0x560] sm:$0xf0]  ;;  %v9899_v6 = vld [vmem:[#allocation22 + $0xa50] sm:$0xf] }
 0x513   :  { %6581 = vmatpush.bf16.msra.mxu0 %v9672_v41  ;;  %6594 = vmatpush.bf16.msra.mxu1 %v9896_v42  ;;  %v11059_v41 = vld [vmem:[#allocation22 + $0xaf4] sm:$0xf]  ;;  %v9977_v42 = vld [vmem:[#allocation22 + $0xb0c] sm:$0xf0]  ;;  %v11042_v53 = vld [vmem:[#allocation22 + $0xa68] sm:$0xf0] }
 0x514   :  { %6607 = vmatpush.bf16.msra.mxu2 %v10120_v45  ;;  %6620 = vmatpush.bf16.msra.mxu3 %v10344_v48  ;;  %v9532_v45 = vor.u32 %v10947_v38, %v9529_v54  ;;  %v9756_v48 = vor.u32 %v11003_v1, %v9753_v22  ;;  %v9980_v59 = vor.u32 %v11059_v41, %v9977_v42  ;;  %v9423_v38 = vld [vmem:[#allocation22 + $0x698] sm:$0xf]  ;;  %v10923_v54 = vld [vmem:[#allocation22 + $0x6b0] sm:$0xf0]  ;;  %v8723_v1 = vld [vmem:[#allocation22 + $0x120] sm:$0xf] }
 0x515   :  { %6563 = vmatmul.bf16.vlgmr.msrb.gmra.mxu2 %v12200_v60  ;;  %6576 = vmatmul.bf16.vlgmr.msrb.gmra.mxu3 %v12202_v62  ;;  %v10748_v22 = vld [vmem:[#allocation22 + $0x138] sm:$0xf0]  ;;  %v9424_v42 = vor.u32 %v10923_v54, %v9423_v38  ;;  %v8835_v38 = vld [vmem:[#allocation22 + $0x200] sm:$0xf] }
 0x516   :  { %v10776_v54 = vld [vmem:[#allocation22 + $0x218] sm:$0xf0] }
 0x517   :  { %6582 = vmatpush.bf16.msra.mxu0 %v9644_v18  ;;  %6595 = vmatpush.bf16.msra.mxu1 %v9868_v0  ;;  %v11052_v18 = vld [vmem:[#allocation22 + $0xabc] sm:$0xf]  ;;  %v9949_v0 = vld [vmem:[#allocation22 + $0xad4] sm:$0xf0] }
 0x518   :  { %6608 = vmatpush.bf16.msra.mxu2 %v10092_v61  ;;  %6621 = vmatpush.bf16.msra.mxu3 %v10316_v52  ;;  %v10933_v61 = vld [vmem:[#allocation22 + $0x704] sm:$0xf]  ;;  %v9504_v52 = vor.u32 %v10940_v49, %v9501_v51  ;;  %v9952_v31 = vor.u32 %v11052_v18, %v9949_v0  ;;  %v9395_v49 = vld [vmem:[#allocation22 + $0x660] sm:$0xf]  ;;  %v10916_v51 = vld [vmem:[#allocation22 + $0x678] sm:$0xf0] }
 0x519   :  { %v9476_v27 = vor.u32 %v10933_v61, %v9473_v58  ;;  %v9396_v0 = vor.u32 %v10916_v51, %v9395_v49  ;;  %v9143_v61 = vld [vmem:[#allocation22 + $0x468] sm:$0xf]  ;;  %v10909_v58 = vld [vmem:[#allocation22 + $0x640] sm:$0xf0] }
 0x51b   :  { %6583 = vmatpush.bf16.msra.mxu0 %v9616_v47  ;;  %6596 = vmatpush.bf16.msra.mxu1 %v9840_v21  ;;  %v11045_v47 = vld [vmem:[#allocation22 + $0xa84] sm:$0xf]  ;;  %v9921_v21 = vld [vmem:[#allocation22 + $0xa9c] sm:$0xf0] }
 0x51c   :  { %6609 = vmatpush.bf16.msra.mxu2 %v10064_v13  ;;  %6622 = vmatpush.bf16.msra.mxu3 %v10288_v14  ;;  %v8779_v13 = vld [vmem:[#allocation22 + $0x190] sm:$0xf]  ;;  %v10762_v14 = vld [vmem:[#allocation22 + $0x1a8] sm:$0xf0]  ;;  %v9924_v17 = vor.u32 %v11045_v47, %v9921_v21 }
 0x51f   :  { %6584 = vmatpush.bf16.msra.mxu0 %v9588_v7  ;;  %6597 = vmatpush.bf16.msra.mxu1 %v9812_v24  ;;  %v9451_v7 = vld [vmem:[#allocation22 + $0x6d0] sm:$0xf]  ;;  %v10930_v24 = vld [vmem:[#allocation22 + $0x6e8] sm:$0xf0] }
 0x520   :  { %6610 = vmatpush.bf16.msra.mxu2 %v10036_v50  ;;  %6623 = vmatpush.bf16.msra.mxu3 %v10260_v26  ;;  %v8780_v50 = vor.u32 %v10762_v14, %v8779_v13  ;;  %v9004_v26 = vor.u32 %v10818_v5, %v9003_v15  ;;  %v9452_v30 = vor.u32 %v10930_v24, %v9451_v7  ;;  %v9115_v13 = vld [vmem:[#allocation22 + $0x430] sm:$0xf]  ;;  %v10846_v14 = vld [vmem:[#allocation22 + $0x448] sm:$0xf0] }
 0x521   :  { %v9339_v15 = vld [vmem:[#allocation22 + $0x5f0] sm:$0xf]  ;;  %v10902_v5 = vld [vmem:[#allocation22 + $0x608] sm:$0xf0]  ;;  %v9116_v7 = vor.u32 %v10846_v14, %v9115_v13 }
 0x522   :  { %v9340_v24 = vor.u32 %v10902_v5, %v9339_v15  ;;  %v9871_v15 = vld [vmem:[#allocation22 + $0xa18] sm:$0xf]  ;;  %v11035_v5 = vld [vmem:[#allocation22 + $0xa30] sm:$0xf0] }
 0x523   :  { %6585 = vmatpush.bf16.msra.mxu0 %v9560_v19  ;;  %6598 = vmatpush.bf16.msra.mxu1 %v9784_v9  ;;  %v9199_v19 = vld [vmem:[#allocation22 + $0x4d8] sm:$0xf]  ;;  %v10867_v9 = vld [vmem:[#allocation22 + $0x4f0] sm:$0xf0] }
 0x524   :  { %6611 = vmatpush.bf16.msra.mxu2 %v10008_v56  ;;  %6624 = vmatpush.bf16.msra.mxu3 %v10232_v35  ;;  %v8752_v56 = vor.u32 %v10755_v29, %v8751_v28  ;;  %v8976_v35 = vor.u32 %v10811_v36, %v8975_v37  ;;  %v9200_v41 = vor.u32 %v10867_v9, %v9199_v19  ;;  %v9311_v28 = vld [vmem:[#allocation22 + $0x5b8] sm:$0xf]  ;;  %v10895_v29 = vld [vmem:[#allocation22 + $0x5d0] sm:$0xf0]  ;;  %v8611_v37 = vld [vmem:[#allocation22 + $0x40] sm:$0xf] }
 0x525   :  { %v10720_v36 = vld [vmem:[#allocation22 + $0x58] sm:$0xf0]  ;;  %v9312_v9 = vor.u32 %v10895_v29, %v9311_v28  ;;  %v9843_v28 = vld [vmem:[#allocation22 + $0x9e0] sm:$0xf] }
 0x526   :  { %v11028_v29 = vld [vmem:[#allocation22 + $0x9f8] sm:$0xf0] }
 0x527   :  { %6586 = vmatpush.bf16.msra.mxu0 %v9532_v45  ;;  %6599 = vmatpush.bf16.msra.mxu1 %v9756_v48  ;;  %v9171_v45 = vld [vmem:[#allocation22 + $0x4a0] sm:$0xf]  ;;  %v10860_v48 = vld [vmem:[#allocation22 + $0x4b8] sm:$0xf0] }
 0x528   :  { %6612 = vmatpush.bf16.msra.mxu2 %v9980_v59  ;;  %6625 = vmatpush.bf16.msra.mxu3 %v10204_v23  ;;  %v8724_v59 = vor.u32 %v10748_v22, %v8723_v1  ;;  %v8948_v23 = vor.u32 %v10804_v44, %v8947_v43  ;;  %v9172_v18 = vor.u32 %v10860_v48, %v9171_v45  ;;  %v9283_v1 = vld [vmem:[#allocation22 + $0x580] sm:$0xf]  ;;  %v10888_v22 = vld [vmem:[#allocation22 + $0x598] sm:$0xf0]  ;;  %v10713_v44 = vld [vmem:[#allocation22 + $0x20] sm:$0xf0] }
 0x529   :  { %v8836_v43 = vor.u32 %v10776_v54, %v8835_v38  ;;  %v8807_v45 = vld [vmem:[#allocation22 + $0x1c8] sm:$0xf]  ;;  %v10769_v48 = vld [vmem:[#allocation22 + $0x1e0] sm:$0xf0]  ;;  %v9284_v51 = vor.u32 %v10888_v22, %v9283_v1 }
 0x52a   :  { %v9591_v38 = vld [vmem:[#allocation22 + $0x7e8] sm:$0xf]  ;;  %v10965_v54 = vld [vmem:[#allocation22 + $0x800] sm:$0xf0] }
 0x52b   :  { %6587 = vmatpush.bf16.msra.mxu0 %v9504_v52  ;;  %6600 = vmatpush.bf16.msra.mxu1 %v9728_v40  ;;  %v10853_v52 = vld [vmem:[#allocation22 + $0x480] sm:$0xf0]  ;;  %v9367_v40 = vld [vmem:[#allocation22 + $0x628] sm:$0xf] }
 0x52c   :  { %6613 = vmatpush.bf16.msra.mxu2 %v9952_v31  ;;  %6626 = vmatpush.bf16.msra.mxu3 %v10176_v2  ;;  %v8667_v31 = vld [vmem:[#allocation22 + $0xb0] sm:$0xf]  ;;  %v10734_v2 = vld [vmem:[#allocation22 + $0xc8] sm:$0xf0]  ;;  %v9144_v47 = vor.u32 %v10853_v52, %v9143_v61  ;;  %v9368_v21 = vor.u32 %v10909_v58, %v9367_v40  ;;  %v8808_v40 = vor.u32 %v10769_v48, %v8807_v45  ;;  %v9815_v1 = vld [vmem:[#allocation22 + $0x9a8] sm:$0xf] }
 0x52d   :  { %v8668_v4 = vor.u32 %v10734_v2, %v8667_v31  ;;  %v10123_v61 = vld [vmem:[#allocation22 + $0xc10] sm:$0xf]  ;;  %v11098_v58 = vld [vmem:[#allocation22 + $0xc28] sm:$0xf0]  ;;  %v9256_v2 = vor.u32 %v10881_v55, %v9255_v25  ;;  %v11021_v22 = vld [vmem:[#allocation22 + $0x9c0] sm:$0xf0]  ;;  %v9592_v45 = vor.u32 %v10965_v54, %v9591_v38 }
 0x52e   :  { %v10124_v13 = vor.u32 %v11098_v58, %v10123_v61  ;;  %v9816_v48 = vor.u32 %v11021_v22, %v9815_v1  ;;  %v9787_v25 = vld [vmem:[#allocation22 + $0x970] sm:$0xf]  ;;  %v11014_v55 = vld [vmem:[#allocation22 + $0x988] sm:$0xf0]  ;;  %v10951_v58 = vld [vmem:[#allocation22 + $0x790] sm:$0xf0] }
 0x52f   :  { %6588 = vmatpush.bf16.msra.mxu0 %v9476_v27  ;;  %6601 = vmatpush.bf16.msra.mxu1 %v9700_v20  ;;  %v8892_v27 = vor.u32 %v10790_v11, %v8891_v10  ;;  %v8639_v20 = vld [vmem:[#allocation22 + $0x78] sm:$0xf]  ;;  %v10979_v11 = vld [vmem:[#allocation22 + $0x870] sm:$0xf0]  ;;  %v10151_v38 = vld [vmem:[#allocation22 + $0xc48] sm:$0xf] }
 0x530   :  { %6614 = vmatpush.bf16.msra.mxu2 %v9924_v17  ;;  %6627 = vmatpush.bf16.msra.mxu3 %v10148_v3  ;;  %v8863_v17 = vld [vmem:[#allocation22 + $0x238] sm:$0xf]  ;;  %v10783_v3 = vld [vmem:[#allocation22 + $0x250] sm:$0xf0]  ;;  %v11105_v54 = vld [vmem:[#allocation22 + $0xc60] sm:$0xf0] }
 0x531   :  { %v9647_v10 = vld [vmem:[#allocation22 + $0x858] sm:$0xf]  ;;  %v10815_v1 = vld [vmem:[#allocation22 + $0x354] sm:$0xf]  ;;  %v9005_v22 = vld [vmem:[#allocation22 + $0x36c] sm:$0xf0] }
 0x532   :  { %6589 = vmatmul.bf16.vlgmr.msra.gmra.mxu0 %v12216_v12  ;;  %6602 = vmatmul.bf16.vlgmr.msra.gmra.mxu1 %v12218_v33 }
 0x533   :  { %6633 = vmatpush.bf16.msrb.mxu0 %v8780_v50  ;;  %6646 = vmatpush.bf16.msrb.mxu1 %v9004_v26  ;;  %v9087_v50 = vld [vmem:[#allocation22 + $0x3f8] sm:$0xf]  ;;  %v10839_v26 = vld [vmem:[#allocation22 + $0x410] sm:$0xf0] }
 0x534   :  { %6659 = vmatpush.bf16.msrb.mxu2 %v9228_v34  ;;  %6672 = vmatpush.bf16.msrb.mxu3 %v9452_v30  ;;  %v8640_v34 = vor.u32 %v10727_v16, %v8639_v20  ;;  %v8864_v30 = vor.u32 %v10783_v3, %v8863_v17  ;;  %v9088_v19 = vor.u32 %v10839_v26, %v9087_v50  ;;  %v10319_v20 = vld [vmem:[#allocation22 + $0xd98] sm:$0xf]  ;;  %v11147_v16 = vld [vmem:[#allocation22 + $0xdb0] sm:$0xf0]  ;;  %v9619_v17 = vld [vmem:[#allocation22 + $0x820] sm:$0xf] }
 0x535   :  { %6615 = vmatmul.bf16.vlgmr.msra.gmra.mxu2 %v12222_v8  ;;  %6628 = vmatmul.bf16.vlgmr.msra.gmra.mxu3 %v12220_v63  ;;  %v10972_v3 = vld [vmem:[#allocation22 + $0x838] sm:$0xf0]  ;;  %v10320_v26 = vor.u32 %v11147_v16, %v10319_v20  ;;  %v9731_v20 = vld [vmem:[#allocation22 + $0x900] sm:$0xf] }
 0x536   :  { %v11000_v16 = vld [vmem:[#allocation22 + $0x918] sm:$0xf0] }
 0x537   :  { %6634 = vmatpush.bf16.msrb.mxu0 %v8752_v56  ;;  %6647 = vmatpush.bf16.msrb.mxu1 %v8976_v35  ;;  %v9059_v56 = vld [vmem:[#allocation22 + $0x3c0] sm:$0xf]  ;;  %v10832_v35 = vld [vmem:[#allocation22 + $0x3d8] sm:$0xf0] }
 0x538   :  { %6660 = vmatpush.bf16.msrb.mxu2 %v9200_v41  ;;  %6673 = vmatpush.bf16.msrb.mxu3 %v9424_v42  ;;  %v8583_v41 = vld [vmem:[#allocation22 + $0x8] sm:$0xf]  ;;  %v8612_v42 = vor.u32 %v10720_v36, %v8611_v37  ;;  %v9060_v49 = vor.u32 %v10832_v35, %v9059_v56  ;;  %v10291_v37 = vld [vmem:[#allocation22 + $0xd60] sm:$0xf]  ;;  %v11140_v36 = vld [vmem:[#allocation22 + $0xd78] sm:$0xf0] }
 0x539   :  { %v8584_v52 = vor.u32 %v10713_v44, %v8583_v41  ;;  %v10292_v35 = vor.u32 %v11140_v36, %v10291_v37  ;;  %v10039_v41 = vld [vmem:[#allocation22 + $0xb68] sm:$0xf]  ;;  %v11133_v44 = vld [vmem:[#allocation22 + $0xd40] sm:$0xf0] }
 0x53b   :  { %6635 = vmatpush.bf16.msrb.mxu0 %v8724_v59  ;;  %6648 = vmatpush.bf16.msrb.mxu1 %v8948_v23  ;;  %v9031_v59 = vld [vmem:[#allocation22 + $0x388] sm:$0xf]  ;;  %v10825_v23 = vld [vmem:[#allocation22 + $0x3a0] sm:$0xf0] }
 0x53c   :  { %6661 = vmatpush.bf16.msrb.mxu2 %v9172_v18  ;;  %6674 = vmatpush.bf16.msrb.mxu3 %v9396_v0  ;;  %v9675_v18 = vld [vmem:[#allocation22 + $0x890] sm:$0xf]  ;;  %v10986_v0 = vld [vmem:[#allocation22 + $0x8a8] sm:$0xf0]  ;;  %v9032_v31 = vor.u32 %v10825_v23, %v9031_v59 }
 0x53f   :  { %6636 = vmatpush.bf16.msrb.mxu0 %v8696_v39  ;;  %6649 = vmatpush.bf16.msrb.mxu1 %v8920_v46  ;;  %v10347_v39 = vld [vmem:[#allocation22 + $0xdd0] sm:$0xf]  ;;  %v11154_v46 = vld [vmem:[#allocation22 + $0xde8] sm:$0xf0] }
 0x540   :  { %6662 = vmatpush.bf16.msrb.mxu2 %v9144_v47  ;;  %6675 = vmatpush.bf16.msrb.mxu3 %v9368_v21  ;;  %v9676_v47 = vor.u32 %v10986_v0, %v9675_v18  ;;  %v9900_v21 = vor.u32 %v11042_v53, %v9899_v6  ;;  %v10348_v14 = vor.u32 %v11154_v46, %v10347_v39  ;;  %v10011_v18 = vld [vmem:[#allocation22 + $0xb30] sm:$0xf]  ;;  %v11070_v0 = vld [vmem:[#allocation22 + $0xb48] sm:$0xf0] }
 0x541   :  { %v10235_v6 = vld [vmem:[#allocation22 + $0xcf0] sm:$0xf]  ;;  %v11126_v53 = vld [vmem:[#allocation22 + $0xd08] sm:$0xf0]  ;;  %v10012_v39 = vor.u32 %v11070_v0, %v10011_v18 }
 0x542   :  { %v10236_v46 = vor.u32 %v11126_v53, %v10235_v6  ;;  %v10808_v6 = vld [vmem:[#allocation22 + $0x31c] sm:$0xf]  ;;  %v8977_v53 = vld [vmem:[#allocation22 + $0x334] sm:$0xf0] }
 0x543   :  { %6637 = vmatpush.bf16.msrb.mxu0 %v8668_v4  ;;  %6650 = vmatpush.bf16.msrb.mxu1 %v8892_v27  ;;  %v10095_v4 = vld [vmem:[#allocation22 + $0xbd8] sm:$0xf]  ;;  %v11091_v27 = vld [vmem:[#allocation22 + $0xbf0] sm:$0xf0] }
 0x544   :  { %6663 = vmatpush.bf16.msrb.mxu2 %v9116_v7  ;;  %6676 = vmatpush.bf16.msrb.mxu3 %v9340_v24  ;;  %v9648_v7 = vor.u32 %v10979_v11, %v9647_v10  ;;  %v9872_v24 = vor.u32 %v11035_v5, %v9871_v15  ;;  %v10096_v50 = vor.u32 %v11091_v27, %v10095_v4  ;;  %v10207_v10 = vld [vmem:[#allocation22 + $0xcb8] sm:$0xf]  ;;  %v11119_v11 = vld [vmem:[#allocation22 + $0xcd0] sm:$0xf0]  ;;  %v9507_v15 = vld [vmem:[#allocation22 + $0x740] sm:$0xf] }
 0x545   :  { %v10944_v5 = vld [vmem:[#allocation22 + $0x758] sm:$0xf0]  ;;  %v10208_v27 = vor.u32 %v11119_v11, %v10207_v10  ;;  %v8949_v11 = vld [vmem:[#allocation22 + $0x2fc] sm:$0xf0] }
 0x547   :  { %6638 = vmatpush.bf16.msrb.mxu0 %v8640_v34  ;;  %6651 = vmatpush.bf16.msrb.mxu1 %v8864_v30  ;;  %v10067_v34 = vld [vmem:[#allocation22 + $0xba0] sm:$0xf]  ;;  %v11084_v30 = vld [vmem:[#allocation22 + $0xbb8] sm:$0xf0] }
 0x548   :  { %6664 = vmatpush.bf16.msrb.mxu2 %v9088_v19  ;;  %6677 = vmatpush.bf16.msrb.mxu3 %v9312_v9  ;;  %v9620_v19 = vor.u32 %v10972_v3, %v9619_v17  ;;  %v9844_v9 = vor.u32 %v11028_v29, %v9843_v28  ;;  %v10068_v56 = vor.u32 %v11084_v30, %v10067_v34  ;;  %v10179_v17 = vld [vmem:[#allocation22 + $0xc80] sm:$0xf]  ;;  %v11112_v3 = vld [vmem:[#allocation22 + $0xc98] sm:$0xf0]  ;;  %v10937_v29 = vld [vmem:[#allocation22 + $0x720] sm:$0xf0] }
 0x549   :  { %v9732_v28 = vor.u32 %v11000_v16, %v9731_v20  ;;  %v9703_v34 = vld [vmem:[#allocation22 + $0x8c8] sm:$0xf]  ;;  %v10993_v30 = vld [vmem:[#allocation22 + $0x8e0] sm:$0xf0]  ;;  %v10180_v36 = vor.u32 %v11112_v3, %v10179_v17  ;;  %v10738_v17 = vld [vmem:[#allocation22 + $0xec] sm:$0xf] }
 0x54a   :  { %v8697_v3 = vld [vmem:[#allocation22 + $0x104] sm:$0xf0] }
 0x54b   :  { %6639 = vmatpush.bf16.msrb.mxu0 %v8612_v42  ;;  %6652 = vmatpush.bf16.msrb.mxu1 %v8836_v43  ;;  %v11077_v42 = vld [vmem:[#allocation22 + $0xb80] sm:$0xf0]  ;;  %v10263_v43 = vld [vmem:[#allocation22 + $0xd28] sm:$0xf] }
 0x54c   :  { %6665 = vmatpush.bf16.msrb.mxu2 %v9060_v49  ;;  %6678 = vmatpush.bf16.msrb.mxu3 %v9284_v51  ;;  %v9563_v49 = vld [vmem:[#allocation22 + $0x7b0] sm:$0xf]  ;;  %v10958_v51 = vld [vmem:[#allocation22 + $0x7c8] sm:$0xf0]  ;;  %v10040_v59 = vor.u32 %v11077_v42, %v10039_v41  ;;  %v10264_v23 = vor.u32 %v11133_v44, %v10263_v43  ;;  %v10871_v41 = vld [vmem:[#allocation22 + $0x514] sm:$0xf]  ;;  %v9704_v43 = vor.u32 %v10993_v30, %v9703_v34 }
 0x54d   :  { %v9564_v61 = vor.u32 %v10958_v51, %v9563_v49  ;;  %v9229_v44 = vld [vmem:[#allocation22 + $0x52c] sm:$0xf0]  ;;  %v10152_v51 = vor.u32 %v11105_v54, %v10151_v38  ;;  %v10850_v34 = vld [vmem:[#allocation22 + $0x46c] sm:$0xf]  ;;  %v9145_v30 = vld [vmem:[#allocation22 + $0x484] sm:$0xf0] }
 0x54e   :  { %v9232_v18 = vor.u32 %v10871_v41, %v9229_v44  ;;  %v10731_v38 = vld [vmem:[#allocation22 + $0xb4] sm:$0xf]  ;;  %v8669_v54 = vld [vmem:[#allocation22 + $0xcc] sm:$0xf0] }
 0x54f   :  { %6640 = vmatpush.bf16.msrb.mxu0 %v8584_v52  ;;  %6653 = vmatpush.bf16.msrb.mxu1 %v8808_v40  ;;  %v9788_v52 = vor.u32 %v11014_v55, %v9787_v25  ;;  %v9535_v40 = vld [vmem:[#allocation22 + $0x778] sm:$0xf]  ;;  %v10752_v25 = vld [vmem:[#allocation22 + $0x15c] sm:$0xf]  ;;  %v8893_v41 = vld [vmem:[#allocation22 + $0x28c] sm:$0xf0] }
 0x550   :  { %6666 = vmatpush.bf16.msrb.mxu2 %v9032_v31  ;;  %6679 = vmatpush.bf16.msrb.mxu3 %v9256_v2  ;;  %v9759_v31 = vld [vmem:[#allocation22 + $0x938] sm:$0xf]  ;;  %v11007_v2 = vld [vmem:[#allocation22 + $0x950] sm:$0xf0] }
 0x551   :  { %v8753_v55 = vld [vmem:[#allocation22 + $0x174] sm:$0xf0] }
 0x552   :  { %6641 = vmatmul.bf16.vlgmr.msrb.gmra.mxu0 %v12196_v57  ;;  %6654 = vmatmul.bf16.vlgmr.msrb.gmra.mxu1 %v12198_v32 }
 0x553   :  { %6685 = vmatpush.bf16.msra.mxu0 %v9676_v47  ;;  %6698 = vmatpush.bf16.msra.mxu1 %v9900_v21  ;;  %v9983_v47 = vld [vmem:[#allocation22 + $0xaf8] sm:$0xf]  ;;  %v11063_v21 = vld [vmem:[#allocation22 + $0xb10] sm:$0xf0] }
 0x554   :  { %6711 = vmatpush.bf16.msra.mxu2 %v10124_v13  ;;  %6724 = vmatpush.bf16.msra.mxu3 %v10348_v14  ;;  %v9536_v13 = vor.u32 %v10951_v58, %v9535_v40  ;;  %v9760_v14 = vor.u32 %v11007_v2, %v9759_v31  ;;  %v9984_v4 = vor.u32 %v11063_v21, %v9983_v47  ;;  %v10920_v40 = vld [vmem:[#allocation22 + $0x69c] sm:$0xf]  ;;  %v9425_v58 = vld [vmem:[#allocation22 + $0x6b4] sm:$0xf0]  ;;  %v10745_v31 = vld [vmem:[#allocation22 + $0x124] sm:$0xf] }
 0x555   :  { %6667 = vmatmul.bf16.vlgmr.msrb.gmra.mxu2 %v12200_v60  ;;  %6680 = vmatmul.bf16.vlgmr.msrb.gmra.mxu3 %v12202_v62  ;;  %v8725_v2 = vld [vmem:[#allocation22 + $0x13c] sm:$0xf0]  ;;  %v10801_v47 = vld [vmem:[#allocation22 + $0x2e4] sm:$0xf]  ;;  %v9428_v10 = vor.u32 %v10920_v40, %v9425_v58  ;;  %v10836_v40 = vld [vmem:[#allocation22 + $0x3fc] sm:$0xf] }
 0x556   :  { %v8728_v16 = vor.u32 %v10745_v31, %v8725_v2  ;;  %v9089_v58 = vld [vmem:[#allocation22 + $0x414] sm:$0xf0] }
 0x557   :  { %6686 = vmatpush.bf16.msra.mxu0 %v9648_v7  ;;  %6699 = vmatpush.bf16.msra.mxu1 %v9872_v24  ;;  %v9955_v7 = vld [vmem:[#allocation22 + $0xac0] sm:$0xf]  ;;  %v11056_v24 = vld [vmem:[#allocation22 + $0xad8] sm:$0xf0] }
 0x558   :  { %6712 = vmatpush.bf16.msra.mxu2 %v10096_v50  ;;  %6725 = vmatpush.bf16.msra.mxu3 %v10320_v26  ;;  %v9479_v50 = vld [vmem:[#allocation22 + $0x708] sm:$0xf]  ;;  %v9508_v26 = vor.u32 %v10944_v5, %v9507_v15  ;;  %v9956_v37 = vor.u32 %v11056_v24, %v9955_v7  ;;  %v9173_v15 = vld [vmem:[#allocation22 + $0x4bc] sm:$0xf0]  ;;  %v10913_v5 = vld [vmem:[#allocation22 + $0x664] sm:$0xf]  ;;  %v8952_v7 = vor.u32 %v10801_v47, %v8949_v11 }
 0x559   :  { %v9480_v42 = vor.u32 %v10937_v29, %v9479_v50  ;;  %v8921_v29 = vld [vmem:[#allocation22 + $0x2c4] sm:$0xf0]  ;;  %v9092_v11 = vor.u32 %v10836_v40, %v9089_v58 }
 0x55b   :  { %6687 = vmatpush.bf16.msra.mxu0 %v9620_v19  ;;  %6700 = vmatpush.bf16.msra.mxu1 %v9844_v9  ;;  %v9927_v19 = vld [vmem:[#allocation22 + $0xa88] sm:$0xf]  ;;  %v11049_v9 = vld [vmem:[#allocation22 + $0xaa0] sm:$0xf0] }
 0x55c   :  { %6713 = vmatpush.bf16.msra.mxu2 %v10068_v56  ;;  %6726 = vmatpush.bf16.msra.mxu3 %v10292_v35  ;;  %v10759_v56 = vld [vmem:[#allocation22 + $0x194] sm:$0xf]  ;;  %v8781_v35 = vld [vmem:[#allocation22 + $0x1ac] sm:$0xf0]  ;;  %v9928_v49 = vor.u32 %v11049_v9, %v9927_v19  ;;  %v8700_v19 = vor.u32 %v10738_v17, %v8697_v3 }
 0x55f   :  { %6688 = vmatpush.bf16.msra.mxu0 %v9592_v45  ;;  %6701 = vmatpush.bf16.msra.mxu1 %v9816_v48  ;;  %v10927_v45 = vld [vmem:[#allocation22 + $0x6d4] sm:$0xf]  ;;  %v9453_v48 = vld [vmem:[#allocation22 + $0x6ec] sm:$0xf0] }
 0x560   :  { %6714 = vmatpush.bf16.msra.mxu2 %v10040_v59  ;;  %6727 = vmatpush.bf16.msra.mxu3 %v10264_v23  ;;  %v8784_v59 = vor.u32 %v10759_v56, %v8781_v35  ;;  %v9008_v23 = vor.u32 %v10815_v1, %v9005_v22  ;;  %v9456_v0 = vor.u32 %v10927_v45, %v9453_v48  ;;  %v10787_v22 = vld [vmem:[#allocation22 + $0x274] sm:$0xf]  ;;  %v9117_v45 = vld [vmem:[#allocation22 + $0x44c] sm:$0xf0] }
 0x561   :  { %v9148_v35 = vor.u32 %v10850_v34, %v9145_v30  ;;  %v10899_v48 = vld [vmem:[#allocation22 + $0x5f4] sm:$0xf]  ;;  %v8585_v34 = vld [vmem:[#allocation22 + $0x24] sm:$0xf0]  ;;  %v10766_v30 = vld [vmem:[#allocation22 + $0x1cc] sm:$0xf] }
 0x563   :  { %6689 = vmatpush.bf16.msra.mxu0 %v9564_v61  ;;  %6702 = vmatpush.bf16.msra.mxu1 %v9788_v52  ;;  %v10864_v61 = vld [vmem:[#allocation22 + $0x4dc] sm:$0xf]  ;;  %v9201_v52 = vld [vmem:[#allocation22 + $0x4f4] sm:$0xf0] }
 0x564   :  { %6715 = vmatpush.bf16.msra.mxu2 %v10012_v39  ;;  %6728 = vmatpush.bf16.msra.mxu3 %v10236_v46  ;;  %v8756_v39 = vor.u32 %v10752_v25, %v8753_v55  ;;  %v8980_v46 = vor.u32 %v10808_v6, %v8977_v53  ;;  %v9204_v21 = vor.u32 %v10864_v61, %v9201_v52  ;;  %v10724_v55 = vld [vmem:[#allocation22 + $0x7c] sm:$0xf]  ;;  %v8865_v52 = vld [vmem:[#allocation22 + $0x254] sm:$0xf0] }
 0x565   :  { %v8896_v25 = vor.u32 %v10787_v22, %v8893_v41  ;;  %v10780_v61 = vld [vmem:[#allocation22 + $0x23c] sm:$0xf]  ;;  %v9677_v22 = vld [vmem:[#allocation22 + $0x8ac] sm:$0xf0]  ;;  %v11039_v41 = vld [vmem:[#allocation22 + $0xa54] sm:$0xf] }
 0x566   :  { %v8868_v47 = vor.u32 %v10780_v61, %v8865_v52  ;;  %v9649_v61 = vld [vmem:[#allocation22 + $0x874] sm:$0xf0] }
 0x567   :  { %6690 = vmatpush.bf16.msra.mxu0 %v9536_v13  ;;  %6703 = vmatpush.bf16.msra.mxu1 %v9760_v14  ;;  %v10857_v13 = vld [vmem:[#allocation22 + $0x4a4] sm:$0xf] }
 0x568   :  { %6716 = vmatpush.bf16.msra.mxu2 %v9984_v4  ;;  %6729 = vmatpush.bf16.msra.mxu3 %v10208_v27  ;;  %v12240_v14 = vld [vmem:[#allocation23] sm:$0xff]  ;;  %v9176_v50 = vor.u32 %v10857_v13, %v9173_v15 }
 0x569   :  { %v9397_v4 = vld [vmem:[#allocation22 + $0x67c] sm:$0xf0]  ;;  %v4107_v24 = vperm.slane %v12240_v14, 0  ;;  %v10773_v15 = vld [vmem:[#allocation22 + $0x204] sm:$0xf] }
 0x56b   :  { %6691 = vmatpush.bf16.msra.mxu0 %v9508_v26  ;;  %6704 = vmatpush.bf16.msra.mxu1 %v9732_v28  ;;  %v9400_v26 = vor.u32 %v10913_v5, %v9397_v4  ;;  %v10794_v28 = vld [vmem:[#allocation22 + $0x2ac] sm:$0xf]  ;;  %v8837_v5 = vld [vmem:[#allocation22 + $0x21c] sm:$0xf0]  ;;  %v10829_v4 = vld [vmem:[#allocation22 + $0x3c4] sm:$0xf] }
 0x56c   :  { %6717 = vmatpush.bf16.msra.mxu2 %v9956_v37  ;;  %6730 = vmatpush.bf16.msra.mxu3 %v10180_v36  ;;  %v10906_v37 = vld [vmem:[#allocation22 + $0x62c] sm:$0xf]  ;;  %v9369_v36 = vld [vmem:[#allocation22 + $0x644] sm:$0xf0]  ;;  %v8924_v9 = vor.u32 %v10794_v28, %v8921_v29  ;;  %v8840_v29 = vor.u32 %v10773_v15, %v8837_v5 }
 0x56d   :  { %v9372_v1 = vor.u32 %v10906_v37, %v9369_v36  ;;  %v8809_v37 = vld [vmem:[#allocation22 + $0x1e4] sm:$0xf0] }
 0x56e   :  { %v6434_v27 = vpop.f32.mrf.mxu0  ;;  %v6447_v20 = vpop.f32.mrf.mxu1 }
 0x56f   :  { %6692 = vmatpush.bf16.msra.mxu0 %v9480_v42  ;;  %6705 = vmatpush.bf16.msra.mxu1 %v9704_v43  ;;  %v6435_v56 = vadd.f32 %v6434_v27, %v4107_v24  ;;  %v10843_v42 = vld [vmem:[#allocation22 + $0x434] sm:$0xf]  ;;  %v9285_v24 = vld [vmem:[#allocation22 + $0x59c] sm:$0xf0] }
 0x570   :  { %6718 = vmatpush.bf16.msra.mxu2 %v9928_v49  ;;  %6731 = vmatpush.bf16.msra.mxu3 %v10152_v51  ;;  %v9341_v49 = vld [vmem:[#allocation22 + $0x60c] sm:$0xf0]  ;;  %v9120_v6 = vor.u32 %v10843_v42, %v9117_v45  ;;  %v8812_v45 = vor.u32 %v10766_v30, %v8809_v37  ;;  %v10962_v37 = vld [vmem:[#allocation22 + $0x7ec] sm:$0xf] }
 0x571   :  { %v9344_v53 = vor.u32 %v10899_v48, %v9341_v49  ;;  %v9901_v42 = vld [vmem:[#allocation22 + $0xa6c] sm:$0xf0]  ;;  %v11151_v49 = vld [vmem:[#allocation22 + $0xdd4] sm:$0xf] }
 0x572   :  { %6693 = vmatmul.bf16.vlgmr.msra.gmra.mxu0 %v12216_v12  ;;  %6706 = vmatmul.bf16.vlgmr.msra.gmra.mxu1 %v12218_v33  ;;  %v10125_v48 = vld [vmem:[#allocation22 + $0xc2c] sm:$0xf0] }
 0x573   :  { %6737 = vmatpush.bf16.msrb.mxu0 %v8784_v59  ;;  %6750 = vmatpush.bf16.msrb.mxu1 %v9008_v23  ;;  %v8672_v23 = vor.u32 %v10731_v38, %v8669_v54  ;;  %v10822_v38 = vld [vmem:[#allocation22 + $0x38c] sm:$0xf]  ;;  %v9033_v54 = vld [vmem:[#allocation22 + $0x3a4] sm:$0xf0] }
 0x574   :  { %6763 = vmatpush.bf16.msrb.mxu2 %v9232_v18  ;;  %6776 = vmatpush.bf16.msrb.mxu3 %v9456_v0  ;;  %v8641_v18 = vld [vmem:[#allocation22 + $0x94] sm:$0xf0]  ;;  %v6448_v0 = vadd.f32 %v6447_v20, %v6435_v56  ;;  %v10878_v56 = vld [vmem:[#allocation22 + $0x54c] sm:$0xf] }
 0x575   :  { %6719 = vmatmul.bf16.vlgmr.msra.gmra.mxu2 %v12222_v8  ;;  %6732 = vmatmul.bf16.vlgmr.msra.gmra.mxu3 %v12220_v63  ;;  %v6460_v43 = vpop.f32.mrf.mxu2  ;;  %v6473_v44 = vpop.f32.mrf.mxu3  ;;  %v8644_v2 = vor.u32 %v10724_v55, %v8641_v18  ;;  %v9904_v18 = vor.u32 %v11039_v41, %v9901_v42 }
 0x576   :  { %v6436_v51 = vpop.f32.mrf.mxu0  ;;  %v6449_v59 = vpop.f32.mrf.mxu1  ;;  %v6461_v31 = vadd.f32 %v6460_v43, %v6448_v0  ;;  %v11095_v43 = vld [vmem:[#allocation22 + $0xc14] sm:$0xf] }
 0x577   :  { %6738 = vmatpush.bf16.msrb.mxu0 %v8756_v39  ;;  %6751 = vmatpush.bf16.msrb.mxu1 %v8980_v46  ;;  %v10892_v39 = vld [vmem:[#allocation22 + $0x5bc] sm:$0xf]  ;;  %v9313_v46 = vld [vmem:[#allocation22 + $0x5d4] sm:$0xf0]  ;;  %v10349_v51 = vld [vmem:[#allocation22 + $0xdec] sm:$0xf0]  ;;  %v10128_v52 = vor.u32 %v11095_v43, %v10125_v48 }
 0x578   :  { %6764 = vmatpush.bf16.msrb.mxu2 %v9204_v21  ;;  %6777 = vmatpush.bf16.msrb.mxu3 %v9428_v10  ;;  %v10717_v21 = vld [vmem:[#allocation22 + $0x44] sm:$0xf]  ;;  %v8613_v10 = vld [vmem:[#allocation22 + $0x5c] sm:$0xf0]  ;;  %v9316_v13 = vor.u32 %v10892_v39, %v9313_v46  ;;  %v6474_v17 = vadd.f32 %v6473_v44, %v6461_v31  ;;  %v10352_v40 = vor.u32 %v11151_v49, %v10349_v51  ;;  %v11032_v31 = vld [vmem:[#allocation22 + $0xa1c] sm:$0xf] }
 0x579   :  { %v8616_v28 = vor.u32 %v10717_v21, %v8613_v10  ;;  %v10097_v21 = vld [vmem:[#allocation22 + $0xbf4] sm:$0xf0]  ;;  %v11144_v10 = vld [vmem:[#allocation22 + $0xd9c] sm:$0xf]  ;;  %v10955_v48 = vld [vmem:[#allocation22 + $0x7b4] sm:$0xf] }
 0x57a   :  { %v9565_v49 = vld [vmem:[#allocation22 + $0x7cc] sm:$0xf0] }
 0x57b   :  { %6739 = vmatpush.bf16.msrb.mxu0 %v8728_v16  ;;  %6752 = vmatpush.bf16.msrb.mxu1 %v8952_v7  ;;  %v9061_v16 = vld [vmem:[#allocation22 + $0x3dc] sm:$0xf0]  ;;  %v10885_v7 = vld [vmem:[#allocation22 + $0x584] sm:$0xf] }
 0x57c   :  { %6765 = vmatpush.bf16.msrb.mxu2 %v9176_v50  ;;  %6778 = vmatpush.bf16.msrb.mxu3 %v9400_v26  ;;  %v10710_v26 = vld [vmem:[#allocation22 + $0xc] sm:$0xf]  ;;  %v9064_v36 = vor.u32 %v10829_v4, %v9061_v16  ;;  %v10969_v4 = vld [vmem:[#allocation22 + $0x824] sm:$0xf] }
 0x57d   :  { %v6462_v27 = vpop.f32.mrf.mxu2  ;;  %v6475_v20 = vpop.f32.mrf.mxu3  ;;  %v8588_v44 = vor.u32 %v10710_v26, %v8585_v34  ;;  %v10293_v26 = vld [vmem:[#allocation22 + $0xd7c] sm:$0xf0] }
 0x57e   :  { %v6486_v3 = vpop.f32.mrf.mxu0  ;;  %v6499_v50 = vpop.f32.mrf.mxu1  ;;  %v9621_v27 = vld [vmem:[#allocation22 + $0x83c] sm:$0xf0] }
 0x57f   :  { %6740 = vmatpush.bf16.msrb.mxu0 %v8700_v19  ;;  %6753 = vmatpush.bf16.msrb.mxu1 %v8924_v9  ;;  %v9288_v19 = vor.u32 %v10885_v7, %v9285_v24  ;;  %v6487_v9 = vadd.f32 %v6486_v3, %v6474_v17  ;;  %v11025_v7 = vld [vmem:[#allocation22 + $0x9e4] sm:$0xf]  ;;  %v9845_v24 = vld [vmem:[#allocation22 + $0x9fc] sm:$0xf0] }
 0x580   :  { %6766 = vmatpush.bf16.msrb.mxu2 %v9148_v35  ;;  %6779 = vmatpush.bf16.msrb.mxu3 %v9372_v1  ;;  %v9257_v35 = vld [vmem:[#allocation22 + $0x564] sm:$0xf0]  ;;  %v10983_v1 = vld [vmem:[#allocation22 + $0x894] sm:$0xf]  ;;  %v11081_v17 = vld [vmem:[#allocation22 + $0xba4] sm:$0xf] }
 0x581   :  { %v6500_v59 = vadd.f32 %v6499_v50, %v6487_v9  ;;  %v9680_v55 = vor.u32 %v10983_v1, %v9677_v22  ;;  %v10069_v3 = vld [vmem:[#allocation22 + $0xbbc] sm:$0xf0]  ;;  %v11137_v50 = vld [vmem:[#allocation22 + $0xd64] sm:$0xf]  ;;  %v11130_v1 = vld [vmem:[#allocation22 + $0xd2c] sm:$0xf] }
 0x582   :  { %v10296_v9 = vor.u32 %v11137_v50, %v10293_v26  ;;  %v10265_v22 = vld [vmem:[#allocation22 + $0xd44] sm:$0xf0]  ;;  %v11053_v50 = vld [vmem:[#allocation22 + $0xac4] sm:$0xf]  ;;  %v9957_v26 = vld [vmem:[#allocation22 + $0xadc] sm:$0xf0] }
 0x583   :  { %6741 = vmatpush.bf16.msrb.mxu0 %v8672_v23  ;;  %6754 = vmatpush.bf16.msrb.mxu1 %v8896_v25  ;;  %v9036_v23 = vor.u32 %v10822_v38, %v9033_v54  ;;  %v9260_v25 = vor.u32 %v10878_v56, %v9257_v35  ;;  %v11018_v38 = vld [vmem:[#allocation22 + $0x9ac] sm:$0xf]  ;;  %v9817_v54 = vld [vmem:[#allocation22 + $0x9c4] sm:$0xf0] }
 0x584   :  { %6767 = vmatpush.bf16.msrb.mxu2 %v9120_v6  ;;  %6780 = vmatpush.bf16.msrb.mxu3 %v9344_v53  ;;  %v10976_v53 = vld [vmem:[#allocation22 + $0x85c] sm:$0xf]  ;;  %v11074_v56 = vld [vmem:[#allocation22 + $0xb6c] sm:$0xf]  ;;  %v10041_v35 = vld [vmem:[#allocation22 + $0xb84] sm:$0xf0] }
 0x585   :  { %v6512_v0 = vpop.f32.mrf.mxu2  ;;  %v6525_v6 = vpop.f32.mrf.mxu3  ;;  %v9652_v15 = vor.u32 %v10976_v53, %v9649_v61  ;;  %v10044_v51 = vor.u32 %v11074_v56, %v10041_v35  ;;  %v9568_v53 = vor.u32 %v10955_v48, %v9565_v49  ;;  %v11046_v35 = vld [vmem:[#allocation22 + $0xa8c] sm:$0xf]  ;;  %v8787_v48 = vld [vmem:[#allocation22 + $0x198] sm:$0xf] }
 0x586   :  { %v6513_v58 = vadd.f32 %v6512_v0, %v6500_v59  ;;  %v6488_v39 = vpop.f32.mrf.mxu0  ;;  %v6501_v46 = vpop.f32.mrf.mxu1  ;;  %v10268_v59 = vor.u32 %v11130_v1, %v10265_v22  ;;  %v11123_v0 = vld [vmem:[#allocation22 + $0xcf4] sm:$0xf]  ;;  %v9929_v1 = vld [vmem:[#allocation22 + $0xaa4] sm:$0xf0]  ;;  %v11102_v22 = vld [vmem:[#allocation22 + $0xc4c] sm:$0xf] }
 0x587   :  { %6742 = vmatpush.bf16.msrb.mxu0 %v8644_v2  ;;  %6755 = vmatpush.bf16.msrb.mxu1 %v8868_v47  ;;  %v9873_v2 = vld [vmem:[#allocation22 + $0xa34] sm:$0xf0]  ;;  %v11088_v47 = vld [vmem:[#allocation22 + $0xbdc] sm:$0xf] }
 0x588   :  { %6768 = vmatpush.bf16.msrb.mxu2 %v9092_v11  ;;  %6781 = vmatpush.bf16.msrb.mxu3 %v9316_v13  ;;  %v10321_v11 = vld [vmem:[#allocation22 + $0xdb4] sm:$0xf0]  ;;  %v6526_v13 = vadd.f32 %v6525_v6, %v6513_v58  ;;  %v9876_v5 = vor.u32 %v11032_v31, %v9873_v2  ;;  %v10100_v20 = vor.u32 %v11088_v47, %v10097_v21  ;;  %v10237_v6 = vld [vmem:[#allocation22 + $0xd0c] sm:$0xf0]  ;;  %v11004_v46 = vld [vmem:[#allocation22 + $0x93c] sm:$0xf] }
 0x589   :  { %v10324_v16 = vor.u32 %v11144_v10, %v10321_v11  ;;  %v10240_v39 = vor.u32 %v11123_v0, %v10237_v6  ;;  %v9761_v31 = vld [vmem:[#allocation22 + $0x954] sm:$0xf0]  ;;  %v11060_v2 = vld [vmem:[#allocation22 + $0xafc] sm:$0xf]  ;;  %v10931_v0 = vld [vmem:[#allocation22 + $0x6f0] sm:$0xf0]  ;;  %v9932_v6 = vor.u32 %v11046_v35, %v9929_v1 }
 0x58a   :  { %11214 = vtanh.f32 %v6526_v13  ;;  %v9985_v10 = vld [vmem:[#allocation22 + $0xb14] sm:$0xf0]  ;;  %v11116_v11 = vld [vmem:[#allocation22 + $0xcbc] sm:$0xf]  ;;  %v10854_v35 = vld [vmem:[#allocation22 + $0x488] sm:$0xf0] }
 0x58b   :  { %6743 = vmatpush.bf16.msrb.mxu0 %v8616_v28  ;;  %6756 = vmatpush.bf16.msrb.mxu1 %v8840_v29  ;;  %v9624_v28 = vor.u32 %v10969_v4, %v9621_v27  ;;  %v9848_v29 = vor.u32 %v11025_v7, %v9845_v24  ;;  %v10209_v13 = vld [vmem:[#allocation22 + $0xcd4] sm:$0xf0]  ;;  %v9764_v27 = vor.u32 %v11004_v46, %v9761_v31  ;;  %v9375_v1 = vld [vmem:[#allocation22 + $0x630] sm:$0xf] }
 0x58c   :  { %6769 = vmatpush.bf16.msrb.mxu2 %v9064_v36  ;;  %6782 = vmatpush.bf16.msrb.mxu3 %v9288_v19  ;;  %v9593_v36 = vld [vmem:[#allocation22 + $0x804] sm:$0xf0]  ;;  %v10072_v19 = vor.u32 %v11081_v17, %v10069_v3  ;;  %v9988_v7 = vor.u32 %v11060_v2, %v9985_v10  ;;  %v10212_v24 = vor.u32 %v11116_v11, %v10209_v13  ;;  %v10997_v17 = vld [vmem:[#allocation22 + $0x904] sm:$0xf]  ;;  %v9733_v3 = vld [vmem:[#allocation22 + $0x91c] sm:$0xf0] }
 0x58d   :  { %v6514_v34 = vpop.f32.mrf.mxu2  ;;  %v6527_v30 = vpop.f32.mrf.mxu3  ;;  %v9011_v49 = vld [vmem:[#allocation22 + $0x358] sm:$0xf]  ;;  %v8983_v2 = vld [vmem:[#allocation22 + $0x320] sm:$0xf]  ;;  %v10812_v10 = vld [vmem:[#allocation22 + $0x338] sm:$0xf0] }
 0x58e   :  { %v4108_v34 = vperm.slane %v12240_v14, 1  ;;  %v10934_v30 = vld [vmem:[#allocation22 + $0x70c] sm:$0xf]  ;;  %v10763_v14 = vld [vmem:[#allocation22 + $0x1b0] sm:$0xf0] }
 0x58f   :  { %6744 = vmatpush.bf16.msrb.mxu0 %v8588_v44  ;;  %6757 = vmatpush.bf16.msrb.mxu1 %v8812_v45  ;;  %v12251_v42 = vpop.f32.mrf.mxu0  ;;  %v12253_v43 = vpop.f32.mrf.mxu1  ;;  %v9596_v44 = vor.u32 %v10962_v37, %v9593_v36  ;;  %v9820_v45 = vor.u32 %v11018_v38, %v9817_v54  ;;  %v9736_v36 = vor.u32 %v10997_v17, %v9733_v3  ;;  %v9705_v38 = vld [vmem:[#allocation22 + $0x8e4] sm:$0xf0]  ;;  %v9207_v11 = vld [vmem:[#allocation22 + $0x4e0] sm:$0xf]  ;;  %v10868_v13 = vld [vmem:[#allocation22 + $0x4f8] sm:$0xf0] }
 0x590   :  { %6770 = vmatpush.bf16.msrb.mxu2 %v9036_v23  ;;  %6783 = vmatpush.bf16.msrb.mxu3 %v9260_v25  ;;  %v11215_v41 = vpop.eup %11214  ;;  %v11011_v23 = vld [vmem:[#allocation22 + $0x974] sm:$0xf]  ;;  %v9789_v25 = vld [vmem:[#allocation22 + $0x98c] sm:$0xf0]  ;;  %v9960_v54 = vor.u32 %v11053_v50, %v9957_v26  ;;  %v8955_v17 = vld [vmem:[#allocation22 + $0x2e8] sm:$0xf] }
 0x591   :  { %7160 = vst [vmem:[#allocation25] sm:$0xff] %v11215_v41  ;;  %v9792_v61 = vor.u32 %v11011_v23, %v9789_v25  ;;  %v10805_v3 = vld [vmem:[#allocation22 + $0x300] sm:$0xf0]  ;;  %v9179_v50 = vld [vmem:[#allocation22 + $0x4a8] sm:$0xf] }
 0x592   :  { %6745 = vmatmul.bf16.vlgmr.msrb.gmra.mxu0 %v12196_v57  ;;  %6758 = vmatmul.bf16.vlgmr.msrb.gmra.mxu1 %v12198_v32  ;;  %v10861_v26 = vld [vmem:[#allocation22 + $0x4c0] sm:$0xf0] }
 0x593   :  { %6789 = vmatpush.bf16.msra.mxu0 %v9680_v55  ;;  %6802 = vmatpush.bf16.msra.mxu1 %v9904_v18  ;;  %v11067_v55 = vld [vmem:[#allocation22 + $0xb34] sm:$0xf]  ;;  %v10013_v18 = vld [vmem:[#allocation22 + $0xb4c] sm:$0xf0] }
 0x594   :  { %6815 = vmatpush.bf16.msra.mxu2 %v10128_v52  ;;  %6828 = vmatpush.bf16.msra.mxu3 %v10352_v40  ;;  %v10948_v52 = vld [vmem:[#allocation22 + $0x77c] sm:$0xf]  ;;  %v9537_v40 = vld [vmem:[#allocation22 + $0x794] sm:$0xf0]  ;;  %v10016_v58 = vor.u32 %v11067_v55, %v10013_v18  ;;  %v10875_v55 = vld [vmem:[#allocation22 + $0x530] sm:$0xf0] }
 0x595   :  { %6771 = vmatmul.bf16.vlgmr.msrb.gmra.mxu2 %v12200_v60  ;;  %6784 = vmatmul.bf16.vlgmr.msrb.gmra.mxu3 %v12202_v62  ;;  %v9540_v4 = vor.u32 %v10948_v52, %v9537_v40  ;;  %v9459_v18 = vld [vmem:[#allocation22 + $0x6d8] sm:$0xf]  ;;  %v8759_v40 = vld [vmem:[#allocation22 + $0x160] sm:$0xf] }
 0x596   :  { %v9460_v31 = vor.u32 %v10931_v0, %v9459_v18  ;;  %v9123_v18 = vld [vmem:[#allocation22 + $0x438] sm:$0xf]  ;;  %v10847_v0 = vld [vmem:[#allocation22 + $0x450] sm:$0xf0] }
 0x597   :  { %6790 = vmatpush.bf16.msra.mxu0 %v9652_v15  ;;  %6803 = vmatpush.bf16.msra.mxu1 %v9876_v5  ;;  %v6540_v15 = vpop.f32.mrf.mxu0  ;;  %v6553_v5 = vpop.f32.mrf.mxu1 }
 0x598   :  { %6816 = vmatpush.bf16.msra.mxu2 %v10100_v20  ;;  %6829 = vmatpush.bf16.msra.mxu3 %v10324_v16  ;;  %v12255_v47 = vpop.f32.mrf.mxu2  ;;  %v12257_v21 = vpop.f32.mrf.mxu3  ;;  %v10941_v20 = vld [vmem:[#allocation22 + $0x744] sm:$0xf]  ;;  %v9509_v16 = vld [vmem:[#allocation22 + $0x75c] sm:$0xf0]  ;;  %v10924_v5 = vld [vmem:[#allocation22 + $0x6b8] sm:$0xf0] }
 0x599   :  { %v9512_v37 = vor.u32 %v10941_v20, %v9509_v16  ;;  %v9431_v15 = vld [vmem:[#allocation22 + $0x6a0] sm:$0xf]  ;;  %v8731_v20 = vld [vmem:[#allocation22 + $0x128] sm:$0xf]  ;;  %v10749_v16 = vld [vmem:[#allocation22 + $0x140] sm:$0xf0] }
 0x59b   :  { %6791 = vmatpush.bf16.msra.mxu0 %v9624_v28  ;;  %6804 = vmatpush.bf16.msra.mxu1 %v9848_v29  ;;  %v11109_v28 = vld [vmem:[#allocation22 + $0xc84] sm:$0xf]  ;;  %v10181_v29 = vld [vmem:[#allocation22 + $0xc9c] sm:$0xf0] }
 0x59c   :  { %6817 = vmatpush.bf16.msra.mxu2 %v10072_v19  ;;  %6830 = vmatpush.bf16.msra.mxu3 %v10296_v9  ;;  %v9481_v19 = vld [vmem:[#allocation22 + $0x724] sm:$0xf0]  ;;  %v10990_v9 = vld [vmem:[#allocation22 + $0x8cc] sm:$0xf]  ;;  %v10184_v56 = vor.u32 %v11109_v28, %v10181_v29  ;;  %v10917_v29 = vld [vmem:[#allocation22 + $0x680] sm:$0xf0] }
 0x59d   :  { %v9484_v23 = vor.u32 %v10934_v30, %v9481_v19  ;;  %v9708_v25 = vor.u32 %v10990_v9, %v9705_v38  ;;  %v9403_v28 = vld [vmem:[#allocation22 + $0x668] sm:$0xf]  ;;  %v8956_v30 = vor.u32 %v10805_v3, %v8955_v17  ;;  %v9180_v19 = vor.u32 %v10861_v26, %v9179_v50  ;;  %v8927_v38 = vld [vmem:[#allocation22 + $0x2b0] sm:$0xf]  ;;  %v10721_v17 = vld [vmem:[#allocation22 + $0x60] sm:$0xf0] }
 0x59e   :  { %v9404_v9 = vor.u32 %v10917_v29, %v9403_v28  ;;  %v8843_v28 = vld [vmem:[#allocation22 + $0x208] sm:$0xf]  ;;  %v10777_v29 = vld [vmem:[#allocation22 + $0x220] sm:$0xf0] }
 0x59f   :  { %6792 = vmatpush.bf16.msra.mxu0 %v9596_v44  ;;  %6805 = vmatpush.bf16.msra.mxu1 %v9820_v45  ;;  %v10153_v45 = vld [vmem:[#allocation22 + $0xc64] sm:$0xf0] }
 0x5a0   :  { %6818 = vmatpush.bf16.msra.mxu2 %v10044_v51  ;;  %6831 = vmatpush.bf16.msra.mxu3 %v10268_v59  ;;  %v6566_v41 = vpop.f32.mrf.mxu2  ;;  %v6579_v44 = vpop.f32.mrf.mxu3  ;;  %v10819_v51 = vld [vmem:[#allocation22 + $0x370] sm:$0xf0]  ;;  %v9235_v59 = vld [vmem:[#allocation22 + $0x518] sm:$0xf] }
 0x5a1   :  { %v9012_v52 = vor.u32 %v10819_v51, %v9011_v49  ;;  %v9236_v46 = vor.u32 %v10875_v55, %v9235_v59  ;;  %v10735_v49 = vld [vmem:[#allocation22 + $0xd0] sm:$0xf0] }
 0x5a2   :  { %v10791_v55 = vld [vmem:[#allocation22 + $0x290] sm:$0xf0] }
 0x5a3   :  { %6793 = vmatpush.bf16.msra.mxu0 %v9568_v53  ;;  %6806 = vmatpush.bf16.msra.mxu1 %v9792_v61  ;;  %v10156_v53 = vor.u32 %v11102_v22, %v10153_v45  ;;  %v8788_v61 = vor.u32 %v10763_v14, %v8787_v48  ;;  %v8675_v14 = vld [vmem:[#allocation22 + $0xb8] sm:$0xf] }
 0x5a4   :  { %6819 = vmatpush.bf16.msra.mxu2 %v10016_v58  ;;  %6832 = vmatpush.bf16.msra.mxu3 %v10240_v39  ;;  %v10756_v58 = vld [vmem:[#allocation22 + $0x178] sm:$0xf0]  ;;  %v6539_v39 = vadd.f32 %v12251_v42, %v4108_v34 }
 0x5a6   :  { %v6552_v42 = vadd.f32 %v12253_v43, %v6539_v39  ;;  %v8732_v43 = vor.u32 %v10749_v16, %v8731_v20  ;;  %v9124_v39 = vor.u32 %v10847_v0, %v9123_v18  ;;  %v11099_v18 = vld [vmem:[#allocation22 + $0xc30] sm:$0xf0]  ;;  %v10355_v0 = vld [vmem:[#allocation22 + $0xdd8] sm:$0xf] }
 0x5a7   :  { %6794 = vmatpush.bf16.msra.mxu0 %v9540_v4  ;;  %6807 = vmatpush.bf16.msra.mxu1 %v9764_v27  ;;  %v8760_v4 = vor.u32 %v10756_v58, %v8759_v40  ;;  %v8984_v27 = vor.u32 %v10812_v10, %v8983_v2  ;;  %v10728_v40 = vld [vmem:[#allocation22 + $0x98] sm:$0xf0]  ;;  %v9095_v10 = vld [vmem:[#allocation22 + $0x400] sm:$0xf] }
 0x5a8   :  { %6820 = vmatpush.bf16.msra.mxu2 %v9988_v7  ;;  %6833 = vmatpush.bf16.msra.mxu3 %v10212_v24  ;;  %v9208_v7 = vor.u32 %v10868_v13, %v9207_v11  ;;  %v9432_v24 = vor.u32 %v10924_v5, %v9431_v15  ;;  %v6565_v34 = vadd.f32 %v12255_v47, %v6552_v42  ;;  %v10910_v47 = vld [vmem:[#allocation22 + $0x648] sm:$0xf0]  ;;  %v10784_v2 = vld [vmem:[#allocation22 + $0x258] sm:$0xf0]  ;;  %v9319_v5 = vld [vmem:[#allocation22 + $0x5c0] sm:$0xf] }
 0x5a9   :  { %v10840_v15 = vld [vmem:[#allocation22 + $0x418] sm:$0xf0] }
 0x5aa   :  { %v6578_v22 = vadd.f32 %v12257_v21, %v6565_v34  ;;  %v8676_v21 = vor.u32 %v10735_v49, %v8675_v14  ;;  %v9096_v50 = vor.u32 %v10840_v15, %v9095_v10  ;;  %v9067_v34 = vld [vmem:[#allocation22 + $0x3c8] sm:$0xf]  ;;  %v9683_v14 = vld [vmem:[#allocation22 + $0x898] sm:$0xf]  ;;  %v10987_v49 = vld [vmem:[#allocation22 + $0x8b0] sm:$0xf0] }
 0x5ab   :  { %6795 = vmatpush.bf16.msra.mxu0 %v9512_v37  ;;  %6808 = vmatpush.bf16.msra.mxu1 %v9736_v36  ;;  %v8703_v37 = vld [vmem:[#allocation22 + $0xf0] sm:$0xf]  ;;  %v10742_v36 = vld [vmem:[#allocation22 + $0x108] sm:$0xf0]  ;;  %v11036_v10 = vld [vmem:[#allocation22 + $0xa38] sm:$0xf0] }
 0x5ac   :  { %6821 = vmatpush.bf16.msra.mxu2 %v9960_v54  ;;  %6834 = vmatpush.bf16.msra.mxu3 %v10184_v56  ;;  %v10798_v54 = vld [vmem:[#allocation22 + $0x2c8] sm:$0xf0]  ;;  %v9151_v56 = vld [vmem:[#allocation22 + $0x470] sm:$0xf]  ;;  %v8704_v45 = vor.u32 %v10742_v36, %v8703_v37  ;;  %v10889_v37 = vld [vmem:[#allocation22 + $0x5a0] sm:$0xf0] }
 0x5ad   :  { %v8928_v48 = vor.u32 %v10798_v54, %v8927_v38  ;;  %v9152_v59 = vor.u32 %v10854_v35, %v9151_v56  ;;  %v8591_v36 = vld [vmem:[#allocation22 + $0x10] sm:$0xf]  ;;  %v10714_v38 = vld [vmem:[#allocation22 + $0x28] sm:$0xf0]  ;;  %v10327_v15 = vld [vmem:[#allocation22 + $0xda0] sm:$0xf] }
 0x5ae   :  { %v8815_v54 = vld [vmem:[#allocation22 + $0x1d0] sm:$0xf]  ;;  %v10770_v56 = vld [vmem:[#allocation22 + $0x1e8] sm:$0xf0] }
 0x5af   :  { %6796 = vmatpush.bf16.msra.mxu0 %v9484_v23  ;;  %6809 = vmatpush.bf16.msra.mxu1 %v9708_v25  ;;  %v6590_v41 = vpop.f32.mrf.mxu0  ;;  %v6603_v44 = vpop.f32.mrf.mxu1  ;;  %v9376_v23 = vor.u32 %v10910_v47, %v9375_v1  ;;  %v8899_v25 = vld [vmem:[#allocation22 + $0x278] sm:$0xf]  ;;  %v9039_v47 = vld [vmem:[#allocation22 + $0x390] sm:$0xf] }
 0x5b0   :  { %6822 = vmatpush.bf16.msra.mxu2 %v9932_v6  ;;  %6835 = vmatpush.bf16.msra.mxu3 %v10156_v53  ;;  %v6591_v51 = vadd.f32 %v6590_v41, %v6578_v22  ;;  %v9347_v6 = vld [vmem:[#allocation22 + $0x5f8] sm:$0xf]  ;;  %v10903_v53 = vld [vmem:[#allocation22 + $0x610] sm:$0xf0]  ;;  %v10826_v22 = vld [vmem:[#allocation22 + $0x3a8] sm:$0xf0] }
 0x5b1   :  { %v9263_v41 = vld [vmem:[#allocation22 + $0x550] sm:$0xf] }
 0x5b2   :  { %6797 = vmatmul.bf16.vlgmr.msra.gmra.mxu0 %v12216_v12  ;;  %6810 = vmatmul.bf16.vlgmr.msra.gmra.mxu1 %v12218_v33  ;;  %v6604_v58 = vadd.f32 %v6603_v44, %v6591_v51  ;;  %v9907_v51 = vld [vmem:[#allocation22 + $0xa58] sm:$0xf] }
 0x5b3   :  { %6841 = vmatpush.bf16.msrb.mxu0 %v8788_v61  ;;  %6854 = vmatpush.bf16.msrb.mxu1 %v9012_v52  ;;  %v8900_v61 = vor.u32 %v10791_v55, %v8899_v25  ;;  %v8647_v52 = vld [vmem:[#allocation22 + $0x80] sm:$0xf]  ;;  %v8592_v25 = vor.u32 %v10714_v38, %v8591_v36  ;;  %v8816_v55 = vor.u32 %v10770_v56, %v8815_v54  ;;  %v10047_v38 = vld [vmem:[#allocation22 + $0xb70] sm:$0xf]  ;;  %v11078_v54 = vld [vmem:[#allocation22 + $0xb88] sm:$0xf0] }
 0x5b4   :  { %6867 = vmatpush.bf16.msrb.mxu2 %v9236_v46  ;;  %6880 = vmatpush.bf16.msrb.mxu3 %v9460_v31  ;;  %v9348_v46 = vor.u32 %v10903_v53, %v9347_v6  ;;  %v8871_v31 = vld [vmem:[#allocation22 + $0x240] sm:$0xf]  ;;  %v8648_v42 = vor.u32 %v10728_v40, %v8647_v52  ;;  %v11155_v6 = vld [vmem:[#allocation22 + $0xdf0] sm:$0xf0]  ;;  %v9684_v52 = vor.u32 %v10987_v49, %v9683_v14  ;;  %v10271_v56 = vld [vmem:[#allocation22 + $0xd30] sm:$0xf] }
 0x5b5   :  { %6823 = vmatmul.bf16.vlgmr.msra.gmra.mxu2 %v12222_v8  ;;  %6836 = vmatmul.bf16.vlgmr.msra.gmra.mxu3 %v12220_v63  ;;  %v9795_v49 = vld [vmem:[#allocation22 + $0x978] sm:$0xf] }
 0x5b7   :  { %6842 = vmatpush.bf16.msrb.mxu0 %v8760_v4  ;;  %6855 = vmatpush.bf16.msrb.mxu1 %v8984_v27  ;;  %v10896_v4 = vld [vmem:[#allocation22 + $0x5d8] sm:$0xf0]  ;;  %v6592_v20 = vpop.f32.mrf.mxu0  ;;  %v6605_v16 = vpop.f32.mrf.mxu1 }
 0x5b8   :  { %6868 = vmatpush.bf16.msrb.mxu2 %v9208_v7  ;;  %6881 = vmatpush.bf16.msrb.mxu3 %v9432_v24  ;;  %v6616_v11 = vpop.f32.mrf.mxu2  ;;  %v6629_v13 = vpop.f32.mrf.mxu3  ;;  %v8872_v7 = vor.u32 %v10784_v2, %v8871_v31  ;;  %v8619_v24 = vld [vmem:[#allocation22 + $0x48] sm:$0xf]  ;;  %v9320_v26 = vor.u32 %v10896_v4, %v9319_v5  ;;  %v10356_v31 = vor.u32 %v11155_v6, %v10355_v0  ;;  %v9879_v2 = vld [vmem:[#allocation22 + $0xa20] sm:$0xf]  ;;  %v11148_v5 = vld [vmem:[#allocation22 + $0xdb8] sm:$0xf0] }
 0x5b9   :  { %v6617_v27 = vadd.f32 %v6616_v11, %v6604_v58  ;;  %v9655_v58 = vld [vmem:[#allocation22 + $0x860] sm:$0xf]  ;;  %v9627_v20 = vld [vmem:[#allocation22 + $0x828] sm:$0xf]  ;;  %v10973_v16 = vld [vmem:[#allocation22 + $0x840] sm:$0xf0] }
 0x5ba   :  { %v10103_v11 = vld [vmem:[#allocation22 + $0xbe0] sm:$0xf] }
 0x5bb   :  { %6843 = vmatpush.bf16.msrb.mxu0 %v8732_v43  ;;  %6856 = vmatpush.bf16.msrb.mxu1 %v8956_v30  ;;  %v6630_v3 = vadd.f32 %v6629_v13, %v6617_v27  ;;  %v10833_v43 = vld [vmem:[#allocation22 + $0x3e0] sm:$0xf0]  ;;  %v9291_v30 = vld [vmem:[#allocation22 + $0x588] sm:$0xf]  ;;  %v11092_v13 = vld [vmem:[#allocation22 + $0xbf8] sm:$0xf0]  ;;  %v9880_v27 = vor.u32 %v11036_v10, %v9879_v2 }
 0x5bc   :  { %6869 = vmatpush.bf16.msrb.mxu2 %v9180_v19  ;;  %6882 = vmatpush.bf16.msrb.mxu3 %v9404_v9  ;;  %v8620_v19 = vor.u32 %v10721_v17, %v8619_v24  ;;  %v8844_v9 = vor.u32 %v10777_v29, %v8843_v28  ;;  %v9068_v35 = vor.u32 %v10833_v43, %v9067_v34  ;;  %v9851_v24 = vld [vmem:[#allocation22 + $0x9e8] sm:$0xf]  ;;  %v11029_v17 = vld [vmem:[#allocation22 + $0xa00] sm:$0xf0]  ;;  %v9599_v43 = vld [vmem:[#allocation22 + $0x7f0] sm:$0xf] }
 0x5bd   :  { %11216 = vtanh.f32 %v6630_v3  ;;  %v9292_v1 = vor.u32 %v10889_v37, %v9291_v30  ;;  %v10075_v3 = vld [vmem:[#allocation22 + $0xba8] sm:$0xf]  ;;  %v11141_v28 = vld [vmem:[#allocation22 + $0xd80] sm:$0xf0]  ;;  %v9628_v29 = vor.u32 %v10973_v16, %v9627_v20  ;;  %v9852_v34 = vor.u32 %v11029_v17, %v9851_v24  ;;  %v10966_v30 = vld [vmem:[#allocation22 + $0x808] sm:$0xf0] }
 0x5be   :  { %v9543_v6 = vld [vmem:[#allocation22 + $0x780] sm:$0xf]  ;;  %v11120_v10 = vld [vmem:[#allocation22 + $0xcd8] sm:$0xf0]  ;;  %v9963_v24 = vld [vmem:[#allocation22 + $0xac8] sm:$0xf] }
 0x5bf   :  { %6844 = vmatpush.bf16.msrb.mxu0 %v8704_v45  ;;  %6857 = vmatpush.bf16.msrb.mxu1 %v8928_v48  ;;  %v10882_v48 = vld [vmem:[#allocation22 + $0x568] sm:$0xf0]  ;;  %v10215_v2 = vld [vmem:[#allocation22 + $0xcc0] sm:$0xf]  ;;  %v11057_v17 = vld [vmem:[#allocation22 + $0xae0] sm:$0xf0] }
 0x5c0   :  { %6870 = vmatpush.bf16.msrb.mxu2 %v9152_v59  ;;  %6883 = vmatpush.bf16.msrb.mxu3 %v9376_v23  ;;  %v6618_v44 = vpop.f32.mrf.mxu2  ;;  %v6631_v45 = vpop.f32.mrf.mxu3  ;;  %v11043_v59 = vld [vmem:[#allocation22 + $0xa70] sm:$0xf0]  ;;  %v10131_v23 = vld [vmem:[#allocation22 + $0xc18] sm:$0xf]  ;;  %v10216_v16 = vor.u32 %v11120_v10, %v10215_v2  ;;  %v8985_v2 = vld [vmem:[#allocation22 + $0x33c] sm:$0xf0] }
 0x5c1   :  { %v9908_v40 = vor.u32 %v11043_v59, %v9907_v51  ;;  %v9571_v44 = vld [vmem:[#allocation22 + $0x7b8] sm:$0xf]  ;;  %v10959_v45 = vld [vmem:[#allocation22 + $0x7d0] sm:$0xf0]  ;;  %v10865_v10 = vld [vmem:[#allocation22 + $0x4e4] sm:$0xf] }
 0x5c2   :  { %v11015_v51 = vld [vmem:[#allocation22 + $0x990] sm:$0xf0]  ;;  %v10019_v59 = vld [vmem:[#allocation22 + $0xb38] sm:$0xf] }
 0x5c3   :  { %6845 = vmatpush.bf16.msrb.mxu0 %v8676_v21  ;;  %6858 = vmatpush.bf16.msrb.mxu1 %v8900_v61  ;;  %v11217_v53 = vpop.eup %11216  ;;  %v9040_v21 = vor.u32 %v10826_v22, %v9039_v47  ;;  %v9264_v61 = vor.u32 %v10882_v48, %v9263_v41  ;;  %v9600_v22 = vor.u32 %v10966_v30, %v9599_v43  ;;  %v10938_v30 = vld [vmem:[#allocation22 + $0x728] sm:$0xf0] }
 0x5c4   :  { %6871 = vmatpush.bf16.msrb.mxu2 %v9124_v39  ;;  %6884 = vmatpush.bf16.msrb.mxu3 %v9348_v46  ;;  %7161 = vst [vmem:[#allocation25 + $0x8] sm:$0xff] %v11217_v53  ;;  %v10980_v39 = vld [vmem:[#allocation22 + $0x878] sm:$0xf0]  ;;  %v10132_v46 = vor.u32 %v11099_v18, %v10131_v23  ;;  %v10048_v48 = vor.u32 %v11078_v54, %v10047_v38  ;;  %v11071_v23 = vld [vmem:[#allocation22 + $0xb50] sm:$0xf0] }
 0x5c5   :  { %v9656_v4 = vor.u32 %v10980_v39, %v9655_v58  ;;  %v9572_v18 = vor.u32 %v10959_v45, %v9571_v44  ;;  %v9796_v0 = vor.u32 %v11015_v51, %v9795_v49  ;;  %v10952_v53 = vld [vmem:[#allocation22 + $0x798] sm:$0xf0]  ;;  %v9991_v58 = vld [vmem:[#allocation22 + $0xb00] sm:$0xf]  ;;  %v9935_v38 = vld [vmem:[#allocation22 + $0xa90] sm:$0xf] }
 0x5c6   :  { %v11050_v54 = vld [vmem:[#allocation22 + $0xaa8] sm:$0xf0]  ;;  %v10760_v44 = vld [vmem:[#allocation22 + $0x19c] sm:$0xf]  ;;  %v8789_v45 = vld [vmem:[#allocation22 + $0x1b4] sm:$0xf0] }
 0x5c7   :  { %6846 = vmatpush.bf16.msrb.mxu0 %v8648_v42  ;;  %6859 = vmatpush.bf16.msrb.mxu1 %v8872_v7  ;;  %v10104_v42 = vor.u32 %v11092_v13, %v10103_v11  ;;  %v10328_v7 = vor.u32 %v11148_v5, %v10327_v15  ;;  %v9544_v15 = vor.u32 %v10952_v53, %v9543_v6  ;;  %v10872_v49 = vld [vmem:[#allocation22 + $0x51c] sm:$0xf] }
 0x5c8   :  { %6872 = vmatpush.bf16.msrb.mxu2 %v9096_v50  ;;  %6885 = vmatpush.bf16.msrb.mxu3 %v9320_v26  ;;  %v11085_v50 = vld [vmem:[#allocation22 + $0xbc0] sm:$0xf0]  ;;  %v10299_v26 = vld [vmem:[#allocation22 + $0xd68] sm:$0xf]  ;;  %v8792_v6 = vor.u32 %v10760_v44, %v8789_v45 }
 0x5c9   :  { %v10076_v37 = vor.u32 %v11085_v50, %v10075_v3  ;;  %v10300_v36 = vor.u32 %v11141_v28, %v10299_v26  ;;  %v10187_v3 = vld [vmem:[#allocation22 + $0xc88] sm:$0xf]  ;;  %v11113_v50 = vld [vmem:[#allocation22 + $0xca0] sm:$0xf0] }
 0x5ca   :  { %v12280_v26 = vld [vmem:[#allocation23] sm:$0xff] }
 0x5cb   :  { %6847 = vmatpush.bf16.msrb.mxu0 %v8620_v19  ;;  %6860 = vmatpush.bf16.msrb.mxu1 %v8844_v9  ;;  %v9823_v19 = vld [vmem:[#allocation22 + $0x9b0] sm:$0xf]  ;;  %v11022_v9 = vld [vmem:[#allocation22 + $0x9c8] sm:$0xf0]  ;;  %v4109_v28 = vperm.slane %v12280_v26, 2 }
 0x5cc   :  { %6873 = vmatpush.bf16.msrb.mxu2 %v9068_v35  ;;  %6886 = vmatpush.bf16.msrb.mxu3 %v9292_v1  ;;  %v11134_v35 = vld [vmem:[#allocation22 + $0xd48] sm:$0xf0]  ;;  %v9824_v41 = vor.u32 %v11022_v9, %v9823_v19  ;;  %v9964_v19 = vor.u32 %v11057_v17, %v9963_v24  ;;  %v10188_v9 = vor.u32 %v11113_v50, %v10187_v3  ;;  %v8957_v24 = vld [vmem:[#allocation22 + $0x304] sm:$0xf0] }
 0x5cd   :  { %v10272_v14 = vor.u32 %v11134_v35, %v10271_v56  ;;  %v10159_v56 = vld [vmem:[#allocation22 + $0xc50] sm:$0xf]  ;;  %v10858_v17 = vld [vmem:[#allocation22 + $0x4ac] sm:$0xf]  ;;  %v9181_v3 = vld [vmem:[#allocation22 + $0x4c4] sm:$0xf0] }
 0x5ce   :  { %v10914_v50 = vld [vmem:[#allocation22 + $0x66c] sm:$0xf] }
 0x5cf   :  { %6848 = vmatpush.bf16.msrb.mxu0 %v8592_v25  ;;  %6861 = vmatpush.bf16.msrb.mxu1 %v8816_v55  ;;  %v12272_v1 = vpop.f32.mrf.mxu0  ;;  %v12274_v47 = vpop.f32.mrf.mxu1  ;;  %v10243_v25 = vld [vmem:[#allocation22 + $0xcf8] sm:$0xf]  ;;  %v11127_v55 = vld [vmem:[#allocation22 + $0xd10] sm:$0xf0] }
 0x5d0   :  { %6874 = vmatpush.bf16.msrb.mxu2 %v9040_v21  ;;  %6887 = vmatpush.bf16.msrb.mxu3 %v9264_v61  ;;  %v10020_v21 = vor.u32 %v11071_v23, %v10019_v59  ;;  %v10244_v61 = vor.u32 %v11127_v55, %v10243_v25  ;;  %v9237_v23 = vld [vmem:[#allocation22 + $0x534] sm:$0xf0]  ;;  %v10928_v25 = vld [vmem:[#allocation22 + $0x6dc] sm:$0xf] }
 0x5d1   :  { %v9461_v55 = vld [vmem:[#allocation22 + $0x6f4] sm:$0xf0] }
 0x5d2   :  { %6849 = vmatmul.bf16.vlgmr.msrb.gmra.mxu0 %v12196_v57  ;;  %6862 = vmatmul.bf16.vlgmr.msrb.gmra.mxu1 %v12198_v32 }
 0x5d3   :  { %6893 = vmatpush.bf16.msra.mxu0 %v9684_v52  ;;  %6906 = vmatpush.bf16.msra.mxu1 %v9908_v40  ;;  %v9767_v52 = vld [vmem:[#allocation22 + $0x940] sm:$0xf]  ;;  %v11008_v40 = vld [vmem:[#allocation22 + $0x958] sm:$0xf0] }
 0x5d4   :  { %6919 = vmatpush.bf16.msra.mxu2 %v10132_v46  ;;  %6932 = vmatpush.bf16.msra.mxu3 %v10356_v31  ;;  %v11064_v31 = vld [vmem:[#allocation22 + $0xb18] sm:$0xf0]  ;;  %v9768_v5 = vor.u32 %v11008_v40, %v9767_v52  ;;  %v6643_v52 = vadd.f32 %v12272_v1, %v4109_v28  ;;  %v9240_v40 = vor.u32 %v10872_v49, %v9237_v23  ;;  %v9405_v28 = vld [vmem:[#allocation22 + $0x684] sm:$0xf0] }
 0x5d5   :  { %6875 = vmatmul.bf16.vlgmr.msrb.gmra.mxu2 %v12200_v60  ;;  %6888 = vmatmul.bf16.vlgmr.msrb.gmra.mxu3 %v12202_v62  ;;  %v9992_v20 = vor.u32 %v11064_v31, %v9991_v58  ;;  %v9464_v58 = vor.u32 %v10928_v25, %v9461_v55  ;;  %v10809_v31 = vld [vmem:[#allocation22 + $0x324] sm:$0xf]  ;;  %v10788_v23 = vld [vmem:[#allocation22 + $0x27c] sm:$0xf]  ;;  %v8901_v25 = vld [vmem:[#allocation22 + $0x294] sm:$0xf0] }
 0x5d6   :  { %v6656_v1 = vadd.f32 %v12274_v47, %v6643_v52  ;;  %v10844_v55 = vld [vmem:[#allocation22 + $0x43c] sm:$0xf] }
 0x5d7   :  { %6894 = vmatpush.bf16.msra.mxu0 %v9656_v4  ;;  %6907 = vmatpush.bf16.msra.mxu1 %v9880_v27  ;;  %v6644_v11 = vpop.f32.mrf.mxu0  ;;  %v6657_v13 = vpop.f32.mrf.mxu1  ;;  %v9515_v4 = vld [vmem:[#allocation22 + $0x748] sm:$0xf]  ;;  %v10945_v27 = vld [vmem:[#allocation22 + $0x760] sm:$0xf0] }
 0x5d8   :  { %6920 = vmatpush.bf16.msra.mxu2 %v10104_v42  ;;  %6933 = vmatpush.bf16.msra.mxu3 %v10328_v7  ;;  %v12276_v39 = vpop.f32.mrf.mxu2  ;;  %v12278_v46 = vpop.f32.mrf.mxu3  ;;  %v9739_v42 = vld [vmem:[#allocation22 + $0x908] sm:$0xf]  ;;  %v11001_v7 = vld [vmem:[#allocation22 + $0x920] sm:$0xf0]  ;;  %v9209_v11 = vld [vmem:[#allocation22 + $0x4fc] sm:$0xf0] }
 0x5d9   :  { %v9740_v43 = vor.u32 %v11001_v7, %v9739_v42  ;;  %v10921_v13 = vld [vmem:[#allocation22 + $0x6a4] sm:$0xf]  ;;  %v10802_v7 = vld [vmem:[#allocation22 + $0x2ec] sm:$0xf] }
 0x5db   :  { %6895 = vmatpush.bf16.msra.mxu0 %v9628_v29  ;;  %6908 = vmatpush.bf16.msra.mxu1 %v9852_v34  ;;  %v9487_v29 = vld [vmem:[#allocation22 + $0x710] sm:$0xf]  ;;  %v9516_v34 = vor.u32 %v10945_v27, %v9515_v4  ;;  %v8988_v4 = vor.u32 %v10809_v31, %v8985_v2  ;;  %v10746_v27 = vld [vmem:[#allocation22 + $0x12c] sm:$0xf]  ;;  %v10781_v31 = vld [vmem:[#allocation22 + $0x244] sm:$0xf] }
 0x5dc   :  { %6921 = vmatpush.bf16.msra.mxu2 %v10076_v37  ;;  %6934 = vmatpush.bf16.msra.mxu3 %v10300_v36  ;;  %v9711_v37 = vld [vmem:[#allocation22 + $0x8d0] sm:$0xf]  ;;  %v10994_v36 = vld [vmem:[#allocation22 + $0x8e8] sm:$0xf0]  ;;  %v9488_v51 = vor.u32 %v10938_v30, %v9487_v29  ;;  %v6669_v29 = vadd.f32 %v12276_v39, %v6656_v1  ;;  %v8873_v2 = vld [vmem:[#allocation22 + $0x25c] sm:$0xf0] }
 0x5dd   :  { %v9712_v59 = vor.u32 %v10994_v36, %v9711_v37  ;;  %v8705_v30 = vld [vmem:[#allocation22 + $0x10c] sm:$0xf0]  ;;  %v9184_v37 = vor.u32 %v10858_v17, %v9181_v3  ;;  %v9408_v36 = vor.u32 %v10914_v50, %v9405_v28  ;;  %v10774_v28 = vld [vmem:[#allocation22 + $0x20c] sm:$0xf] }
 0x5de   :  { %v9377_v39 = vld [vmem:[#allocation22 + $0x64c] sm:$0xf0] }
 0x5df   :  { %6896 = vmatpush.bf16.msra.mxu0 %v9600_v22  ;;  %6909 = vmatpush.bf16.msra.mxu1 %v9824_v41  ;;  %v11106_v41 = vld [vmem:[#allocation22 + $0xc68] sm:$0xf0] }
 0x5e0   :  { %6922 = vmatpush.bf16.msra.mxu2 %v10048_v48  ;;  %6935 = vmatpush.bf16.msra.mxu3 %v10272_v14  ;;  %v6670_v35 = vpop.f32.mrf.mxu2  ;;  %v6683_v22 = vpop.f32.mrf.mxu3  ;;  %v10816_v48 = vld [vmem:[#allocation22 + $0x35c] sm:$0xf]  ;;  %v9013_v14 = vld [vmem:[#allocation22 + $0x374] sm:$0xf0] }
 0x5e1   :  { %v9016_v53 = vor.u32 %v10816_v48, %v9013_v14  ;;  %v6682_v35 = vadd.f32 %v12278_v46, %v6669_v29  ;;  %v10732_v48 = vld [vmem:[#allocation22 + $0xbc] sm:$0xf]  ;;  %v8677_v14 = vld [vmem:[#allocation22 + $0xd4] sm:$0xf0]  ;;  %v8845_v29 = vld [vmem:[#allocation22 + $0x224] sm:$0xf0] }
 0x5e2   :  { %v8680_v46 = vor.u32 %v10732_v48, %v8677_v14  ;;  %v9265_v48 = vld [vmem:[#allocation22 + $0x56c] sm:$0xf0]  ;;  %v10984_v14 = vld [vmem:[#allocation22 + $0x89c] sm:$0xf] }
 0x5e3   :  { %6897 = vmatpush.bf16.msra.mxu0 %v9572_v18  ;;  %6910 = vmatpush.bf16.msra.mxu1 %v9796_v0  ;;  %v9936_v18 = vor.u32 %v11050_v54, %v9935_v38  ;;  %v10160_v0 = vor.u32 %v11106_v41, %v10159_v56  ;;  %v10851_v38 = vld [vmem:[#allocation22 + $0x474] sm:$0xf]  ;;  %v9153_v54 = vld [vmem:[#allocation22 + $0x48c] sm:$0xf0] }
 0x5e4   :  { %6923 = vmatpush.bf16.msra.mxu2 %v10020_v21  ;;  %6936 = vmatpush.bf16.msra.mxu3 %v10244_v61  ;;  %v10753_v21 = vld [vmem:[#allocation22 + $0x164] sm:$0xf]  ;;  %v8761_v61 = vld [vmem:[#allocation22 + $0x17c] sm:$0xf0]  ;;  %v10907_v56 = vld [vmem:[#allocation22 + $0x634] sm:$0xf] }
 0x5e7   :  { %6898 = vmatpush.bf16.msra.mxu0 %v9544_v15  ;;  %6911 = vmatpush.bf16.msra.mxu1 %v9768_v5  ;;  %v9433_v15 = vld [vmem:[#allocation22 + $0x6bc] sm:$0xf0]  ;;  %v8764_v5 = vor.u32 %v10753_v21, %v8761_v61  ;;  %v10725_v21 = vld [vmem:[#allocation22 + $0x84] sm:$0xf] }
 0x5e8   :  { %6924 = vmatpush.bf16.msra.mxu2 %v9992_v20  ;;  %6937 = vmatpush.bf16.msra.mxu3 %v10216_v16  ;;  %v8733_v20 = vld [vmem:[#allocation22 + $0x144] sm:$0xf0]  ;;  %v9212_v16 = vor.u32 %v10865_v10, %v9209_v11  ;;  %v9436_v42 = vor.u32 %v10921_v13, %v9433_v15  ;;  %v8649_v61 = vld [vmem:[#allocation22 + $0x9c] sm:$0xf0]  ;;  %v10837_v10 = vld [vmem:[#allocation22 + $0x404] sm:$0xf] }
 0x5e9   :  { %v8736_v47 = vor.u32 %v10746_v27, %v8733_v20  ;;  %v9097_v15 = vld [vmem:[#allocation22 + $0x41c] sm:$0xf0] }
 0x5ea   :  { %v9100_v3 = vor.u32 %v10837_v10, %v9097_v15  ;;  %v11033_v10 = vld [vmem:[#allocation22 + $0xa24] sm:$0xf]  ;;  %v10105_v15 = vld [vmem:[#allocation22 + $0xbfc] sm:$0xf0] }
 0x5eb   :  { %6899 = vmatpush.bf16.msra.mxu0 %v9516_v34  ;;  %6912 = vmatpush.bf16.msra.mxu1 %v9740_v43  ;;  %v8960_v34 = vor.u32 %v10802_v7, %v8957_v24  ;;  %v10739_v43 = vld [vmem:[#allocation22 + $0xf4] sm:$0xf]  ;;  %v10718_v7 = vld [vmem:[#allocation22 + $0x4c] sm:$0xf]  ;;  %v8621_v24 = vld [vmem:[#allocation22 + $0x64] sm:$0xf0] }
 0x5ec   :  { %6925 = vmatpush.bf16.msra.mxu2 %v9964_v19  ;;  %6938 = vmatpush.bf16.msra.mxu3 %v10188_v9  ;;  %v10795_v19 = vld [vmem:[#allocation22 + $0x2b4] sm:$0xf]  ;;  %v8929_v9 = vld [vmem:[#allocation22 + $0x2cc] sm:$0xf0]  ;;  %v8708_v44 = vor.u32 %v10739_v43, %v8705_v30  ;;  %v10886_v43 = vld [vmem:[#allocation22 + $0x58c] sm:$0xf] }
 0x5ed   :  { %v8932_v45 = vor.u32 %v10795_v19, %v8929_v9  ;;  %v9293_v30 = vld [vmem:[#allocation22 + $0x5a4] sm:$0xf0]  ;;  %v8848_v19 = vor.u32 %v10774_v28, %v8845_v29  ;;  %v8593_v9 = vld [vmem:[#allocation22 + $0x2c] sm:$0xf0]  ;;  %v11138_v28 = vld [vmem:[#allocation22 + $0xd6c] sm:$0xf] }
 0x5ee   :  { %v10301_v29 = vld [vmem:[#allocation22 + $0xd84] sm:$0xf0] }
 0x5ef   :  { %6900 = vmatpush.bf16.msra.mxu0 %v9488_v51  ;;  %6913 = vmatpush.bf16.msra.mxu1 %v9712_v59  ;;  %v6694_v22 = vpop.f32.mrf.mxu0  ;;  %v6707_v41 = vpop.f32.mrf.mxu1  ;;  %v9156_v51 = vor.u32 %v10851_v38, %v9153_v54  ;;  %v9380_v59 = vor.u32 %v10907_v56, %v9377_v39  ;;  %v10767_v38 = vld [vmem:[#allocation22 + $0x1d4] sm:$0xf]  ;;  %v8817_v54 = vld [vmem:[#allocation22 + $0x1ec] sm:$0xf0]  ;;  %v9296_v39 = vor.u32 %v10886_v43, %v9293_v30 }
 0x5f0   :  { %6926 = vmatpush.bf16.msra.mxu2 %v9936_v18  ;;  %6939 = vmatpush.bf16.msra.mxu3 %v10160_v0  ;;  %v6695_v49 = vadd.f32 %v6694_v22, %v6682_v35  ;;  %v9125_v18 = vld [vmem:[#allocation22 + $0x454] sm:$0xf0]  ;;  %v10900_v0 = vld [vmem:[#allocation22 + $0x5fc] sm:$0xf]  ;;  %v10823_v35 = vld [vmem:[#allocation22 + $0x394] sm:$0xf] }
 0x5f1   :  { %v9041_v22 = vld [vmem:[#allocation22 + $0x3ac] sm:$0xf0]  ;;  %v10963_v43 = vld [vmem:[#allocation22 + $0x7f4] sm:$0xf] }
 0x5f2   :  { %6901 = vmatmul.bf16.vlgmr.msra.gmra.mxu0 %v12216_v12  ;;  %6914 = vmatmul.bf16.vlgmr.msra.gmra.mxu1 %v12218_v33  ;;  %v6708_v52 = vadd.f32 %v6707_v41, %v6695_v49  ;;  %v10879_v41 = vld [vmem:[#allocation22 + $0x554] sm:$0xf]  ;;  %v9685_v49 = vld [vmem:[#allocation22 + $0x8b4] sm:$0xf0]  ;;  %v9601_v30 = vld [vmem:[#allocation22 + $0x80c] sm:$0xf0] }
 0x5f3   :  { %6945 = vmatpush.bf16.msrb.mxu0 %v8792_v6  ;;  %6958 = vmatpush.bf16.msrb.mxu1 %v9016_v53  ;;  %v9349_v6 = vld [vmem:[#allocation22 + $0x614] sm:$0xf0]  ;;  %v8904_v53 = vor.u32 %v10788_v23, %v8901_v25  ;;  %v11096_v23 = vld [vmem:[#allocation22 + $0xc1c] sm:$0xf] }
 0x5f4   :  { %6971 = vmatpush.bf16.msrb.mxu2 %v9240_v40  ;;  %6984 = vmatpush.bf16.msrb.mxu3 %v9464_v58  ;;  %v9128_v40 = vor.u32 %v10844_v55, %v9125_v18  ;;  %v9352_v58 = vor.u32 %v10900_v0, %v9349_v6  ;;  %v8820_v55 = vor.u32 %v10767_v38, %v8817_v54  ;;  %v10133_v18 = vld [vmem:[#allocation22 + $0xc34] sm:$0xf0]  ;;  %v11152_v0 = vld [vmem:[#allocation22 + $0xddc] sm:$0xf]  ;;  %v11075_v38 = vld [vmem:[#allocation22 + $0xb74] sm:$0xf] }
 0x5f5   :  { %6927 = vmatmul.bf16.vlgmr.msra.gmra.mxu2 %v12222_v8  ;;  %6940 = vmatmul.bf16.vlgmr.msra.gmra.mxu3 %v12220_v63  ;;  %v10357_v6 = vld [vmem:[#allocation22 + $0xdf4] sm:$0xf0]  ;;  %v10049_v54 = vld [vmem:[#allocation22 + $0xb8c] sm:$0xf0] }
 0x5f7   :  { %6946 = vmatpush.bf16.msrb.mxu0 %v8764_v5  ;;  %6959 = vmatpush.bf16.msrb.mxu1 %v8988_v4  ;;  %v10893_v5 = vld [vmem:[#allocation22 + $0x5c4] sm:$0xf]  ;;  %v9321_v4 = vld [vmem:[#allocation22 + $0x5dc] sm:$0xf0]  ;;  %v6696_v20 = vpop.f32.mrf.mxu0  ;;  %v6709_v1 = vpop.f32.mrf.mxu1 }
 0x5f8   :  { %6972 = vmatpush.bf16.msrb.mxu2 %v9212_v16  ;;  %6985 = vmatpush.bf16.msrb.mxu3 %v9436_v42  ;;  %v6720_v11 = vpop.f32.mrf.mxu2  ;;  %v6733_v13 = vpop.f32.mrf.mxu3  ;;  %v8652_v16 = vor.u32 %v10725_v21, %v8649_v61  ;;  %v8876_v42 = vor.u32 %v10781_v31, %v8873_v2  ;;  %v9324_v50 = vor.u32 %v10893_v5, %v9321_v4  ;;  %v11145_v5 = vld [vmem:[#allocation22 + $0xda4] sm:$0xf]  ;;  %v10329_v4 = vld [vmem:[#allocation22 + $0xdbc] sm:$0xf0]  ;;  %v10970_v1 = vld [vmem:[#allocation22 + $0x82c] sm:$0xf] }
 0x5f9   :  { %v6721_v27 = vadd.f32 %v6720_v11, %v6708_v52  ;;  %v9268_v21 = vor.u32 %v10879_v41, %v9265_v48  ;;  %v9688_v61 = vor.u32 %v10984_v14, %v9685_v49  ;;  %v10136_v31 = vor.u32 %v11096_v23, %v10133_v18  ;;  %v9881_v11 = vld [vmem:[#allocation22 + $0xa3c] sm:$0xf0]  ;;  %v9573_v48 = vld [vmem:[#allocation22 + $0x7d4] sm:$0xf0]  ;;  %v11068_v23 = vld [vmem:[#allocation22 + $0xb3c] sm:$0xf] }
 0x5fa   :  { %v10360_v2 = vor.u32 %v11152_v0, %v10357_v6  ;;  %v9884_v20 = vor.u32 %v11033_v10, %v9881_v11  ;;  %v9604_v41 = vor.u32 %v10963_v43, %v9601_v30  ;;  %v10052_v14 = vor.u32 %v11075_v38, %v10049_v54  ;;  %v10245_v18 = vld [vmem:[#allocation22 + $0xd14] sm:$0xf0]  ;;  %v9993_v10 = vld [vmem:[#allocation22 + $0xb1c] sm:$0xf0]  ;;  %v11117_v11 = vld [vmem:[#allocation22 + $0xcc4] sm:$0xf] }
 0x5fb   :  { %6947 = vmatpush.bf16.msrb.mxu0 %v8736_v47  ;;  %6960 = vmatpush.bf16.msrb.mxu1 %v8960_v34  ;;  %v6734_v17 = vadd.f32 %v6733_v13, %v6721_v27  ;;  %v10830_v47 = vld [vmem:[#allocation22 + $0x3cc] sm:$0xf]  ;;  %v9069_v34 = vld [vmem:[#allocation22 + $0x3e4] sm:$0xf0]  ;;  %v11089_v13 = vld [vmem:[#allocation22 + $0xbe4] sm:$0xf] }
 0x5fc   :  { %6973 = vmatpush.bf16.msrb.mxu2 %v9184_v37  ;;  %6986 = vmatpush.bf16.msrb.mxu3 %v9408_v36  ;;  %v10711_v37 = vld [vmem:[#allocation22 + $0x14] sm:$0xf]  ;;  %v8624_v36 = vor.u32 %v10718_v7, %v8621_v24  ;;  %v9072_v56 = vor.u32 %v10830_v47, %v9069_v34  ;;  %v10332_v7 = vor.u32 %v11145_v5, %v10329_v4  ;;  %v11026_v24 = vld [vmem:[#allocation22 + $0x9ec] sm:$0xf]  ;;  %v9489_v30 = vld [vmem:[#allocation22 + $0x72c] sm:$0xf0] }
 0x5fd   :  { %11218 = vtanh.f32 %v6734_v17  ;;  %v8596_v25 = vor.u32 %v10711_v37, %v8593_v9  ;;  %v9853_v17 = vld [vmem:[#allocation22 + $0xa04] sm:$0xf0]  ;;  %v9825_v9 = vld [vmem:[#allocation22 + $0x9cc] sm:$0xf0]  ;;  %v11047_v38 = vld [vmem:[#allocation22 + $0xa94] sm:$0xf] }
 0x5fe   :  { %v9856_v34 = vor.u32 %v11026_v24, %v9853_v17  ;;  %v9741_v24 = vld [vmem:[#allocation22 + $0x924] sm:$0xf0]  ;;  %v11054_v17 = vld [vmem:[#allocation22 + $0xacc] sm:$0xf]  ;;  %v9937_v54 = vld [vmem:[#allocation22 + $0xaac] sm:$0xf0] }
 0x5ff   :  { %6948 = vmatpush.bf16.msrb.mxu0 %v8708_v44  ;;  %6961 = vmatpush.bf16.msrb.mxu1 %v8932_v45 }
 0x600   :  { %6974 = vmatpush.bf16.msrb.mxu2 %v9156_v51  ;;  %6987 = vmatpush.bf16.msrb.mxu3 %v9380_v59  ;;  %v6722_v44 = vpop.f32.mrf.mxu2  ;;  %v6735_v45 = vpop.f32.mrf.mxu3  ;;  %v11040_v51 = vld [vmem:[#allocation22 + $0xa5c] sm:$0xf]  ;;  %v9909_v59 = vld [vmem:[#allocation22 + $0xa74] sm:$0xf0] }
 0x601   :  { %v9912_v52 = vor.u32 %v11040_v51, %v9909_v59  ;;  %v10956_v45 = vld [vmem:[#allocation22 + $0x7bc] sm:$0xf]  ;;  %v9797_v59 = vld [vmem:[#allocation22 + $0x994] sm:$0xf0] }
 0x602   :  { %v11012_v51 = vld [vmem:[#allocation22 + $0x97c] sm:$0xf]  ;;  %v9576_v0 = vor.u32 %v10956_v45, %v9573_v48  ;;  %v8795_v45 = vld [vmem:[#allocation22 + $0x1a0] sm:$0xf] }
 0x603   :  { %6949 = vmatpush.bf16.msrb.mxu0 %v8680_v46  ;;  %6962 = vmatpush.bf16.msrb.mxu1 %v8904_v53  ;;  %v11219_v46 = vpop.eup %11218  ;;  %v9044_v53 = vor.u32 %v10823_v35, %v9041_v22  ;;  %v9800_v6 = vor.u32 %v11012_v51, %v9797_v59  ;;  %v9019_v48 = vld [vmem:[#allocation22 + $0x360] sm:$0xf] }
 0x604   :  { %6975 = vmatpush.bf16.msrb.mxu2 %v9128_v40  ;;  %6988 = vmatpush.bf16.msrb.mxu3 %v9352_v58  ;;  %7162 = vst [vmem:[#allocation25 + $0x10] sm:$0xff] %v11219_v46  ;;  %v10977_v40 = vld [vmem:[#allocation22 + $0x864] sm:$0xf]  ;;  %v9657_v58 = vld [vmem:[#allocation22 + $0x87c] sm:$0xf0] }
 0x605   :  { %v9660_v27 = vor.u32 %v10977_v40, %v9657_v58  ;;  %v10949_v46 = vld [vmem:[#allocation22 + $0x784] sm:$0xf]  ;;  %v9769_v40 = vld [vmem:[#allocation22 + $0x95c] sm:$0xf0] }
 0x606   :  { %v11061_v58 = vld [vmem:[#allocation22 + $0xb04] sm:$0xf] }
 0x607   :  { %6950 = vmatpush.bf16.msrb.mxu0 %v8652_v16  ;;  %6963 = vmatpush.bf16.msrb.mxu1 %v8876_v42  ;;  %v9629_v16 = vld [vmem:[#allocation22 + $0x844] sm:$0xf0]  ;;  %v10108_v42 = vor.u32 %v11089_v13, %v10105_v15  ;;  %v10217_v13 = vld [vmem:[#allocation22 + $0xcdc] sm:$0xf0] }
 0x608   :  { %6976 = vmatpush.bf16.msrb.mxu2 %v9100_v3  ;;  %6989 = vmatpush.bf16.msrb.mxu3 %v9324_v50  ;;  %v11082_v3 = vld [vmem:[#allocation22 + $0xbac] sm:$0xf]  ;;  %v10077_v50 = vld [vmem:[#allocation22 + $0xbc4] sm:$0xf0]  ;;  %v9632_v47 = vor.u32 %v10970_v1, %v9629_v16  ;;  %v9996_v16 = vor.u32 %v11061_v58, %v9993_v10  ;;  %v10813_v10 = vld [vmem:[#allocation22 + $0x340] sm:$0xf0] }
 0x609   :  { %v10080_v37 = vor.u32 %v11082_v3, %v10077_v50  ;;  %v9517_v1 = vld [vmem:[#allocation22 + $0x764] sm:$0xf0]  ;;  %v11110_v50 = vld [vmem:[#allocation22 + $0xc8c] sm:$0xf] }
 0x60a   :  { %v9965_v3 = vld [vmem:[#allocation22 + $0xae4] sm:$0xf0] }
 0x60b   :  { %6951 = vmatpush.bf16.msrb.mxu0 %v8624_v36  ;;  %6964 = vmatpush.bf16.msrb.mxu1 %v8848_v19  ;;  %v10304_v36 = vor.u32 %v11138_v28, %v10301_v29  ;;  %v11019_v19 = vld [vmem:[#allocation22 + $0x9b4] sm:$0xf]  ;;  %v10189_v28 = vld [vmem:[#allocation22 + $0xca4] sm:$0xf0]  ;;  %v4110_v29 = vperm.slane %v12280_v26, 3 }
 0x60c   :  { %6977 = vmatpush.bf16.msrb.mxu2 %v9072_v56  ;;  %6990 = vmatpush.bf16.msrb.mxu3 %v9296_v39  ;;  %v11131_v56 = vld [vmem:[#allocation22 + $0xd34] sm:$0xf]  ;;  %v10273_v39 = vld [vmem:[#allocation22 + $0xd4c] sm:$0xf0]  ;;  %v9828_v44 = vor.u32 %v11019_v19, %v9825_v9  ;;  %v9968_v19 = vor.u32 %v11054_v17, %v9965_v3  ;;  %v10192_v9 = vor.u32 %v11110_v50, %v10189_v28  ;;  %v10764_v26 = vld [vmem:[#allocation22 + $0x1b8] sm:$0xf0] }
 0x60d   :  { %v10276_v49 = vor.u32 %v11131_v56, %v10273_v39  ;;  %v11103_v56 = vld [vmem:[#allocation22 + $0xc54] sm:$0xf]  ;;  %v8991_v58 = vld [vmem:[#allocation22 + $0x328] sm:$0xf]  ;;  %v9187_v17 = vld [vmem:[#allocation22 + $0x4b0] sm:$0xf] }
 0x60e   :  { %v10862_v3 = vld [vmem:[#allocation22 + $0x4c8] sm:$0xf0]  ;;  %v9411_v50 = vld [vmem:[#allocation22 + $0x670] sm:$0xf] }
 0x60f   :  { %6952 = vmatpush.bf16.msrb.mxu0 %v8596_v25  ;;  %6965 = vmatpush.bf16.msrb.mxu1 %v8820_v55  ;;  %v12295_v35 = vpop.f32.mrf.mxu0  ;;  %v12297_v22 = vpop.f32.mrf.mxu1  ;;  %v10021_v25 = vld [vmem:[#allocation22 + $0xb54] sm:$0xf0]  ;;  %v11124_v55 = vld [vmem:[#allocation22 + $0xcfc] sm:$0xf]  ;;  %v10918_v28 = vld [vmem:[#allocation22 + $0x688] sm:$0xf0] }
 0x610   :  { %6978 = vmatpush.bf16.msrb.mxu2 %v9044_v53  ;;  %6991 = vmatpush.bf16.msrb.mxu3 %v9268_v21  ;;  %v9545_v53 = vld [vmem:[#allocation22 + $0x79c] sm:$0xf0]  ;;  %v10024_v21 = vor.u32 %v11068_v23, %v10021_v25  ;;  %v10876_v23 = vld [vmem:[#allocation22 + $0x538] sm:$0xf0] }
 0x611   :  { %v9548_v4 = vor.u32 %v10949_v46, %v9545_v53  ;;  %v9467_v25 = vld [vmem:[#allocation22 + $0x6e0] sm:$0xf]  ;;  %v8767_v53 = vld [vmem:[#allocation22 + $0x168] sm:$0xf] }
 0x612   :  { %6953 = vmatmul.bf16.vlgmr.msrb.gmra.mxu0 %v12196_v57  ;;  %6966 = vmatmul.bf16.vlgmr.msrb.gmra.mxu1 %v12198_v32 }
 0x613   :  { %6997 = vmatpush.bf16.msra.mxu0 %v9688_v61  ;;  %7010 = vmatpush.bf16.msra.mxu1 %v9912_v52  ;;  %v10248_v61 = vor.u32 %v11124_v55, %v10245_v18  ;;  %v11005_v52 = vld [vmem:[#allocation22 + $0x944] sm:$0xf]  ;;  %v10932_v55 = vld [vmem:[#allocation22 + $0x6f8] sm:$0xf0]  ;;  %v9940_v18 = vor.u32 %v11047_v38, %v9937_v54  ;;  %v10855_v38 = vld [vmem:[#allocation22 + $0x490] sm:$0xf0] }
 0x614   :  { %7023 = vmatpush.bf16.msra.mxu2 %v10136_v31  ;;  %7036 = vmatpush.bf16.msra.mxu3 %v10360_v2  ;;  %v9383_v54 = vld [vmem:[#allocation22 + $0x638] sm:$0xf] }
 0x615   :  { %6979 = vmatmul.bf16.vlgmr.msrb.gmra.mxu2 %v12200_v60  ;;  %6992 = vmatmul.bf16.vlgmr.msrb.gmra.mxu3 %v12202_v62 }
 0x617   :  { %6998 = vmatpush.bf16.msra.mxu0 %v9660_v27  ;;  %7011 = vmatpush.bf16.msra.mxu1 %v9884_v20  ;;  %v6748_v15 = vpop.f32.mrf.mxu0  ;;  %v6761_v5 = vpop.f32.mrf.mxu1  ;;  %v9772_v27 = vor.u32 %v11005_v52, %v9769_v40  ;;  %v10942_v20 = vld [vmem:[#allocation22 + $0x74c] sm:$0xf]  ;;  %v9468_v40 = vor.u32 %v10932_v55, %v9467_v25  ;;  %v9131_v25 = vld [vmem:[#allocation22 + $0x440] sm:$0xf]  ;;  %v10848_v55 = vld [vmem:[#allocation22 + $0x458] sm:$0xf0] }
 0x618   :  { %7024 = vmatpush.bf16.msra.mxu2 %v10108_v42  ;;  %7037 = vmatpush.bf16.msra.mxu3 %v10332_v7  ;;  %v12299_v31 = vpop.f32.mrf.mxu2  ;;  %v12301_v2 = vpop.f32.mrf.mxu3  ;;  %v10220_v42 = vor.u32 %v11117_v11, %v10217_v13  ;;  %v10998_v7 = vld [vmem:[#allocation22 + $0x90c] sm:$0xf]  ;;  %v9215_v11 = vld [vmem:[#allocation22 + $0x4e8] sm:$0xf]  ;;  %v10869_v13 = vld [vmem:[#allocation22 + $0x500] sm:$0xf0] }
 0x619   :  { %v9744_v43 = vor.u32 %v10998_v7, %v9741_v24  ;;  %v9439_v15 = vld [vmem:[#allocation22 + $0x6a8] sm:$0xf]  ;;  %v10925_v5 = vld [vmem:[#allocation22 + $0x6c0] sm:$0xf0]  ;;  %v8963_v7 = vld [vmem:[#allocation22 + $0x2f0] sm:$0xf] }
 0x61a   :  { %v10806_v24 = vld [vmem:[#allocation22 + $0x308] sm:$0xf0] }
 0x61b   :  { %6999 = vmatpush.bf16.msra.mxu0 %v9632_v47  ;;  %7012 = vmatpush.bf16.msra.mxu1 %v9856_v34  ;;  %v10935_v47 = vld [vmem:[#allocation22 + $0x714] sm:$0xf]  ;;  %v9520_v34 = vor.u32 %v10942_v20, %v9517_v1  ;;  %v8739_v20 = vld [vmem:[#allocation22 + $0x130] sm:$0xf]  ;;  %v10750_v1 = vld [vmem:[#allocation22 + $0x148] sm:$0xf0] }
 0x61c   :  { %7025 = vmatpush.bf16.msra.mxu2 %v10080_v37  ;;  %7038 = vmatpush.bf16.msra.mxu3 %v10304_v36  ;;  %v10991_v37 = vld [vmem:[#allocation22 + $0x8d4] sm:$0xf]  ;;  %v9713_v36 = vld [vmem:[#allocation22 + $0x8ec] sm:$0xf0]  ;;  %v9492_v51 = vor.u32 %v10935_v47, %v9489_v30  ;;  %v8964_v47 = vor.u32 %v10806_v24, %v8963_v7  ;;  %v9188_v30 = vor.u32 %v10862_v3, %v9187_v17  ;;  %v10722_v7 = vld [vmem:[#allocation22 + $0x68] sm:$0xf0] }
 0x61d   :  { %v9716_v59 = vor.u32 %v10991_v37, %v9713_v36  ;;  %v9412_v37 = vor.u32 %v10918_v28, %v9411_v50  ;;  %v8935_v36 = vld [vmem:[#allocation22 + $0x2b8] sm:$0xf]  ;;  %v8851_v50 = vld [vmem:[#allocation22 + $0x210] sm:$0xf]  ;;  %v10778_v28 = vld [vmem:[#allocation22 + $0x228] sm:$0xf0] }
 0x61f   :  { %7000 = vmatpush.bf16.msra.mxu0 %v9604_v41  ;;  %7013 = vmatpush.bf16.msra.mxu1 %v9828_v44  ;;  %v10161_v44 = vld [vmem:[#allocation22 + $0xc6c] sm:$0xf0] }
 0x620   :  { %7026 = vmatpush.bf16.msra.mxu2 %v10052_v14  ;;  %7039 = vmatpush.bf16.msra.mxu3 %v10276_v49  ;;  %v6774_v39 = vpop.f32.mrf.mxu2  ;;  %v6787_v41 = vpop.f32.mrf.mxu3  ;;  %v10820_v14 = vld [vmem:[#allocation22 + $0x378] sm:$0xf0]  ;;  %v9243_v49 = vld [vmem:[#allocation22 + $0x520] sm:$0xf] }
 0x621   :  { %v9020_v46 = vor.u32 %v10820_v14, %v9019_v48  ;;  %v9244_v52 = vor.u32 %v10876_v23, %v9243_v49  ;;  %v10736_v48 = vld [vmem:[#allocation22 + $0xd8] sm:$0xf0] }
 0x622   :  { %v10792_v23 = vld [vmem:[#allocation22 + $0x298] sm:$0xf0] }
 0x623   :  { %7001 = vmatpush.bf16.msra.mxu0 %v9576_v0  ;;  %7014 = vmatpush.bf16.msra.mxu1 %v9800_v6  ;;  %v10164_v0 = vor.u32 %v11103_v56, %v10161_v44  ;;  %v8796_v6 = vor.u32 %v10764_v26, %v8795_v45  ;;  %v8683_v26 = vld [vmem:[#allocation22 + $0xc0] sm:$0xf] }
 0x624   :  { %7027 = vmatpush.bf16.msra.mxu2 %v10024_v21  ;;  %7040 = vmatpush.bf16.msra.mxu3 %v10248_v61  ;;  %v10757_v21 = vld [vmem:[#allocation22 + $0x180] sm:$0xf0]  ;;  %v6747_v61 = vadd.f32 %v12295_v35, %v4110_v29 }
 0x626   :  { %v6760_v35 = vadd.f32 %v12297_v22, %v6747_v61  ;;  %v8740_v22 = vor.u32 %v10750_v1, %v8739_v20  ;;  %v9132_v61 = vor.u32 %v10848_v55, %v9131_v25  ;;  %v11100_v25 = vld [vmem:[#allocation22 + $0xc38] sm:$0xf0]  ;;  %v10363_v55 = vld [vmem:[#allocation22 + $0xde0] sm:$0xf] }
 0x627   :  { %7002 = vmatpush.bf16.msra.mxu0 %v9548_v4  ;;  %7015 = vmatpush.bf16.msra.mxu1 %v9772_v27  ;;  %v8768_v4 = vor.u32 %v10757_v21, %v8767_v53  ;;  %v8992_v27 = vor.u32 %v10813_v10, %v8991_v58  ;;  %v10729_v53 = vld [vmem:[#allocation22 + $0xa0] sm:$0xf0]  ;;  %v9103_v10 = vld [vmem:[#allocation22 + $0x408] sm:$0xf] }
 0x628   :  { %7028 = vmatpush.bf16.msra.mxu2 %v9996_v16  ;;  %7041 = vmatpush.bf16.msra.mxu3 %v10220_v42  ;;  %v9216_v16 = vor.u32 %v10869_v13, %v9215_v11  ;;  %v9440_v42 = vor.u32 %v10925_v5, %v9439_v15  ;;  %v6773_v29 = vadd.f32 %v12299_v31, %v6760_v35  ;;  %v10911_v31 = vld [vmem:[#allocation22 + $0x650] sm:$0xf0]  ;;  %v10785_v58 = vld [vmem:[#allocation22 + $0x260] sm:$0xf0]  ;;  %v9327_v5 = vld [vmem:[#allocation22 + $0x5c8] sm:$0xf] }
 0x629   :  { %v10841_v15 = vld [vmem:[#allocation22 + $0x420] sm:$0xf0] }
 0x62a   :  { %v6786_v56 = vadd.f32 %v12301_v2, %v6773_v29  ;;  %v8684_v2 = vor.u32 %v10736_v48, %v8683_v26  ;;  %v9104_v17 = vor.u32 %v10841_v15, %v9103_v10  ;;  %v9075_v29 = vld [vmem:[#allocation22 + $0x3d0] sm:$0xf]  ;;  %v9691_v26 = vld [vmem:[#allocation22 + $0x8a0] sm:$0xf]  ;;  %v10988_v48 = vld [vmem:[#allocation22 + $0x8b8] sm:$0xf0] }
 0x62b   :  { %7003 = vmatpush.bf16.msra.mxu0 %v9520_v34  ;;  %7016 = vmatpush.bf16.msra.mxu1 %v9744_v43  ;;  %v8711_v34 = vld [vmem:[#allocation22 + $0xf8] sm:$0xf]  ;;  %v10743_v43 = vld [vmem:[#allocation22 + $0x110] sm:$0xf0]  ;;  %v11037_v10 = vld [vmem:[#allocation22 + $0xa40] sm:$0xf0] }
 0x62c   :  { %7029 = vmatpush.bf16.msra.mxu2 %v9968_v19  ;;  %7042 = vmatpush.bf16.msra.mxu3 %v10192_v9  ;;  %v10799_v19 = vld [vmem:[#allocation22 + $0x2d0] sm:$0xf0]  ;;  %v9159_v9 = vld [vmem:[#allocation22 + $0x478] sm:$0xf]  ;;  %v8712_v44 = vor.u32 %v10743_v43, %v8711_v34  ;;  %v10890_v34 = vld [vmem:[#allocation22 + $0x5a8] sm:$0xf0] }
 0x62d   :  { %v8936_v45 = vor.u32 %v10799_v19, %v8935_v36  ;;  %v9160_v49 = vor.u32 %v10855_v38, %v9159_v9  ;;  %v8599_v43 = vld [vmem:[#allocation22 + $0x18] sm:$0xf]  ;;  %v10715_v36 = vld [vmem:[#allocation22 + $0x30] sm:$0xf0]  ;;  %v10335_v15 = vld [vmem:[#allocation22 + $0xda8] sm:$0xf] }
 0x62e   :  { %v8823_v19 = vld [vmem:[#allocation22 + $0x1d8] sm:$0xf]  ;;  %v10771_v9 = vld [vmem:[#allocation22 + $0x1f0] sm:$0xf0] }
 0x62f   :  { %7004 = vmatpush.bf16.msra.mxu0 %v9492_v51  ;;  %7017 = vmatpush.bf16.msra.mxu1 %v9716_v59  ;;  %v6798_v39 = vpop.f32.mrf.mxu0  ;;  %v6811_v41 = vpop.f32.mrf.mxu1  ;;  %v9384_v51 = vor.u32 %v10911_v31, %v9383_v54  ;;  %v8907_v59 = vld [vmem:[#allocation22 + $0x280] sm:$0xf]  ;;  %v9047_v31 = vld [vmem:[#allocation22 + $0x398] sm:$0xf] }
 0x630   :  { %7030 = vmatpush.bf16.msra.mxu2 %v9940_v18  ;;  %7043 = vmatpush.bf16.msra.mxu3 %v10164_v0  ;;  %v6799_v14 = vadd.f32 %v6798_v39, %v6786_v56  ;;  %v9355_v18 = vld [vmem:[#allocation22 + $0x600] sm:$0xf]  ;;  %v10904_v0 = vld [vmem:[#allocation22 + $0x618] sm:$0xf0]  ;;  %v10827_v56 = vld [vmem:[#allocation22 + $0x3b0] sm:$0xf0] }
 0x631   :  { %v9271_v39 = vld [vmem:[#allocation22 + $0x558] sm:$0xf] }
 0x632   :  { %7005 = vmatmul.bf16.vlgmr.msra.gmra.mxu0 %v12216_v12  ;;  %7018 = vmatmul.bf16.vlgmr.msra.gmra.mxu1 %v12218_v33  ;;  %v6812_v21 = vadd.f32 %v6811_v41, %v6799_v14  ;;  %v9915_v14 = vld [vmem:[#allocation22 + $0xa60] sm:$0xf] }
 0x633   :  { %7049 = vmatpush.bf16.msrb.mxu0 %v8796_v6  ;;  %7062 = vmatpush.bf16.msrb.mxu1 %v9020_v46  ;;  %v8908_v6 = vor.u32 %v10792_v23, %v8907_v59  ;;  %v8655_v46 = vld [vmem:[#allocation22 + $0x88] sm:$0xf]  ;;  %v8600_v59 = vor.u32 %v10715_v36, %v8599_v43  ;;  %v8824_v23 = vor.u32 %v10771_v9, %v8823_v19  ;;  %v10279_v36 = vld [vmem:[#allocation22 + $0xd38] sm:$0xf]  ;;  %v11135_v19 = vld [vmem:[#allocation22 + $0xd50] sm:$0xf0] }
 0x634   :  { %7075 = vmatpush.bf16.msrb.mxu2 %v9244_v52  ;;  %7088 = vmatpush.bf16.msrb.mxu3 %v9468_v40  ;;  %v9356_v52 = vor.u32 %v10904_v0, %v9355_v18  ;;  %v8879_v40 = vld [vmem:[#allocation22 + $0x248] sm:$0xf]  ;;  %v8656_v35 = vor.u32 %v10729_v53, %v8655_v46  ;;  %v11156_v18 = vld [vmem:[#allocation22 + $0xdf8] sm:$0xf0]  ;;  %v9692_v46 = vor.u32 %v10988_v48, %v9691_v26  ;;  %v10251_v48 = vld [vmem:[#allocation22 + $0xd00] sm:$0xf] }
 0x635   :  { %7031 = vmatmul.bf16.vlgmr.msra.gmra.mxu2 %v12222_v8  ;;  %7044 = vmatmul.bf16.vlgmr.msra.gmra.mxu3 %v12220_v63  ;;  %v11072_v26 = vld [vmem:[#allocation22 + $0xb58] sm:$0xf0] }
 0x637   :  { %7050 = vmatpush.bf16.msrb.mxu0 %v8768_v4  ;;  %7063 = vmatpush.bf16.msrb.mxu1 %v8992_v27  ;;  %v10897_v4 = vld [vmem:[#allocation22 + $0x5e0] sm:$0xf0]  ;;  %v6800_v20 = vpop.f32.mrf.mxu0  ;;  %v6813_v1 = vpop.f32.mrf.mxu1 }
 0x638   :  { %7076 = vmatpush.bf16.msrb.mxu2 %v9216_v16  ;;  %7089 = vmatpush.bf16.msrb.mxu3 %v9440_v42  ;;  %v6824_v11 = vpop.f32.mrf.mxu2  ;;  %v6837_v13 = vpop.f32.mrf.mxu3  ;;  %v8880_v16 = vor.u32 %v10785_v58, %v8879_v40  ;;  %v8627_v42 = vld [vmem:[#allocation22 + $0x50] sm:$0xf]  ;;  %v9328_v3 = vor.u32 %v10897_v4, %v9327_v5  ;;  %v10364_v40 = vor.u32 %v11156_v18, %v10363_v55  ;;  %v9887_v58 = vld [vmem:[#allocation22 + $0xa28] sm:$0xf]  ;;  %v11149_v5 = vld [vmem:[#allocation22 + $0xdc0] sm:$0xf0] }
 0x639   :  { %v6825_v27 = vadd.f32 %v6824_v11, %v6812_v21  ;;  %v9663_v21 = vld [vmem:[#allocation22 + $0x868] sm:$0xf]  ;;  %v9635_v20 = vld [vmem:[#allocation22 + $0x830] sm:$0xf]  ;;  %v10974_v1 = vld [vmem:[#allocation22 + $0x848] sm:$0xf0] }
 0x63a   :  { %v10111_v11 = vld [vmem:[#allocation22 + $0xbe8] sm:$0xf] }
 0x63b   :  { %7051 = vmatpush.bf16.msrb.mxu0 %v8740_v22  ;;  %7064 = vmatpush.bf16.msrb.mxu1 %v8964_v47  ;;  %v6838_v24 = vadd.f32 %v6837_v13, %v6825_v27  ;;  %v10834_v22 = vld [vmem:[#allocation22 + $0x3e8] sm:$0xf0]  ;;  %v9299_v47 = vld [vmem:[#allocation22 + $0x590] sm:$0xf]  ;;  %v11093_v13 = vld [vmem:[#allocation22 + $0xc00] sm:$0xf0]  ;;  %v9888_v27 = vor.u32 %v11037_v10, %v9887_v58 }
 0x63c   :  { %7077 = vmatpush.bf16.msrb.mxu2 %v9188_v30  ;;  %7090 = vmatpush.bf16.msrb.mxu3 %v9412_v37  ;;  %v8628_v30 = vor.u32 %v10722_v7, %v8627_v42  ;;  %v8852_v37 = vor.u32 %v10778_v28, %v8851_v50  ;;  %v9076_v38 = vor.u32 %v10834_v22, %v9075_v29  ;;  %v9859_v42 = vld [vmem:[#allocation22 + $0x9f0] sm:$0xf]  ;;  %v11030_v7 = vld [vmem:[#allocation22 + $0xa08] sm:$0xf0]  ;;  %v9607_v22 = vld [vmem:[#allocation22 + $0x7f8] sm:$0xf] }
 0x63d   :  { %11220 = vtanh.f32 %v6838_v24  ;;  %v9300_v54 = vor.u32 %v10890_v34, %v9299_v47  ;;  %v10083_v24 = vld [vmem:[#allocation22 + $0xbb0] sm:$0xf]  ;;  %v11142_v50 = vld [vmem:[#allocation22 + $0xd88] sm:$0xf0]  ;;  %v9636_v28 = vor.u32 %v10974_v1, %v9635_v20  ;;  %v9860_v29 = vor.u32 %v11030_v7, %v9859_v42  ;;  %v10967_v47 = vld [vmem:[#allocation22 + $0x810] sm:$0xf0] }
 0x63e   :  { %v9775_v18 = vld [vmem:[#allocation22 + $0x948] sm:$0xf]  ;;  %v9971_v20 = vld [vmem:[#allocation22 + $0xad0] sm:$0xf]  ;;  %v11058_v1 = vld [vmem:[#allocation22 + $0xae8] sm:$0xf0] }
 0x63f   :  { %7052 = vmatpush.bf16.msrb.mxu0 %v8712_v44  ;;  %7065 = vmatpush.bf16.msrb.mxu1 %v8936_v45  ;;  %v10883_v45 = vld [vmem:[#allocation22 + $0x570] sm:$0xf0] }
 0x640   :  { %7078 = vmatpush.bf16.msrb.mxu2 %v9160_v49  ;;  %7091 = vmatpush.bf16.msrb.mxu3 %v9384_v51  ;;  %v6826_v41 = vpop.f32.mrf.mxu2  ;;  %v6839_v44 = vpop.f32.mrf.mxu3  ;;  %v11044_v49 = vld [vmem:[#allocation22 + $0xa78] sm:$0xf0]  ;;  %v10139_v51 = vld [vmem:[#allocation22 + $0xc20] sm:$0xf] }
 0x641   :  { %v9916_v53 = vor.u32 %v11044_v49, %v9915_v14  ;;  %v9803_v41 = vld [vmem:[#allocation22 + $0x980] sm:$0xf]  ;;  %v11016_v44 = vld [vmem:[#allocation22 + $0x998] sm:$0xf0] }
 0x642   :  { %v11128_v14 = vld [vmem:[#allocation22 + $0xd18] sm:$0xf0] }
 0x643   :  { %7053 = vmatpush.bf16.msrb.mxu0 %v8684_v2  ;;  %7066 = vmatpush.bf16.msrb.mxu1 %v8908_v6  ;;  %v11221_v0 = vpop.eup %11220  ;;  %v9048_v2 = vor.u32 %v10827_v56, %v9047_v31  ;;  %v9272_v6 = vor.u32 %v10883_v45, %v9271_v39  ;;  %v10960_v31 = vld [vmem:[#allocation22 + $0x7d8] sm:$0xf0]  ;;  %v10280_v39 = vor.u32 %v11135_v19, %v10279_v36  ;;  %v10027_v45 = vld [vmem:[#allocation22 + $0xb40] sm:$0xf] }
 0x644   :  { %7079 = vmatpush.bf16.msrb.mxu2 %v9132_v61  ;;  %7092 = vmatpush.bf16.msrb.mxu3 %v9356_v52  ;;  %7163 = vst [vmem:[#allocation25 + $0x18] sm:$0xff] %v11221_v0  ;;  %v10981_v61 = vld [vmem:[#allocation22 + $0x880] sm:$0xf0]  ;;  %v10140_v52 = vor.u32 %v11100_v25, %v10139_v51  ;;  %v9804_v51 = vor.u32 %v11016_v44, %v9803_v41 }
 0x645   :  { %v9664_v4 = vor.u32 %v10981_v61, %v9663_v21  ;;  %v10028_v25 = vor.u32 %v11072_v26, %v10027_v45  ;;  %v10252_v55 = vor.u32 %v11128_v14, %v10251_v48  ;;  %v11009_v0 = vld [vmem:[#allocation22 + $0x960] sm:$0xf0]  ;;  %v10223_v21 = vld [vmem:[#allocation22 + $0xcc8] sm:$0xf] }
 0x646   :  { %v11121_v61 = vld [vmem:[#allocation22 + $0xce0] sm:$0xf0]  ;;  %v9776_v10 = vor.u32 %v11009_v0, %v9775_v18 }
 0x647   :  { %7054 = vmatpush.bf16.msrb.mxu0 %v8656_v35  ;;  %7067 = vmatpush.bf16.msrb.mxu1 %v8880_v16  ;;  %v10112_v35 = vor.u32 %v11093_v13, %v10111_v11  ;;  %v10336_v16 = vor.u32 %v11149_v5, %v10335_v15  ;;  %v9523_v11 = vld [vmem:[#allocation22 + $0x750] sm:$0xf]  ;;  %v10946_v13 = vld [vmem:[#allocation22 + $0x768] sm:$0xf0]  ;;  %v10224_v5 = vor.u32 %v11121_v61, %v10223_v21 }
 0x648   :  { %7080 = vmatpush.bf16.msrb.mxu2 %v9104_v17  ;;  %7093 = vmatpush.bf16.msrb.mxu3 %v9328_v3  ;;  %v11086_v17 = vld [vmem:[#allocation22 + $0xbc8] sm:$0xf0]  ;;  %v10307_v3 = vld [vmem:[#allocation22 + $0xd70] sm:$0xf]  ;;  %v9524_v42 = vor.u32 %v10946_v13, %v9523_v11 }
 0x649   :  { %v10084_v34 = vor.u32 %v11086_v17, %v10083_v24  ;;  %v10308_v43 = vor.u32 %v11142_v50, %v10307_v3  ;;  %v9495_v24 = vld [vmem:[#allocation22 + $0x718] sm:$0xf]  ;;  %v10939_v17 = vld [vmem:[#allocation22 + $0x730] sm:$0xf0]  ;;  %v9972_v3 = vor.u32 %v11058_v1, %v9971_v20 }
 0x64a   :  { %v9496_v36 = vor.u32 %v10939_v17, %v9495_v24 }
 0x64b   :  { %7055 = vmatpush.bf16.msrb.mxu0 %v8628_v30  ;;  %7068 = vmatpush.bf16.msrb.mxu1 %v8852_v37  ;;  %v11023_v30 = vld [vmem:[#allocation22 + $0x9d0] sm:$0xf0] }
 0x64c   :  { %7081 = vmatpush.bf16.msrb.mxu2 %v9076_v38  ;;  %7094 = vmatpush.bf16.msrb.mxu3 %v9300_v54  ;;  %v11079_v37 = vld [vmem:[#allocation22 + $0xb90] sm:$0xf0]  ;;  %v9579_v54 = vld [vmem:[#allocation22 + $0x7c0] sm:$0xf] }
 0x64d   :  { %v9580_v49 = vor.u32 %v10960_v31, %v9579_v54 }
 0x64f   :  { %7056 = vmatpush.bf16.msrb.mxu0 %v8600_v59  ;;  %7069 = vmatpush.bf16.msrb.mxu1 %v8824_v23  ;;  %v12316_v9 = vpop.f32.mrf.mxu0  ;;  %v9551_v59 = vld [vmem:[#allocation22 + $0x788] sm:$0xf]  ;;  %v10953_v23 = vld [vmem:[#allocation22 + $0x7a0] sm:$0xf0] }
 0x650   :  { %7082 = vmatpush.bf16.msrb.mxu2 %v9048_v2  ;;  %7095 = vmatpush.bf16.msrb.mxu3 %v9272_v6  ;;  %v9999_v2 = vld [vmem:[#allocation22 + $0xb08] sm:$0xf]  ;;  %v9552_v58 = vor.u32 %v10953_v23, %v9551_v59 }
 0x652   :  { %7057 = vmatmul.bf16.vlgmr.msrb.gmra.mxu0 %v12196_v57  ;;  %7070 = vmatmul.bf16.vlgmr.msrb.gmra.mxu1 %v12198_v32  ;;  %v9831_v57 = vld [vmem:[#allocation22 + $0x9b8] sm:$0xf] }
 0x653   :  { %7101 = vmatpush.bf16.msra.mxu0 %v9692_v46  ;;  %7114 = vmatpush.bf16.msra.mxu1 %v9916_v53  ;;  %v10055_v32 = vld [vmem:[#allocation22 + $0xb78] sm:$0xf]  ;;  %v9832_v38 = vor.u32 %v11023_v30, %v9831_v57  ;;  %v11065_v53 = vld [vmem:[#allocation22 + $0xb20] sm:$0xf0]  ;;  %v11107_v30 = vld [vmem:[#allocation22 + $0xc70] sm:$0xf0] }
 0x654   :  { %7127 = vmatpush.bf16.msra.mxu2 %v10140_v52  ;;  %7140 = vmatpush.bf16.msra.mxu3 %v10364_v40  ;;  %v10056_v56 = vor.u32 %v11079_v37, %v10055_v32  ;;  %v10000_v15 = vor.u32 %v11065_v53, %v9999_v2  ;;  %v10167_v57 = vld [vmem:[#allocation22 + $0xc58] sm:$0xf]  ;;  %v12320_v32 = vld [vmem:[#allocation23] sm:$0xff] }
 0x655   :  { %7083 = vmatmul.bf16.vlgmr.msrb.gmra.mxu2 %v12200_v60  ;;  %7096 = vmatmul.bf16.vlgmr.msrb.gmra.mxu3 %v12202_v62  ;;  %v12318_v60 = vpop.f32.mrf.mxu1  ;;  %v9608_v62 = vor.u32 %v10967_v47, %v9607_v22  ;;  %v9943_v22 = vld [vmem:[#allocation22 + $0xa98] sm:$0xf]  ;;  %v4111_v37 = vperm.slane %v12320_v32, 4 }
 0x657   :  { %7102 = vmatpush.bf16.msra.mxu0 %v9664_v4  ;;  %7115 = vmatpush.bf16.msra.mxu1 %v9888_v27  ;;  %v6852_v52 = vpop.f32.mrf.mxu0  ;;  %v9747_v4 = vld [vmem:[#allocation22 + $0x910] sm:$0xf]  ;;  %v11002_v27 = vld [vmem:[#allocation22 + $0x928] sm:$0xf0]  ;;  %v6851_v54 = vadd.f32 %v12316_v9, %v4111_v37 }
 0x658   :  { %7128 = vmatpush.bf16.msra.mxu2 %v10112_v35  ;;  %7141 = vmatpush.bf16.msra.mxu3 %v10336_v16  ;;  %v6876_v6 = vpop.f32.mrf.mxu2  ;;  %v6889_v46 = vpop.f32.mrf.mxu3  ;;  %v10195_v35 = vld [vmem:[#allocation22 + $0xc90] sm:$0xf]  ;;  %v11114_v16 = vld [vmem:[#allocation22 + $0xca8] sm:$0xf0]  ;;  %v9748_v7 = vor.u32 %v11002_v27, %v9747_v4 }
 0x659   :  { %v10196_v50 = vor.u32 %v11114_v16, %v10195_v35  ;;  %v6864_v31 = vadd.f32 %v12318_v60, %v6851_v54 }
 0x65b   :  { %7103 = vmatpush.bf16.msra.mxu0 %v9636_v28  ;;  %7116 = vmatpush.bf16.msra.mxu1 %v9860_v29  ;;  %v9719_v28 = vld [vmem:[#allocation22 + $0x8d8] sm:$0xf]  ;;  %v10995_v29 = vld [vmem:[#allocation22 + $0x8f0] sm:$0xf0] }
 0x65c   :  { %7129 = vmatpush.bf16.msra.mxu2 %v10084_v34  ;;  %7142 = vmatpush.bf16.msra.mxu3 %v10308_v43  ;;  %v11051_v43 = vld [vmem:[#allocation22 + $0xab0] sm:$0xf0]  ;;  %v9720_v19 = vor.u32 %v10995_v29, %v9719_v28 }
 0x65d   :  { %v6865_v40 = vpop.f32.mrf.mxu1 }
 0x65f   :  { %7104 = vmatpush.bf16.msra.mxu0 %v9608_v62  ;;  %7117 = vmatpush.bf16.msra.mxu1 %v9832_v38  ;;  %v9944_v62 = vor.u32 %v11051_v43, %v9943_v22  ;;  %v10168_v38 = vor.u32 %v11107_v30, %v10167_v57 }
 0x660   :  { %7130 = vmatpush.bf16.msra.mxu2 %v10056_v56  ;;  %7143 = vmatpush.bf16.msra.mxu3 %v10280_v39  ;;  %v6878_v47 = vpop.f32.mrf.mxu2  ;;  %v6891_v34 = vpop.f32.mrf.mxu3  ;;  %v6877_v56 = vadd.f32 %v6876_v6, %v6864_v31  ;;  %v4112_v6 = vperm.slane %v12320_v32, 5 }
 0x662   :  { %v6890_v39 = vadd.f32 %v6889_v46, %v6877_v56 }
 0x663   :  { %7105 = vmatpush.bf16.msra.mxu0 %v9580_v49  ;;  %7118 = vmatpush.bf16.msra.mxu1 %v9804_v51 }
 0x664   :  { %7131 = vmatpush.bf16.msra.mxu2 %v10028_v25  ;;  %7144 = vmatpush.bf16.msra.mxu3 %v10252_v55 }
 0x667   :  { %7106 = vmatpush.bf16.msra.mxu0 %v9552_v58  ;;  %7119 = vmatpush.bf16.msra.mxu1 %v9776_v10 }
 0x668   :  { %7132 = vmatpush.bf16.msra.mxu2 %v10000_v15  ;;  %7145 = vmatpush.bf16.msra.mxu3 %v10224_v5 }
 0x66b   :  { %7107 = vmatpush.bf16.msra.mxu0 %v9524_v42  ;;  %7120 = vmatpush.bf16.msra.mxu1 %v9748_v7 }
 0x66c   :  { %7133 = vmatpush.bf16.msra.mxu2 %v9972_v3  ;;  %7146 = vmatpush.bf16.msra.mxu3 %v10196_v50  ;;  %v4113_v50 = vperm.slane %v12320_v32, 6 }
 0x66f   :  { %7108 = vmatpush.bf16.msra.mxu0 %v9496_v36  ;;  %7121 = vmatpush.bf16.msra.mxu1 %v9720_v19  ;;  %v6902_v41 = vpop.f32.mrf.mxu0  ;;  %v6915_v44 = vpop.f32.mrf.mxu1 }
 0x670   :  { %7134 = vmatpush.bf16.msra.mxu2 %v9944_v62  ;;  %7147 = vmatpush.bf16.msra.mxu3 %v10168_v38  ;;  %v6903_v45 = vadd.f32 %v6902_v41, %v6890_v39 }
 0x672   :  { %7109 = vmatmul.bf16.vlgmr.msra.gmra.mxu0 %v12216_v12  ;;  %7122 = vmatmul.bf16.vlgmr.msra.gmra.mxu1 %v12218_v33  ;;  %v6916_v9 = vadd.f32 %v6915_v44, %v6903_v45 }
 0x673   :  { %7135 = vmatmul.bf16.vlgmr.msra.gmra.mxu2 %v12222_v8  ;;  %7148 = vmatmul.bf16.vlgmr.msra.gmra.mxu3 %v12220_v63 }
 0x677   :  { %v6904_v49 = vpop.f32.mrf.mxu0  ;;  %v6917_v51 = vpop.f32.mrf.mxu1 }
 0x678   :  { %v6928_v26 = vpop.f32.mrf.mxu2  ;;  %v6941_v48 = vpop.f32.mrf.mxu3 }
 0x679   :  { %v6929_v14 = vadd.f32 %v6928_v26, %v6916_v9 }
 0x67b   :  { %v6942_v60 = vadd.f32 %v6941_v48, %v6929_v14 }
 0x67d   :  { %11222 = vtanh.f32 %v6942_v60 }
 0x680   :  { %v6930_v12 = vpop.f32.mrf.mxu2  ;;  %v6943_v59 = vpop.f32.mrf.mxu3 }
 0x683   :  { %v11223_v33 = vpop.eup %11222 }
 0x684   :  { %7164 = vst [vmem:[#allocation25 + $0x20] sm:$0xff] %v11223_v33 }
 0x68f   :  { %v6954_v8 = vpop.f32.mrf.mxu0  ;;  %v6967_v23 = vpop.f32.mrf.mxu1 }
 0x690   :  { %v6955_v46 = vadd.f32 %v6954_v8, %v4112_v6 }
 0x692   :  { %v6968_v53 = vadd.f32 %v6967_v23, %v6955_v46 }
 0x697   :  { %v6956_v55 = vpop.f32.mrf.mxu0  ;;  %v6969_v18 = vpop.f32.mrf.mxu1 }
 0x698   :  { %v6980_v63 = vpop.f32.mrf.mxu2  ;;  %v6993_v25 = vpop.f32.mrf.mxu3 }
 0x699   :  { %v6981_v21 = vadd.f32 %v6980_v63, %v6968_v53 }
 0x69b   :  { %v6994_v61 = vadd.f32 %v6993_v25, %v6981_v21 }
 0x6a0   :  { %v6982_v0 = vpop.f32.mrf.mxu2  ;;  %v6995_v2 = vpop.f32.mrf.mxu3 }
 0x6af   :  { %v7006_v52 = vpop.f32.mrf.mxu0  ;;  %v7019_v40 = vpop.f32.mrf.mxu1 }
 0x6b0   :  { %v7007_v58 = vadd.f32 %v7006_v52, %v6994_v61 }
 0x6b2   :  { %v7020_v10 = vadd.f32 %v7019_v40, %v7007_v58 }
 0x6b7   :  { %v7008_v5 = vpop.f32.mrf.mxu0  ;;  %v7021_v4 = vpop.f32.mrf.mxu1 }
 0x6b8   :  { %v7032_v11 = vpop.f32.mrf.mxu2  ;;  %v7045_v13 = vpop.f32.mrf.mxu3 }
 0x6b9   :  { %v7033_v15 = vadd.f32 %v7032_v11, %v7020_v10 }
 0x6bb   :  { %v7046_v27 = vadd.f32 %v7045_v13, %v7033_v15 }
 0x6bd   :  { %11224 = vtanh.f32 %v7046_v27 }
 0x6c0   :  { %v7034_v20 = vpop.f32.mrf.mxu2  ;;  %v7047_v1 = vpop.f32.mrf.mxu3 }
 0x6c3   :  { %v11225_v35 = vpop.eup %11224 }
 0x6c4   :  { %7165 = vst [vmem:[#allocation25 + $0x28] sm:$0xff] %v11225_v35 }
 0x6cf   :  { %v7058_v16 = vpop.f32.mrf.mxu0  ;;  %v7071_v42 = vpop.f32.mrf.mxu1 }
 0x6d0   :  { %v7059_v22 = vadd.f32 %v7058_v16, %v4113_v50 }
 0x6d2   :  { %v7072_v47 = vadd.f32 %v7071_v42, %v7059_v22 }
 0x6d7   :  { %v7060_v17 = vpop.f32.mrf.mxu0  ;;  %v7073_v3 = vpop.f32.mrf.mxu1 }
 0x6d8   :  { %v7084_v7 = vpop.f32.mrf.mxu2  ;;  %v7097_v24 = vpop.f32.mrf.mxu3 }
 0x6d9   :  { %v7085_v34 = vadd.f32 %v7084_v7, %v7072_v47 }
 0x6db   :  { %v7098_v43 = vadd.f32 %v7097_v24, %v7085_v34 }
 0x6e0   :  { %v7086_v28 = vpop.f32.mrf.mxu2  ;;  %v7099_v29 = vpop.f32.mrf.mxu3 }
 0x6ef   :  { %v7110_v57 = vpop.f32.mrf.mxu0  ;;  %v7123_v30 = vpop.f32.mrf.mxu1 }
 0x6f0   :  { %v7111_v37 = vadd.f32 %v7110_v57, %v7098_v43 }
 0x6f2   :  { %v7124_v36 = vadd.f32 %v7123_v30, %v7111_v37 }
 0x6f6   :  { %v7136_v19 = vpop.f32.mrf.mxu2  ;;  %v7149_v62 = vpop.f32.mrf.mxu3 }
 0x6f7   :  { %v7137_v38 = vadd.f32 %v7136_v19, %v7124_v36  ;;  %v7112_v54 = vpop.f32.mrf.mxu0  ;;  %v7125_v31 = vpop.f32.mrf.mxu1 }
 0x6f9   :  { %v7150_v56 = vadd.f32 %v7149_v62, %v7137_v38 }
 0x6fb   :  { %11226 = vtanh.f32 %v7150_v56 }
 0x6fe   :  { %v7138_v32 = vpop.f32.mrf.mxu2  ;;  %v7151_v39 = vpop.f32.mrf.mxu3 }
 0x701   :  { %v11227_v41 = vpop.eup %11226 }
 0x702   :  { %7166 = vst [vmem:[#allocation25 + $0x30] sm:$0xff] %v11227_v41 }
 0x703   :  { %7177 = dma.vmem_to_hbm [thread:$0]  %s7173_s30, 896, %s7175_s2, [#allocation4]  }
 0x704   :  { %11606 = dma.done.wait [#allocation4], 896  }
 0x705   :  { %11607 = vsyncadd [#allocation4], 4294966400 }
 0x706   :  { %7182 = vsyncpa [#allocation3], 1 }
 0x707   :  { %7183 = vsyncpa [#allocation6], 1 }
 0x708   :  { %7184 = vsyncpa [#allocation9], 1 }
 0x709   :  { %7185 = vsyncpa [#allocation12], 1 }
 0x70a   :  { %7186 = vsyncpa [#allocation15], 1 }
 0x70b   :  { %7187 = vsyncpa [#allocation18], 1 }
 0x70c   :  { %7188 = vsyncpa [#allocation21], 1 }
 0x70d   :  { %7189 = vsyncpa [#allocation24], 1 }
 0x70e   :  { %7190 = vsyncpa [#allocation4], 1 }

</bundles_post_ra>
